<compile_context>
chip_gen: v7x
topology: tpu7x:2x2x1
jax: 0.10.0
libtpu: 0.0.40
codegen_flags: <defaults>
</compile_context>

<pallas_src>
import functools
import math

import jax
import jax.numpy as jnp
from jax.experimental import pallas as pl
from jax.experimental.pallas import tpu as pltpu

EPS = 1e-5          # nn.BatchNorm2d default eps
NEG_SLOPE = 0.01    # nn.LeakyReLU default negative_slope

_PARALLEL = pltpu.CompilerParams(dimension_semantics=("parallel",))


# ------------------------------- kernel bodies --------------------------------

def _bn_lrelu(x, scale_ref, shift_ref):
    """Pre-folded BatchNorm (scale/shift) + LeakyReLU.  x: (P, C) f32."""
    y = x * scale_ref[...] + shift_ref[...]
    return jnp.where(y > 0, y, NEG_SLOPE * y)


def _emit_out_and_stats(acc, res_ref, out_ref, sum_ref, sq_ref):
    """Optional residual add, write output, emit per-block BN stats epilogue."""
    if res_ref is not None:
        acc = acc + res_ref[0]
    out_ref[0] = acc.astype(out_ref.dtype)
    sum_ref[0] = jnp.sum(acc, axis=0, keepdims=True)          # (1, Cout) f32
    sq_ref[0] = jnp.sum(acc * acc, axis=0, keepdims=True)     # (1, Cout) f32


def _stats_kernel(x_ref, sum_ref, sq_ref):
    """Per-block (sum, sum_sq) of the module input (for the encoder BN)."""
    x = x_ref[0]
    sum_ref[0] = jnp.sum(x, axis=0, keepdims=True)
    sq_ref[0] = jnp.sum(x * x, axis=0, keepdims=True)


def _conv1x1_body(scale_ref, shift_ref, x_ref, w_ref, res_ref,
                  out_ref, sum_ref, sq_ref):
    """Fused BN + LeakyReLU + 1x1 conv (matmul over channels)."""
    y = _bn_lrelu(x_ref[0], scale_ref, shift_ref)
    acc = jnp.dot(y.astype(jnp.bfloat16), w_ref[...],
                  preferred_element_type=jnp.float32)
    _emit_out_and_stats(acc, res_ref, out_ref, sum_ref, sq_ref)


def _conv3x3_body(scale_ref, shift_ref, x_ref, w_ref, res_ref,
                  out_ref, sum_ref, sq_ref, *, width):
    """Fused BN + LeakyReLU + 3x3 conv (padding=1) as 9 shifted MXU matmuls.

    The activation tile is the flattened image (P, Cin) with P = H*W.  Tap
    (di, dj) is a roll by (di-1)*W + (dj-1) along the flattened axis; rows that
    fall outside the image (top/bottom) or wrap across a row boundary
    (left/right columns) are masked to zero before feeding the MXU.
    """
    P = x_ref.shape[1]
    Cout = out_ref.shape[2]

    y = _bn_lrelu(x_ref[0], scale_ref, shift_ref)               # (P, Cin) f32

    row = jax.lax.broadcasted_iota(jnp.int32, (P, 1), 0)
    col = row % width

    acc = jnp.zeros((P, Cout), jnp.float32)
    for di in range(3):
        for dj in range(3):
            s = (di - 1) * width + (dj - 1)
            tap = pltpu.roll(y, shift=(-s) % P, axis=0) if s != 0 else y
            src = row + s
            ok = (src >= 0) & (src < P)          # stay inside the image rows
            if dj == 0:
                ok = ok & (col > 0)              # left neighbor of column 0
            elif dj == 2:
                ok = ok & (col < width - 1)      # right neighbor of last column
            tap = jnp.where(ok, tap, 0.0).astype(jnp.bfloat16)
            acc = acc + jnp.dot(tap, w_ref[di * 3 + dj],
                                preferred_element_type=jnp.float32)

    _emit_out_and_stats(acc, res_ref, out_ref, sum_ref, sq_ref)


def _conv1x1_kernel(scale_ref, shift_ref, x_ref, w_ref, out_ref, sum_ref, sq_ref):
    _conv1x1_body(scale_ref, shift_ref, x_ref, w_ref, None, out_ref, sum_ref, sq_ref)


def _conv1x1_res_kernel(scale_ref, shift_ref, x_ref, w_ref, res_ref,
                        out_ref, sum_ref, sq_ref):
    _conv1x1_body(scale_ref, shift_ref, x_ref, w_ref, res_ref, out_ref, sum_ref, sq_ref)


def _make_conv3x3_kernel(width, with_res):
    if with_res:
        def kernel(scale_ref, shift_ref, x_ref, w_ref, res_ref,
                   out_ref, sum_ref, sq_ref):
            _conv3x3_body(scale_ref, shift_ref, x_ref, w_ref, res_ref,
                          out_ref, sum_ref, sq_ref, width=width)
    else:
        def kernel(scale_ref, shift_ref, x_ref, w_ref, out_ref, sum_ref, sq_ref):
            _conv3x3_body(scale_ref, shift_ref, x_ref, w_ref, None,
                          out_ref, sum_ref, sq_ref, width=width)
    return kernel


# ------------------------------ pallas_call glue -------------------------------

def _stats_pass(x):
    B, P, C = x.shape
    blk = pl.BlockSpec((1, P, C), lambda b: (b, 0, 0))
    stat = pl.BlockSpec((1, 1, C), lambda b: (b, 0, 0))
    return pl.pallas_call(
        _stats_kernel,
        out_shape=(jax.ShapeDtypeStruct((B, 1, C), jnp.float32),
                   jax.ShapeDtypeStruct((B, 1, C), jnp.float32)),
        grid=(B,),
        in_specs=[blk],
        out_specs=(stat, stat),
        compiler_params=_PARALLEL,
    )(x)


def _fused_conv(x, scale, shift, w, *, kernel, res=None):
    """Shared plumbing for the fused BN+LReLU+conv kernels (grid over batch)."""
    B, P, Cin = x.shape
    Cout = w.shape[-1]

    vec = pl.BlockSpec((1, Cin), lambda b: (0, 0))
    w_spec = pl.BlockSpec(w.shape, lambda b, n=w.ndim: (0,) * n)
    x_spec = pl.BlockSpec((1, P, Cin), lambda b: (b, 0, 0))
    o_spec = pl.BlockSpec((1, P, Cout), lambda b: (b, 0, 0))
    stat = pl.BlockSpec((1, 1, Cout), lambda b: (b, 0, 0))

    in_specs = [vec, vec, x_spec, w_spec]
    args = [scale, shift, x, w]
    aliases = {}
    if res is not None:
        in_specs.append(o_spec)
        args.append(res)
        aliases = {4: 0}     # residual buffer is reused as the output buffer

    return pl.pallas_call(
        kernel,
        out_shape=(jax.ShapeDtypeStruct((B, P, Cout), jnp.float32),
                   jax.ShapeDtypeStruct((B, 1, Cout), jnp.float32),
                   jax.ShapeDtypeStruct((B, 1, Cout), jnp.float32)),
        grid=(B,),
        in_specs=in_specs,
        out_specs=(o_spec, stat, stat),
        input_output_aliases=aliases,
        compiler_params=_PARALLEL,
    )(*args)


def fused_conv1x1(x, scale, shift, w, res=None):
    kernel = _conv1x1_res_kernel if res is not None else _conv1x1_kernel
    return _fused_conv(x, scale, shift, w, kernel=kernel, res=res)


def fused_conv3x3(x, scale, shift, w, width, res=None):
    kernel = _make_conv3x3_kernel(width, res is not None)
    return _fused_conv(x, scale, shift, w, kernel=kernel, res=res)


def _finalize_bn(sums, sqs, gamma, beta, count):
    """Partial (sum, sum_sq) -> per-channel scale/shift (training-mode BN)."""
    s = jnp.sum(sums[:, 0, :], axis=0)
    ss = jnp.sum(sqs[:, 0, :], axis=0)
    mean = s / count
    var = jnp.maximum(ss / count - mean * mean, 0.0)    # biased variance
    scale = gamma * jax.lax.rsqrt(var + EPS)
    shift = beta - mean * scale
    return scale.reshape(1, -1), shift.reshape(1, -1)


# ------------------------------- forward pass ----------------------------------

def zhugo_residual_conv_block(x_nchw, params):
    """(B, C, N, M) -> (B, C, N, M), matching ZhuGoResidualConvBlock.forward."""
    B, C, H, W = x_nchw.shape
    P = H * W
    count = B * P

    # NCHW -> (B, H*W, C).  Boundary layout change kept as XLA transposes.
    xf = jnp.transpose(x_nchw, (0, 2, 3, 1)).reshape(B, P, C)

    # encoder_conv1x1: BN(C) -> LeakyReLU -> Conv1x1 (C -> inner, no bias)
    s0, q0 = _stats_pass(xf)
    sc, sh = _finalize_bn(s0, q0, params["enc_gamma"], params["enc_beta"], count)
    h, hs, hq = fused_conv1x1(xf, sc, sh, params["enc_w"])

    # inner_residual_blocks: (BN -> LReLU -> Conv3x3) x 2 + skip, twice
    for blk in params["blocks"]:
        sc1, sh1 = _finalize_bn(hs, hq, blk["g1"], blk["b1"], count)
        c1, cs, cq = fused_conv3x3(h, sc1, sh1, blk["w1"], W)
        sc2, sh2 = _finalize_bn(cs, cq, blk["g2"], blk["b2"], count)
        h, hs, hq = fused_conv3x3(c1, sc2, sh2, blk["w2"], W, res=h)

    # decoder_conv1x1: BN(inner) -> LReLU -> Conv1x1 (inner -> C) + x
    scd, shd = _finalize_bn(hs, hq, params["dec_gamma"], params["dec_beta"], count)
    out_f, _, _ = fused_conv1x1(h, scd, shd, params["dec_w"], res=xf)

    return jnp.transpose(out_f.reshape(B, H, W, C), (0, 3, 1, 2))


# ------------------------------ parameter init ----------------------------------

def _kaiming_std(fan_in, a=NEG_SLOPE):
    return math.sqrt(2.0 / (1.0 + a * a)) / math.sqrt(fan_in)


def init_params(key, channels):
    inner = channels // 2
    keys = jax.random.split(key, 6)

    def conv1x1(k, cin, cout):
        w = jax.random.normal(k, (cin, cout), jnp.float32) * _kaiming_std(cin)
        return w.astype(jnp.bfloat16)        # MXU-native storage

    def conv3x3(k, cin, cout):
        # Layout: (tap = 3*di + dj, cin, cout).  To load torch OIHW weights,
        # permute (2, 3, 1, 0) then reshape to (9, cin, cout).
        w = jax.random.normal(k, (9, cin, cout), jnp.float32) * _kaiming_std(9 * cin)
        return w.astype(jnp.bfloat16)

    def bn(c):
        return jnp.ones((c,), jnp.float32), jnp.zeros((c,), jnp.float32)

    enc_g, enc_b = bn(channels)
    dec_g, dec_b = bn(inner)

    blocks = []
    for i in range(2):
        g1, b1 = bn(inner)
        g2, b2 = bn(inner)
        blocks.append(dict(
            g1=g1, b1=b1, w1=conv3x3(keys[2 + 2 * i], inner, inner),
            g2=g2, b2=b2, w2=conv3x3(keys[3 + 2 * i], inner, inner),
        ))

    return dict(
        enc_gamma=enc_g, enc_beta=enc_b, enc_w=conv1x1(keys[0], channels, inner),
        blocks=blocks,
        dec_gamma=dec_g, dec_beta=dec_b, dec_w=conv1x1(keys[1], inner, channels),
    )


# ----------------------------------- main ---------------------------------------

if __name__ == "__main__":
    key = jax.random.PRNGKey(0)
    k_x, k_p = jax.random.split(key)

    # Small test shape (NCHW); channels must be even (inner = C // 2).
    # Production shapes (C>=256, inner>=128) make every matmul lane-dense.
    B, C, H, W = 2, 16, 16, 16
    x = jax.random.normal(k_x, (B, C, H, W), jnp.float32)
    params = init_params(k_p, C)

    fwd = jax.jit(zhugo_residual_conv_block)
    out = jax.block_until_ready(fwd(x, params))

    assert out.shape == (B, C, H, W), out.shape
    assert bool(jnp.all(jnp.isfinite(out)))
    print("KERNEL_OK")
</pallas_src>

<mosaic_0001>
module attributes {stable_mosaic.version = 11 : i64} {
  func.func @_stats_kernel(%arg0: i32, %arg1: memref<1x256x16xf32, #tpu.memory_space<vmem>>, %arg2: memref<1x1x16xf32, #tpu.memory_space<vmem>>, %arg3: memref<1x1x16xf32, #tpu.memory_space<vmem>>) attributes {dimension_semantics = [#tpu.dimension_semantics<parallel>], iteration_bounds = array<i64: 2>, scalar_prefetch = 0 : i64, scratch_operands = 0 : i64, tpu.core_type = #tpu.core_type<tc>, window_params = [{transform_indices = @transform_0, window_bounds = array<i64: 1, 256, 16>}, {transform_indices = @transform_1, window_bounds = array<i64: 1, 1, 16>}, {transform_indices = @transform_2, window_bounds = array<i64: 1, 1, 16>}]} {
    %c0 = arith.constant 0 : index
    %c0_0 = arith.constant 0 : index
    %c0_1 = arith.constant 0 : index
    %0 = vector.load %arg1[%c0, %c0_0, %c0_1] : memref<1x256x16xf32, #tpu.memory_space<vmem>>, vector<1x256x16xf32>
    %1 = vector.shape_cast %0 : vector<1x256x16xf32> to vector<256x16xf32>
    %cst = arith.constant dense<0.000000e+00> : vector<16xf32>
    %2 = vector.multi_reduction <add>, %1, %cst [0] : vector<256x16xf32> to vector<16xf32>
    %3 = vector.shape_cast %2 : vector<16xf32> to vector<1x16xf32>
    %c0_2 = arith.constant 0 : index
    %c0_3 = arith.constant 0 : index
    %c0_4 = arith.constant 0 : index
    %4 = vector.load %arg2[%c0_2, %c0_3, %c0_4] : memref<1x1x16xf32, #tpu.memory_space<vmem>>, vector<1x1x16xf32>
    %5 = vector.shape_cast %4 : vector<1x1x16xf32> to vector<1x16xf32>
    %6 = vector.shape_cast %3 : vector<1x16xf32> to vector<1x1x16xf32>
    tpu.vector_store %arg2[%c0_2, %c0_3, %c0_4], %6 {strides = array<i32>} : memref<1x1x16xf32, #tpu.memory_space<vmem>>, vector<1x1x16xf32>,
    %7 = arith.mulf %1, %1 : vector<256x16xf32>
    %cst_5 = arith.constant dense<0.000000e+00> : vector<16xf32>
    %8 = vector.multi_reduction <add>, %7, %cst_5 [0] : vector<256x16xf32> to vector<16xf32>
    %9 = vector.shape_cast %8 : vector<16xf32> to vector<1x16xf32>
    %c0_6 = arith.constant 0 : index
    %c0_7 = arith.constant 0 : index
    %c0_8 = arith.constant 0 : index
    %10 = vector.load %arg3[%c0_6, %c0_7, %c0_8] : memref<1x1x16xf32, #tpu.memory_space<vmem>>, vector<1x1x16xf32>
    %11 = vector.shape_cast %10 : vector<1x1x16xf32> to vector<1x16xf32>
    %12 = vector.shape_cast %9 : vector<1x16xf32> to vector<1x1x16xf32>
    tpu.vector_store %arg3[%c0_6, %c0_7, %c0_8], %12 {strides = array<i32>} : memref<1x1x16xf32, #tpu.memory_space<vmem>>, vector<1x1x16xf32>,
    return
  }
  func.func @transform_0(%arg0: i32) -> (i32, i32, i32) {
    %c0_i32 = arith.constant 0 : i32
    %c0_i32_0 = arith.constant 0 : i32
    %c0_i32_1 = arith.constant 0 : i32
    return %arg0, %c0_i32, %c0_i32_0 : i32, i32, i32
  }
  func.func @transform_1(%arg0: i32) -> (i32, i32, i32) {
    %c0_i32 = arith.constant 0 : i32
    %c0_i32_0 = arith.constant 0 : i32
    %c0_i32_1 = arith.constant 0 : i32
    return %arg0, %c0_i32, %c0_i32_0 : i32, i32, i32
  }
  func.func @transform_2(%arg0: i32) -> (i32, i32, i32) {
    %c0_i32 = arith.constant 0 : i32
    %c0_i32_0 = arith.constant 0 : i32
    %c0_i32_1 = arith.constant 0 : i32
    return %arg0, %c0_i32, %c0_i32_0 : i32, i32, i32
  }
}

module attributes {stable_mosaic.version = 11 : i64} {
  func.func @_conv1x1_kernel(%arg0: i32, %arg1: memref<1x16xf32, #tpu.memory_space<vmem>>, %arg2: memref<1x16xf32, #tpu.memory_space<vmem>>, %arg3: memref<1x256x16xf32, #tpu.memory_space<vmem>>, %arg4: memref<16x8xbf16, #tpu.memory_space<vmem>>, %arg5: memref<1x256x8xf32, #tpu.memory_space<vmem>>, %arg6: memref<1x1x8xf32, #tpu.memory_space<vmem>>, %arg7: memref<1x1x8xf32, #tpu.memory_space<vmem>>) attributes {dimension_semantics = [#tpu.dimension_semantics<parallel>], iteration_bounds = array<i64: 2>, scalar_prefetch = 0 : i64, scratch_operands = 0 : i64, tpu.core_type = #tpu.core_type<tc>, window_params = [{pipeline_mode = #tpu.pipeline_mode<synchronous>, transform_indices = @transform_0, window_bounds = array<i64: 1, 16>}, {pipeline_mode = #tpu.pipeline_mode<synchronous>, transform_indices = @transform_1, window_bounds = array<i64: 1, 16>}, {transform_indices = @transform_2, window_bounds = array<i64: 1, 256, 16>}, {pipeline_mode = #tpu.pipeline_mode<synchronous>, transform_indices = @transform_3, window_bounds = array<i64: 16, 8>}, {transform_indices = @transform_4, window_bounds = array<i64: 1, 256, 8>}, {transform_indices = @transform_5, window_bounds = array<i64: 1, 1, 8>}, {transform_indices = @transform_6, window_bounds = array<i64: 1, 1, 8>}]} {
    %c0 = arith.constant 0 : index
    %c0_0 = arith.constant 0 : index
    %c0_1 = arith.constant 0 : index
    %0 = vector.load %arg3[%c0, %c0_0, %c0_1] : memref<1x256x16xf32, #tpu.memory_space<vmem>>, vector<1x256x16xf32>
    %1 = vector.shape_cast %0 : vector<1x256x16xf32> to vector<256x16xf32>
    %c0_2 = arith.constant 0 : index
    %c0_3 = arith.constant 0 : index
    %2 = vector.load %arg1[%c0_2, %c0_3] : memref<1x16xf32, #tpu.memory_space<vmem>>, vector<1x16xf32>
    %3 = vector.broadcast %2 : vector<1x16xf32> to vector<256x16xf32>
    %4 = arith.mulf %1, %3 : vector<256x16xf32>
    %c0_4 = arith.constant 0 : index
    %c0_5 = arith.constant 0 : index
    %5 = vector.load %arg2[%c0_4, %c0_5] : memref<1x16xf32, #tpu.memory_space<vmem>>, vector<1x16xf32>
    %6 = vector.broadcast %5 : vector<1x16xf32> to vector<256x16xf32>
    %7 = arith.addf %4, %6 : vector<256x16xf32>
    %cst = arith.constant 0.000000e+00 : f32
    %8 = vector.broadcast %cst : f32 to vector<256x16xf32>
    %9 = arith.cmpf ogt, %7, %8 : vector<256x16xf32>
    %cst_6 = arith.constant 0.00999999977 : f32
    %10 = vector.broadcast %cst_6 : f32 to vector<256x16xf32>
    %11 = arith.mulf %10, %7 : vector<256x16xf32>
    %12 = arith.select %9, %7, %11 : vector<256x16xi1>, vector<256x16xf32>
    %13 = arith.truncf %12 : vector<256x16xf32> to vector<256x16xbf16>
    %c0_7 = arith.constant 0 : index
    %c0_8 = arith.constant 0 : index
    %14 = vector.load %arg4[%c0_7, %c0_8] : memref<16x8xbf16, #tpu.memory_space<vmem>>, vector<16x8xbf16>
    %cst_9 = arith.constant dense<0.000000e+00> : vector<256x8xf32>
    %15 = tpu.matmul %13, %14, %cst_9 {dimension_numbers = #tpu.dot_dimension_numbers<[1], [0], [0], [1], [0, 0, 1, 1], [], []>} : vector<256x16xbf16>, vector<16x8xbf16>, vector<256x8xf32> -> vector<256x8xf32>
    %c0_10 = arith.constant 0 : index
    %c0_11 = arith.constant 0 : index
    %c0_12 = arith.constant 0 : index
    %16 = vector.load %arg5[%c0_10, %c0_11, %c0_12] : memref<1x256x8xf32, #tpu.memory_space<vmem>>, vector<1x256x8xf32>
    %17 = vector.shape_cast %16 : vector<1x256x8xf32> to vector<256x8xf32>
    %18 = vector.shape_cast %15 : vector<256x8xf32> to vector<1x256x8xf32>
    tpu.vector_store %arg5[%c0_10, %c0_11, %c0_12], %18 {strides = array<i32>} : memref<1x256x8xf32, #tpu.memory_space<vmem>>, vector<1x256x8xf32>,
    %cst_13 = arith.constant dense<0.000000e+00> : vector<8xf32>
    %19 = vector.multi_reduction <add>, %15, %cst_13 [0] : vector<256x8xf32> to vector<8xf32>
    %20 = vector.shape_cast %19 : vector<8xf32> to vector<1x8xf32>
    %c0_14 = arith.constant 0 : index
    %c0_15 = arith.constant 0 : index
    %c0_16 = arith.constant 0 : index
    %21 = vector.load %arg6[%c0_14, %c0_15, %c0_16] : memref<1x1x8xf32, #tpu.memory_space<vmem>>, vector<1x1x8xf32>
    %22 = vector.shape_cast %21 : vector<1x1x8xf32> to vector<1x8xf32>
    %23 = vector.shape_cast %20 : vector<1x8xf32> to vector<1x1x8xf32>
    tpu.vector_store %arg6[%c0_14, %c0_15, %c0_16], %23 {strides = array<i32>} : memref<1x1x8xf32, #tpu.memory_space<vmem>>, vector<1x1x8xf32>,
    %24 = arith.mulf %15, %15 : vector<256x8xf32>
    %cst_17 = arith.constant dense<0.000000e+00> : vector<8xf32>
    %25 = vector.multi_reduction <add>, %24, %cst_17 [0] : vector<256x8xf32> to vector<8xf32>
    %26 = vector.shape_cast %25 : vector<8xf32> to vector<1x8xf32>
    %c0_18 = arith.constant 0 : index
    %c0_19 = arith.constant 0 : index
    %c0_20 = arith.constant 0 : index
    %27 = vector.load %arg7[%c0_18, %c0_19, %c0_20] : memref<1x1x8xf32, #tpu.memory_space<vmem>>, vector<1x1x8xf32>
    %28 = vector.shape_cast %27 : vector<1x1x8xf32> to vector<1x8xf32>
    %29 = vector.shape_cast %26 : vector<1x8xf32> to vector<1x1x8xf32>
    tpu.vector_store %arg7[%c0_18, %c0_19, %c0_20], %29 {strides = array<i32>} : memref<1x1x8xf32, #tpu.memory_space<vmem>>, vector<1x1x8xf32>,
    return
  }
  func.func @transform_0(%arg0: i32) -> (i32, i32) {
    %c0_i32 = arith.constant 0 : i32
    %c0_i32_0 = arith.constant 0 : i32
    %c0_i32_1 = arith.constant 0 : i32
    return %c0_i32, %c0_i32_0 : i32, i32
  }
  func.func @transform_1(%arg0: i32) -> (i32, i32) {
    %c0_i32 = arith.constant 0 : i32
    %c0_i32_0 = arith.constant 0 : i32
    %c0_i32_1 = arith.constant 0 : i32
    return %c0_i32, %c0_i32_0 : i32, i32
  }
  func.func @transform_2(%arg0: i32) -> (i32, i32, i32) {
    %c0_i32 = arith.constant 0 : i32
    %c0_i32_0 = arith.constant 0 : i32
    %c0_i32_1 = arith.constant 0 : i32
    return %arg0, %c0_i32, %c0_i32_0 : i32, i32, i32
  }
  func.func @transform_3(%arg0: i32) -> (i32, i32) {
    %c0_i32 = arith.constant 0 : i32
    %c0_i32_0 = arith.constant 0 : i32
    %c0_i32_1 = arith.constant 0 : i32
    return %c0_i32, %c0_i32_0 : i32, i32
  }
  func.func @transform_4(%arg0: i32) -> (i32, i32, i32) {
    %c0_i32 = arith.constant 0 : i32
    %c0_i32_0 = arith.constant 0 : i32
    %c0_i32_1 = arith.constant 0 : i32
    return %arg0, %c0_i32, %c0_i32_0 : i32, i32, i32
  }
  func.func @transform_5(%arg0: i32) -> (i32, i32, i32) {
    %c0_i32 = arith.constant 0 : i32
    %c0_i32_0 = arith.constant 0 : i32
    %c0_i32_1 = arith.constant 0 : i32
    return %arg0, %c0_i32, %c0_i32_0 : i32, i32, i32
  }
  func.func @transform_6(%arg0: i32) -> (i32, i32, i32) {
    %c0_i32 = arith.constant 0 : i32
    %c0_i32_0 = arith.constant 0 : i32
    %c0_i32_1 = arith.constant 0 : i32
    return %arg0, %c0_i32, %c0_i32_0 : i32, i32, i32
  }
}

module attributes {stable_mosaic.version = 11 : i64} {
  func.func @kernel(%arg0: i32, %arg1: memref<1x8xf32, #tpu.memory_space<vmem>>, %arg2: memref<1x8xf32, #tpu.memory_space<vmem>>, %arg3: memref<1x256x8xf32, #tpu.memory_space<vmem>>, %arg4: memref<9x8x8xbf16, #tpu.memory_space<vmem>>, %arg5: memref<1x256x8xf32, #tpu.memory_space<vmem>>, %arg6: memref<1x1x8xf32, #tpu.memory_space<vmem>>, %arg7: memref<1x1x8xf32, #tpu.memory_space<vmem>>) attributes {dimension_semantics = [#tpu.dimension_semantics<parallel>], iteration_bounds = array<i64: 2>, scalar_prefetch = 0 : i64, scratch_operands = 0 : i64, tpu.core_type = #tpu.core_type<tc>, window_params = [{pipeline_mode = #tpu.pipeline_mode<synchronous>, transform_indices = @transform_0, window_bounds = array<i64: 1, 8>}, {pipeline_mode = #tpu.pipeline_mode<synchronous>, transform_indices = @transform_1, window_bounds = array<i64: 1, 8>}, {transform_indices = @transform_2, window_bounds = array<i64: 1, 256, 8>}, {pipeline_mode = #tpu.pipeline_mode<synchronous>, transform_indices = @transform_3, window_bounds = array<i64: 9, 8, 8>}, {transform_indices = @transform_4, window_bounds = array<i64: 1, 256, 8>}, {transform_indices = @transform_5, window_bounds = array<i64: 1, 1, 8>}, {transform_indices = @transform_6, window_bounds = array<i64: 1, 1, 8>}]} {
    %c0 = arith.constant 0 : index
    %c0_0 = arith.constant 0 : index
    %c0_1 = arith.constant 0 : index
    %0 = vector.load %arg3[%c0, %c0_0, %c0_1] : memref<1x256x8xf32, #tpu.memory_space<vmem>>, vector<1x256x8xf32>
    %1 = vector.shape_cast %0 : vector<1x256x8xf32> to vector<256x8xf32>
    %c0_2 = arith.constant 0 : index
    %c0_3 = arith.constant 0 : index
    %2 = vector.load %arg1[%c0_2, %c0_3] : memref<1x8xf32, #tpu.memory_space<vmem>>, vector<1x8xf32>
    %3 = vector.broadcast %2 : vector<1x8xf32> to vector<256x8xf32>
    %4 = arith.mulf %1, %3 : vector<256x8xf32>
    %c0_4 = arith.constant 0 : index
    %c0_5 = arith.constant 0 : index
    %5 = vector.load %arg2[%c0_4, %c0_5] : memref<1x8xf32, #tpu.memory_space<vmem>>, vector<1x8xf32>
    %6 = vector.broadcast %5 : vector<1x8xf32> to vector<256x8xf32>
    %7 = arith.addf %4, %6 : vector<256x8xf32>
    %cst = arith.constant 0.000000e+00 : f32
    %8 = vector.broadcast %cst : f32 to vector<256x8xf32>
    %9 = arith.cmpf ogt, %7, %8 : vector<256x8xf32>
    %cst_6 = arith.constant 0.00999999977 : f32
    %10 = vector.broadcast %cst_6 : f32 to vector<256x8xf32>
    %11 = arith.mulf %10, %7 : vector<256x8xf32>
    %12 = arith.select %9, %7, %11 : vector<256x8xi1>, vector<256x8xf32>
    %13 = tpu.iota {dimensions = array<i32: 0>} : vector<256x1xi32>
    %c16_i32 = arith.constant 16 : i32
    %c0_i32 = arith.constant 0 : i32
    %14 = arith.cmpi eq, %c16_i32, %c0_i32 : i32
    %c1_i32 = arith.constant 1 : i32
    %15 = arith.select %14, %c1_i32, %c16_i32 : i32
    %16 = vector.broadcast %15 : i32 to vector<256x1xi32>
    %17 = arith.remsi %13, %16 : vector<256x1xi32>
    %c0_i32_7 = arith.constant 0 : i32
    %18 = vector.broadcast %c0_i32_7 : i32 to vector<256x1xi32>
    %19 = arith.cmpi ne, %17, %18 : vector<256x1xi32>
    %c0_i32_8 = arith.constant 0 : i32
    %20 = vector.broadcast %c0_i32_8 : i32 to vector<256x1xi32>
    %21 = arith.cmpi slt, %17, %20 : vector<256x1xi32>
    %c0_i32_9 = arith.constant 0 : i32
    %22 = arith.cmpi slt, %15, %c0_i32_9 : i32
    %23 = vector.broadcast %22 : i1 to vector<256x1xi1>
    %24 = vector.broadcast %23 : vector<256x1xi1> to vector<256x1xi1>
    %25 = arith.xori %21, %24 : vector<256x1xi1>
    %26 = arith.andi %25, %19 : vector<256x1xi1>
    %27 = vector.broadcast %15 : i32 to vector<256x1xi32>
    %28 = arith.addi %17, %27 : vector<256x1xi32>
    %29 = arith.select %26, %28, %17 : vector<256x1xi1>, vector<256x1xi32>
    %cst_10 = arith.constant 0.000000e+00 : f32
    %30 = vector.broadcast %cst_10 : f32 to vector<256x8xf32>
    %c17_i32 = arith.constant 17 : i32
    %31 = tpu.dynamic_rotate %12 by %c17_i32 dim 0 : vector<256x8xf32>, i32 -> vector<256x8xf32>
    %c-17_i32 = arith.constant -17 : i32
    %32 = vector.broadcast %c-17_i32 : i32 to vector<256x1xi32>
    %33 = arith.addi %13, %32 : vector<256x1xi32>
    %c0_i32_11 = arith.constant 0 : i32
    %34 = vector.broadcast %c0_i32_11 : i32 to vector<256x1xi32>
    %35 = arith.cmpi sge, %33, %34 : vector<256x1xi32>
    %c256_i32 = arith.constant 256 : i32
    %36 = vector.broadcast %c256_i32 : i32 to vector<256x1xi32>
    %37 = arith.cmpi slt, %33, %36 : vector<256x1xi32>
    %38 = arith.andi %35, %37 : vector<256x1xi1>
    %c0_i32_12 = arith.constant 0 : i32
    %39 = vector.broadcast %c0_i32_12 : i32 to vector<256x1xi32>
    %40 = arith.cmpi sgt, %29, %39 : vector<256x1xi32>
    %41 = arith.andi %38, %40 : vector<256x1xi1>
    %cst_13 = arith.constant 0.000000e+00 : f32
    %42 = vector.shape_cast %41 : vector<256x1xi1> to vector<256x1xi1>
    %43 = vector.broadcast %42 : vector<256x1xi1> to vector<256x8xi1>
    %44 = vector.broadcast %cst_13 : f32 to vector<256x8xf32>
    %45 = arith.select %43, %31, %44 : vector<256x8xi1>, vector<256x8xf32>
    %46 = arith.truncf %45 : vector<256x8xf32> to vector<256x8xbf16>
    %c0_14 = arith.constant 0 : index
    %c0_15 = arith.constant 0 : index
    %c0_16 = arith.constant 0 : index
    %47 = vector.load %arg4[%c0_14, %c0_15, %c0_16] : memref<9x8x8xbf16, #tpu.memory_space<vmem>>, vector<1x8x8xbf16>
    %48 = vector.shape_cast %47 : vector<1x8x8xbf16> to vector<8x8xbf16>
    %cst_17 = arith.constant dense<0.000000e+00> : vector<256x8xf32>
    %49 = tpu.matmul %46, %48, %cst_17 {dimension_numbers = #tpu.dot_dimension_numbers<[1], [0], [0], [1], [0, 0, 1, 1], [], []>} : vector<256x8xbf16>, vector<8x8xbf16>, vector<256x8xf32> -> vector<256x8xf32>
    %50 = arith.addf %30, %49 : vector<256x8xf32>
    %c16_i32_18 = arith.constant 16 : i32
    %51 = tpu.dynamic_rotate %12 by %c16_i32_18 dim 0 : vector<256x8xf32>, i32 -> vector<256x8xf32>
    %c-16_i32 = arith.constant -16 : i32
    %52 = vector.broadcast %c-16_i32 : i32 to vector<256x1xi32>
    %53 = arith.addi %13, %52 : vector<256x1xi32>
    %c0_i32_19 = arith.constant 0 : i32
    %54 = vector.broadcast %c0_i32_19 : i32 to vector<256x1xi32>
    %55 = arith.cmpi sge, %53, %54 : vector<256x1xi32>
    %c256_i32_20 = arith.constant 256 : i32
    %56 = vector.broadcast %c256_i32_20 : i32 to vector<256x1xi32>
    %57 = arith.cmpi slt, %53, %56 : vector<256x1xi32>
    %58 = arith.andi %55, %57 : vector<256x1xi1>
    %cst_21 = arith.constant 0.000000e+00 : f32
    %59 = vector.shape_cast %58 : vector<256x1xi1> to vector<256x1xi1>
    %60 = vector.broadcast %59 : vector<256x1xi1> to vector<256x8xi1>
    %61 = vector.broadcast %cst_21 : f32 to vector<256x8xf32>
    %62 = arith.select %60, %51, %61 : vector<256x8xi1>, vector<256x8xf32>
    %63 = arith.truncf %62 : vector<256x8xf32> to vector<256x8xbf16>
    %c1 = arith.constant 1 : index
    %c0_22 = arith.constant 0 : index
    %c0_23 = arith.constant 0 : index
    %64 = vector.load %arg4[%c1, %c0_22, %c0_23] : memref<9x8x8xbf16, #tpu.memory_space<vmem>>, vector<1x8x8xbf16>
    %65 = vector.shape_cast %64 : vector<1x8x8xbf16> to vector<8x8xbf16>
    %cst_24 = arith.constant dense<0.000000e+00> : vector<256x8xf32>
    %66 = tpu.matmul %63, %65, %cst_24 {dimension_numbers = #tpu.dot_dimension_numbers<[1], [0], [0], [1], [0, 0, 1, 1], [], []>} : vector<256x8xbf16>, vector<8x8xbf16>, vector<256x8xf32> -> vector<256x8xf32>
    %67 = arith.addf %50, %66 : vector<256x8xf32>
    %c15_i32 = arith.constant 15 : i32
    %68 = tpu.dynamic_rotate %12 by %c15_i32 dim 0 : vector<256x8xf32>, i32 -> vector<256x8xf32>
    %c-15_i32 = arith.constant -15 : i32
    %69 = vector.broadcast %c-15_i32 : i32 to vector<256x1xi32>
    %70 = arith.addi %13, %69 : vector<256x1xi32>
    %c0_i32_25 = arith.constant 0 : i32
    %71 = vector.broadcast %c0_i32_25 : i32 to vector<256x1xi32>
    %72 = arith.cmpi sge, %70, %71 : vector<256x1xi32>
    %c256_i32_26 = arith.constant 256 : i32
    %73 = vector.broadcast %c256_i32_26 : i32 to vector<256x1xi32>
    %74 = arith.cmpi slt, %70, %73 : vector<256x1xi32>
    %75 = arith.andi %72, %74 : vector<256x1xi1>
    %c15_i32_27 = arith.constant 15 : i32
    %76 = vector.broadcast %c15_i32_27 : i32 to vector<256x1xi32>
    %77 = arith.cmpi slt, %29, %76 : vector<256x1xi32>
    %78 = arith.andi %75, %77 : vector<256x1xi1>
    %cst_28 = arith.constant 0.000000e+00 : f32
    %79 = vector.shape_cast %78 : vector<256x1xi1> to vector<256x1xi1>
    %80 = vector.broadcast %79 : vector<256x1xi1> to vector<256x8xi1>
    %81 = vector.broadcast %cst_28 : f32 to vector<256x8xf32>
    %82 = arith.select %80, %68, %81 : vector<256x8xi1>, vector<256x8xf32>
    %83 = arith.truncf %82 : vector<256x8xf32> to vector<256x8xbf16>
    %c2 = arith.constant 2 : index
    %c0_29 = arith.constant 0 : index
    %c0_30 = arith.constant 0 : index
    %84 = vector.load %arg4[%c2, %c0_29, %c0_30] : memref<9x8x8xbf16, #tpu.memory_space<vmem>>, vector<1x8x8xbf16>
    %85 = vector.shape_cast %84 : vector<1x8x8xbf16> to vector<8x8xbf16>
    %cst_31 = arith.constant dense<0.000000e+00> : vector<256x8xf32>
    %86 = tpu.matmul %83, %85, %cst_31 {dimension_numbers = #tpu.dot_dimension_numbers<[1], [0], [0], [1], [0, 0, 1, 1], [], []>} : vector<256x8xbf16>, vector<8x8xbf16>, vector<256x8xf32> -> vector<256x8xf32>
    %87 = arith.addf %67, %86 : vector<256x8xf32>
    %c1_i32_32 = arith.constant 1 : i32
    %88 = tpu.dynamic_rotate %12 by %c1_i32_32 dim 0 : vector<256x8xf32>, i32 -> vector<256x8xf32>
    %c-1_i32 = arith.constant -1 : i32
    %89 = vector.broadcast %c-1_i32 : i32 to vector<256x1xi32>
    %90 = arith.addi %13, %89 : vector<256x1xi32>
    %c0_i32_33 = arith.constant 0 : i32
    %91 = vector.broadcast %c0_i32_33 : i32 to vector<256x1xi32>
    %92 = arith.cmpi sge, %90, %91 : vector<256x1xi32>
    %c256_i32_34 = arith.constant 256 : i32
    %93 = vector.broadcast %c256_i32_34 : i32 to vector<256x1xi32>
    %94 = arith.cmpi slt, %90, %93 : vector<256x1xi32>
    %95 = arith.andi %92, %94 : vector<256x1xi1>
    %c0_i32_35 = arith.constant 0 : i32
    %96 = vector.broadcast %c0_i32_35 : i32 to vector<256x1xi32>
    %97 = arith.cmpi sgt, %29, %96 : vector<256x1xi32>
    %98 = arith.andi %95, %97 : vector<256x1xi1>
    %cst_36 = arith.constant 0.000000e+00 : f32
    %99 = vector.shape_cast %98 : vector<256x1xi1> to vector<256x1xi1>
    %100 = vector.broadcast %99 : vector<256x1xi1> to vector<256x8xi1>
    %101 = vector.broadcast %cst_36 : f32 to vector<256x8xf32>
    %102 = arith.select %100, %88, %101 : vector<256x8xi1>, vector<256x8xf32>
    %103 = arith.truncf %102 : vector<256x8xf32> to vector<256x8xbf16>
    %c3 = arith.constant 3 : index
    %c0_37 = arith.constant 0 : index
    %c0_38 = arith.constant 0 : index
    %104 = vector.load %arg4[%c3, %c0_37, %c0_38] : memref<9x8x8xbf16, #tpu.memory_space<vmem>>, vector<1x8x8xbf16>
    %105 = vector.shape_cast %104 : vector<1x8x8xbf16> to vector<8x8xbf16>
    %cst_39 = arith.constant dense<0.000000e+00> : vector<256x8xf32>
    %106 = tpu.matmul %103, %105, %cst_39 {dimension_numbers = #tpu.dot_dimension_numbers<[1], [0], [0], [1], [0, 0, 1, 1], [], []>} : vector<256x8xbf16>, vector<8x8xbf16>, vector<256x8xf32> -> vector<256x8xf32>
    %107 = arith.addf %87, %106 : vector<256x8xf32>
    %c0_i32_40 = arith.constant 0 : i32
    %108 = vector.broadcast %c0_i32_40 : i32 to vector<256x1xi32>
    %109 = arith.addi %13, %108 : vector<256x1xi32>
    %c0_i32_41 = arith.constant 0 : i32
    %110 = vector.broadcast %c0_i32_41 : i32 to vector<256x1xi32>
    %111 = arith.cmpi sge, %109, %110 : vector<256x1xi32>
    %c256_i32_42 = arith.constant 256 : i32
    %112 = vector.broadcast %c256_i32_42 : i32 to vector<256x1xi32>
    %113 = arith.cmpi slt, %109, %112 : vector<256x1xi32>
    %114 = arith.andi %111, %113 : vector<256x1xi1>
    %cst_43 = arith.constant 0.000000e+00 : f32
    %115 = vector.shape_cast %114 : vector<256x1xi1> to vector<256x1xi1>
    %116 = vector.broadcast %115 : vector<256x1xi1> to vector<256x8xi1>
    %117 = vector.broadcast %cst_43 : f32 to vector<256x8xf32>
    %118 = arith.select %116, %12, %117 : vector<256x8xi1>, vector<256x8xf32>
    %119 = arith.truncf %118 : vector<256x8xf32> to vector<256x8xbf16>
    %c4 = arith.constant 4 : index
    %c0_44 = arith.constant 0 : index
    %c0_45 = arith.constant 0 : index
    %120 = vector.load %arg4[%c4, %c0_44, %c0_45] : memref<9x8x8xbf16, #tpu.memory_space<vmem>>, vector<1x8x8xbf16>
    %121 = vector.shape_cast %120 : vector<1x8x8xbf16> to vector<8x8xbf16>
    %cst_46 = arith.constant dense<0.000000e+00> : vector<256x8xf32>
    %122 = tpu.matmul %119, %121, %cst_46 {dimension_numbers = #tpu.dot_dimension_numbers<[1], [0], [0], [1], [0, 0, 1, 1], [], []>} : vector<256x8xbf16>, vector<8x8xbf16>, vector<256x8xf32> -> vector<256x8xf32>
    %123 = arith.addf %107, %122 : vector<256x8xf32>
    %c255_i32 = arith.constant 255 : i32
    %124 = tpu.dynamic_rotate %12 by %c255_i32 dim 0 : vector<256x8xf32>, i32 -> vector<256x8xf32>
    %c1_i32_47 = arith.constant 1 : i32
    %125 = vector.broadcast %c1_i32_47 : i32 to vector<256x1xi32>
    %126 = arith.addi %13, %125 : vector<256x1xi32>
    %c0_i32_48 = arith.constant 0 : i32
    %127 = vector.broadcast %c0_i32_48 : i32 to vector<256x1xi32>
    %128 = arith.cmpi sge, %126, %127 : vector<256x1xi32>
    %c256_i32_49 = arith.constant 256 : i32
    %129 = vector.broadcast %c256_i32_49 : i32 to vector<256x1xi32>
    %130 = arith.cmpi slt, %126, %129 : vector<256x1xi32>
    %131 = arith.andi %128, %130 : vector<256x1xi1>
    %c15_i32_50 = arith.constant 15 : i32
    %132 = vector.broadcast %c15_i32_50 : i32 to vector<256x1xi32>
    %133 = arith.cmpi slt, %29, %132 : vector<256x1xi32>
    %134 = arith.andi %131, %133 : vector<256x1xi1>
    %cst_51 = arith.constant 0.000000e+00 : f32
    %135 = vector.shape_cast %134 : vector<256x1xi1> to vector<256x1xi1>
    %136 = vector.broadcast %135 : vector<256x1xi1> to vector<256x8xi1>
    %137 = vector.broadcast %cst_51 : f32 to vector<256x8xf32>
    %138 = arith.select %136, %124, %137 : vector<256x8xi1>, vector<256x8xf32>
    %139 = arith.truncf %138 : vector<256x8xf32> to vector<256x8xbf16>
    %c5 = arith.constant 5 : index
    %c0_52 = arith.constant 0 : index
    %c0_53 = arith.constant 0 : index
    %140 = vector.load %arg4[%c5, %c0_52, %c0_53] : memref<9x8x8xbf16, #tpu.memory_space<vmem>>, vector<1x8x8xbf16>
    %141 = vector.shape_cast %140 : vector<1x8x8xbf16> to vector<8x8xbf16>
    %cst_54 = arith.constant dense<0.000000e+00> : vector<256x8xf32>
    %142 = tpu.matmul %139, %141, %cst_54 {dimension_numbers = #tpu.dot_dimension_numbers<[1], [0], [0], [1], [0, 0, 1, 1], [], []>} : vector<256x8xbf16>, vector<8x8xbf16>, vector<256x8xf32> -> vector<256x8xf32>
    %143 = arith.addf %123, %142 : vector<256x8xf32>
    %c241_i32 = arith.constant 241 : i32
    %144 = tpu.dynamic_rotate %12 by %c241_i32 dim 0 : vector<256x8xf32>, i32 -> vector<256x8xf32>
    %c15_i32_55 = arith.constant 15 : i32
    %145 = vector.broadcast %c15_i32_55 : i32 to vector<256x1xi32>
    %146 = arith.addi %13, %145 : vector<256x1xi32>
    %c0_i32_56 = arith.constant 0 : i32
    %147 = vector.broadcast %c0_i32_56 : i32 to vector<256x1xi32>
    %148 = arith.cmpi sge, %146, %147 : vector<256x1xi32>
    %c256_i32_57 = arith.constant 256 : i32
    %149 = vector.broadcast %c256_i32_57 : i32 to vector<256x1xi32>
    %150 = arith.cmpi slt, %146, %149 : vector<256x1xi32>
    %151 = arith.andi %148, %150 : vector<256x1xi1>
    %c0_i32_58 = arith.constant 0 : i32
    %152 = vector.broadcast %c0_i32_58 : i32 to vector<256x1xi32>
    %153 = arith.cmpi sgt, %29, %152 : vector<256x1xi32>
    %154 = arith.andi %151, %153 : vector<256x1xi1>
    %cst_59 = arith.constant 0.000000e+00 : f32
    %155 = vector.shape_cast %154 : vector<256x1xi1> to vector<256x1xi1>
    %156 = vector.broadcast %155 : vector<256x1xi1> to vector<256x8xi1>
    %157 = vector.broadcast %cst_59 : f32 to vector<256x8xf32>
    %158 = arith.select %156, %144, %157 : vector<256x8xi1>, vector<256x8xf32>
    %159 = arith.truncf %158 : vector<256x8xf32> to vector<256x8xbf16>
    %c6 = arith.constant 6 : index
    %c0_60 = arith.constant 0 : index
    %c0_61 = arith.constant 0 : index
    %160 = vector.load %arg4[%c6, %c0_60, %c0_61] : memref<9x8x8xbf16, #tpu.memory_space<vmem>>, vector<1x8x8xbf16>
    %161 = vector.shape_cast %160 : vector<1x8x8xbf16> to vector<8x8xbf16>
    %cst_62 = arith.constant dense<0.000000e+00> : vector<256x8xf32>
    %162 = tpu.matmul %159, %161, %cst_62 {dimension_numbers = #tpu.dot_dimension_numbers<[1], [0], [0], [1], [0, 0, 1, 1], [], []>} : vector<256x8xbf16>, vector<8x8xbf16>, vector<256x8xf32> -> vector<256x8xf32>
    %163 = arith.addf %143, %162 : vector<256x8xf32>
    %c240_i32 = arith.constant 240 : i32
    %164 = tpu.dynamic_rotate %12 by %c240_i32 dim 0 : vector<256x8xf32>, i32 -> vector<256x8xf32>
    %c16_i32_63 = arith.constant 16 : i32
    %165 = vector.broadcast %c16_i32_63 : i32 to vector<256x1xi32>
    %166 = arith.addi %13, %165 : vector<256x1xi32>
    %c0_i32_64 = arith.constant 0 : i32
    %167 = vector.broadcast %c0_i32_64 : i32 to vector<256x1xi32>
    %168 = arith.cmpi sge, %166, %167 : vector<256x1xi32>
    %c256_i32_65 = arith.constant 256 : i32
    %169 = vector.broadcast %c256_i32_65 : i32 to vector<256x1xi32>
    %170 = arith.cmpi slt, %166, %169 : vector<256x1xi32>
    %171 = arith.andi %168, %170 : vector<256x1xi1>
    %cst_66 = arith.constant 0.000000e+00 : f32
    %172 = vector.shape_cast %171 : vector<256x1xi1> to vector<256x1xi1>
    %173 = vector.broadcast %172 : vector<256x1xi1> to vector<256x8xi1>
    %174 = vector.broadcast %cst_66 : f32 to vector<256x8xf32>
    %175 = arith.select %173, %164, %174 : vector<256x8xi1>, vector<256x8xf32>
    %176 = arith.truncf %175 : vector<256x8xf32> to vector<256x8xbf16>
    %c7 = arith.constant 7 : index
    %c0_67 = arith.constant 0 : index
    %c0_68 = arith.constant 0 : index
    %177 = vector.load %arg4[%c7, %c0_67, %c0_68] : memref<9x8x8xbf16, #tpu.memory_space<vmem>>, vector<1x8x8xbf16>
    %178 = vector.shape_cast %177 : vector<1x8x8xbf16> to vector<8x8xbf16>
    %cst_69 = arith.constant dense<0.000000e+00> : vector<256x8xf32>
    %179 = tpu.matmul %176, %178, %cst_69 {dimension_numbers = #tpu.dot_dimension_numbers<[1], [0], [0], [1], [0, 0, 1, 1], [], []>} : vector<256x8xbf16>, vector<8x8xbf16>, vector<256x8xf32> -> vector<256x8xf32>
    %180 = arith.addf %163, %179 : vector<256x8xf32>
    %c239_i32 = arith.constant 239 : i32
    %181 = tpu.dynamic_rotate %12 by %c239_i32 dim 0 : vector<256x8xf32>, i32 -> vector<256x8xf32>
    %c17_i32_70 = arith.constant 17 : i32
    %182 = vector.broadcast %c17_i32_70 : i32 to vector<256x1xi32>
    %183 = arith.addi %13, %182 : vector<256x1xi32>
    %c0_i32_71 = arith.constant 0 : i32
    %184 = vector.broadcast %c0_i32_71 : i32 to vector<256x1xi32>
    %185 = arith.cmpi sge, %183, %184 : vector<256x1xi32>
    %c256_i32_72 = arith.constant 256 : i32
    %186 = vector.broadcast %c256_i32_72 : i32 to vector<256x1xi32>
    %187 = arith.cmpi slt, %183, %186 : vector<256x1xi32>
    %188 = arith.andi %185, %187 : vector<256x1xi1>
    %c15_i32_73 = arith.constant 15 : i32
    %189 = vector.broadcast %c15_i32_73 : i32 to vector<256x1xi32>
    %190 = arith.cmpi slt, %29, %189 : vector<256x1xi32>
    %191 = arith.andi %188, %190 : vector<256x1xi1>
    %cst_74 = arith.constant 0.000000e+00 : f32
    %192 = vector.shape_cast %191 : vector<256x1xi1> to vector<256x1xi1>
    %193 = vector.broadcast %192 : vector<256x1xi1> to vector<256x8xi1>
    %194 = vector.broadcast %cst_74 : f32 to vector<256x8xf32>
    %195 = arith.select %193, %181, %194 : vector<256x8xi1>, vector<256x8xf32>
    %196 = arith.truncf %195 : vector<256x8xf32> to vector<256x8xbf16>
    %c8 = arith.constant 8 : index
    %c0_75 = arith.constant 0 : index
    %c0_76 = arith.constant 0 : index
    %197 = vector.load %arg4[%c8, %c0_75, %c0_76] : memref<9x8x8xbf16, #tpu.memory_space<vmem>>, vector<1x8x8xbf16>
    %198 = vector.shape_cast %197 : vector<1x8x8xbf16> to vector<8x8xbf16>
    %cst_77 = arith.constant dense<0.000000e+00> : vector<256x8xf32>
    %199 = tpu.matmul %196, %198, %cst_77 {dimension_numbers = #tpu.dot_dimension_numbers<[1], [0], [0], [1], [0, 0, 1, 1], [], []>} : vector<256x8xbf16>, vector<8x8xbf16>, vector<256x8xf32> -> vector<256x8xf32>
    %200 = arith.addf %180, %199 : vector<256x8xf32>
    %c0_78 = arith.constant 0 : index
    %c0_79 = arith.constant 0 : index
    %c0_80 = arith.constant 0 : index
    %201 = vector.load %arg5[%c0_78, %c0_79, %c0_80] : memref<1x256x8xf32, #tpu.memory_space<vmem>>, vector<1x256x8xf32>
    %202 = vector.shape_cast %201 : vector<1x256x8xf32> to vector<256x8xf32>
    %203 = vector.shape_cast %200 : vector<256x8xf32> to vector<1x256x8xf32>
    tpu.vector_store %arg5[%c0_78, %c0_79, %c0_80], %203 {strides = array<i32>} : memref<1x256x8xf32, #tpu.memory_space<vmem>>, vector<1x256x8xf32>,
    %cst_81 = arith.constant dense<0.000000e+00> : vector<8xf32>
    %204 = vector.multi_reduction <add>, %200, %cst_81 [0] : vector<256x8xf32> to vector<8xf32>
    %205 = vector.shape_cast %204 : vector<8xf32> to vector<1x8xf32>
    %c0_82 = arith.constant 0 : index
    %c0_83 = arith.constant 0 : index
    %c0_84 = arith.constant 0 : index
    %206 = vector.load %arg6[%c0_82, %c0_83, %c0_84] : memref<1x1x8xf32, #tpu.memory_space<vmem>>, vector<1x1x8xf32>
    %207 = vector.shape_cast %206 : vector<1x1x8xf32> to vector<1x8xf32>
    %208 = vector.shape_cast %205 : vector<1x8xf32> to vector<1x1x8xf32>
    tpu.vector_store %arg6[%c0_82, %c0_83, %c0_84], %208 {strides = array<i32>} : memref<1x1x8xf32, #tpu.memory_space<vmem>>, vector<1x1x8xf32>,
    %209 = arith.mulf %200, %200 : vector<256x8xf32>
    %cst_85 = arith.constant dense<0.000000e+00> : vector<8xf32>
    %210 = vector.multi_reduction <add>, %209, %cst_85 [0] : vector<256x8xf32> to vector<8xf32>
    %211 = vector.shape_cast %210 : vector<8xf32> to vector<1x8xf32>
    %c0_86 = arith.constant 0 : index
    %c0_87 = arith.constant 0 : index
    %c0_88 = arith.constant 0 : index
    %212 = vector.load %arg7[%c0_86, %c0_87, %c0_88] : memref<1x1x8xf32, #tpu.memory_space<vmem>>, vector<1x1x8xf32>
    %213 = vector.shape_cast %212 : vector<1x1x8xf32> to vector<1x8xf32>
    %214 = vector.shape_cast %211 : vector<1x8xf32> to vector<1x1x8xf32>
    tpu.vector_store %arg7[%c0_86, %c0_87, %c0_88], %214 {strides = array<i32>} : memref<1x1x8xf32, #tpu.memory_space<vmem>>, vector<1x1x8xf32>,
    return
  }
  func.func @transform_0(%arg0: i32) -> (i32, i32) {
    %c0_i32 = arith.constant 0 : i32
    %c0_i32_0 = arith.constant 0 : i32
    %c0_i32_1 = arith.constant 0 : i32
    return %c0_i32, %c0_i32_0 : i32, i32
  }
  func.func @transform_1(%arg0: i32) -> (i32, i32) {
    %c0_i32 = arith.constant 0 : i32
    %c0_i32_0 = arith.constant 0 : i32
    %c0_i32_1 = arith.constant 0 : i32
    return %c0_i32, %c0_i32_0 : i32, i32
  }
  func.func @transform_2(%arg0: i32) -> (i32, i32, i32) {
    %c0_i32 = arith.constant 0 : i32
    %c0_i32_0 = arith.constant 0 : i32
    %c0_i32_1 = arith.constant 0 : i32
    return %arg0, %c0_i32, %c0_i32_0 : i32, i32, i32
  }
  func.func @transform_3(%arg0: i32) -> (i32, i32, i32) {
    %c0_i32 = arith.constant 0 : i32
    %c0_i32_0 = arith.constant 0 : i32
    %c0_i32_1 = arith.constant 0 : i32
    %c0_i32_2 = arith.constant 0 : i32
    return %c0_i32, %c0_i32_0, %c0_i32_1 : i32, i32, i32
  }
  func.func @transform_4(%arg0: i32) -> (i32, i32, i32) {
    %c0_i32 = arith.constant 0 : i32
    %c0_i32_0 = arith.constant 0 : i32
    %c0_i32_1 = arith.constant 0 : i32
    return %arg0, %c0_i32, %c0_i32_0 : i32, i32, i32
  }
  func.func @transform_5(%arg0: i32) -> (i32, i32, i32) {
    %c0_i32 = arith.constant 0 : i32
    %c0_i32_0 = arith.constant 0 : i32
    %c0_i32_1 = arith.constant 0 : i32
    return %arg0, %c0_i32, %c0_i32_0 : i32, i32, i32
  }
  func.func @transform_6(%arg0: i32) -> (i32, i32, i32) {
    %c0_i32 = arith.constant 0 : i32
    %c0_i32_0 = arith.constant 0 : i32
    %c0_i32_1 = arith.constant 0 : i32
    return %arg0, %c0_i32, %c0_i32_0 : i32, i32, i32
  }
}

module attributes {stable_mosaic.version = 11 : i64} {
  func.func @kernel(%arg0: i32, %arg1: memref<1x8xf32, #tpu.memory_space<vmem>>, %arg2: memref<1x8xf32, #tpu.memory_space<vmem>>, %arg3: memref<1x256x8xf32, #tpu.memory_space<vmem>>, %arg4: memref<9x8x8xbf16, #tpu.memory_space<vmem>>, %arg5: memref<1x256x8xf32, #tpu.memory_space<vmem>>, %arg6: memref<1x256x8xf32, #tpu.memory_space<vmem>>, %arg7: memref<1x1x8xf32, #tpu.memory_space<vmem>>, %arg8: memref<1x1x8xf32, #tpu.memory_space<vmem>>) attributes {dimension_semantics = [#tpu.dimension_semantics<parallel>], iteration_bounds = array<i64: 2>, scalar_prefetch = 0 : i64, scratch_operands = 0 : i64, tpu.core_type = #tpu.core_type<tc>, window_params = [{pipeline_mode = #tpu.pipeline_mode<synchronous>, transform_indices = @transform_0, window_bounds = array<i64: 1, 8>}, {pipeline_mode = #tpu.pipeline_mode<synchronous>, transform_indices = @transform_1, window_bounds = array<i64: 1, 8>}, {transform_indices = @transform_2, window_bounds = array<i64: 1, 256, 8>}, {pipeline_mode = #tpu.pipeline_mode<synchronous>, transform_indices = @transform_3, window_bounds = array<i64: 9, 8, 8>}, {transform_indices = @transform_4, window_bounds = array<i64: 1, 256, 8>}, {transform_indices = @transform_5, window_bounds = array<i64: 1, 256, 8>}, {transform_indices = @transform_6, window_bounds = array<i64: 1, 1, 8>}, {transform_indices = @transform_7, window_bounds = array<i64: 1, 1, 8>}]} {
    %c0 = arith.constant 0 : index
    %c0_0 = arith.constant 0 : index
    %c0_1 = arith.constant 0 : index
    %0 = vector.load %arg3[%c0, %c0_0, %c0_1] : memref<1x256x8xf32, #tpu.memory_space<vmem>>, vector<1x256x8xf32>
    %1 = vector.shape_cast %0 : vector<1x256x8xf32> to vector<256x8xf32>
    %c0_2 = arith.constant 0 : index
    %c0_3 = arith.constant 0 : index
    %2 = vector.load %arg1[%c0_2, %c0_3] : memref<1x8xf32, #tpu.memory_space<vmem>>, vector<1x8xf32>
    %3 = vector.broadcast %2 : vector<1x8xf32> to vector<256x8xf32>
    %4 = arith.mulf %1, %3 : vector<256x8xf32>
    %c0_4 = arith.constant 0 : index
    %c0_5 = arith.constant 0 : index
    %5 = vector.load %arg2[%c0_4, %c0_5] : memref<1x8xf32, #tpu.memory_space<vmem>>, vector<1x8xf32>
    %6 = vector.broadcast %5 : vector<1x8xf32> to vector<256x8xf32>
    %7 = arith.addf %4, %6 : vector<256x8xf32>
    %cst = arith.constant 0.000000e+00 : f32
    %8 = vector.broadcast %cst : f32 to vector<256x8xf32>
    %9 = arith.cmpf ogt, %7, %8 : vector<256x8xf32>
    %cst_6 = arith.constant 0.00999999977 : f32
    %10 = vector.broadcast %cst_6 : f32 to vector<256x8xf32>
    %11 = arith.mulf %10, %7 : vector<256x8xf32>
    %12 = arith.select %9, %7, %11 : vector<256x8xi1>, vector<256x8xf32>
    %13 = tpu.iota {dimensions = array<i32: 0>} : vector<256x1xi32>
    %c16_i32 = arith.constant 16 : i32
    %c0_i32 = arith.constant 0 : i32
    %14 = arith.cmpi eq, %c16_i32, %c0_i32 : i32
    %c1_i32 = arith.constant 1 : i32
    %15 = arith.select %14, %c1_i32, %c16_i32 : i32
    %16 = vector.broadcast %15 : i32 to vector<256x1xi32>
    %17 = arith.remsi %13, %16 : vector<256x1xi32>
    %c0_i32_7 = arith.constant 0 : i32
    %18 = vector.broadcast %c0_i32_7 : i32 to vector<256x1xi32>
    %19 = arith.cmpi ne, %17, %18 : vector<256x1xi32>
    %c0_i32_8 = arith.constant 0 : i32
    %20 = vector.broadcast %c0_i32_8 : i32 to vector<256x1xi32>
    %21 = arith.cmpi slt, %17, %20 : vector<256x1xi32>
    %c0_i32_9 = arith.constant 0 : i32
    %22 = arith.cmpi slt, %15, %c0_i32_9 : i32
    %23 = vector.broadcast %22 : i1 to vector<256x1xi1>
    %24 = vector.broadcast %23 : vector<256x1xi1> to vector<256x1xi1>
    %25 = arith.xori %21, %24 : vector<256x1xi1>
    %26 = arith.andi %25, %19 : vector<256x1xi1>
    %27 = vector.broadcast %15 : i32 to vector<256x1xi32>
    %28 = arith.addi %17, %27 : vector<256x1xi32>
    %29 = arith.select %26, %28, %17 : vector<256x1xi1>, vector<256x1xi32>
    %cst_10 = arith.constant 0.000000e+00 : f32
    %30 = vector.broadcast %cst_10 : f32 to vector<256x8xf32>
    %c17_i32 = arith.constant 17 : i32
    %31 = tpu.dynamic_rotate %12 by %c17_i32 dim 0 : vector<256x8xf32>, i32 -> vector<256x8xf32>
    %c-17_i32 = arith.constant -17 : i32
    %32 = vector.broadcast %c-17_i32 : i32 to vector<256x1xi32>
    %33 = arith.addi %13, %32 : vector<256x1xi32>
    %c0_i32_11 = arith.constant 0 : i32
    %34 = vector.broadcast %c0_i32_11 : i32 to vector<256x1xi32>
    %35 = arith.cmpi sge, %33, %34 : vector<256x1xi32>
    %c256_i32 = arith.constant 256 : i32
    %36 = vector.broadcast %c256_i32 : i32 to vector<256x1xi32>
    %37 = arith.cmpi slt, %33, %36 : vector<256x1xi32>
    %38 = arith.andi %35, %37 : vector<256x1xi1>
    %c0_i32_12 = arith.constant 0 : i32
    %39 = vector.broadcast %c0_i32_12 : i32 to vector<256x1xi32>
    %40 = arith.cmpi sgt, %29, %39 : vector<256x1xi32>
    %41 = arith.andi %38, %40 : vector<256x1xi1>
    %cst_13 = arith.constant 0.000000e+00 : f32
    %42 = vector.shape_cast %41 : vector<256x1xi1> to vector<256x1xi1>
    %43 = vector.broadcast %42 : vector<256x1xi1> to vector<256x8xi1>
    %44 = vector.broadcast %cst_13 : f32 to vector<256x8xf32>
    %45 = arith.select %43, %31, %44 : vector<256x8xi1>, vector<256x8xf32>
    %46 = arith.truncf %45 : vector<256x8xf32> to vector<256x8xbf16>
    %c0_14 = arith.constant 0 : index
    %c0_15 = arith.constant 0 : index
    %c0_16 = arith.constant 0 : index
    %47 = vector.load %arg4[%c0_14, %c0_15, %c0_16] : memref<9x8x8xbf16, #tpu.memory_space<vmem>>, vector<1x8x8xbf16>
    %48 = vector.shape_cast %47 : vector<1x8x8xbf16> to vector<8x8xbf16>
    %cst_17 = arith.constant dense<0.000000e+00> : vector<256x8xf32>
    %49 = tpu.matmul %46, %48, %cst_17 {dimension_numbers = #tpu.dot_dimension_numbers<[1], [0], [0], [1], [0, 0, 1, 1], [], []>} : vector<256x8xbf16>, vector<8x8xbf16>, vector<256x8xf32> -> vector<256x8xf32>
    %50 = arith.addf %30, %49 : vector<256x8xf32>
    %c16_i32_18 = arith.constant 16 : i32
    %51 = tpu.dynamic_rotate %12 by %c16_i32_18 dim 0 : vector<256x8xf32>, i32 -> vector<256x8xf32>
    %c-16_i32 = arith.constant -16 : i32
    %52 = vector.broadcast %c-16_i32 : i32 to vector<256x1xi32>
    %53 = arith.addi %13, %52 : vector<256x1xi32>
    %c0_i32_19 = arith.constant 0 : i32
    %54 = vector.broadcast %c0_i32_19 : i32 to vector<256x1xi32>
    %55 = arith.cmpi sge, %53, %54 : vector<256x1xi32>
    %c256_i32_20 = arith.constant 256 : i32
    %56 = vector.broadcast %c256_i32_20 : i32 to vector<256x1xi32>
    %57 = arith.cmpi slt, %53, %56 : vector<256x1xi32>
    %58 = arith.andi %55, %57 : vector<256x1xi1>
    %cst_21 = arith.constant 0.000000e+00 : f32
    %59 = vector.shape_cast %58 : vector<256x1xi1> to vector<256x1xi1>
    %60 = vector.broadcast %59 : vector<256x1xi1> to vector<256x8xi1>
    %61 = vector.broadcast %cst_21 : f32 to vector<256x8xf32>
    %62 = arith.select %60, %51, %61 : vector<256x8xi1>, vector<256x8xf32>
    %63 = arith.truncf %62 : vector<256x8xf32> to vector<256x8xbf16>
    %c1 = arith.constant 1 : index
    %c0_22 = arith.constant 0 : index
    %c0_23 = arith.constant 0 : index
    %64 = vector.load %arg4[%c1, %c0_22, %c0_23] : memref<9x8x8xbf16, #tpu.memory_space<vmem>>, vector<1x8x8xbf16>
    %65 = vector.shape_cast %64 : vector<1x8x8xbf16> to vector<8x8xbf16>
    %cst_24 = arith.constant dense<0.000000e+00> : vector<256x8xf32>
    %66 = tpu.matmul %63, %65, %cst_24 {dimension_numbers = #tpu.dot_dimension_numbers<[1], [0], [0], [1], [0, 0, 1, 1], [], []>} : vector<256x8xbf16>, vector<8x8xbf16>, vector<256x8xf32> -> vector<256x8xf32>
    %67 = arith.addf %50, %66 : vector<256x8xf32>
    %c15_i32 = arith.constant 15 : i32
    %68 = tpu.dynamic_rotate %12 by %c15_i32 dim 0 : vector<256x8xf32>, i32 -> vector<256x8xf32>
    %c-15_i32 = arith.constant -15 : i32
    %69 = vector.broadcast %c-15_i32 : i32 to vector<256x1xi32>
    %70 = arith.addi %13, %69 : vector<256x1xi32>
    %c0_i32_25 = arith.constant 0 : i32
    %71 = vector.broadcast %c0_i32_25 : i32 to vector<256x1xi32>
    %72 = arith.cmpi sge, %70, %71 : vector<256x1xi32>
    %c256_i32_26 = arith.constant 256 : i32
    %73 = vector.broadcast %c256_i32_26 : i32 to vector<256x1xi32>
    %74 = arith.cmpi slt, %70, %73 : vector<256x1xi32>
    %75 = arith.andi %72, %74 : vector<256x1xi1>
    %c15_i32_27 = arith.constant 15 : i32
    %76 = vector.broadcast %c15_i32_27 : i32 to vector<256x1xi32>
    %77 = arith.cmpi slt, %29, %76 : vector<256x1xi32>
    %78 = arith.andi %75, %77 : vector<256x1xi1>
    %cst_28 = arith.constant 0.000000e+00 : f32
    %79 = vector.shape_cast %78 : vector<256x1xi1> to vector<256x1xi1>
    %80 = vector.broadcast %79 : vector<256x1xi1> to vector<256x8xi1>
    %81 = vector.broadcast %cst_28 : f32 to vector<256x8xf32>
    %82 = arith.select %80, %68, %81 : vector<256x8xi1>, vector<256x8xf32>
    %83 = arith.truncf %82 : vector<256x8xf32> to vector<256x8xbf16>
    %c2 = arith.constant 2 : index
    %c0_29 = arith.constant 0 : index
    %c0_30 = arith.constant 0 : index
    %84 = vector.load %arg4[%c2, %c0_29, %c0_30] : memref<9x8x8xbf16, #tpu.memory_space<vmem>>, vector<1x8x8xbf16>
    %85 = vector.shape_cast %84 : vector<1x8x8xbf16> to vector<8x8xbf16>
    %cst_31 = arith.constant dense<0.000000e+00> : vector<256x8xf32>
    %86 = tpu.matmul %83, %85, %cst_31 {dimension_numbers = #tpu.dot_dimension_numbers<[1], [0], [0], [1], [0, 0, 1, 1], [], []>} : vector<256x8xbf16>, vector<8x8xbf16>, vector<256x8xf32> -> vector<256x8xf32>
    %87 = arith.addf %67, %86 : vector<256x8xf32>
    %c1_i32_32 = arith.constant 1 : i32
    %88 = tpu.dynamic_rotate %12 by %c1_i32_32 dim 0 : vector<256x8xf32>, i32 -> vector<256x8xf32>
    %c-1_i32 = arith.constant -1 : i32
    %89 = vector.broadcast %c-1_i32 : i32 to vector<256x1xi32>
    %90 = arith.addi %13, %89 : vector<256x1xi32>
    %c0_i32_33 = arith.constant 0 : i32
    %91 = vector.broadcast %c0_i32_33 : i32 to vector<256x1xi32>
    %92 = arith.cmpi sge, %90, %91 : vector<256x1xi32>
    %c256_i32_34 = arith.constant 256 : i32
    %93 = vector.broadcast %c256_i32_34 : i32 to vector<256x1xi32>
    %94 = arith.cmpi slt, %90, %93 : vector<256x1xi32>
    %95 = arith.andi %92, %94 : vector<256x1xi1>
    %c0_i32_35 = arith.constant 0 : i32
    %96 = vector.broadcast %c0_i32_35 : i32 to vector<256x1xi32>
    %97 = arith.cmpi sgt, %29, %96 : vector<256x1xi32>
    %98 = arith.andi %95, %97 : vector<256x1xi1>
    %cst_36 = arith.constant 0.000000e+00 : f32
    %99 = vector.shape_cast %98 : vector<256x1xi1> to vector<256x1xi1>
    %100 = vector.broadcast %99 : vector<256x1xi1> to vector<256x8xi1>
    %101 = vector.broadcast %cst_36 : f32 to vector<256x8xf32>
    %102 = arith.select %100, %88, %101 : vector<256x8xi1>, vector<256x8xf32>
    %103 = arith.truncf %102 : vector<256x8xf32> to vector<256x8xbf16>
    %c3 = arith.constant 3 : index
    %c0_37 = arith.constant 0 : index
    %c0_38 = arith.constant 0 : index
    %104 = vector.load %arg4[%c3, %c0_37, %c0_38] : memref<9x8x8xbf16, #tpu.memory_space<vmem>>, vector<1x8x8xbf16>
    %105 = vector.shape_cast %104 : vector<1x8x8xbf16> to vector<8x8xbf16>
    %cst_39 = arith.constant dense<0.000000e+00> : vector<256x8xf32>
    %106 = tpu.matmul %103, %105, %cst_39 {dimension_numbers = #tpu.dot_dimension_numbers<[1], [0], [0], [1], [0, 0, 1, 1], [], []>} : vector<256x8xbf16>, vector<8x8xbf16>, vector<256x8xf32> -> vector<256x8xf32>
    %107 = arith.addf %87, %106 : vector<256x8xf32>
    %c0_i32_40 = arith.constant 0 : i32
    %108 = vector.broadcast %c0_i32_40 : i32 to vector<256x1xi32>
    %109 = arith.addi %13, %108 : vector<256x1xi32>
    %c0_i32_41 = arith.constant 0 : i32
    %110 = vector.broadcast %c0_i32_41 : i32 to vector<256x1xi32>
    %111 = arith.cmpi sge, %109, %110 : vector<256x1xi32>
    %c256_i32_42 = arith.constant 256 : i32
    %112 = vector.broadcast %c256_i32_42 : i32 to vector<256x1xi32>
    %113 = arith.cmpi slt, %109, %112 : vector<256x1xi32>
    %114 = arith.andi %111, %113 : vector<256x1xi1>
    %cst_43 = arith.constant 0.000000e+00 : f32
    %115 = vector.shape_cast %114 : vector<256x1xi1> to vector<256x1xi1>
    %116 = vector.broadcast %115 : vector<256x1xi1> to vector<256x8xi1>
    %117 = vector.broadcast %cst_43 : f32 to vector<256x8xf32>
    %118 = arith.select %116, %12, %117 : vector<256x8xi1>, vector<256x8xf32>
    %119 = arith.truncf %118 : vector<256x8xf32> to vector<256x8xbf16>
    %c4 = arith.constant 4 : index
    %c0_44 = arith.constant 0 : index
    %c0_45 = arith.constant 0 : index
    %120 = vector.load %arg4[%c4, %c0_44, %c0_45] : memref<9x8x8xbf16, #tpu.memory_space<vmem>>, vector<1x8x8xbf16>
    %121 = vector.shape_cast %120 : vector<1x8x8xbf16> to vector<8x8xbf16>
    %cst_46 = arith.constant dense<0.000000e+00> : vector<256x8xf32>
    %122 = tpu.matmul %119, %121, %cst_46 {dimension_numbers = #tpu.dot_dimension_numbers<[1], [0], [0], [1], [0, 0, 1, 1], [], []>} : vector<256x8xbf16>, vector<8x8xbf16>, vector<256x8xf32> -> vector<256x8xf32>
    %123 = arith.addf %107, %122 : vector<256x8xf32>
    %c255_i32 = arith.constant 255 : i32
    %124 = tpu.dynamic_rotate %12 by %c255_i32 dim 0 : vector<256x8xf32>, i32 -> vector<256x8xf32>
    %c1_i32_47 = arith.constant 1 : i32
    %125 = vector.broadcast %c1_i32_47 : i32 to vector<256x1xi32>
    %126 = arith.addi %13, %125 : vector<256x1xi32>
    %c0_i32_48 = arith.constant 0 : i32
    %127 = vector.broadcast %c0_i32_48 : i32 to vector<256x1xi32>
    %128 = arith.cmpi sge, %126, %127 : vector<256x1xi32>
    %c256_i32_49 = arith.constant 256 : i32
    %129 = vector.broadcast %c256_i32_49 : i32 to vector<256x1xi32>
    %130 = arith.cmpi slt, %126, %129 : vector<256x1xi32>
    %131 = arith.andi %128, %130 : vector<256x1xi1>
    %c15_i32_50 = arith.constant 15 : i32
    %132 = vector.broadcast %c15_i32_50 : i32 to vector<256x1xi32>
    %133 = arith.cmpi slt, %29, %132 : vector<256x1xi32>
    %134 = arith.andi %131, %133 : vector<256x1xi1>
    %cst_51 = arith.constant 0.000000e+00 : f32
    %135 = vector.shape_cast %134 : vector<256x1xi1> to vector<256x1xi1>
    %136 = vector.broadcast %135 : vector<256x1xi1> to vector<256x8xi1>
    %137 = vector.broadcast %cst_51 : f32 to vector<256x8xf32>
    %138 = arith.select %136, %124, %137 : vector<256x8xi1>, vector<256x8xf32>
    %139 = arith.truncf %138 : vector<256x8xf32> to vector<256x8xbf16>
    %c5 = arith.constant 5 : index
    %c0_52 = arith.constant 0 : index
    %c0_53 = arith.constant 0 : index
    %140 = vector.load %arg4[%c5, %c0_52, %c0_53] : memref<9x8x8xbf16, #tpu.memory_space<vmem>>, vector<1x8x8xbf16>
    %141 = vector.shape_cast %140 : vector<1x8x8xbf16> to vector<8x8xbf16>
    %cst_54 = arith.constant dense<0.000000e+00> : vector<256x8xf32>
    %142 = tpu.matmul %139, %141, %cst_54 {dimension_numbers = #tpu.dot_dimension_numbers<[1], [0], [0], [1], [0, 0, 1, 1], [], []>} : vector<256x8xbf16>, vector<8x8xbf16>, vector<256x8xf32> -> vector<256x8xf32>
    %143 = arith.addf %123, %142 : vector<256x8xf32>
    %c241_i32 = arith.constant 241 : i32
    %144 = tpu.dynamic_rotate %12 by %c241_i32 dim 0 : vector<256x8xf32>, i32 -> vector<256x8xf32>
    %c15_i32_55 = arith.constant 15 : i32
    %145 = vector.broadcast %c15_i32_55 : i32 to vector<256x1xi32>
    %146 = arith.addi %13, %145 : vector<256x1xi32>
    %c0_i32_56 = arith.constant 0 : i32
    %147 = vector.broadcast %c0_i32_56 : i32 to vector<256x1xi32>
    %148 = arith.cmpi sge, %146, %147 : vector<256x1xi32>
    %c256_i32_57 = arith.constant 256 : i32
    %149 = vector.broadcast %c256_i32_57 : i32 to vector<256x1xi32>
    %150 = arith.cmpi slt, %146, %149 : vector<256x1xi32>
    %151 = arith.andi %148, %150 : vector<256x1xi1>
    %c0_i32_58 = arith.constant 0 : i32
    %152 = vector.broadcast %c0_i32_58 : i32 to vector<256x1xi32>
    %153 = arith.cmpi sgt, %29, %152 : vector<256x1xi32>
    %154 = arith.andi %151, %153 : vector<256x1xi1>
    %cst_59 = arith.constant 0.000000e+00 : f32
    %155 = vector.shape_cast %154 : vector<256x1xi1> to vector<256x1xi1>
    %156 = vector.broadcast %155 : vector<256x1xi1> to vector<256x8xi1>
    %157 = vector.broadcast %cst_59 : f32 to vector<256x8xf32>
    %158 = arith.select %156, %144, %157 : vector<256x8xi1>, vector<256x8xf32>
    %159 = arith.truncf %158 : vector<256x8xf32> to vector<256x8xbf16>
    %c6 = arith.constant 6 : index
    %c0_60 = arith.constant 0 : index
    %c0_61 = arith.constant 0 : index
    %160 = vector.load %arg4[%c6, %c0_60, %c0_61] : memref<9x8x8xbf16, #tpu.memory_space<vmem>>, vector<1x8x8xbf16>
    %161 = vector.shape_cast %160 : vector<1x8x8xbf16> to vector<8x8xbf16>
    %cst_62 = arith.constant dense<0.000000e+00> : vector<256x8xf32>
    %162 = tpu.matmul %159, %161, %cst_62 {dimension_numbers = #tpu.dot_dimension_numbers<[1], [0], [0], [1], [0, 0, 1, 1], [], []>} : vector<256x8xbf16>, vector<8x8xbf16>, vector<256x8xf32> -> vector<256x8xf32>
    %163 = arith.addf %143, %162 : vector<256x8xf32>
    %c240_i32 = arith.constant 240 : i32
    %164 = tpu.dynamic_rotate %12 by %c240_i32 dim 0 : vector<256x8xf32>, i32 -> vector<256x8xf32>
    %c16_i32_63 = arith.constant 16 : i32
    %165 = vector.broadcast %c16_i32_63 : i32 to vector<256x1xi32>
    %166 = arith.addi %13, %165 : vector<256x1xi32>
    %c0_i32_64 = arith.constant 0 : i32
    %167 = vector.broadcast %c0_i32_64 : i32 to vector<256x1xi32>
    %168 = arith.cmpi sge, %166, %167 : vector<256x1xi32>
    %c256_i32_65 = arith.constant 256 : i32
    %169 = vector.broadcast %c256_i32_65 : i32 to vector<256x1xi32>
    %170 = arith.cmpi slt, %166, %169 : vector<256x1xi32>
    %171 = arith.andi %168, %170 : vector<256x1xi1>
    %cst_66 = arith.constant 0.000000e+00 : f32
    %172 = vector.shape_cast %171 : vector<256x1xi1> to vector<256x1xi1>
    %173 = vector.broadcast %172 : vector<256x1xi1> to vector<256x8xi1>
    %174 = vector.broadcast %cst_66 : f32 to vector<256x8xf32>
    %175 = arith.select %173, %164, %174 : vector<256x8xi1>, vector<256x8xf32>
    %176 = arith.truncf %175 : vector<256x8xf32> to vector<256x8xbf16>
    %c7 = arith.constant 7 : index
    %c0_67 = arith.constant 0 : index
    %c0_68 = arith.constant 0 : index
    %177 = vector.load %arg4[%c7, %c0_67, %c0_68] : memref<9x8x8xbf16, #tpu.memory_space<vmem>>, vector<1x8x8xbf16>
    %178 = vector.shape_cast %177 : vector<1x8x8xbf16> to vector<8x8xbf16>
    %cst_69 = arith.constant dense<0.000000e+00> : vector<256x8xf32>
    %179 = tpu.matmul %176, %178, %cst_69 {dimension_numbers = #tpu.dot_dimension_numbers<[1], [0], [0], [1], [0, 0, 1, 1], [], []>} : vector<256x8xbf16>, vector<8x8xbf16>, vector<256x8xf32> -> vector<256x8xf32>
    %180 = arith.addf %163, %179 : vector<256x8xf32>
    %c239_i32 = arith.constant 239 : i32
    %181 = tpu.dynamic_rotate %12 by %c239_i32 dim 0 : vector<256x8xf32>, i32 -> vector<256x8xf32>
    %c17_i32_70 = arith.constant 17 : i32
    %182 = vector.broadcast %c17_i32_70 : i32 to vector<256x1xi32>
    %183 = arith.addi %13, %182 : vector<256x1xi32>
    %c0_i32_71 = arith.constant 0 : i32
    %184 = vector.broadcast %c0_i32_71 : i32 to vector<256x1xi32>
    %185 = arith.cmpi sge, %183, %184 : vector<256x1xi32>
    %c256_i32_72 = arith.constant 256 : i32
    %186 = vector.broadcast %c256_i32_72 : i32 to vector<256x1xi32>
    %187 = arith.cmpi slt, %183, %186 : vector<256x1xi32>
    %188 = arith.andi %185, %187 : vector<256x1xi1>
    %c15_i32_73 = arith.constant 15 : i32
    %189 = vector.broadcast %c15_i32_73 : i32 to vector<256x1xi32>
    %190 = arith.cmpi slt, %29, %189 : vector<256x1xi32>
    %191 = arith.andi %188, %190 : vector<256x1xi1>
    %cst_74 = arith.constant 0.000000e+00 : f32
    %192 = vector.shape_cast %191 : vector<256x1xi1> to vector<256x1xi1>
    %193 = vector.broadcast %192 : vector<256x1xi1> to vector<256x8xi1>
    %194 = vector.broadcast %cst_74 : f32 to vector<256x8xf32>
    %195 = arith.select %193, %181, %194 : vector<256x8xi1>, vector<256x8xf32>
    %196 = arith.truncf %195 : vector<256x8xf32> to vector<256x8xbf16>
    %c8 = arith.constant 8 : index
    %c0_75 = arith.constant 0 : index
    %c0_76 = arith.constant 0 : index
    %197 = vector.load %arg4[%c8, %c0_75, %c0_76] : memref<9x8x8xbf16, #tpu.memory_space<vmem>>, vector<1x8x8xbf16>
    %198 = vector.shape_cast %197 : vector<1x8x8xbf16> to vector<8x8xbf16>
    %cst_77 = arith.constant dense<0.000000e+00> : vector<256x8xf32>
    %199 = tpu.matmul %196, %198, %cst_77 {dimension_numbers = #tpu.dot_dimension_numbers<[1], [0], [0], [1], [0, 0, 1, 1], [], []>} : vector<256x8xbf16>, vector<8x8xbf16>, vector<256x8xf32> -> vector<256x8xf32>
    %200 = arith.addf %180, %199 : vector<256x8xf32>
    %c0_78 = arith.constant 0 : index
    %c0_79 = arith.constant 0 : index
    %c0_80 = arith.constant 0 : index
    %201 = vector.load %arg5[%c0_78, %c0_79, %c0_80] : memref<1x256x8xf32, #tpu.memory_space<vmem>>, vector<1x256x8xf32>
    %202 = vector.shape_cast %201 : vector<1x256x8xf32> to vector<256x8xf32>
    %203 = arith.addf %200, %202 : vector<256x8xf32>
    %c0_81 = arith.constant 0 : index
    %c0_82 = arith.constant 0 : index
    %c0_83 = arith.constant 0 : index
    %204 = vector.load %arg6[%c0_81, %c0_82, %c0_83] : memref<1x256x8xf32, #tpu.memory_space<vmem>>, vector<1x256x8xf32>
    %205 = vector.shape_cast %204 : vector<1x256x8xf32> to vector<256x8xf32>
    %206 = vector.shape_cast %203 : vector<256x8xf32> to vector<1x256x8xf32>
    tpu.vector_store %arg6[%c0_81, %c0_82, %c0_83], %206 {strides = array<i32>} : memref<1x256x8xf32, #tpu.memory_space<vmem>>, vector<1x256x8xf32>,
    %cst_84 = arith.constant dense<0.000000e+00> : vector<8xf32>
    %207 = vector.multi_reduction <add>, %203, %cst_84 [0] : vector<256x8xf32> to vector<8xf32>
    %208 = vector.shape_cast %207 : vector<8xf32> to vector<1x8xf32>
    %c0_85 = arith.constant 0 : index
    %c0_86 = arith.constant 0 : index
    %c0_87 = arith.constant 0 : index
    %209 = vector.load %arg7[%c0_85, %c0_86, %c0_87] : memref<1x1x8xf32, #tpu.memory_space<vmem>>, vector<1x1x8xf32>
    %210 = vector.shape_cast %209 : vector<1x1x8xf32> to vector<1x8xf32>
    %211 = vector.shape_cast %208 : vector<1x8xf32> to vector<1x1x8xf32>
    tpu.vector_store %arg7[%c0_85, %c0_86, %c0_87], %211 {strides = array<i32>} : memref<1x1x8xf32, #tpu.memory_space<vmem>>, vector<1x1x8xf32>,
    %212 = arith.mulf %203, %203 : vector<256x8xf32>
    %cst_88 = arith.constant dense<0.000000e+00> : vector<8xf32>
    %213 = vector.multi_reduction <add>, %212, %cst_88 [0] : vector<256x8xf32> to vector<8xf32>
    %214 = vector.shape_cast %213 : vector<8xf32> to vector<1x8xf32>
    %c0_89 = arith.constant 0 : index
    %c0_90 = arith.constant 0 : index
    %c0_91 = arith.constant 0 : index
    %215 = vector.load %arg8[%c0_89, %c0_90, %c0_91] : memref<1x1x8xf32, #tpu.memory_space<vmem>>, vector<1x1x8xf32>
    %216 = vector.shape_cast %215 : vector<1x1x8xf32> to vector<1x8xf32>
    %217 = vector.shape_cast %214 : vector<1x8xf32> to vector<1x1x8xf32>
    tpu.vector_store %arg8[%c0_89, %c0_90, %c0_91], %217 {strides = array<i32>} : memref<1x1x8xf32, #tpu.memory_space<vmem>>, vector<1x1x8xf32>,
    return
  }
  func.func @transform_0(%arg0: i32) -> (i32, i32) {
    %c0_i32 = arith.constant 0 : i32
    %c0_i32_0 = arith.constant 0 : i32
    %c0_i32_1 = arith.constant 0 : i32
    return %c0_i32, %c0_i32_0 : i32, i32
  }
  func.func @transform_1(%arg0: i32) -> (i32, i32) {
    %c0_i32 = arith.constant 0 : i32
    %c0_i32_0 = arith.constant 0 : i32
    %c0_i32_1 = arith.constant 0 : i32
    return %c0_i32, %c0_i32_0 : i32, i32
  }
  func.func @transform_2(%arg0: i32) -> (i32, i32, i32) {
    %c0_i32 = arith.constant 0 : i32
    %c0_i32_0 = arith.constant 0 : i32
    %c0_i32_1 = arith.constant 0 : i32
    return %arg0, %c0_i32, %c0_i32_0 : i32, i32, i32
  }
  func.func @transform_3(%arg0: i32) -> (i32, i32, i32) {
    %c0_i32 = arith.constant 0 : i32
    %c0_i32_0 = arith.constant 0 : i32
    %c0_i32_1 = arith.constant 0 : i32
    %c0_i32_2 = arith.constant 0 : i32
    return %c0_i32, %c0_i32_0, %c0_i32_1 : i32, i32, i32
  }
  func.func @transform_4(%arg0: i32) -> (i32, i32, i32) {
    %c0_i32 = arith.constant 0 : i32
    %c0_i32_0 = arith.constant 0 : i32
    %c0_i32_1 = arith.constant 0 : i32
    return %arg0, %c0_i32, %c0_i32_0 : i32, i32, i32
  }
  func.func @transform_5(%arg0: i32) -> (i32, i32, i32) {
    %c0_i32 = arith.constant 0 : i32
    %c0_i32_0 = arith.constant 0 : i32
    %c0_i32_1 = arith.constant 0 : i32
    return %arg0, %c0_i32, %c0_i32_0 : i32, i32, i32
  }
  func.func @transform_6(%arg0: i32) -> (i32, i32, i32) {
    %c0_i32 = arith.constant 0 : i32
    %c0_i32_0 = arith.constant 0 : i32
    %c0_i32_1 = arith.constant 0 : i32
    return %arg0, %c0_i32, %c0_i32_0 : i32, i32, i32
  }
  func.func @transform_7(%arg0: i32) -> (i32, i32, i32) {
    %c0_i32 = arith.constant 0 : i32
    %c0_i32_0 = arith.constant 0 : i32
    %c0_i32_1 = arith.constant 0 : i32
    return %arg0, %c0_i32, %c0_i32_0 : i32, i32, i32
  }
}

module attributes {stable_mosaic.version = 11 : i64} {
  func.func @_conv1x1_res_kernel(%arg0: i32, %arg1: memref<1x8xf32, #tpu.memory_space<vmem>>, %arg2: memref<1x8xf32, #tpu.memory_space<vmem>>, %arg3: memref<1x256x8xf32, #tpu.memory_space<vmem>>, %arg4: memref<8x16xbf16, #tpu.memory_space<vmem>>, %arg5: memref<1x256x16xf32, #tpu.memory_space<vmem>>, %arg6: memref<1x256x16xf32, #tpu.memory_space<vmem>>, %arg7: memref<1x1x16xf32, #tpu.memory_space<vmem>>, %arg8: memref<1x1x16xf32, #tpu.memory_space<vmem>>) attributes {dimension_semantics = [#tpu.dimension_semantics<parallel>], iteration_bounds = array<i64: 2>, scalar_prefetch = 0 : i64, scratch_operands = 0 : i64, tpu.core_type = #tpu.core_type<tc>, window_params = [{pipeline_mode = #tpu.pipeline_mode<synchronous>, transform_indices = @transform_0, window_bounds = array<i64: 1, 8>}, {pipeline_mode = #tpu.pipeline_mode<synchronous>, transform_indices = @transform_1, window_bounds = array<i64: 1, 8>}, {transform_indices = @transform_2, window_bounds = array<i64: 1, 256, 8>}, {pipeline_mode = #tpu.pipeline_mode<synchronous>, transform_indices = @transform_3, window_bounds = array<i64: 8, 16>}, {transform_indices = @transform_4, window_bounds = array<i64: 1, 256, 16>}, {transform_indices = @transform_5, window_bounds = array<i64: 1, 256, 16>}, {transform_indices = @transform_6, window_bounds = array<i64: 1, 1, 16>}, {transform_indices = @transform_7, window_bounds = array<i64: 1, 1, 16>}]} {
    %c0 = arith.constant 0 : index
    %c0_0 = arith.constant 0 : index
    %c0_1 = arith.constant 0 : index
    %0 = vector.load %arg3[%c0, %c0_0, %c0_1] : memref<1x256x8xf32, #tpu.memory_space<vmem>>, vector<1x256x8xf32>
    %1 = vector.shape_cast %0 : vector<1x256x8xf32> to vector<256x8xf32>
    %c0_2 = arith.constant 0 : index
    %c0_3 = arith.constant 0 : index
    %2 = vector.load %arg1[%c0_2, %c0_3] : memref<1x8xf32, #tpu.memory_space<vmem>>, vector<1x8xf32>
    %3 = vector.broadcast %2 : vector<1x8xf32> to vector<256x8xf32>
    %4 = arith.mulf %1, %3 : vector<256x8xf32>
    %c0_4 = arith.constant 0 : index
    %c0_5 = arith.constant 0 : index
    %5 = vector.load %arg2[%c0_4, %c0_5] : memref<1x8xf32, #tpu.memory_space<vmem>>, vector<1x8xf32>
    %6 = vector.broadcast %5 : vector<1x8xf32> to vector<256x8xf32>
    %7 = arith.addf %4, %6 : vector<256x8xf32>
    %cst = arith.constant 0.000000e+00 : f32
    %8 = vector.broadcast %cst : f32 to vector<256x8xf32>
    %9 = arith.cmpf ogt, %7, %8 : vector<256x8xf32>
    %cst_6 = arith.constant 0.00999999977 : f32
    %10 = vector.broadcast %cst_6 : f32 to vector<256x8xf32>
    %11 = arith.mulf %10, %7 : vector<256x8xf32>
    %12 = arith.select %9, %7, %11 : vector<256x8xi1>, vector<256x8xf32>
    %13 = arith.truncf %12 : vector<256x8xf32> to vector<256x8xbf16>
    %c0_7 = arith.constant 0 : index
    %c0_8 = arith.constant 0 : index
    %14 = vector.load %arg4[%c0_7, %c0_8] : memref<8x16xbf16, #tpu.memory_space<vmem>>, vector<8x16xbf16>
    %cst_9 = arith.constant dense<0.000000e+00> : vector<256x16xf32>
    %15 = tpu.matmul %13, %14, %cst_9 {dimension_numbers = #tpu.dot_dimension_numbers<[1], [0], [0], [1], [0, 0, 1, 1], [], []>} : vector<256x8xbf16>, vector<8x16xbf16>, vector<256x16xf32> -> vector<256x16xf32>
    %c0_10 = arith.constant 0 : index
    %c0_11 = arith.constant 0 : index
    %c0_12 = arith.constant 0 : index
    %16 = vector.load %arg5[%c0_10, %c0_11, %c0_12] : memref<1x256x16xf32, #tpu.memory_space<vmem>>, vector<1x256x16xf32>
    %17 = vector.shape_cast %16 : vector<1x256x16xf32> to vector<256x16xf32>
    %18 = arith.addf %15, %17 : vector<256x16xf32>
    %c0_13 = arith.constant 0 : index
    %c0_14 = arith.constant 0 : index
    %c0_15 = arith.constant 0 : index
    %19 = vector.load %arg6[%c0_13, %c0_14, %c0_15] : memref<1x256x16xf32, #tpu.memory_space<vmem>>, vector<1x256x16xf32>
    %20 = vector.shape_cast %19 : vector<1x256x16xf32> to vector<256x16xf32>
    %21 = vector.shape_cast %18 : vector<256x16xf32> to vector<1x256x16xf32>
    tpu.vector_store %arg6[%c0_13, %c0_14, %c0_15], %21 {strides = array<i32>} : memref<1x256x16xf32, #tpu.memory_space<vmem>>, vector<1x256x16xf32>,
    %cst_16 = arith.constant dense<0.000000e+00> : vector<16xf32>
    %22 = vector.multi_reduction <add>, %18, %cst_16 [0] : vector<256x16xf32> to vector<16xf32>
    %23 = vector.shape_cast %22 : vector<16xf32> to vector<1x16xf32>
    %c0_17 = arith.constant 0 : index
    %c0_18 = arith.constant 0 : index
    %c0_19 = arith.constant 0 : index
    %24 = vector.load %arg7[%c0_17, %c0_18, %c0_19] : memref<1x1x16xf32, #tpu.memory_space<vmem>>, vector<1x1x16xf32>
    %25 = vector.shape_cast %24 : vector<1x1x16xf32> to vector<1x16xf32>
    %26 = vector.shape_cast %23 : vector<1x16xf32> to vector<1x1x16xf32>
    tpu.vector_store %arg7[%c0_17, %c0_18, %c0_19], %26 {strides = array<i32>} : memref<1x1x16xf32, #tpu.memory_space<vmem>>, vector<1x1x16xf32>,
    %27 = arith.mulf %18, %18 : vector<256x16xf32>
    %cst_20 = arith.constant dense<0.000000e+00> : vector<16xf32>
    %28 = vector.multi_reduction <add>, %27, %cst_20 [0] : vector<256x16xf32> to vector<16xf32>
    %29 = vector.shape_cast %28 : vector<16xf32> to vector<1x16xf32>
    %c0_21 = arith.constant 0 : index
    %c0_22 = arith.constant 0 : index
    %c0_23 = arith.constant 0 : index
    %30 = vector.load %arg8[%c0_21, %c0_22, %c0_23] : memref<1x1x16xf32, #tpu.memory_space<vmem>>, vector<1x1x16xf32>
    %31 = vector.shape_cast %30 : vector<1x1x16xf32> to vector<1x16xf32>
    %32 = vector.shape_cast %29 : vector<1x16xf32> to vector<1x1x16xf32>
    tpu.vector_store %arg8[%c0_21, %c0_22, %c0_23], %32 {strides = array<i32>} : memref<1x1x16xf32, #tpu.memory_space<vmem>>, vector<1x1x16xf32>,
    return
  }
  func.func @transform_0(%arg0: i32) -> (i32, i32) {
    %c0_i32 = arith.constant 0 : i32
    %c0_i32_0 = arith.constant 0 : i32
    %c0_i32_1 = arith.constant 0 : i32
    return %c0_i32, %c0_i32_0 : i32, i32
  }
  func.func @transform_1(%arg0: i32) -> (i32, i32) {
    %c0_i32 = arith.constant 0 : i32
    %c0_i32_0 = arith.constant 0 : i32
    %c0_i32_1 = arith.constant 0 : i32
    return %c0_i32, %c0_i32_0 : i32, i32
  }
  func.func @transform_2(%arg0: i32) -> (i32, i32, i32) {
    %c0_i32 = arith.constant 0 : i32
    %c0_i32_0 = arith.constant 0 : i32
    %c0_i32_1 = arith.constant 0 : i32
    return %arg0, %c0_i32, %c0_i32_0 : i32, i32, i32
  }
  func.func @transform_3(%arg0: i32) -> (i32, i32) {
    %c0_i32 = arith.constant 0 : i32
    %c0_i32_0 = arith.constant 0 : i32
    %c0_i32_1 = arith.constant 0 : i32
    return %c0_i32, %c0_i32_0 : i32, i32
  }
  func.func @transform_4(%arg0: i32) -> (i32, i32, i32) {
    %c0_i32 = arith.constant 0 : i32
    %c0_i32_0 = arith.constant 0 : i32
    %c0_i32_1 = arith.constant 0 : i32
    return %arg0, %c0_i32, %c0_i32_0 : i32, i32, i32
  }
  func.func @transform_5(%arg0: i32) -> (i32, i32, i32) {
    %c0_i32 = arith.constant 0 : i32
    %c0_i32_0 = arith.constant 0 : i32
    %c0_i32_1 = arith.constant 0 : i32
    return %arg0, %c0_i32, %c0_i32_0 : i32, i32, i32
  }
  func.func @transform_6(%arg0: i32) -> (i32, i32, i32) {
    %c0_i32 = arith.constant 0 : i32
    %c0_i32_0 = arith.constant 0 : i32
    %c0_i32_1 = arith.constant 0 : i32
    return %arg0, %c0_i32, %c0_i32_0 : i32, i32, i32
  }
  func.func @transform_7(%arg0: i32) -> (i32, i32, i32) {
    %c0_i32 = arith.constant 0 : i32
    %c0_i32_0 = arith.constant 0 : i32
    %c0_i32_1 = arith.constant 0 : i32
    return %arg0, %c0_i32, %c0_i32_0 : i32, i32, i32
  }
}

</mosaic_0001>

<bundles_post_ra>
// kernel: zhugo_residual_conv_block.7
= control target key start
LH: loop header
LB: loop body
LE: loop exit
PB: predicated region body
PF: predicated region fallthrough
CT: control target
= control target key end

     0   :  { %s468_s9 = smov 0   ;;  %s593_s0 = inlined_call_operand.vmem [shape: f32[2,256,16], index: 0, kind: input, shape index: {}]   ;;  %s594_s1 = inlined_call_operand.vmem [shape: f32[2,1,16], index: 1, kind: output, shape index: {0}]   ;;  %s595_s2 = inlined_call_operand.vmem [shape: f32[2,1,16], index: 2, kind: output, shape index: {1}]  }
   0x1 LB: > { %s427_s10 = sadd.s32 4294967295, %s451_s9   ;;  %p431_p0 = scmp.ge.s32.totalorder %s451_s9, 1  ;;  %s451_s9 = sphi %s468_s9, %s13_s9  }
   0x2   : > { %p115_p1 = scmp.lt.s32.totalorder %s451_s9, 3 }
   0x4   : > { %p116_p2 = pnand %p431_p0, %p115_p1 }
   0x5   : > { %p138_p3 = scmp.lt.s32.totalorder (!%p116_p2), %s427_s10, 1  ;;  %vm181_vm0 = vcmask (!%p116_p2), 130048   ;;  %vm251_vm1 = vcmask (!%p116_p2), 122880  }
   0x6   : > { %119 = sbr.rel (%p116_p2) target bundleno = 98 (0x62), region = 24 }
   0xd   : > { %s597_s10 = smov (!%p138_p3, %s427_s10), 1 }
   0xe   : > { %s436_s11 = sshll.u32 %s597_s10, 8  ;;  %s145_s17 = scalar_lea.vmem %s594_s1, %s597_s10 }
   0xf   : > { %s482_s14 = scalar_lea.vmem %s593_s0, %s436_s11  ;;  %s148_s20 = scalar_lea.vmem %s595_s2, %s597_s10 }
  0x10   : > { %v149_v0 = vld [vmem:[%s482_s14] sm:$0xff]  ;;  %v150_v1 = vld [vmem:[%s482_s14 + $0x8] sm:$0xff]  ;;  %v151_v2 = vld [vmem:[%s482_s14 + $0x10] sm:$0xff] }
  0x11   : > { %v182_v3 = vsel %vm181_vm0, %v149_v0, 0.0  ;;  %v183_v4 = vsel %vm181_vm0, %v150_v1, 0.0  ;;  %v185_v5 = vsel %vm181_vm0, %v151_v2, 0.0  ;;  %v152_v6 = vld [vmem:[%s482_s14 + $0x18] sm:$0xff]  ;;  %v153_v9 = vld [vmem:[%s482_s14 + $0x20] sm:$0xff]  ;;  %v154_v12 = vld [vmem:[%s482_s14 + $0x28] sm:$0xff]  ;;  %v253_v27 = vmul.f32 %v149_v0, %v149_v0 }
  0x12   : > { %v184_v7 = vadd.f32 %v183_v4, %v182_v3  ;;  %v187_v8 = vsel %vm181_vm0, %v152_v6, 0.0  ;;  %v189_v11 = vsel %vm181_vm0, %v153_v9, 0.0  ;;  %v191_v14 = vsel %vm181_vm0, %v154_v12, 0.0  ;;  %v155_v15 = vld [vmem:[%s482_s14 + $0x30] sm:$0xff]  ;;  %v156_v18 = vld [vmem:[%s482_s14 + $0x38] sm:$0xff]  ;;  %v157_v21 = vld [vmem:[%s482_s14 + $0x40] sm:$0xff] }
  0x13   : > { %v193_v17 = vsel %vm181_vm0, %v155_v15, 0.0  ;;  %v195_v20 = vsel %vm181_vm0, %v156_v18, 0.0  ;;  %v197_v23 = vsel %vm181_vm0, %v157_v21, 0.0  ;;  %v158_v24 = vld [vmem:[%s482_s14 + $0x48] sm:$0xff]  ;;  %v254_v28 = vmul.f32 %v150_v1, %v150_v1  ;;  %v159_v30 = vld [vmem:[%s482_s14 + $0x50] sm:$0xff]  ;;  %v160_v32 = vld [vmem:[%s482_s14 + $0x58] sm:$0xff] }
  0x14   : > { %v186_v10 = vadd.f32 %v185_v5, %v184_v7  ;;  %v199_v26 = vsel %vm181_vm0, %v158_v24, 0.0  ;;  %v255_v29 = vmul.f32 %v151_v2, %v151_v2  ;;  %v201_v33 = vsel %vm181_vm0, %v159_v30, 0.0  ;;  %v161_v41 = vld [vmem:[%s482_s14 + $0x60] sm:$0xff]  ;;  %v162_v47 = vld [vmem:[%s482_s14 + $0x68] sm:$0xff]  ;;  %v163_v53 = vld [vmem:[%s482_s14 + $0x70] sm:$0xff] }
  0x15   : > { %v256_v34 = vmul.f32 %v152_v6, %v152_v6  ;;  %v203_v36 = vsel %vm181_vm0, %v160_v32, 0.0  ;;  %v257_v37 = vmul.f32 %v153_v9, %v153_v9  ;;  %v285_v38 = vsel %vm181_vm0, %v253_v27, 0.0  ;;  %v164_v59 = vld [vmem:[%s482_s14 + $0x78] sm:$0xff]  ;;  %v165_v1 = vld [vmem:[%s482_s14 + $0x80] sm:$0xff]  ;;  %v166_v7 = vld [vmem:[%s482_s14 + $0x88] sm:$0xff] }
  0x16   : > { %v188_v13 = vadd.f32 %v187_v8, %v186_v10  ;;  %v286_v39 = vsel %vm181_vm0, %v254_v28, 0.0  ;;  %v288_v40 = vsel %vm181_vm0, %v255_v29, 0.0  ;;  %v205_v44 = vsel %vm181_vm0, %v161_v41, 0.0 }
  0x17   : > { %v287_v43 = vadd.f32 %v286_v39, %v285_v38  ;;  %v258_v45 = vmul.f32 %v154_v12, %v154_v12  ;;  %v290_v46 = vsel %vm181_vm0, %v256_v34, 0.0  ;;  %v207_v50 = vsel %vm181_vm0, %v162_v47, 0.0 }
  0x18   : > { %v190_v16 = vadd.f32 %v189_v11, %v188_v13  ;;  %v259_v51 = vmul.f32 %v155_v15, %v155_v15  ;;  %v292_v52 = vsel %vm181_vm0, %v257_v37, 0.0  ;;  %v209_v56 = vsel %vm181_vm0, %v163_v53, 0.0  ;;  %v167_v13 = vld [vmem:[%s482_s14 + $0x90] sm:$0xff] }
  0x19   : > { %v289_v49 = vadd.f32 %v288_v40, %v287_v43  ;;  %v260_v57 = vmul.f32 %v156_v18, %v156_v18  ;;  %v294_v58 = vsel %vm181_vm0, %v258_v45, 0.0  ;;  %v211_v62 = vsel %vm181_vm0, %v164_v59, 0.0  ;;  %v171_v37 = vld [vmem:[%s482_s14 + $0xb0] sm:$0xff]  ;;  %v172_v43 = vld [vmem:[%s482_s14 + $0xb8] sm:$0xff] }
  0x1a   : > { %v192_v19 = vadd.f32 %v191_v14, %v190_v16  ;;  %v261_v63 = vmul.f32 %v157_v21, %v157_v21  ;;  %v296_v0 = vsel %vm181_vm0, %v259_v51, 0.0  ;;  %v213_v4 = vsel %vm181_vm0, %v165_v1, 0.0 }
  0x1b   : > { %v291_v55 = vadd.f32 %v290_v46, %v289_v49  ;;  %v262_v5 = vmul.f32 %v158_v24, %v158_v24  ;;  %v298_v6 = vsel %vm181_vm0, %v260_v57, 0.0  ;;  %v215_v10 = vsel %vm181_vm0, %v166_v7, 0.0  ;;  %v173_v49 = vld [vmem:[%s482_s14 + $0xc0] sm:$0xff] }
  0x1c   : > { %v194_v22 = vadd.f32 %v193_v17, %v192_v19  ;;  %v263_v11 = vmul.f32 %v159_v30, %v159_v30  ;;  %v300_v12 = vsel %vm181_vm0, %v261_v63, 0.0  ;;  %v217_v16 = vsel %vm181_vm0, %v167_v13, 0.0  ;;  %v168_v19 = vld [vmem:[%s482_s14 + $0x98] sm:$0xff] }
  0x1d   : > { %v293_v61 = vadd.f32 %v292_v52, %v291_v55  ;;  %v264_v17 = vmul.f32 %v160_v32, %v160_v32  ;;  %v302_v18 = vsel %vm181_vm0, %v262_v5, 0.0  ;;  %v266_v29 = vmul.f32 %v162_v47, %v162_v47  ;;  %v174_v55 = vld [vmem:[%s482_s14 + $0xc8] sm:$0xff] }
  0x1e   : > { %v196_v25 = vadd.f32 %v195_v20, %v194_v22  ;;  %v219_v22 = vsel %vm181_vm0, %v168_v19, 0.0  ;;  %v304_v24 = vsel %vm181_vm0, %v263_v11, 0.0  ;;  %v225_v40 = vsel %vm181_vm0, %v171_v37, 0.0 }
  0x1f   : > { %v295_v3 = vadd.f32 %v294_v58, %v293_v61  ;;  %v306_v30 = vsel %vm181_vm0, %v264_v17, 0.0  ;;  %v227_v46 = vsel %vm181_vm0, %v172_v43, 0.0  ;;  %v269_v47 = vmul.f32 %v165_v1, %v165_v1  ;;  %v175_v61 = vld [vmem:[%s482_s14 + $0xd0] sm:$0xff] }
  0x20   : > { %v198_v31 = vadd.f32 %v197_v23, %v196_v25  ;;  %v265_v23 = vmul.f32 %v161_v41, %v161_v41  ;;  %v169_v25 = vld [vmem:[%s482_s14 + $0xa0] sm:$0xff]  ;;  %v268_v41 = vmul.f32 %v164_v59, %v164_v59  ;;  %v229_v52 = vsel %vm181_vm0, %v173_v49, 0.0 }
  0x21   : > { %v297_v9 = vadd.f32 %v296_v0, %v295_v3  ;;  %v221_v28 = vsel %vm181_vm0, %v169_v25, 0.0  ;;  %v231_v58 = vsel %vm181_vm0, %v174_v55, 0.0  ;;  %v271_v59 = vmul.f32 %v167_v13, %v167_v13  ;;  %v176_v3 = vld [vmem:[%s482_s14 + $0xd8] sm:$0xff] }
  0x22   : > { %v200_v35 = vadd.f32 %v199_v26, %v198_v31  ;;  %v170_v31 = vld [vmem:[%s482_s14 + $0xa8] sm:$0xff]  ;;  %v233_v0 = vsel %vm181_vm0, %v175_v61, 0.0  ;;  %v272_v1 = vmul.f32 %v168_v19, %v168_v19  ;;  %v275_v19 = vmul.f32 %v171_v37, %v171_v37 }
  0x23   : > { %v299_v15 = vadd.f32 %v298_v6, %v297_v9  ;;  %v223_v34 = vsel %vm181_vm0, %v170_v31, 0.0  ;;  %v235_v6 = vsel %vm181_vm0, %v176_v3, 0.0  ;;  %v177_v9 = vld [vmem:[%s482_s14 + $0xe0] sm:$0xff]  ;;  %v274_v13 = vmul.f32 %v170_v31, %v170_v31 }
  0x24   : > { %v202_v42 = vadd.f32 %v201_v33, %v200_v35  ;;  %v267_v35 = vmul.f32 %v163_v53, %v163_v53  ;;  %v270_v53 = vmul.f32 %v166_v7, %v166_v7  ;;  %v273_v7 = vmul.f32 %v169_v25, %v169_v25 }
  0x25   : > { %v301_v21 = vadd.f32 %v300_v12, %v299_v15  ;;  %v237_v12 = vsel %vm181_vm0, %v177_v9, 0.0  ;;  %v178_v15 = vld [vmem:[%s482_s14 + $0xe8] sm:$0xff]  ;;  %v276_v25 = vmul.f32 %v172_v43, %v172_v43  ;;  %v277_v31 = vmul.f32 %v173_v49, %v173_v49 }
  0x26   : > { %v204_v48 = vadd.f32 %v203_v36, %v202_v42  ;;  %v308_v36 = vsel %vm181_vm0, %v265_v23, 0.0  ;;  %v310_v42 = vsel %vm181_vm0, %v266_v29, 0.0  ;;  %v280_v43 = vmul.f32 %v176_v3, %v176_v3 }
  0x27   : > { %v303_v27 = vadd.f32 %v302_v18, %v301_v21  ;;  %v239_v18 = vsel %vm181_vm0, %v178_v15, 0.0  ;;  %v179_v21 = vld [vmem:[%s482_s14 + $0xf0] sm:$0xff] }
  0x28   : > { %v206_v54 = vadd.f32 %v205_v44, %v204_v48  ;;  %v312_v48 = vsel %vm181_vm0, %v267_v35, 0.0  ;;  %v278_v35 = vmul.f32 %v174_v55, %v174_v55  ;;  %v283_v55 = vmul.f32 %v179_v21, %v179_v21 }
  0x29   : > { %v305_v33 = vadd.f32 %v304_v24, %v303_v27  ;;  %v241_v24 = vsel %vm181_vm0, %v179_v21, 0.0  ;;  %v180_v27 = vld [vmem:[%s482_s14 + $0xf8] sm:$0xff] }
  0x2a   : > { %v208_v60 = vadd.f32 %v207_v50, %v206_v54  ;;  %v314_v54 = vsel %vm181_vm0, %v268_v41, 0.0 }
  0x2b   : > { %v307_v39 = vadd.f32 %v306_v30, %v305_v33  ;;  %v243_v30 = vsel %vm181_vm0, %v180_v27, 0.0 }
  0x2c   : > { %v210_v2 = vadd.f32 %v209_v56, %v208_v60  ;;  %v316_v60 = vsel %vm181_vm0, %v269_v47, 0.0  ;;  %v281_v47 = vmul.f32 %v177_v9, %v177_v9 }
  0x2d   : > { %v309_v45 = vadd.f32 %v308_v36, %v307_v39  ;;  %v330_v36 = vsel %vm181_vm0, %v276_v25, 0.0  ;;  %v279_v39 = vmul.f32 %v175_v61, %v175_v61 }
  0x2e   : > { %v212_v8 = vadd.f32 %v211_v62, %v210_v2  ;;  %v318_v2 = vsel %vm181_vm0, %v270_v53, 0.0 }
  0x2f   : > { %v311_v51 = vadd.f32 %v310_v42, %v309_v45 }
  0x30   : > { %v214_v14 = vadd.f32 %v213_v4, %v212_v8  ;;  %v320_v8 = vsel %vm181_vm0, %v271_v59, 0.0  ;;  %v284_v59 = vmul.f32 %v180_v27, %v180_v27 }
  0x31   : > { %v313_v57 = vadd.f32 %v312_v48, %v311_v51  ;;  %v336_v48 = vsel %vm181_vm0, %v279_v39, 0.0  ;;  %v282_v51 = vmul.f32 %v178_v15, %v178_v15 }
  0x32   : > { %v216_v20 = vadd.f32 %v215_v10, %v214_v14  ;;  %v322_v14 = vsel %vm181_vm0, %v272_v1, 0.0  ;;  %v346_v1 = vsel %vm181_vm0, %v284_v59, 0.0 }
  0x33   : > { %v315_v63 = vadd.f32 %v314_v54, %v313_v57 }
  0x34   : > { %v218_v26 = vadd.f32 %v217_v16, %v216_v20  ;;  %v324_v20 = vsel %vm181_vm0, %v273_v7, 0.0 }
  0x35   : > { %v317_v5 = vadd.f32 %v316_v60, %v315_v63  ;;  %v342_v60 = vsel %vm181_vm0, %v282_v51, 0.0  ;;  %v344_v63 = vsel %vm181_vm0, %v283_v55, 0.0 }
  0x36   : > { %v220_v32 = vadd.f32 %v219_v22, %v218_v26  ;;  %v326_v26 = vsel %vm181_vm0, %v274_v13, 0.0 }
  0x37   : > { %v319_v11 = vadd.f32 %v318_v2, %v317_v5 }
  0x38   : > { %v222_v38 = vadd.f32 %v221_v28, %v220_v32  ;;  %v328_v32 = vsel %vm181_vm0, %v275_v19, 0.0 }
  0x39   : > { %v321_v17 = vadd.f32 %v320_v8, %v319_v11 }
  0x3a   : > { %v224_v44 = vadd.f32 %v223_v34, %v222_v38 }
  0x3b   : > { %v323_v23 = vadd.f32 %v322_v14, %v321_v17 }
  0x3c   : > { %v226_v50 = vadd.f32 %v225_v40, %v224_v44  ;;  %v332_v40 = vsel %vm181_vm0, %v277_v31, 0.0  ;;  %v334_v44 = vsel %vm181_vm0, %v278_v35, 0.0 }
  0x3d   : > { %v325_v29 = vadd.f32 %v324_v20, %v323_v23 }
  0x3e   : > { %v228_v56 = vadd.f32 %v227_v46, %v226_v50 }
  0x3f   : > { %v327_v34 = vadd.f32 %v326_v26, %v325_v29 }
  0x40   : > { %v230_v62 = vadd.f32 %v229_v52, %v228_v56  ;;  %v338_v52 = vsel %vm181_vm0, %v280_v43, 0.0  ;;  %v340_v56 = vsel %vm181_vm0, %v281_v47, 0.0 }
  0x41   : > { %v329_v38 = vadd.f32 %v328_v32, %v327_v34 }
  0x42   : > { %v232_v4 = vadd.f32 %v231_v58, %v230_v62 }
  0x43   : > { %v331_v42 = vadd.f32 %v330_v36, %v329_v38 }
  0x44   : > { %v234_v10 = vadd.f32 %v233_v0, %v232_v4 }
  0x45   : > { %v333_v46 = vadd.f32 %v332_v40, %v331_v42 }
  0x46   : > { %v236_v16 = vadd.f32 %v235_v6, %v234_v10 }
  0x47   : > { %v335_v50 = vadd.f32 %v334_v44, %v333_v46 }
  0x48   : > { %v238_v22 = vadd.f32 %v237_v12, %v236_v16 }
  0x49   : > { %v337_v54 = vadd.f32 %v336_v48, %v335_v50 }
  0x4a   : > { %v240_v28 = vadd.f32 %v239_v18, %v238_v22 }
  0x4b   : > { %v339_v58 = vadd.f32 %v338_v52, %v337_v54 }
  0x4c   : > { %v242_v33 = vadd.f32 %v241_v24, %v240_v28 }
  0x4d   : > { %v341_v62 = vadd.f32 %v340_v56, %v339_v58 }
  0x4e   : > { %v244_v37 = vadd.f32 %v243_v30, %v242_v33 }
  0x4f   : > { %v343_v0 = vadd.f32 %v342_v60, %v341_v62 }
  0x50   : > { %v245_v41 = vrot.slane %v244_v37, 4 }
  0x51   : > { %v345_v2 = vadd.f32 %v344_v63, %v343_v0 }
  0x52   : > { %v246_v45 = vadd.f32 %v245_v41, %v244_v37 }
  0x53   : > { %v347_v3 = vadd.f32 %v346_v1, %v345_v2 }
  0x54   : > { %v247_v49 = vrot.slane %v246_v45, 2 }
  0x55   : > { %v348_v4 = vrot.slane %v347_v3, 4 }
  0x56   : > { %v248_v53 = vadd.f32 %v247_v49, %v246_v45 }
  0x57   : > { %v349_v5 = vadd.f32 %v348_v4, %v347_v3 }
  0x58   : > { %v249_v57 = vrot.slane %v248_v53, 1 }
  0x59   : > { %v350_v6 = vrot.slane %v349_v5, 2 }
  0x5a   : > { %v250_v61 = vadd.f32 %v249_v57, %v248_v53 }
  0x5b   : > { %v351_v7 = vadd.f32 %v350_v6, %v349_v5 }
  0x5c   : > { %252 = vst.msk [vmem:[%s145_s17] sm:$0x1] %vm251_vm1, %v250_v61 }
  0x5d   : > { %v352_v8 = vrot.slane %v351_v7, 1 }
  0x5f   : > { %v353_v9 = vadd.f32 %v352_v8, %v351_v7 }
  0x61   : > { %354 = vst.msk [vmem:[%s148_s20] sm:$0x1] %vm251_vm1, %v353_v9 }
  0x62 PF: > { %s13_s9 = sadd.s32 1, %s451_s9  }
  0x63   : > { %p10_p4 = scmp.ge.s32.totalorder %s13_s9, 4  }
  0x65   :  { %12 = sbr.rel (!%p10_p4) target bundleno = 1 (0x1), region = 66 }

// kernel: zhugo_residual_conv_block.8
= control target key start
LH: loop header
LB: loop body
LE: loop exit
PB: predicated region body
PF: predicated region fallthrough
CT: control target
= control target key end

     0   :  { %s1158_s21 = smov 0   ;;  %s1448_s0 = inlined_call_operand.vmem [shape: f32[1,16], index: 0, kind: input, shape index: {}]   ;;  %s1449_s1 = inlined_call_operand.vmem [shape: f32[1,16], index: 1, kind: input, shape index: {}]   ;;  %s1450_s2 = inlined_call_operand.vmem [shape: f32[2,256,16], index: 2, kind: input, shape index: {}]   ;;  %s1451_s3 = inlined_call_operand.vmem [shape: bf16[16,8], index: 3, kind: input, shape index: {}]   ;;  %s1452_s4 = inlined_call_operand.vmem [shape: f32[2,256,8], index: 4, kind: output, shape index: {0}]   ;;  %s1453_s5 = inlined_call_operand.vmem [shape: f32[2,1,8], index: 5, kind: output, shape index: {1}]   ;;  %s1454_s6 = inlined_call_operand.vmem [shape: f32[2,1,8], index: 6, kind: output, shape index: {2}]  }
   0x1 LB: > { %s1021_s22 = sadd.s32 4294967295, %s1121_s21   ;;  %p1025_p0 = scmp.ge.s32.totalorder %s1121_s21, 1  ;;  %s1121_s21 = sphi %s1158_s21, %s17_s21  }
   0x2   : > { %p217_p1 = scmp.lt.s32.totalorder %s1121_s21, 3 }
   0x4   : > { %p218_p2 = pnand %p1025_p0, %p217_p1 }
   0x5   : > { %v1114_v0 = vld [vmem:[%s1451_s3] sm:$0xff] (!%p218_p2)   ;;  %p253_p3 = scmp.lt.s32.totalorder (!%p218_p2), %s1021_s22, 1  ;;  %vm500_vm0 = vcmask (!%p218_p2), 130048  }
   0x6   : > { %221 = sbr.rel (%p218_p2) target bundleno = 320 (0x140), region = 36  ;;  %1070 = vmatprep.subr.bf16.mxu0 (!%p218_p2), %v1114_v0  ;;  %1104 = vmatprep.subr.bf16.mxu1 (!%p218_p2), %v1114_v0  ;;  %v1175_v1 = vld [vmem:[%s1448_s0] ss:$0 sm:$0xff] (!%p218_p2) }
   0x7   : > { %1071 = vmatpush3.bf16.msra.mxu0 (!%p218_p2), %v1114_v0  ;;  %1105 = vmatpush3.bf16.msra.mxu1 (!%p218_p2), %v1114_v0  ;;  %v1187_v2 = vld [vmem:[%s1449_s1] ss:$0 sm:$0xff] (!%p218_p2) }
   0xd   : > { %s1456_s22 = smov (!%p253_p3, %s1021_s22), 1 }
   0xe   : > { %s1051_s25 = sshll.u32 %s1456_s22, 8  ;;  %s265_s14 = scalar_lea.vmem %s1453_s5, %s1456_s22 }
   0xf   : > { %s1182_s30 = scalar_lea.vmem %s1450_s2, %s1051_s25  ;;  %s1307_s11 = scalar_lea.vmem %s1452_s4, %s1051_s25 }
  0x10   : > { %v270_v3 = vld [vmem:[%s1182_s30] sm:$0xff]  ;;  %v271_v4 = vld [vmem:[%s1182_s30 + $0x8] sm:$0xff]  ;;  %v272_v5 = vld [vmem:[%s1182_s30 + $0x10] sm:$0xff]  ;;  %s268_s17 = scalar_lea.vmem %s1454_s6, %s1456_s22 }
  0x11   : > { %v309_v6 = vmul.f32 %v1175_v1, %v270_v3  ;;  %v310_v7 = vmul.f32 %v1175_v1, %v271_v4  ;;  %v273_v8 = vld [vmem:[%s1182_s30 + $0x18] sm:$0xff]  ;;  %v311_v9 = vmul.f32 %v1175_v1, %v272_v5  ;;  %v274_v10 = vld [vmem:[%s1182_s30 + $0x20] sm:$0xff]  ;;  %v275_v11 = vld [vmem:[%s1182_s30 + $0x28] sm:$0xff] }
  0x12   : > { %v312_v12 = vmul.f32 %v1175_v1, %v273_v8  ;;  %v313_v13 = vmul.f32 %v1175_v1, %v274_v10  ;;  %v314_v14 = vmul.f32 %v1175_v1, %v275_v11  ;;  %v276_v15 = vld [vmem:[%s1182_s30 + $0x30] sm:$0xff]  ;;  %v277_v16 = vld [vmem:[%s1182_s30 + $0x38] sm:$0xff]  ;;  %v278_v31 = vld [vmem:[%s1182_s30 + $0x40] sm:$0xff] }
  0x13   : > { %v348_v17 = vadd.f32 %v1187_v2, %v309_v6  ;;  %v349_v18 = vadd.f32 %v1187_v2, %v310_v7  ;;  %v350_v19 = vadd.f32 %v1187_v2, %v311_v9  ;;  %v315_v20 = vmul.f32 %v1175_v1, %v276_v15  ;;  %v279_v32 = vld [vmem:[%s1182_s30 + $0x48] sm:$0xff]  ;;  %v280_v33 = vld [vmem:[%s1182_s30 + $0x50] sm:$0xff]  ;;  %v281_v45 = vld [vmem:[%s1182_s30 + $0x58] sm:$0xff] }
  0x14   : > { %v351_v21 = vadd.f32 %v1187_v2, %v312_v12  ;;  %v352_v22 = vadd.f32 %v1187_v2, %v313_v13  ;;  %v353_v23 = vadd.f32 %v1187_v2, %v314_v14  ;;  %v316_v24 = vmul.f32 %v1175_v1, %v277_v16  ;;  %v282_v47 = vld [vmem:[%s1182_s30 + $0x60] sm:$0xff]  ;;  %v283_v57 = vld [vmem:[%s1182_s30 + $0x68] sm:$0xff]  ;;  %v284_v61 = vld [vmem:[%s1182_s30 + $0x70] sm:$0xff] }
  0x15   : > { %vm380_vm1 = vcmp.gt.f32.partialorder %v348_v17, 0.0  ;;  %vm381_vm2 = vcmp.gt.f32.partialorder %v349_v18, 0.0  ;;  %v412_v25 = vmul.f32 0.01, %v348_v17  ;;  %v413_v26 = vmul.f32 0.01, %v349_v18 }
  0x16   : > { %vm382_vm3 = vcmp.gt.f32.partialorder %v350_v19, 0.0  ;;  %vm383_vm4 = vcmp.gt.f32.partialorder %v351_v21, 0.0  ;;  %v414_v27 = vmul.f32 0.01, %v350_v19  ;;  %v415_v28 = vmul.f32 0.01, %v351_v21 }
  0x17   : > { %v444_v29 = vsel %vm380_vm1, %v348_v17, %v412_v25  ;;  %v445_v30 = vsel %vm381_vm2, %v349_v18, %v413_v26  ;;  %vm384_vm5 = vcmp.gt.f32.partialorder %v352_v22, 0.0  ;;  %vm385_vm6 = vcmp.gt.f32.partialorder %v353_v23, 0.0  ;;  %v285_v7 = vld [vmem:[%s1182_s30 + $0x78] sm:$0xff]  ;;  %v286_v11 = vld [vmem:[%s1182_s30 + $0x80] sm:$0xff] }
  0x18   : > { %v476_v34 = vpack.c.bf16 %v445_v30, %v444_v29  ;;  %v446_v35 = vsel %vm382_vm3, %v350_v19, %v414_v27  ;;  %v447_v36 = vsel %vm383_vm4, %v351_v21, %v415_v28  ;;  %v416_v37 = vmul.f32 0.01, %v352_v22  ;;  %v287_v19 = vld [vmem:[%s1182_s30 + $0x88] sm:$0xff]  ;;  %v289_v27 = vld [vmem:[%s1182_s30 + $0x98] sm:$0xff] }
  0x19   : > { %v477_v38 = vpack.c.bf16 %v447_v36, %v446_v35  ;;  %v417_v39 = vmul.f32 0.01, %v353_v23  ;;  %v354_v40 = vadd.f32 %v1187_v2, %v315_v20  ;;  %v355_v41 = vadd.f32 %v1187_v2, %v316_v24  ;;  %v288_v20 = vld [vmem:[%s1182_s30 + $0x90] sm:$0xff] }
  0x1a   : > { %1072 = vmatprep.mubr.msk.bf16.mxu0 %vm500_vm0, %v476_v34  ;;  %v448_v42 = vsel %vm384_vm5, %v352_v22, %v416_v37  ;;  %v317_v43 = vmul.f32 %v1175_v1, %v278_v31  ;;  %v318_v44 = vmul.f32 %v1175_v1, %v279_v32  ;;  %v319_v46 = vmul.f32 %v1175_v1, %v280_v33  ;;  %v290_v32 = vld [vmem:[%s1182_s30 + $0xa0] sm:$0xff]  ;;  %v291_v33 = vld [vmem:[%s1182_s30 + $0xa8] sm:$0xff] }
  0x1b   : > { %1073 = vmatmul.mubr.msk.bf16.vlgmr.msra.gmra.mrb[0].mxu0 %vm500_vm0, %v477_v38  ;;  %v449_v48 = vsel %vm385_vm6, %v353_v23, %v417_v39  ;;  %vm386_vm7 = vcmp.gt.f32.partialorder %v354_v40, 0.0  ;;  %vm387_vm8 = vcmp.gt.f32.partialorder %v355_v41, 0.0  ;;  %v418_v49 = vmul.f32 0.01, %v354_v40 }
  0x1c   : > { %v478_v50 = vpack.c.bf16 %v449_v48, %v448_v42  ;;  %v419_v51 = vmul.f32 0.01, %v355_v41  ;;  %v356_v52 = vadd.f32 %v1187_v2, %v317_v43  ;;  %v357_v53 = vadd.f32 %v1187_v2, %v318_v44  ;;  %v292_v44 = vld [vmem:[%s1182_s30 + $0xb0] sm:$0xff] }
  0x1d   : > { %v450_v54 = vsel %vm386_vm7, %v354_v40, %v418_v49  ;;  %v320_v55 = vmul.f32 %v1175_v1, %v281_v45  ;;  %v358_v56 = vadd.f32 %v1187_v2, %v319_v46  ;;  %v321_v58 = vmul.f32 %v1175_v1, %v282_v47  ;;  %v293_v45 = vld [vmem:[%s1182_s30 + $0xb8] sm:$0xff] }
  0x1e   : > { %1076 = vmatprep.mubr.msk.bf16.mxu0 %vm500_vm0, %v478_v50  ;;  %v451_v59 = vsel %vm387_vm8, %v355_v41, %v419_v51  ;;  %vm388_vm9 = vcmp.gt.f32.partialorder %v356_v52, 0.0  ;;  %vm389_vm10 = vcmp.gt.f32.partialorder %v357_v53, 0.0  ;;  %v420_v60 = vmul.f32 0.01, %v356_v52 }
  0x1f   : > { %v479_v62 = vpack.c.bf16 %v451_v59, %v450_v54  ;;  %v421_v63 = vmul.f32 0.01, %v357_v53  ;;  %v359_v0 = vadd.f32 %v1187_v2, %v320_v55  ;;  %vm390_vm11 = vcmp.gt.f32.partialorder %v358_v56, 0.0 }
  0x20   : > { %v452_v3 = vsel %vm388_vm9, %v356_v52, %v420_v60  ;;  %v422_v4 = vmul.f32 0.01, %v358_v56  ;;  %v322_v5 = vmul.f32 %v1175_v1, %v283_v57  ;;  %v360_v6 = vadd.f32 %v1187_v2, %v321_v58  ;;  %v295_v60 = vld [vmem:[%s1182_s30 + $0xc8] sm:$0xff] }
  0x21   : > { %v453_v8 = vsel %vm389_vm10, %v357_v53, %v421_v63  ;;  %vm391_vm12 = vcmp.gt.f32.partialorder %v359_v0, 0.0  ;;  %v423_v9 = vmul.f32 0.01, %v359_v0  ;;  %v323_v10 = vmul.f32 %v1175_v1, %v284_v61 }
  0x22   : > { %v480_v12 = vpack.c.bf16 %v453_v8, %v452_v3  ;;  %v454_v13 = vsel %vm390_vm11, %v358_v56, %v422_v4  ;;  %v361_v14 = vadd.f32 %v1187_v2, %v322_v5  ;;  %vm392_vm13 = vcmp.gt.f32.partialorder %v360_v6, 0.0  ;;  %v294_v56 = vld [vmem:[%s1182_s30 + $0xc0] sm:$0xff]  ;;  %v296_v5 = vld [vmem:[%s1182_s30 + $0xd0] sm:$0xff] }
  0x23   : > { %1077 = vmatmul.mubr.msk.bf16.gmra.mrb[4].mxu0 %vm500_vm0, %v479_v62  ;;  %v455_v15 = vsel %vm391_vm12, %v359_v0, %v423_v9  ;;  %v424_v16 = vmul.f32 0.01, %v360_v6  ;;  %v324_v17 = vmul.f32 %v1175_v1, %v285_v7  ;;  %v362_v18 = vadd.f32 %v1187_v2, %v323_v10  ;;  %v297_v10 = vld [vmem:[%s1182_s30 + $0xd8] sm:$0xff] }
  0x24   : > { %1080 = vmatprep.mubr.msk.bf16.mxu0 %vm500_vm0, %v480_v12  ;;  %v481_v21 = vpack.c.bf16 %v455_v15, %v454_v13  ;;  %vm393_vm14 = vcmp.gt.f32.partialorder %v361_v14, 0.0  ;;  %v425_v22 = vmul.f32 0.01, %v361_v14  ;;  %v325_v23 = vmul.f32 %v1175_v1, %v286_v11  ;;  %v298_v11 = vld [vmem:[%s1182_s30 + $0xe0] sm:$0xff] }
  0x25   : > { %v456_v24 = vsel %vm392_vm13, %v360_v6, %v424_v16  ;;  %v363_v25 = vadd.f32 %v1187_v2, %v324_v17  ;;  %vm394_vm15 = vcmp.gt.f32.partialorder %v362_v18, 0.0  ;;  %v426_v26 = vmul.f32 0.01, %v362_v18 }
  0x26   : > { %v457_v28 = vsel %vm393_vm14, %v361_v14, %v425_v22  ;;  %v326_v29 = vmul.f32 %v1175_v1, %v287_v19  ;;  %v364_v30 = vadd.f32 %v1187_v2, %v325_v23  ;;  %v327_v31 = vmul.f32 %v1175_v1, %v288_v20  ;;  %v299_v20 = vld [vmem:[%s1182_s30 + $0xe8] sm:$0xff] }
  0x27   : > { %v482_v34 = vpack.c.bf16 %v457_v28, %v456_v24  ;;  %vm395_vm1 = vcmp.gt.f32.partialorder %v363_v25, 0.0  ;;  %v427_v35 = vmul.f32 0.01, %v363_v25  ;;  %v458_v36 = vsel %vm394_vm15, %v362_v18, %v426_v26  ;;  %v300_v24 = vld [vmem:[%s1182_s30 + $0xf0] sm:$0xff] }
  0x28   : > { %v365_v37 = vadd.f32 %v1187_v2, %v326_v29  ;;  %vm396_vm2 = vcmp.gt.f32.partialorder %v364_v30, 0.0  ;;  %v428_v38 = vmul.f32 0.01, %v364_v30  ;;  %v328_v39 = vmul.f32 %v1175_v1, %v289_v27 }
  0x29   : > { %v459_v40 = vsel %vm395_vm1, %v363_v25, %v427_v35  ;;  %v366_v41 = vadd.f32 %v1187_v2, %v327_v31  ;;  %v329_v42 = vmul.f32 %v1175_v1, %v290_v32  ;;  %v330_v43 = vmul.f32 %v1175_v1, %v291_v33  ;;  %v301_v32 = vld [vmem:[%s1182_s30 + $0xf8] sm:$0xff] }
  0x2a   : > { %v483_v46 = vpack.c.bf16 %v459_v40, %v458_v36  ;;  %vm397_vm3 = vcmp.gt.f32.partialorder %v365_v37, 0.0  ;;  %v429_v47 = vmul.f32 0.01, %v365_v37  ;;  %v460_v48 = vsel %vm396_vm2, %v364_v30, %v428_v38 }
  0x2b   : > { %1081 = vmatmul.mubr.msk.bf16.gmra.mrb[8].mxu0 %vm500_vm0, %v481_v21  ;;  %v367_v49 = vadd.f32 %v1187_v2, %v328_v39  ;;  %vm398_vm4 = vcmp.gt.f32.partialorder %v366_v41, 0.0  ;;  %v430_v50 = vmul.f32 0.01, %v366_v41  ;;  %v368_v51 = vadd.f32 %v1187_v2, %v329_v42 }
  0x2c   : > { %1084 = vmatprep.mubr.msk.bf16.mxu0 %vm500_vm0, %v482_v34  ;;  %v461_v52 = vsel %vm397_vm3, %v365_v37, %v429_v47  ;;  %v369_v53 = vadd.f32 %v1187_v2, %v330_v43  ;;  %v331_v54 = vmul.f32 %v1175_v1, %v292_v44  ;;  %v332_v55 = vmul.f32 %v1175_v1, %v293_v45 }
  0x2d   : > { %v484_v57 = vpack.c.bf16 %v461_v52, %v460_v48  ;;  %vm399_vm5 = vcmp.gt.f32.partialorder %v367_v49, 0.0  ;;  %v431_v58 = vmul.f32 0.01, %v367_v49  ;;  %v462_v59 = vsel %vm398_vm4, %v366_v41, %v430_v50 }
  0x2e   : > { %vm400_vm6 = vcmp.gt.f32.partialorder %v368_v51, 0.0  ;;  %vm401_vm7 = vcmp.gt.f32.partialorder %v369_v53, 0.0  ;;  %v432_v61 = vmul.f32 0.01, %v368_v51  ;;  %v433_v62 = vmul.f32 0.01, %v369_v53 }
  0x2f   : > { %1088 = vmatprep.mubr.msk.bf16.mxu1 %vm500_vm0, %v484_v57  ;;  %v463_v63 = vsel %vm399_vm5, %v367_v49, %v431_v58  ;;  %v370_v0 = vadd.f32 %v1187_v2, %v331_v54  ;;  %v371_v3 = vadd.f32 %v1187_v2, %v332_v55  ;;  %v333_v4 = vmul.f32 %v1175_v1, %v294_v56 }
  0x30   : > { %v485_v6 = vpack.c.bf16 %v463_v63, %v462_v59  ;;  %v464_v7 = vsel %vm400_vm6, %v368_v51, %v432_v61  ;;  %v465_v8 = vsel %vm401_vm7, %v369_v53, %v433_v62  ;;  %v334_v9 = vmul.f32 %v1175_v1, %v295_v60 }
  0x31   : > { %v486_v12 = vpack.c.bf16 %v465_v8, %v464_v7  ;;  %vm402_vm8 = vcmp.gt.f32.partialorder %v370_v0, 0.0  ;;  %vm403_vm9 = vcmp.gt.f32.partialorder %v371_v3, 0.0  ;;  %v434_v13 = vmul.f32 0.01, %v370_v0 }
  0x32   : > { %1089 = vmatmul.mubr.msk.bf16.vlgmr.msra.gmra.mrb[0].mxu1 %vm500_vm0, %v485_v6  ;;  %v435_v14 = vmul.f32 0.01, %v371_v3  ;;  %v372_v15 = vadd.f32 %v1187_v2, %v333_v4  ;;  %v373_v16 = vadd.f32 %v1187_v2, %v334_v9  ;;  %v335_v17 = vmul.f32 %v1175_v1, %v296_v5 }
  0x33   : > { %1085 = vmatmul.mubr.msk.bf16.gmra.mrb[12].mxu0 %vm500_vm0, %v483_v46  ;;  %1092 = vmatprep.mubr.msk.bf16.mxu1 %vm500_vm0, %v486_v12  ;;  %v466_v18 = vsel %vm402_vm8, %v370_v0, %v434_v13  ;;  %v336_v19 = vmul.f32 %v1175_v1, %v297_v10  ;;  %v337_v21 = vmul.f32 %v1175_v1, %v298_v11  ;;  %vm710_vm3 = vcmask 64512  }
  0x34   : > { %v467_v22 = vsel %vm403_vm9, %v371_v3, %v435_v14  ;;  %vm404_vm10 = vcmp.gt.f32.partialorder %v372_v15, 0.0  ;;  %vm405_vm11 = vcmp.gt.f32.partialorder %v373_v16, 0.0  ;;  %v436_v23 = vmul.f32 0.01, %v372_v15 }
  0x35   : > { %v437_v25 = vmul.f32 0.01, %v373_v16  ;;  %v374_v26 = vadd.f32 %v1187_v2, %v335_v17  ;;  %v375_v27 = vadd.f32 %v1187_v2, %v336_v19  ;;  %v487_v28 = vpack.c.bf16 %v467_v22, %v466_v18 }
  0x36   : > { %v468_v29 = vsel %vm404_vm10, %v372_v15, %v436_v23  ;;  %v338_v30 = vmul.f32 %v1175_v1, %v299_v20  ;;  %v376_v31 = vadd.f32 %v1187_v2, %v337_v21  ;;  %v339_v35 = vmul.f32 %v1175_v1, %v300_v24 }
  0x37   : > { %v469_v33 = vsel %vm405_vm11, %v373_v16, %v437_v25  ;;  %vm406_vm12 = vcmp.gt.f32.partialorder %v374_v26, 0.0  ;;  %v438_v34 = vmul.f32 0.01, %v374_v26  ;;  %vm407_vm13 = vcmp.gt.f32.partialorder %v375_v27, 0.0 }
  0x38   : > { %v488_v36 = vpack.c.bf16 %v469_v33, %v468_v29  ;;  %v439_v37 = vmul.f32 0.01, %v375_v27  ;;  %v377_v38 = vadd.f32 %v1187_v2, %v338_v30  ;;  %vm408_vm14 = vcmp.gt.f32.partialorder %v376_v31, 0.0 }
  0x39   : > { %v440_v39 = vmul.f32 0.01, %v376_v31  ;;  %v340_v40 = vmul.f32 %v1175_v1, %v301_v32  ;;  %v470_v42 = vsel %vm406_vm12, %v374_v26, %v438_v34  ;;  %v378_v44 = vadd.f32 %v1187_v2, %v339_v35 }
  0x3a   : > { %1093 = vmatmul.mubr.msk.bf16.gmra.mrb[4].mxu1 %vm500_vm0, %v487_v28  ;;  %vm409_vm15 = vcmp.gt.f32.partialorder %v377_v38, 0.0  ;;  %v441_v41 = vmul.f32 0.01, %v377_v38  ;;  %v471_v43 = vsel %vm407_vm13, %v375_v27, %v439_v37 }
  0x3b   : > { %1096 = vmatprep.mubr.msk.bf16.mxu1 %vm500_vm0, %v488_v36  ;;  %v379_v45 = vadd.f32 %v1187_v2, %v340_v40  ;;  %v472_v46 = vsel %vm408_vm14, %v376_v31, %v440_v39  ;;  %v489_v48 = vpack.c.bf16 %v471_v43, %v470_v42  ;;  %v442_v50 = vmul.f32 0.01, %v378_v44 }
  0x3c   : > { %v473_v47 = vsel %vm409_vm15, %v377_v38, %v441_v41  ;;  %vm410_vm1 = vcmp.gt.f32.partialorder %v378_v44, 0.0 }
  0x3d   : > { %v490_v49 = vpack.c.bf16 %v473_v47, %v472_v46  ;;  %v443_v51 = vmul.f32 0.01, %v379_v45  ;;  %vm411_vm2 = vcmp.gt.f32.partialorder %v379_v45, 0.0  ;;  %v474_v1 = vsel %vm410_vm1, %v378_v44, %v442_v50 }
  0x3f   : > { %v475_v52 = vsel %vm411_vm2, %v379_v45, %v443_v51 }
  0x40   : > { %v491_v53 = vpack.c.bf16 %v475_v52, %v474_v1 }
  0x42   : > { %1097 = vmatmul.mubr.msk.bf16.gmra.mrb[8].mxu1 %vm500_vm0, %v489_v48 }
  0x43   : > { %1100 = vmatprep.mubr.msk.bf16.mxu1 %vm500_vm0, %v490_v49 }
  0x4a   : > { %1101 = vmatmul.mubr.msk.bf16.gmra.mrb[12].mxu1 %vm500_vm0, %v491_v53  ;;  %vm812_vm0 = vcmask 57344  }
  0xee   : > { %v1074_v2 = vpop.f32.mrb[0].mxu0 }
  0xef   : > { %713 = vst.msk [vmem:[%s1307_s11 + $0x10] sm:$0xff] %vm710_vm3, %v1074_v2  ;;  %v583_v54 = vpop.f32.mrb[1].mxu0  ;;  %v816_v58 = vmul.f32 %v1074_v2, %v1074_v2  ;;  %v746_v63 = vsel %vm710_vm3, %v1074_v2, 0.0 }
  0xf0   : > { %711 = vst.msk [vmem:[%s1307_s11] sm:$0xff] %vm710_vm3, %v583_v54  ;;  %v814_v55 = vmul.f32 %v583_v54, %v583_v54  ;;  %v1075_v56 = vpop.f32.mrb[2].mxu0  ;;  %v743_v59 = vsel %vm710_vm3, %v583_v54, 0.0 }
  0xf1   : > { %714 = vst.msk [vmem:[%s1307_s11 + $0x18] sm:$0xff] %vm710_vm3, %v1075_v56  ;;  %v586_v57 = vpop.f32.mrb[3].mxu0  ;;  %v817_v3 = vmul.f32 %v1075_v56, %v1075_v56  ;;  %v849_v7 = vsel %vm710_vm3, %v816_v58, 0.0  ;;  %v748_v8 = vsel %vm710_vm3, %v1075_v56, 0.0 }
  0xf2   : > { %712 = vst.msk [vmem:[%s1307_s11 + $0x8] sm:$0xff] %vm710_vm3, %v586_v57  ;;  %v744_v60 = vsel %vm710_vm3, %v586_v57, 0.0  ;;  %v815_v61 = vmul.f32 %v586_v57, %v586_v57  ;;  %v846_v0 = vsel %vm710_vm3, %v814_v55, 0.0 }
  0xf3   : > { %v745_v62 = vadd.f32 %v744_v60, %v743_v59  ;;  %v851_v13 = vsel %vm710_vm3, %v817_v3, 0.0 }
  0xf4   : > { %v847_v4 = vsel %vm710_vm3, %v815_v61, 0.0 }
  0xf5   : > { %v747_v5 = vadd.f32 %v746_v63, %v745_v62  ;;  %v848_v6 = vadd.f32 %v847_v4, %v846_v0 }
  0xf6   : > { %v1078_v9 = vpop.f32.mrb[4].mxu0 }
  0xf7   : > { %v850_v10 = vadd.f32 %v849_v7, %v848_v6  ;;  %717 = vst.msk [vmem:[%s1307_s11 + $0x30] sm:$0xff] %vm710_vm3, %v1078_v9  ;;  %v599_v11 = vpop.f32.mrb[5].mxu0  ;;  %v749_v12 = vadd.f32 %v748_v8, %v747_v5  ;;  %v820_v20 = vmul.f32 %v1078_v9, %v1078_v9  ;;  %v754_v26 = vsel %vm710_vm3, %v1078_v9, 0.0 }
  0xf8   : > { %715 = vst.msk [vmem:[%s1307_s11 + $0x20] sm:$0xff] %vm710_vm3, %v599_v11  ;;  %v750_v14 = vsel %vm710_vm3, %v599_v11, 0.0  ;;  %v818_v15 = vmul.f32 %v599_v11, %v599_v11  ;;  %v1079_v16 = vpop.f32.mrb[6].mxu0 }
  0xf9   : > { %v751_v17 = vadd.f32 %v750_v14, %v749_v12  ;;  %v852_v18 = vadd.f32 %v851_v13, %v850_v10  ;;  %718 = vst.msk [vmem:[%s1307_s11 + $0x38] sm:$0xff] %vm710_vm3, %v1079_v16  ;;  %v602_v19 = vpop.f32.mrb[7].mxu0  ;;  %v821_v27 = vmul.f32 %v1079_v16, %v1079_v16  ;;  %v857_v31 = vsel %vm710_vm3, %v820_v20, 0.0 }
  0xfa   : > { %v853_v21 = vsel %vm710_vm3, %v818_v15, 0.0  ;;  %716 = vst.msk [vmem:[%s1307_s11 + $0x28] sm:$0xff] %vm710_vm3, %v602_v19  ;;  %v752_v22 = vsel %vm710_vm3, %v602_v19, 0.0  ;;  %v819_v23 = vmul.f32 %v602_v19, %v602_v19  ;;  %v756_v32 = vsel %vm710_vm3, %v1079_v16, 0.0 }
  0xfb   : > { %v854_v24 = vadd.f32 %v853_v21, %v852_v18  ;;  %v753_v25 = vadd.f32 %v752_v22, %v751_v17  ;;  %v859_v37 = vsel %vm710_vm3, %v821_v27, 0.0 }
  0xfc   : > { %v855_v28 = vsel %vm710_vm3, %v819_v23, 0.0 }
  0xfd   : > { %v755_v29 = vadd.f32 %v754_v26, %v753_v25  ;;  %v856_v30 = vadd.f32 %v855_v28, %v854_v24 }
  0xfe   : > { %v1082_v33 = vpop.f32.mrb[8].mxu0 }
  0xff   : > { %v858_v34 = vadd.f32 %v857_v31, %v856_v30  ;;  %721 = vst.msk [vmem:[%s1307_s11 + $0x50] sm:$0xff] %vm710_vm3, %v1082_v33  ;;  %v615_v35 = vpop.f32.mrb[9].mxu0  ;;  %v757_v36 = vadd.f32 %v756_v32, %v755_v29  ;;  %v824_v44 = vmul.f32 %v1082_v33, %v1082_v33  ;;  %v762_v50 = vsel %vm710_vm3, %v1082_v33, 0.0 }
 0x100   : > { %719 = vst.msk [vmem:[%s1307_s11 + $0x40] sm:$0xff] %vm710_vm3, %v615_v35  ;;  %v758_v38 = vsel %vm710_vm3, %v615_v35, 0.0  ;;  %v822_v39 = vmul.f32 %v615_v35, %v615_v35  ;;  %v1083_v40 = vpop.f32.mrb[10].mxu0 }
 0x101   : > { %v759_v41 = vadd.f32 %v758_v38, %v757_v36  ;;  %v860_v42 = vadd.f32 %v859_v37, %v858_v34  ;;  %722 = vst.msk [vmem:[%s1307_s11 + $0x58] sm:$0xff] %vm710_vm3, %v1083_v40  ;;  %v618_v43 = vpop.f32.mrb[11].mxu0  ;;  %v825_v51 = vmul.f32 %v1083_v40, %v1083_v40  ;;  %v865_v54 = vsel %vm710_vm3, %v824_v44, 0.0 }
 0x102   : > { %v861_v45 = vsel %vm710_vm3, %v822_v39, 0.0  ;;  %720 = vst.msk [vmem:[%s1307_s11 + $0x48] sm:$0xff] %vm710_vm3, %v618_v43  ;;  %v760_v46 = vsel %vm710_vm3, %v618_v43, 0.0  ;;  %v823_v47 = vmul.f32 %v618_v43, %v618_v43  ;;  %v764_v55 = vsel %vm710_vm3, %v1083_v40, 0.0 }
 0x103   : > { %v862_v48 = vadd.f32 %v861_v45, %v860_v42  ;;  %v761_v49 = vadd.f32 %v760_v46, %v759_v41  ;;  %v867_v62 = vsel %vm710_vm3, %v825_v51, 0.0 }
 0x104   : > { %v863_v1 = vsel %vm710_vm3, %v823_v47, 0.0 }
 0x105   : > { %v763_v52 = vadd.f32 %v762_v50, %v761_v49  ;;  %v864_v53 = vadd.f32 %v863_v1, %v862_v48  ;;  %v1090_v2 = vpop.f32.mrb[0].mxu1 }
 0x106   : > { %v1086_v56 = vpop.f32.mrb[12].mxu0  ;;  %729 = vst.msk [vmem:[%s1307_s11 + $0x90] sm:$0xff] %vm710_vm3, %v1090_v2  ;;  %v647_v57 = vpop.f32.mrb[1].mxu1  ;;  %v832_v34 = vmul.f32 %v1090_v2, %v1090_v2  ;;  %v778_v38 = vsel %vm710_vm3, %v1090_v2, 0.0 }
 0x107   : > { %v866_v58 = vadd.f32 %v865_v54, %v864_v53  ;;  %725 = vst.msk [vmem:[%s1307_s11 + $0x70] sm:$0xff] %vm710_vm3, %v1086_v56  ;;  %v631_v59 = vpop.f32.mrb[13].mxu0  ;;  %v765_v60 = vadd.f32 %v764_v55, %v763_v52  ;;  %727 = vst.msk [vmem:[%s1307_s11 + $0x80] sm:$0xff] %vm710_vm3, %v647_v57  ;;  %v1091_v61 = vpop.f32.mrb[2].mxu1  ;;  %v828_v8 = vmul.f32 %v1086_v56, %v1086_v56  ;;  %v770_v14 = vsel %vm710_vm3, %v1086_v56, 0.0 }
 0x108   : > { %723 = vst.msk [vmem:[%s1307_s11 + $0x60] sm:$0xff] %vm710_vm3, %v631_v59  ;;  %v766_v63 = vsel %vm710_vm3, %v631_v59, 0.0  ;;  %v826_v0 = vmul.f32 %v631_v59, %v631_v59  ;;  %v1087_v3 = vpop.f32.mrb[14].mxu0  ;;  %730 = vst.msk [vmem:[%s1307_s11 + $0x98] sm:$0xff] %vm710_vm3, %v1091_v61  ;;  %v650_v4 = vpop.f32.mrb[3].mxu1  ;;  %v830_v17 = vmul.f32 %v647_v57, %v647_v57  ;;  %v774_v23 = vsel %vm710_vm3, %v647_v57, 0.0 }
 0x109   : > { %v767_v5 = vadd.f32 %v766_v63, %v765_v60  ;;  %v868_v6 = vadd.f32 %v867_v62, %v866_v58  ;;  %726 = vst.msk [vmem:[%s1307_s11 + $0x78] sm:$0xff] %vm710_vm3, %v1087_v3  ;;  %v634_v7 = vpop.f32.mrb[15].mxu0  ;;  %728 = vst.msk [vmem:[%s1307_s11 + $0x88] sm:$0xff] %vm710_vm3, %v650_v4  ;;  %v829_v15 = vmul.f32 %v1087_v3, %v1087_v3  ;;  %v873_v21 = vsel %vm710_vm3, %v828_v8, 0.0 }
 0x10a   : > { %v869_v9 = vsel %vm710_vm3, %v826_v0, 0.0  ;;  %724 = vst.msk [vmem:[%s1307_s11 + $0x68] sm:$0xff] %vm710_vm3, %v634_v7  ;;  %v768_v10 = vsel %vm710_vm3, %v634_v7, 0.0  ;;  %v827_v11 = vmul.f32 %v634_v7, %v634_v7  ;;  %v772_v22 = vsel %vm710_vm3, %v1087_v3, 0.0 }
 0x10b   : > { %v870_v12 = vadd.f32 %v869_v9, %v868_v6  ;;  %v769_v13 = vadd.f32 %v768_v10, %v767_v5  ;;  %v875_v28 = vsel %vm710_vm3, %v829_v15, 0.0  ;;  %v877_v29 = vsel %vm710_vm3, %v830_v17, 0.0 }
 0x10c   : > { %v871_v16 = vsel %vm710_vm3, %v827_v11, 0.0  ;;  %v831_v30 = vmul.f32 %v650_v4, %v650_v4  ;;  %v776_v35 = vsel %vm710_vm3, %v650_v4, 0.0  ;;  %v833_v39 = vmul.f32 %v1091_v61, %v1091_v61 }
 0x10d   : > { %v771_v18 = vadd.f32 %v770_v14, %v769_v13  ;;  %v872_v19 = vadd.f32 %v871_v16, %v870_v12  ;;  %v1094_v20 = vpop.f32.mrb[4].mxu1  ;;  %v881_v45 = vsel %vm710_vm3, %v832_v34, 0.0  ;;  %v780_v46 = vsel %vm710_vm3, %v1091_v61, 0.0 }
 0x10e   : > { %733 = vst.msk [vmem:[%s1307_s11 + $0xb0] sm:$0xff] %vm710_vm3, %v1094_v20  ;;  %v663_v24 = vpop.f32.mrb[5].mxu1  ;;  %v879_v40 = vsel %vm710_vm3, %v831_v30, 0.0  ;;  %v883_v1 = vsel %vm710_vm3, %v833_v39, 0.0  ;;  %v836_v56 = vmul.f32 %v1094_v20, %v1094_v20  ;;  %v786_v60 = vsel %vm710_vm3, %v1094_v20, 0.0 }
 0x10f   : > { %v874_v25 = vadd.f32 %v873_v21, %v872_v19  ;;  %v773_v26 = vadd.f32 %v772_v22, %v771_v18  ;;  %731 = vst.msk [vmem:[%s1307_s11 + $0xa0] sm:$0xff] %vm710_vm3, %v663_v24  ;;  %v1095_v27 = vpop.f32.mrb[6].mxu1  ;;  %v834_v41 = vmul.f32 %v663_v24, %v663_v24  ;;  %v782_v47 = vsel %vm710_vm3, %v663_v24, 0.0 }
 0x110   : > { %734 = vst.msk [vmem:[%s1307_s11 + $0xb8] sm:$0xff] %vm710_vm3, %v1095_v27  ;;  %v666_v31 = vpop.f32.mrb[7].mxu1  ;;  %v837_v61 = vmul.f32 %v1095_v27, %v1095_v27  ;;  %v889_v5 = vsel %vm710_vm3, %v836_v56, 0.0  ;;  %v788_v6 = vsel %vm710_vm3, %v1095_v27, 0.0 }
 0x111   : > { %v775_v32 = vadd.f32 %v774_v23, %v773_v26  ;;  %v876_v33 = vadd.f32 %v875_v28, %v874_v25  ;;  %732 = vst.msk [vmem:[%s1307_s11 + $0xa8] sm:$0xff] %vm710_vm3, %v666_v31  ;;  %v885_v52 = vsel %vm710_vm3, %v834_v41, 0.0  ;;  %v835_v53 = vmul.f32 %v666_v31, %v666_v31 }
 0x112   : > { %v784_v57 = vsel %vm710_vm3, %v666_v31, 0.0  ;;  %v891_v12 = vsel %vm710_vm3, %v837_v61, 0.0 }
 0x113   : > { %v878_v36 = vadd.f32 %v877_v29, %v876_v33  ;;  %v777_v37 = vadd.f32 %v776_v35, %v775_v32  ;;  %v887_v62 = vsel %vm710_vm3, %v835_v53, 0.0 }
 0x115   : > { %v779_v42 = vadd.f32 %v778_v38, %v777_v37  ;;  %v880_v43 = vadd.f32 %v879_v40, %v878_v36  ;;  %v1098_v44 = vpop.f32.mrb[8].mxu1 }
 0x116   : > { %737 = vst.msk [vmem:[%s1307_s11 + $0xd0] sm:$0xff] %vm710_vm3, %v1098_v44  ;;  %v679_v48 = vpop.f32.mrb[9].mxu1  ;;  %v840_v19 = vmul.f32 %v1098_v44, %v1098_v44  ;;  %v794_v24 = vsel %vm710_vm3, %v1098_v44, 0.0 }
 0x117   : > { %v882_v49 = vadd.f32 %v881_v45, %v880_v43  ;;  %v781_v50 = vadd.f32 %v780_v46, %v779_v42  ;;  %735 = vst.msk [vmem:[%s1307_s11 + $0xc0] sm:$0xff] %vm710_vm3, %v679_v48  ;;  %v1099_v51 = vpop.f32.mrb[10].mxu1  ;;  %v838_v63 = vmul.f32 %v679_v48, %v679_v48  ;;  %v790_v7 = vsel %vm710_vm3, %v679_v48, 0.0 }
 0x118   : > { %738 = vst.msk [vmem:[%s1307_s11 + $0xd8] sm:$0xff] %vm710_vm3, %v1099_v51  ;;  %v682_v2 = vpop.f32.mrb[11].mxu1  ;;  %v841_v25 = vmul.f32 %v1099_v51, %v1099_v51  ;;  %v897_v30 = vsel %vm710_vm3, %v840_v19, 0.0  ;;  %v796_v31 = vsel %vm710_vm3, %v1099_v51, 0.0 }
 0x119   : > { %v783_v54 = vadd.f32 %v782_v47, %v781_v50  ;;  %v884_v55 = vadd.f32 %v883_v1, %v882_v49  ;;  %736 = vst.msk [vmem:[%s1307_s11 + $0xc8] sm:$0xff] %vm710_vm3, %v682_v2  ;;  %v893_v13 = vsel %vm710_vm3, %v838_v63, 0.0  ;;  %v839_v14 = vmul.f32 %v682_v2, %v682_v2 }
 0x11a   : > { %v792_v20 = vsel %vm710_vm3, %v682_v2, 0.0  ;;  %v899_v35 = vsel %vm710_vm3, %v841_v25, 0.0 }
 0x11b   : > { %v886_v58 = vadd.f32 %v885_v52, %v884_v55  ;;  %v785_v59 = vadd.f32 %v784_v57, %v783_v54  ;;  %v895_v26 = vsel %vm710_vm3, %v839_v14, 0.0 }
 0x11d   : > { %v787_v0 = vadd.f32 %v786_v60, %v785_v59  ;;  %v888_v3 = vadd.f32 %v887_v62, %v886_v58  ;;  %v1102_v4 = vpop.f32.mrb[12].mxu1 }
 0x11e   : > { %741 = vst.msk [vmem:[%s1307_s11 + $0xf0] sm:$0xff] %vm710_vm3, %v1102_v4  ;;  %v695_v8 = vpop.f32.mrb[13].mxu1  ;;  %v844_v40 = vmul.f32 %v1102_v4, %v1102_v4  ;;  %v802_v44 = vsel %vm710_vm3, %v1102_v4, 0.0 }
 0x11f   : > { %v890_v9 = vadd.f32 %v889_v5, %v888_v3  ;;  %v789_v10 = vadd.f32 %v788_v6, %v787_v0  ;;  %739 = vst.msk [vmem:[%s1307_s11 + $0xe0] sm:$0xff] %vm710_vm3, %v695_v8  ;;  %v1103_v11 = vpop.f32.mrb[14].mxu1  ;;  %v842_v27 = vmul.f32 %v695_v8, %v695_v8  ;;  %v798_v32 = vsel %vm710_vm3, %v695_v8, 0.0 }
 0x120   : > { %742 = vst.msk [vmem:[%s1307_s11 + $0xf8] sm:$0xff] %vm710_vm3, %v1103_v11  ;;  %v845_v15 = vmul.f32 %v1103_v11, %v1103_v11  ;;  %v698_v16 = vpop.f32.mrb[15].mxu1  ;;  %v905_v48 = vsel %vm710_vm3, %v844_v40, 0.0  ;;  %v804_v49 = vsel %vm710_vm3, %v1103_v11, 0.0 }
 0x121   : > { %v791_v17 = vadd.f32 %v790_v7, %v789_v10  ;;  %v892_v18 = vadd.f32 %v891_v12, %v890_v9  ;;  %740 = vst.msk [vmem:[%s1307_s11 + $0xe8] sm:$0xff] %vm710_vm3, %v698_v16  ;;  %v901_v36 = vsel %vm710_vm3, %v842_v27, 0.0  ;;  %v843_v37 = vmul.f32 %v698_v16, %v698_v16 }
 0x122   : > { %v907_v21 = vsel %vm710_vm3, %v845_v15, 0.0  ;;  %v800_v41 = vsel %vm710_vm3, %v698_v16, 0.0 }
 0x123   : > { %v894_v22 = vadd.f32 %v893_v13, %v892_v18  ;;  %v793_v23 = vadd.f32 %v792_v20, %v791_v17  ;;  %v903_v45 = vsel %vm710_vm3, %v843_v37, 0.0 }
 0x125   : > { %v795_v28 = vadd.f32 %v794_v24, %v793_v23  ;;  %v896_v29 = vadd.f32 %v895_v26, %v894_v22 }
 0x127   : > { %v898_v33 = vadd.f32 %v897_v30, %v896_v29  ;;  %v797_v34 = vadd.f32 %v796_v31, %v795_v28 }
 0x129   : > { %v799_v38 = vadd.f32 %v798_v32, %v797_v34  ;;  %v900_v39 = vadd.f32 %v899_v35, %v898_v33 }
 0x12b   : > { %v902_v42 = vadd.f32 %v901_v36, %v900_v39  ;;  %v801_v43 = vadd.f32 %v800_v41, %v799_v38 }
 0x12d   : > { %v803_v46 = vadd.f32 %v802_v44, %v801_v43  ;;  %v904_v47 = vadd.f32 %v903_v45, %v902_v42 }
 0x12f   : > { %v805_v50 = vadd.f32 %v804_v49, %v803_v46  ;;  %v906_v51 = vadd.f32 %v905_v48, %v904_v47 }
 0x131   : > { %v806_v1 = vrot.slane %v805_v50, 4  ;;  %v908_v52 = vadd.f32 %v907_v21, %v906_v51 }
 0x133   : > { %v807_v53 = vadd.f32 %v806_v1, %v805_v50  ;;  %v909_v2 = vrot.slane %v908_v52, 4 }
 0x135   : > { %v808_v54 = vrot.slane %v807_v53, 2  ;;  %v910_v55 = vadd.f32 %v909_v2, %v908_v52 }
 0x137   : > { %v809_v56 = vadd.f32 %v808_v54, %v807_v53  ;;  %v911_v57 = vrot.slane %v910_v55, 2 }
 0x139   : > { %v810_v58 = vrot.slane %v809_v56, 1  ;;  %v912_v59 = vadd.f32 %v911_v57, %v910_v55 }
 0x13b   : > { %v811_v60 = vadd.f32 %v810_v58, %v809_v56  ;;  %v913_v61 = vrot.slane %v912_v59, 1 }
 0x13d   : > { %813 = vst.msk [vmem:[%s265_s14] sm:$0x1] %vm812_vm0, %v811_v60  ;;  %v914_v62 = vadd.f32 %v913_v61, %v912_v59 }
 0x13f   : > { %915 = vst.msk [vmem:[%s268_s17] sm:$0x1] %vm812_vm0, %v914_v62 }
 0x140 PF: > { %s17_s21 = sadd.s32 1, %s1121_s21  }
 0x141   : > { %p14_p4 = scmp.ge.s32.totalorder %s17_s21, 4  }
 0x143   :  { %16 = sbr.rel (!%p14_p4) target bundleno = 1 (0x1), region = 90 }

// kernel: zhugo_residual_conv_block.13
= control target key start
LH: loop header
LB: loop body
LE: loop exit
PB: predicated region body
PF: predicated region fallthrough
CT: control target
= control target key end

     0   :  { %13 = vsyncpa [#allocation3], 0  ;;  %s1957_s0 = inlined_call_operand.vmem [shape: f32[1,8], index: 0, kind: input, shape index: {}]   ;;  %s1958_s1 = inlined_call_operand.vmem [shape: f32[1,8], index: 1, kind: input, shape index: {}]   ;;  %s1959_s2 = inlined_call_operand.vmem [shape: f32[2,256,8], index: 2, kind: input, shape index: {}]   ;;  %s1960_s3 = inlined_call_operand.vmem [shape: bf16[8,16], index: 3, kind: input, shape index: {}]   ;;  %s1961_s4 = inlined_call_operand.vmem [shape: f32[2,256,16], index: 4, kind: input, shape index: {}, may-alias: {4,5}]   ;;  %s1962_s5 = inlined_call_operand.vmem [shape: f32[2,256,16], index: 5, kind: output, shape index: {0}, may-alias: {4,5}]   ;;  %s1963_s6 = inlined_call_operand.hbm [shape: f32[2,1,16], index: 6, kind: output, shape index: {1}]   ;;  %s1964_s7 = inlined_call_operand.hbm [shape: f32[2,1,16], index: 7, kind: output, shape index: {2}]  }
   0x1   :  { %15 = vsyncpa [#allocation3 + $0x1], 0 }
   0x2   :  { %16 = vsyncpa [#allocation5], 0 }
   0x3   :  { %18 = vsyncpa [#allocation5 + $0x1], 0  ;;  %s1424_s24 = smov 0   ;;  %s1426_s25 = smov 0  }
   0x4   :  { %s1428_s26 = smov 0   ;;  %s1430_s27 = smov 0  }
   0x5 LB: > { %s1445_s28 = sadd.s32 4294967295, %s1380_s27   ;;  %s1152_s29 = sadd.s32 4294967294, %s1380_s27   ;;  %s1380_s27 = sphi %s1430_s27, %s1970_s27   ;;  %s1376_s26 = sphi %s1428_s26, %s1969_s26   ;;  %s1372_s25 = sphi %s1426_s25, %s1968_s25   ;;  %s1368_s24 = sphi %s1424_s24, %s1967_s24  }
   0x6   : > { %s1449_s30 = sadd.s32 1, %s1380_s27   ;;  %s172_s8 = sadd.s32 1, %s1376_s26 }
   0x7   : > { %s169_s9 = ssub.s32 %s1380_s27, %s1449_s30  ;;  %p182_p0 = scmp.ne.s32.totalorder %s1376_s26, %s1372_s25 }
   0x8   : > { %p170_p1 = scmp.eq.s32.totalorder %s169_s9, 0  ;;  %p183_p2 = scmp.eq.s32.totalorder %s1445_s28, 1 }
   0x9   : > { %p188_p3 = scmp.ne.s32.totalorder %s1372_s25, %s1368_s24  ;;  %p189_p4 = scmp.eq.s32.totalorder %s1152_s29, 1 }
   0xa   : > { %s1460_s10 = scalar_select %p170_p1, %s1376_s26, %s172_s8  }
   0xb   : > { %p1462_p5 = por %p183_p2, %p182_p0  ;;  %p1466_p6 = por %p189_p4, %p188_p3 }
   0xc   : > { %p1155_p7 = scmp.ge.s32.totalorder %s1380_s27, 1  ;;  %p258_p8 = scmp.lt.s32.totalorder %s1380_s27, 3 }
   0xe   : > { %p259_p9 = pnand %p1155_p7, %p258_p8 }
   0xf   : > { %v541_v0 = vld [vmem:[%s1960_s3] sm:$0xf] (!%p259_p9)  ;;  %vm623_vm0 = vcmask (!%p259_p9), 1043456   ;;  %p303_p10 = scmp.lt.s32.totalorder (!%p259_p9), %s1445_s28, 1  ;;  %vm574_vm1 = vcmask (!%p259_p9), 64512   ;;  %s1180_s17 = sshll.u32 (!%p259_p9), %s1445_s28, 4 }
  0x10   : > { %262 = sbr.rel (%p259_p9) target bundleno = 367 (0x16f), region = 40  ;;  %1240 = vmatprep.subr.msk.bf16.mxu0 (!%p259_p9), %vm623_vm0, %v541_v0  ;;  %v625_v1 = vsel (!%p259_p9), %vm623_vm0, %v541_v0, 0  ;;  %1241 = vmatprep.subr.msk.bf16.mxu1 (!%p259_p9), %vm623_vm0, %v541_v0  ;;  %v1482_v2 = vld [vmem:[%s1957_s0] ss:$0 sm:$0xff] (!%p259_p9)  ;;  %s1881_s29 = scalar_lea.hbm (!%p259_p9), %s1963_s6, %s1180_s17 }
  0x11   : > { %1205 = vmatpush3.bf16.msra.mxu0 (!%p259_p9), %v625_v1  ;;  %1239 = vmatpush3.bf16.msra.mxu1 (!%p259_p9), %v625_v1  ;;  %v1493_v3 = vld [vmem:[%s1958_s1] ss:$0 sm:$0xff] (!%p259_p9) }
  0x17   : > { %s304_s15 = scalar_select %p303_p10, %s1445_s28, 1 }
  0x19   : > { %s1477_s16 = sshll.u32 %s304_s15, 8 }
  0x1a   : > { %s1488_s21 = scalar_lea.vmem %s1959_s2, %s1477_s16  ;;  %s1612_s9 = scalar_lea.vmem %s1961_s4, %s1477_s16 }
  0x1b   : > { %v319_v4 = vld [vmem:[%s1488_s21] sm:$0xff]  ;;  %v320_v5 = vld [vmem:[%s1488_s21 + $0x8] sm:$0xff]  ;;  %v321_v6 = vld [vmem:[%s1488_s21 + $0x10] sm:$0xff]  ;;  %s1693_s15 = scalar_lea.vmem %s1962_s5, %s1477_s16  ;;  %s1871_s16 = sand.u32 1, %s1372_s25  }
  0x1c   : > { %v358_v7 = vmul.f32 %v1482_v2, %v319_v4  ;;  %v359_v8 = vmul.f32 %v1482_v2, %v320_v5  ;;  %v322_v9 = vld [vmem:[%s1488_s21 + $0x18] sm:$0xff]  ;;  %v360_v10 = vmul.f32 %v1482_v2, %v321_v6  ;;  %v323_v11 = vld [vmem:[%s1488_s21 + $0x20] sm:$0xff]  ;;  %v324_v12 = vld [vmem:[%s1488_s21 + $0x28] sm:$0xff]  ;;  %s296_s18 = scalar_lea.vmem [#allocation2], %s1871_s16  ;;  %s302_s20 = scalar_lea.vmem [#allocation4], %s1871_s16 }
  0x1d   : > { %v361_v13 = vmul.f32 %v1482_v2, %v322_v9  ;;  %v362_v14 = vmul.f32 %v1482_v2, %v323_v11  ;;  %v363_v15 = vmul.f32 %v1482_v2, %v324_v12  ;;  %v325_v16 = vld [vmem:[%s1488_s21 + $0x30] sm:$0xff]  ;;  %v326_v17 = vld [vmem:[%s1488_s21 + $0x38] sm:$0xff]  ;;  %v327_v32 = vld [vmem:[%s1488_s21 + $0x40] sm:$0xff]  ;;  %s1019_s19 = sshll.u32 %s296_s18, 4  ;;  %s1000_s13 = scalar_lea.sflag [#allocation3], %s1871_s16  ;;  %s1883_s19 = int_to_ptr.vmem [resolvable:$true] %s1019_s19 }
  0x1e   : > { %v397_v18 = vadd.f32 %v1493_v3, %v358_v7  ;;  %v398_v19 = vadd.f32 %v1493_v3, %v359_v8  ;;  %v399_v20 = vadd.f32 %v1493_v3, %v360_v10  ;;  %v364_v21 = vmul.f32 %v1482_v2, %v325_v16  ;;  %v328_v33 = vld [vmem:[%s1488_s21 + $0x48] sm:$0xff]  ;;  %v329_v34 = vld [vmem:[%s1488_s21 + $0x50] sm:$0xff]  ;;  %v330_v46 = vld [vmem:[%s1488_s21 + $0x58] sm:$0xff]  ;;  %s1286_s14 = scalar_lea.vmem %s1883_s19, 16 }
  0x1f   : > { %v400_v22 = vadd.f32 %v1493_v3, %v361_v13  ;;  %v401_v23 = vadd.f32 %v1493_v3, %v362_v14  ;;  %v402_v24 = vadd.f32 %v1493_v3, %v363_v15  ;;  %v365_v25 = vmul.f32 %v1482_v2, %v326_v17  ;;  %v331_v48 = vld [vmem:[%s1488_s21 + $0x60] sm:$0xff]  ;;  %v332_v58 = vld [vmem:[%s1488_s21 + $0x68] sm:$0xff]  ;;  %v333_v62 = vld [vmem:[%s1488_s21 + $0x70] sm:$0xff]  ;;  %p1287_p11 = scmp.ne.s32.totalorder %s1883_s19, %s1286_s14 }
  0x20   : > { %vm429_vm2 = vcmp.gt.f32.partialorder %v397_v18, 0.0  ;;  %vm430_vm3 = vcmp.gt.f32.partialorder %v398_v19, 0.0  ;;  %v461_v26 = vmul.f32 0.01, %v397_v18  ;;  %v462_v27 = vmul.f32 0.01, %v398_v19 }
  0x21   : > { %vm431_vm4 = vcmp.gt.f32.partialorder %v399_v20, 0.0  ;;  %vm432_vm5 = vcmp.gt.f32.partialorder %v400_v22, 0.0  ;;  %v463_v28 = vmul.f32 0.01, %v399_v20  ;;  %v464_v29 = vmul.f32 0.01, %v400_v22  ;;  %p1288_p12 = pnand %p1287_p11, %p1462_p5 }
  0x22   : > { %v493_v30 = vsel %vm429_vm2, %v397_v18, %v461_v26  ;;  %v494_v31 = vsel %vm430_vm3, %v398_v19, %v462_v27  ;;  %vm433_vm6 = vcmp.gt.f32.partialorder %v401_v23, 0.0  ;;  %vm434_vm7 = vcmp.gt.f32.partialorder %v402_v24, 0.0  ;;  %v334_v8 = vld [vmem:[%s1488_s21 + $0x78] sm:$0xff]  ;;  %v335_v12 = vld [vmem:[%s1488_s21 + $0x80] sm:$0xff] }
  0x23   : > { %v525_v35 = vpack.c.bf16 %v494_v31, %v493_v30  ;;  %v495_v36 = vsel %vm431_vm4, %v399_v20, %v463_v28  ;;  %v496_v37 = vsel %vm432_vm5, %v400_v22, %v464_v29  ;;  %v465_v38 = vmul.f32 0.01, %v401_v23  ;;  %v336_v20 = vld [vmem:[%s1488_s21 + $0x88] sm:$0xff]  ;;  %v338_v28 = vld [vmem:[%s1488_s21 + $0x98] sm:$0xff]  ;;  %p1289_p13 = pneg %p1288_p12 }
  0x24   : > { %v526_v39 = vpack.c.bf16 %v496_v37, %v495_v36  ;;  %v466_v40 = vmul.f32 0.01, %v402_v24  ;;  %v403_v41 = vadd.f32 %v1493_v3, %v364_v21  ;;  %v404_v42 = vadd.f32 %v1493_v3, %v365_v25  ;;  %v337_v21 = vld [vmem:[%s1488_s21 + $0x90] sm:$0xff] }
  0x25   : > { %1206 = vmatprep.mubr.msk.bf16.mxu0 %vm574_vm1, %v525_v35  ;;  %v497_v43 = vsel %vm433_vm6, %v401_v23, %v465_v38  ;;  %v366_v44 = vmul.f32 %v1482_v2, %v327_v32  ;;  %v367_v45 = vmul.f32 %v1482_v2, %v328_v33  ;;  %v368_v47 = vmul.f32 %v1482_v2, %v329_v34  ;;  %v339_v33 = vld [vmem:[%s1488_s21 + $0xa0] sm:$0xff]  ;;  %v340_v34 = vld [vmem:[%s1488_s21 + $0xa8] sm:$0xff] }
  0x26   : > { %1207 = vmatmul.mubr.msk.bf16.vlgmr.msra.gmra.mrb[0].mxu0 %vm574_vm1, %v526_v39  ;;  %v498_v49 = vsel %vm434_vm7, %v402_v24, %v466_v40  ;;  %vm435_vm8 = vcmp.gt.f32.partialorder %v403_v41, 0.0  ;;  %vm436_vm9 = vcmp.gt.f32.partialorder %v404_v42, 0.0  ;;  %v467_v50 = vmul.f32 0.01, %v403_v41 }
  0x27   : > { %v527_v51 = vpack.c.bf16 %v498_v49, %v497_v43  ;;  %v468_v52 = vmul.f32 0.01, %v404_v42  ;;  %v405_v53 = vadd.f32 %v1493_v3, %v366_v44  ;;  %v406_v54 = vadd.f32 %v1493_v3, %v367_v45  ;;  %v341_v45 = vld [vmem:[%s1488_s21 + $0xb0] sm:$0xff] }
  0x28   : > { %v499_v55 = vsel %vm435_vm8, %v403_v41, %v467_v50  ;;  %v369_v56 = vmul.f32 %v1482_v2, %v330_v46  ;;  %v407_v57 = vadd.f32 %v1493_v3, %v368_v47  ;;  %v370_v59 = vmul.f32 %v1482_v2, %v331_v48  ;;  %v342_v46 = vld [vmem:[%s1488_s21 + $0xb8] sm:$0xff] }
  0x29   : > { %1210 = vmatprep.mubr.msk.bf16.mxu0 %vm574_vm1, %v527_v51  ;;  %v500_v60 = vsel %vm436_vm9, %v404_v42, %v468_v52  ;;  %vm437_vm10 = vcmp.gt.f32.partialorder %v405_v53, 0.0  ;;  %vm438_vm11 = vcmp.gt.f32.partialorder %v406_v54, 0.0  ;;  %v469_v61 = vmul.f32 0.01, %v405_v53 }
  0x2a   : > { %v528_v63 = vpack.c.bf16 %v500_v60, %v499_v55  ;;  %v470_v0 = vmul.f32 0.01, %v406_v54  ;;  %v408_v1 = vadd.f32 %v1493_v3, %v369_v56  ;;  %vm439_vm12 = vcmp.gt.f32.partialorder %v407_v57, 0.0 }
  0x2b   : > { %v501_v4 = vsel %vm437_vm10, %v405_v53, %v469_v61  ;;  %v471_v5 = vmul.f32 0.01, %v407_v57  ;;  %v371_v6 = vmul.f32 %v1482_v2, %v332_v58  ;;  %v409_v7 = vadd.f32 %v1493_v3, %v370_v59  ;;  %v344_v61 = vld [vmem:[%s1488_s21 + $0xc8] sm:$0xff] }
  0x2c   : > { %v502_v9 = vsel %vm438_vm11, %v406_v54, %v470_v0  ;;  %vm440_vm13 = vcmp.gt.f32.partialorder %v408_v1, 0.0  ;;  %v472_v10 = vmul.f32 0.01, %v408_v1  ;;  %v372_v11 = vmul.f32 %v1482_v2, %v333_v62 }
  0x2d   : > { %v529_v13 = vpack.c.bf16 %v502_v9, %v501_v4  ;;  %v503_v14 = vsel %vm439_vm12, %v407_v57, %v471_v5  ;;  %v410_v15 = vadd.f32 %v1493_v3, %v371_v6  ;;  %vm441_vm14 = vcmp.gt.f32.partialorder %v409_v7, 0.0  ;;  %v343_v57 = vld [vmem:[%s1488_s21 + $0xc0] sm:$0xff]  ;;  %v345_v6 = vld [vmem:[%s1488_s21 + $0xd0] sm:$0xff] }
  0x2e   : > { %1211 = vmatmul.mubr.msk.bf16.gmra.mrb[4].mxu0 %vm574_vm1, %v528_v63  ;;  %v504_v16 = vsel %vm440_vm13, %v408_v1, %v472_v10  ;;  %v473_v17 = vmul.f32 0.01, %v409_v7  ;;  %v373_v18 = vmul.f32 %v1482_v2, %v334_v8  ;;  %v411_v19 = vadd.f32 %v1493_v3, %v372_v11  ;;  %v346_v11 = vld [vmem:[%s1488_s21 + $0xd8] sm:$0xff] }
  0x2f   : > { %1214 = vmatprep.mubr.msk.bf16.mxu0 %vm574_vm1, %v529_v13  ;;  %v530_v22 = vpack.c.bf16 %v504_v16, %v503_v14  ;;  %vm442_vm15 = vcmp.gt.f32.partialorder %v410_v15, 0.0  ;;  %v474_v23 = vmul.f32 0.01, %v410_v15  ;;  %v374_v24 = vmul.f32 %v1482_v2, %v335_v12  ;;  %v347_v12 = vld [vmem:[%s1488_s21 + $0xe0] sm:$0xff] }
  0x30   : > { %v505_v25 = vsel %vm441_vm14, %v409_v7, %v473_v17  ;;  %v412_v26 = vadd.f32 %v1493_v3, %v373_v18  ;;  %vm443_vm0 = vcmp.gt.f32.partialorder %v411_v19, 0.0  ;;  %v475_v27 = vmul.f32 0.01, %v411_v19 }
  0x31   : > { %v506_v29 = vsel %vm442_vm15, %v410_v15, %v474_v23  ;;  %v375_v30 = vmul.f32 %v1482_v2, %v336_v20  ;;  %v413_v31 = vadd.f32 %v1493_v3, %v374_v24  ;;  %v376_v32 = vmul.f32 %v1482_v2, %v337_v21  ;;  %v348_v21 = vld [vmem:[%s1488_s21 + $0xe8] sm:$0xff] }
  0x32   : > { %v531_v35 = vpack.c.bf16 %v506_v29, %v505_v25  ;;  %vm444_vm2 = vcmp.gt.f32.partialorder %v412_v26, 0.0  ;;  %v476_v36 = vmul.f32 0.01, %v412_v26  ;;  %v507_v37 = vsel %vm443_vm0, %v411_v19, %v475_v27  ;;  %v349_v25 = vld [vmem:[%s1488_s21 + $0xf0] sm:$0xff] }
  0x33   : > { %v414_v38 = vadd.f32 %v1493_v3, %v375_v30  ;;  %vm445_vm3 = vcmp.gt.f32.partialorder %v413_v31, 0.0  ;;  %v477_v39 = vmul.f32 0.01, %v413_v31  ;;  %v377_v40 = vmul.f32 %v1482_v2, %v338_v28 }
  0x34   : > { %v508_v41 = vsel %vm444_vm2, %v412_v26, %v476_v36  ;;  %v415_v42 = vadd.f32 %v1493_v3, %v376_v32  ;;  %v378_v43 = vmul.f32 %v1482_v2, %v339_v33  ;;  %v379_v44 = vmul.f32 %v1482_v2, %v340_v34  ;;  %v350_v33 = vld [vmem:[%s1488_s21 + $0xf8] sm:$0xff]  ;;  %s1032_s21 = sshll.u32 %s302_s20, 4  ;;  %s1891_s21 = int_to_ptr.vmem [resolvable:$true] %s1032_s21 }
  0x35   : > { %v532_v47 = vpack.c.bf16 %v508_v41, %v507_v37  ;;  %vm446_vm4 = vcmp.gt.f32.partialorder %v414_v38, 0.0  ;;  %v478_v48 = vmul.f32 0.01, %v414_v38  ;;  %v509_v49 = vsel %vm445_vm3, %v413_v31, %v477_v39 }
  0x36   : > { %1215 = vmatmul.mubr.msk.bf16.gmra.mrb[8].mxu0 %vm574_vm1, %v530_v22  ;;  %v416_v50 = vadd.f32 %v1493_v3, %v377_v40  ;;  %vm447_vm5 = vcmp.gt.f32.partialorder %v415_v42, 0.0  ;;  %v479_v51 = vmul.f32 0.01, %v415_v42  ;;  %v417_v52 = vadd.f32 %v1493_v3, %v378_v43 }
  0x37   : > { %1218 = vmatprep.mubr.msk.bf16.mxu0 %vm574_vm1, %v531_v35  ;;  %v510_v53 = vsel %vm446_vm4, %v414_v38, %v478_v48  ;;  %v418_v54 = vadd.f32 %v1493_v3, %v379_v44  ;;  %v380_v55 = vmul.f32 %v1482_v2, %v341_v45  ;;  %v381_v56 = vmul.f32 %v1482_v2, %v342_v46 }
  0x38   : > { %v533_v58 = vpack.c.bf16 %v510_v53, %v509_v49  ;;  %vm448_vm6 = vcmp.gt.f32.partialorder %v416_v50, 0.0  ;;  %v480_v59 = vmul.f32 0.01, %v416_v50  ;;  %v511_v60 = vsel %vm447_vm5, %v415_v42, %v479_v51 }
  0x39   : > { %vm449_vm7 = vcmp.gt.f32.partialorder %v417_v52, 0.0  ;;  %vm450_vm8 = vcmp.gt.f32.partialorder %v418_v54, 0.0  ;;  %v481_v62 = vmul.f32 0.01, %v417_v52  ;;  %v482_v63 = vmul.f32 0.01, %v418_v54 }
  0x3a   : > { %1222 = vmatprep.mubr.msk.bf16.mxu1 %vm574_vm1, %v533_v58  ;;  %v512_v0 = vsel %vm448_vm6, %v416_v50, %v480_v59  ;;  %v419_v1 = vadd.f32 %v1493_v3, %v380_v55  ;;  %v420_v4 = vadd.f32 %v1493_v3, %v381_v56  ;;  %v382_v5 = vmul.f32 %v1482_v2, %v343_v57  ;;  %v542_v55 = vld [vmem:[%s1612_s9] sm:$0xff]  ;;  %v545_v56 = vld [vmem:[%s1612_s9 + $0x18] sm:$0xff]  ;;  %v543_v57 = vld [vmem:[%s1612_s9 + $0x8] sm:$0xff] }
  0x3b   : > { %v534_v7 = vpack.c.bf16 %v512_v0, %v511_v60  ;;  %v513_v8 = vsel %vm449_vm7, %v417_v52, %v481_v62  ;;  %v514_v9 = vsel %vm450_vm8, %v418_v54, %v482_v63  ;;  %v383_v10 = vmul.f32 %v1482_v2, %v344_v61  ;;  %v548_v58 = vld [vmem:[%s1612_s9 + $0x30] sm:$0xff]  ;;  %v546_v59 = vld [vmem:[%s1612_s9 + $0x20] sm:$0xff]  ;;  %v1621_v60 = vld [vmem:[%s1612_s9 + $0x38] sm:$0xff] }
  0x3c   : > { %v535_v13 = vpack.c.bf16 %v514_v9, %v513_v8  ;;  %vm451_vm9 = vcmp.gt.f32.partialorder %v419_v1, 0.0  ;;  %vm452_vm10 = vcmp.gt.f32.partialorder %v420_v4, 0.0  ;;  %v483_v14 = vmul.f32 0.01, %v419_v1  ;;  %v1624_v61 = vld [vmem:[%s1612_s9 + $0x28] sm:$0xff]  ;;  %v1627_v62 = vld [vmem:[%s1612_s9 + $0x50] sm:$0xff] }
  0x3d   : > { %1223 = vmatmul.mubr.msk.bf16.vlgmr.msra.gmra.mrb[0].mxu1 %vm574_vm1, %v534_v7  ;;  %v484_v15 = vmul.f32 0.01, %v420_v4  ;;  %v421_v16 = vadd.f32 %v1493_v3, %v382_v5  ;;  %v422_v17 = vadd.f32 %v1493_v3, %v383_v10  ;;  %v384_v18 = vmul.f32 %v1482_v2, %v345_v6  ;;  %v1630_v63 = vld [vmem:[%s1612_s9 + $0x40] sm:$0xff]  ;;  %v1633_v0 = vld [vmem:[%s1612_s9 + $0x58] sm:$0xff]  ;;  %v1648_v7 = vld [vmem:[%s1612_s9 + $0x68] sm:$0xff] }
  0x3e   : > { %1219 = vmatmul.mubr.msk.bf16.gmra.mrb[12].mxu0 %vm574_vm1, %v532_v47  ;;  %1226 = vmatprep.mubr.msk.bf16.mxu1 %vm574_vm1, %v535_v13  ;;  %v515_v19 = vsel %vm451_vm9, %v419_v1, %v483_v14  ;;  %v385_v20 = vmul.f32 %v1482_v2, %v346_v11  ;;  %v386_v22 = vmul.f32 %v1482_v2, %v347_v12  ;;  %v1636_v1 = vld [vmem:[%s1612_s9 + $0x48] sm:$0xff]  ;;  %v1642_v5 = vld [vmem:[%s1612_s9 + $0x60] sm:$0xff]  ;;  %v1645_v6 = vld [vmem:[%s1612_s9 + $0x78] sm:$0xff]  ;;  %vm890_vm4 = vcmask 122880  }
  0x3f   : > { %v516_v23 = vsel %vm452_vm10, %v420_v4, %v484_v15  ;;  %vm453_vm11 = vcmp.gt.f32.partialorder %v421_v16, 0.0  ;;  %vm454_vm12 = vcmp.gt.f32.partialorder %v422_v17, 0.0  ;;  %v485_v24 = vmul.f32 0.01, %v421_v16  ;;  %v1639_v4 = vld [vmem:[%s1612_s9 + $0x70] sm:$0xff]  ;;  %v1654_v9 = vld [vmem:[%s1612_s9 + $0x80] sm:$0xff] }
  0x40   : > { %v486_v26 = vmul.f32 0.01, %v422_v17  ;;  %v423_v27 = vadd.f32 %v1493_v3, %v384_v18  ;;  %v424_v28 = vadd.f32 %v1493_v3, %v385_v20  ;;  %v536_v29 = vpack.c.bf16 %v516_v23, %v515_v19  ;;  %v1651_v8 = vld [vmem:[%s1612_s9 + $0x90] sm:$0xff]  ;;  %v1657_v10 = vld [vmem:[%s1612_s9 + $0x98] sm:$0xff]  ;;  %v1660_v11 = vld [vmem:[%s1612_s9 + $0x88] sm:$0xff] }
  0x41   : > { %v517_v30 = vsel %vm453_vm11, %v421_v16, %v485_v24  ;;  %v387_v31 = vmul.f32 %v1482_v2, %v348_v21  ;;  %v425_v32 = vadd.f32 %v1493_v3, %v386_v22  ;;  %v388_v36 = vmul.f32 %v1482_v2, %v349_v25  ;;  %v1663_v12 = vld [vmem:[%s1612_s9 + $0xb0] sm:$0xff]  ;;  %v1666_v13 = vld [vmem:[%s1612_s9 + $0xa0] sm:$0xff]  ;;  %v1669_v14 = vld [vmem:[%s1612_s9 + $0xb8] sm:$0xff] }
  0x42   : > { %v518_v34 = vsel %vm454_vm12, %v422_v17, %v486_v26  ;;  %vm455_vm13 = vcmp.gt.f32.partialorder %v423_v27, 0.0  ;;  %v487_v35 = vmul.f32 0.01, %v423_v27  ;;  %vm456_vm14 = vcmp.gt.f32.partialorder %v424_v28, 0.0  ;;  %v1672_v15 = vld [vmem:[%s1612_s9 + $0xa8] sm:$0xff]  ;;  %v1675_v16 = vld [vmem:[%s1612_s9 + $0xd0] sm:$0xff] }
  0x43   : > { %v537_v37 = vpack.c.bf16 %v518_v34, %v517_v30  ;;  %v488_v38 = vmul.f32 0.01, %v424_v28  ;;  %v426_v39 = vadd.f32 %v1493_v3, %v387_v31  ;;  %vm457_vm15 = vcmp.gt.f32.partialorder %v425_v32, 0.0  ;;  %v1678_v17 = vld [vmem:[%s1612_s9 + $0xc0] sm:$0xff]  ;;  %v1681_v18 = vld [vmem:[%s1612_s9 + $0xd8] sm:$0xff]  ;;  %v1684_v19 = vld [vmem:[%s1612_s9 + $0xc8] sm:$0xff] }
  0x44   : > { %v489_v40 = vmul.f32 0.01, %v425_v32  ;;  %v389_v41 = vmul.f32 %v1482_v2, %v350_v33  ;;  %v519_v43 = vsel %vm455_vm13, %v423_v27, %v487_v35  ;;  %v427_v45 = vadd.f32 %v1493_v3, %v388_v36  ;;  %v1687_v20 = vld [vmem:[%s1612_s9 + $0xf0] sm:$0xff]  ;;  %v1696_v22 = vld [vmem:[%s1612_s9 + $0xe0] sm:$0xff]  ;;  %v1699_v23 = vld [vmem:[%s1612_s9 + $0xf8] sm:$0xff] }
  0x45   : > { %1227 = vmatmul.mubr.msk.bf16.gmra.mrb[4].mxu1 %vm574_vm1, %v536_v29  ;;  %vm458_vm0 = vcmp.gt.f32.partialorder %v426_v39, 0.0  ;;  %v490_v42 = vmul.f32 0.01, %v426_v39  ;;  %v520_v44 = vsel %vm456_vm14, %v424_v28, %v488_v38  ;;  %v1702_v24 = vld [vmem:[%s1612_s9 + $0xe8] sm:$0xff] }
  0x46   : > { %1230 = vmatprep.mubr.msk.bf16.mxu1 %vm574_vm1, %v537_v37  ;;  %v428_v46 = vadd.f32 %v1493_v3, %v389_v41  ;;  %v521_v47 = vsel %vm457_vm15, %v425_v32, %v489_v40  ;;  %v538_v49 = vpack.c.bf16 %v520_v44, %v519_v43  ;;  %v491_v51 = vmul.f32 0.01, %v427_v45  ;;  %v544_v3 = vld [vmem:[%s1612_s9 + $0x10] sm:$0xff]  ;;  %s1889_s9 = scalar_lea.hbm %s1964_s7, %s1180_s17 }
  0x47   : > { %v522_v48 = vsel %vm458_vm0, %v426_v39, %v490_v42  ;;  %vm459_vm2 = vcmp.gt.f32.partialorder %v427_v45, 0.0 }
  0x48   : > { %v539_v50 = vpack.c.bf16 %v522_v48, %v521_v47  ;;  %v492_v52 = vmul.f32 0.01, %v428_v46  ;;  %vm460_vm3 = vcmp.gt.f32.partialorder %v428_v46, 0.0  ;;  %v523_v2 = vsel %vm459_vm2, %v427_v45, %v491_v51 }
  0x4a   : > { %v524_v53 = vsel %vm460_vm3, %v428_v46, %v492_v52 }
  0x4b   : > { %v540_v54 = vpack.c.bf16 %v524_v53, %v523_v2 }
  0x4d   : > { %1231 = vmatmul.mubr.msk.bf16.gmra.mrb[8].mxu1 %vm574_vm1, %v538_v49 }
  0x4e   : > { %1234 = vmatprep.mubr.msk.bf16.mxu1 %vm574_vm1, %v539_v50 }
  0x55   : > { %1235 = vmatmul.mubr.msk.bf16.gmra.mrb[12].mxu1 %vm574_vm1, %v540_v54  ;;  %vm788_vm1 = vcmask 130048  }
  0xf9   : > { %v1208_v21 = vpop.f32.mrb[0].mxu0 }
  0xfa   : > { %v670_v25 = vadd.f32 %v1208_v21, %v544_v3  ;;  %v661_v26 = vpop.f32.mrb[1].mxu0 }
  0xfb   : > { %v662_v27 = vadd.f32 %v661_v26, %v542_v55  ;;  %v1209_v28 = vpop.f32.mrb[2].mxu0 }
  0xfc   : > { %v673_v29 = vadd.f32 %v1209_v28, %v545_v56  ;;  %v664_v30 = vpop.f32.mrb[3].mxu0  ;;  %791 = vst.msk [vmem:[%s1693_s15 + $0x10] sm:$0xff] %vm788_vm1, %v670_v25  ;;  %v894_v33 = vmul.f32 %v670_v25, %v670_v25  ;;  %v824_v39 = vsel %vm788_vm1, %v670_v25, 0.0 }
  0xfd   : > { %v892_v31 = vmul.f32 %v662_v27, %v662_v27  ;;  %v665_v32 = vadd.f32 %v664_v30, %v543_v57  ;;  %789 = vst.msk [vmem:[%s1693_s15] sm:$0xff] %vm788_vm1, %v662_v27  ;;  %v821_v34 = vsel %vm788_vm1, %v662_v27, 0.0 }
  0xfe   : > { %792 = vst.msk [vmem:[%s1693_s15 + $0x18] sm:$0xff] %vm788_vm1, %v673_v29  ;;  %v895_v37 = vmul.f32 %v673_v29, %v673_v29  ;;  %v927_v47 = vsel %vm788_vm1, %v894_v33, 0.0  ;;  %v826_v48 = vsel %vm788_vm1, %v673_v29, 0.0 }
  0xff   : > { %v822_v35 = vsel %vm788_vm1, %v665_v32, 0.0  ;;  %v893_v36 = vmul.f32 %v665_v32, %v665_v32  ;;  %790 = vst.msk [vmem:[%s1693_s15 + $0x8] sm:$0xff] %vm788_vm1, %v665_v32  ;;  %v924_v40 = vsel %vm788_vm1, %v892_v31, 0.0 }
 0x100   : > { %v823_v38 = vadd.f32 %v822_v35, %v821_v34  ;;  %v929_v51 = vsel %vm788_vm1, %v895_v37, 0.0 }
 0x101   : > { %v925_v41 = vsel %vm788_vm1, %v893_v36, 0.0  ;;  %v1212_v42 = vpop.f32.mrb[4].mxu0 }
 0x102   : > { %v825_v43 = vadd.f32 %v824_v39, %v823_v38  ;;  %v926_v44 = vadd.f32 %v925_v41, %v924_v40  ;;  %v686_v45 = vadd.f32 %v1212_v42, %v548_v58  ;;  %v677_v46 = vpop.f32.mrb[5].mxu0 }
 0x103   : > { %v678_v49 = vadd.f32 %v677_v46, %v546_v59  ;;  %v1213_v50 = vpop.f32.mrb[6].mxu0 }
 0x104   : > { %v928_v52 = vadd.f32 %v927_v47, %v926_v44  ;;  %v827_v2 = vadd.f32 %v826_v48, %v825_v43  ;;  %v680_v53 = vpop.f32.mrb[7].mxu0  ;;  %795 = vst.msk [vmem:[%s1693_s15 + $0x30] sm:$0xff] %vm788_vm1, %v686_v45  ;;  %v689_v55 = vadd.f32 %v1213_v50, %v1621_v60  ;;  %v898_v25 = vmul.f32 %v686_v45, %v686_v45 }
 0x105   : > { %v828_v54 = vsel %vm788_vm1, %v678_v49, 0.0  ;;  %v896_v3 = vmul.f32 %v678_v49, %v678_v49  ;;  %v681_v56 = vadd.f32 %v680_v53, %v1624_v61  ;;  %793 = vst.msk [vmem:[%s1693_s15 + $0x20] sm:$0xff] %vm788_vm1, %v678_v49  ;;  %v832_v60 = vsel %vm788_vm1, %v686_v45, 0.0 }
 0x106   : > { %v829_v57 = vadd.f32 %v828_v54, %v827_v2  ;;  %v930_v58 = vadd.f32 %v929_v51, %v928_v52  ;;  %796 = vst.msk [vmem:[%s1693_s15 + $0x38] sm:$0xff] %vm788_vm1, %v689_v55  ;;  %v899_v29 = vmul.f32 %v689_v55, %v689_v55  ;;  %v834_v34 = vsel %vm788_vm1, %v689_v55, 0.0 }
 0x107   : > { %v931_v59 = vsel %vm788_vm1, %v896_v3, 0.0  ;;  %v830_v21 = vsel %vm788_vm1, %v681_v56, 0.0  ;;  %794 = vst.msk [vmem:[%s1693_s15 + $0x28] sm:$0xff] %vm788_vm1, %v681_v56  ;;  %v897_v28 = vmul.f32 %v681_v56, %v681_v56  ;;  %v935_v38 = vsel %vm788_vm1, %v898_v25, 0.0 }
 0x108   : > { %v932_v26 = vadd.f32 %v931_v59, %v930_v58  ;;  %v831_v27 = vadd.f32 %v830_v21, %v829_v57 }
 0x109   : > { %v1216_v61 = vpop.f32.mrb[8].mxu0  ;;  %v933_v31 = vsel %vm788_vm1, %v897_v28, 0.0 }
 0x10a   : > { %v833_v30 = vadd.f32 %v832_v60, %v831_v27  ;;  %v702_v32 = vadd.f32 %v1216_v61, %v1627_v62  ;;  %v693_v33 = vpop.f32.mrb[9].mxu0  ;;  %v934_v35 = vadd.f32 %v933_v31, %v932_v26 }
 0x10b   : > { %v694_v36 = vadd.f32 %v693_v33, %v1630_v63  ;;  %v1217_v37 = vpop.f32.mrb[10].mxu0  ;;  %v937_v63 = vsel %vm788_vm1, %v899_v29, 0.0 }
 0x10c   : > { %v835_v39 = vadd.f32 %v834_v34, %v833_v30  ;;  %v705_v40 = vadd.f32 %v1217_v37, %v1633_v0  ;;  %v696_v41 = vpop.f32.mrb[11].mxu0  ;;  %799 = vst.msk [vmem:[%s1693_s15 + $0x50] sm:$0xff] %vm788_vm1, %v702_v32  ;;  %v936_v42 = vadd.f32 %v935_v38, %v934_v35  ;;  %v902_v49 = vmul.f32 %v702_v32, %v702_v32 }
 0x10d   : > { %v836_v62 = vsel %vm788_vm1, %v694_v36, 0.0  ;;  %v900_v43 = vmul.f32 %v694_v36, %v694_v36  ;;  %v697_v44 = vadd.f32 %v696_v41, %v1636_v1  ;;  %797 = vst.msk [vmem:[%s1693_s15 + $0x40] sm:$0xff] %vm788_vm1, %v694_v36  ;;  %v840_v1 = vsel %vm788_vm1, %v702_v32, 0.0 }
 0x10e   : > { %v837_v45 = vadd.f32 %v836_v62, %v835_v39  ;;  %800 = vst.msk [vmem:[%s1693_s15 + $0x58] sm:$0xff] %vm788_vm1, %v705_v40  ;;  %v938_v46 = vadd.f32 %v937_v63, %v936_v42  ;;  %v903_v55 = vmul.f32 %v705_v40, %v705_v40  ;;  %v842_v25 = vsel %vm788_vm1, %v705_v40, 0.0 }
 0x10f   : > { %v939_v47 = vsel %vm788_vm1, %v900_v43, 0.0  ;;  %v838_v0 = vsel %vm788_vm1, %v697_v44, 0.0  ;;  %v901_v48 = vmul.f32 %v697_v44, %v697_v44  ;;  %798 = vst.msk [vmem:[%s1693_s15 + $0x48] sm:$0xff] %vm788_vm1, %v697_v44  ;;  %v943_v60 = vsel %vm788_vm1, %v902_v49, 0.0 }
 0x110   : > { %v839_v50 = vadd.f32 %v838_v0, %v837_v45  ;;  %v1224_v51 = vpop.f32.mrb[0].mxu1  ;;  %v940_v52 = vadd.f32 %v939_v47, %v938_v46  ;;  %v945_v32 = vsel %vm788_vm1, %v903_v55, 0.0 }
 0x111   : > { %v941_v2 = vsel %vm788_vm1, %v901_v48, 0.0  ;;  %v1220_v53 = vpop.f32.mrb[12].mxu0  ;;  %v1756_v54 = vadd.f32 %v1224_v51, %v1651_v8  ;;  %v725_v3 = vpop.f32.mrb[1].mxu1 }
 0x112   : > { %v841_v56 = vadd.f32 %v840_v1, %v839_v50  ;;  %v718_v57 = vadd.f32 %v1220_v53, %v1639_v4  ;;  %v709_v58 = vpop.f32.mrb[13].mxu0  ;;  %v726_v59 = vadd.f32 %v725_v3, %v1654_v9  ;;  %v1225_v21 = vpop.f32.mrb[2].mxu1  ;;  %v942_v26 = vadd.f32 %v941_v2, %v940_v52 }
 0x113   : > { %v710_v27 = vadd.f32 %v709_v58, %v1642_v5  ;;  %v1221_v28 = vpop.f32.mrb[14].mxu0  ;;  %v728_v8 = vpop.f32.mrb[3].mxu1  ;;  %807 = vst.msk [vmem:[%s1693_s15 + $0x90] sm:$0xff] %vm788_vm1, %v1756_v54  ;;  %v737_v43 = vadd.f32 %v1225_v21, %v1657_v10  ;;  %v856_v21 = vsel %vm788_vm1, %v1756_v54, 0.0 }
 0x114   : > { %v843_v61 = vadd.f32 %v842_v25, %v841_v56  ;;  %v721_v4 = vadd.f32 %v1221_v28, %v1645_v6  ;;  %v712_v9 = vpop.f32.mrb[15].mxu0  ;;  %803 = vst.msk [vmem:[%s1693_s15 + $0x70] sm:$0xff] %vm788_vm1, %v718_v57  ;;  %805 = vst.msk [vmem:[%s1693_s15 + $0x80] sm:$0xff] %vm788_vm1, %v726_v59  ;;  %v944_v29 = vadd.f32 %v943_v60, %v942_v26  ;;  %v848_v37 = vsel %vm788_vm1, %v718_v57, 0.0 }
 0x115   : > { %v844_v5 = vsel %vm788_vm1, %v710_v27, 0.0  ;;  %v904_v30 = vmul.f32 %v710_v27, %v710_v27  ;;  %v713_v31 = vadd.f32 %v712_v9, %v1648_v7  ;;  %801 = vst.msk [vmem:[%s1693_s15 + $0x60] sm:$0xff] %vm788_vm1, %v710_v27  ;;  %v906_v38 = vmul.f32 %v718_v57, %v718_v57  ;;  %808 = vst.msk [vmem:[%s1693_s15 + $0x98] sm:$0xff] %vm788_vm1, %v737_v43 }
 0x116   : > { %v845_v33 = vadd.f32 %v844_v5, %v843_v61  ;;  %804 = vst.msk [vmem:[%s1693_s15 + $0x78] sm:$0xff] %vm788_vm1, %v721_v4  ;;  %v946_v6 = vadd.f32 %v945_v32, %v944_v29  ;;  %v907_v39 = vmul.f32 %v721_v4, %v721_v4  ;;  %v908_v62 = vmul.f32 %v726_v59, %v726_v59 }
 0x117   : > { %v947_v34 = vsel %vm788_vm1, %v904_v30, 0.0  ;;  %v846_v35 = vsel %vm788_vm1, %v713_v31, 0.0  ;;  %v905_v36 = vmul.f32 %v713_v31, %v713_v31  ;;  %802 = vst.msk [vmem:[%s1693_s15 + $0x68] sm:$0xff] %vm788_vm1, %v713_v31  ;;  %v729_v45 = vadd.f32 %v728_v8, %v1660_v11 }
 0x118   : > { %v847_v7 = vadd.f32 %v846_v35, %v845_v33  ;;  %v1228_v40 = vpop.f32.mrb[4].mxu1  ;;  %v948_v41 = vadd.f32 %v947_v34, %v946_v6  ;;  %v850_v48 = vsel %vm788_vm1, %v721_v4, 0.0  ;;  %v852_v50 = vsel %vm788_vm1, %v726_v59, 0.0 }
 0x119   : > { %v949_v42 = vsel %vm788_vm1, %v905_v36, 0.0  ;;  %v741_v44 = vpop.f32.mrb[5].mxu1  ;;  %v750_v46 = vadd.f32 %v1228_v40, %v1663_v12  ;;  %v951_v10 = vsel %vm788_vm1, %v906_v38, 0.0  ;;  %806 = vst.msk [vmem:[%s1693_s15 + $0x88] sm:$0xff] %vm788_vm1, %v729_v45  ;;  %v953_v11 = vsel %vm788_vm1, %v907_v39, 0.0 }
 0x11a   : > { %v849_v63 = vadd.f32 %v848_v37, %v847_v7  ;;  %v742_v47 = vadd.f32 %v741_v44, %v1666_v13  ;;  %v1229_v0 = vpop.f32.mrb[6].mxu1  ;;  %v950_v49 = vadd.f32 %v949_v42, %v948_v41  ;;  %v955_v52 = vsel %vm788_vm1, %v908_v62, 0.0 }
 0x11b   : > { %v744_v51 = vpop.f32.mrb[7].mxu1  ;;  %811 = vst.msk [vmem:[%s1693_s15 + $0xb0] sm:$0xff] %vm788_vm1, %v750_v46  ;;  %v909_v2 = vmul.f32 %v729_v45, %v729_v45  ;;  %v753_v53 = vadd.f32 %v1229_v0, %v1669_v14  ;;  %v854_v55 = vsel %vm788_vm1, %v729_v45, 0.0  ;;  %v910_v57 = vmul.f32 %v1756_v54, %v1756_v54 }
 0x11c   : > { %v851_v1 = vadd.f32 %v850_v48, %v849_v63  ;;  %809 = vst.msk [vmem:[%s1693_s15 + $0xa0] sm:$0xff] %vm788_vm1, %v742_v47  ;;  %v952_v12 = vadd.f32 %v951_v10, %v950_v49  ;;  %v745_v56 = vadd.f32 %v744_v51, %v1672_v15  ;;  %v911_v26 = vmul.f32 %v737_v43, %v737_v43 }
 0x11d   : > { %812 = vst.msk [vmem:[%s1693_s15 + $0xb8] sm:$0xff] %vm788_vm1, %v753_v53  ;;  %v957_v28 = vsel %vm788_vm1, %v909_v2, 0.0  ;;  %v912_v8 = vmul.f32 %v742_v47, %v742_v47  ;;  %v858_v4 = vsel %vm788_vm1, %v737_v43, 0.0  ;;  %v860_v9 = vsel %vm788_vm1, %v742_v47, 0.0 }
 0x11e   : > { %v853_v13 = vadd.f32 %v852_v50, %v851_v1  ;;  %v954_v3 = vadd.f32 %v953_v11, %v952_v12  ;;  %810 = vst.msk [vmem:[%s1693_s15 + $0xa8] sm:$0xff] %vm788_vm1, %v745_v56  ;;  %v959_v29 = vsel %vm788_vm1, %v910_v57, 0.0  ;;  %v961_v32 = vsel %vm788_vm1, %v911_v26, 0.0 }
 0x11f   : > { %v963_v6 = vsel %vm788_vm1, %v912_v8, 0.0  ;;  %v913_v34 = vmul.f32 %v745_v56, %v745_v56  ;;  %v862_v36 = vsel %vm788_vm1, %v745_v56, 0.0  ;;  %v914_v37 = vmul.f32 %v750_v46, %v750_v46 }
 0x120   : > { %v855_v58 = vadd.f32 %v854_v55, %v853_v13  ;;  %v1232_v59 = vpop.f32.mrb[8].mxu1  ;;  %v956_v25 = vadd.f32 %v955_v52, %v954_v3  ;;  %v866_v7 = vsel %vm788_vm1, %v753_v53, 0.0  ;;  %v915_v40 = vmul.f32 %v753_v53, %v753_v53 }
 0x121   : > { %v1811_v14 = vadd.f32 %v1232_v59, %v1675_v16  ;;  %v757_v27 = vpop.f32.mrb[9].mxu1  ;;  %v965_v43 = vsel %vm788_vm1, %v913_v34, 0.0 }
 0x122   : > { %v857_v15 = vadd.f32 %v856_v21, %v855_v58  ;;  %v758_v60 = vadd.f32 %v757_v27, %v1678_v17  ;;  %v1233_v61 = vpop.f32.mrb[10].mxu1  ;;  %v958_v54 = vadd.f32 %v957_v28, %v956_v25  ;;  %v969_v11 = vsel %vm788_vm1, %v915_v40, 0.0 }
 0x123   : > { %v760_v16 = vpop.f32.mrb[11].mxu1  ;;  %815 = vst.msk [vmem:[%s1693_s15 + $0xd0] sm:$0xff] %vm788_vm1, %v1811_v14  ;;  %v769_v30 = vadd.f32 %v1233_v61, %v1681_v18  ;;  %v864_v18 = vsel %vm788_vm1, %v750_v46, 0.0  ;;  %v918_v53 = vmul.f32 %v1811_v14, %v1811_v14  ;;  %v872_v55 = vsel %vm788_vm1, %v1811_v14, 0.0 }
 0x124   : > { %v859_v5 = vadd.f32 %v858_v4, %v857_v15  ;;  %813 = vst.msk [vmem:[%s1693_s15 + $0xc0] sm:$0xff] %vm788_vm1, %v758_v60  ;;  %v960_v17 = vadd.f32 %v959_v29, %v958_v54  ;;  %v761_v31 = vadd.f32 %v760_v16, %v1684_v19  ;;  %v916_v44 = vmul.f32 %v758_v60, %v758_v60 }
 0x125   : > { %816 = vst.msk [vmem:[%s1693_s15 + $0xd8] sm:$0xff] %vm788_vm1, %v769_v30  ;;  %v868_v47 = vsel %vm788_vm1, %v758_v60, 0.0  ;;  %v919_v57 = vmul.f32 %v769_v30, %v769_v30  ;;  %v874_v25 = vsel %vm788_vm1, %v769_v30, 0.0  ;;  %v975_v15 = vsel %vm788_vm1, %v918_v53, 0.0 }
 0x126   : > { %v861_v33 = vadd.f32 %v860_v9, %v859_v5  ;;  %v962_v35 = vadd.f32 %v961_v32, %v960_v17  ;;  %814 = vst.msk [vmem:[%s1693_s15 + $0xc8] sm:$0xff] %vm788_vm1, %v761_v31  ;;  %v917_v13 = vmul.f32 %v761_v31, %v761_v31  ;;  %v870_v2 = vsel %vm788_vm1, %v761_v31, 0.0 }
 0x127   : > { %v977_v60 = vsel %vm788_vm1, %v919_v57, 0.0 }
 0x128   : > { %v863_v38 = vadd.f32 %v862_v36, %v861_v33  ;;  %v1236_v39 = vpop.f32.mrb[12].mxu1  ;;  %v964_v19 = vadd.f32 %v963_v6, %v962_v35  ;;  %v973_v59 = vsel %vm788_vm1, %v917_v13, 0.0 }
 0x129   : > { %v782_v41 = vadd.f32 %v1236_v39, %v1687_v20  ;;  %v773_v42 = vpop.f32.mrb[13].mxu1  ;;  %v967_v20 = vsel %vm788_vm1, %v914_v37, 0.0 }
 0x12a   : > { %v865_v62 = vadd.f32 %v864_v18, %v863_v38  ;;  %v774_v63 = vadd.f32 %v773_v42, %v1696_v22  ;;  %v1237_v45 = vpop.f32.mrb[14].mxu1  ;;  %v966_v46 = vadd.f32 %v965_v43, %v964_v19 }
 0x12b   : > { %v922_v0 = vmul.f32 %v782_v41, %v782_v41  ;;  %v785_v48 = vadd.f32 %v1237_v45, %v1699_v23  ;;  %v776_v49 = vpop.f32.mrb[15].mxu1  ;;  %819 = vst.msk [vmem:[%s1693_s15 + $0xf0] sm:$0xff] %vm788_vm1, %v782_v41  ;;  %v971_v23 = vsel %vm788_vm1, %v916_v44, 0.0  ;;  %v880_v29 = vsel %vm788_vm1, %v782_v41, 0.0 }
 0x12c   : > { %v867_v50 = vadd.f32 %v866_v7, %v865_v62  ;;  %v777_v51 = vadd.f32 %v776_v49, %v1702_v24  ;;  %817 = vst.msk [vmem:[%s1693_s15 + $0xe0] sm:$0xff] %vm788_vm1, %v774_v63  ;;  %v968_v10 = vadd.f32 %v967_v20, %v966_v46  ;;  %v920_v21 = vmul.f32 %v774_v63, %v774_v63 }
 0x12d   : > { %v983_v22 = vsel %vm788_vm1, %v922_v0, 0.0  ;;  %v923_v1 = vmul.f32 %v785_v48, %v785_v48  ;;  %820 = vst.msk [vmem:[%s1693_s15 + $0xf8] sm:$0xff] %vm788_vm1, %v785_v48  ;;  %v876_v27 = vsel %vm788_vm1, %v774_v63, 0.0  ;;  %v882_v31 = vsel %vm788_vm1, %v785_v48, 0.0 }
 0x12e   : > { %v869_v12 = vadd.f32 %v868_v47, %v867_v50  ;;  %818 = vst.msk [vmem:[%s1693_s15 + $0xe8] sm:$0xff] %vm788_vm1, %v777_v51  ;;  %v970_v52 = vadd.f32 %v969_v11, %v968_v10  ;;  %v979_v14 = vsel %vm788_vm1, %v920_v21, 0.0  ;;  %v921_v4 = vmul.f32 %v777_v51, %v777_v51  ;;  %s1382_s15 = smov [#allocation2]  }
 0x12f   : > { %v985_v24 = vsel %vm788_vm1, %v923_v1, 0.0  ;;  %v878_v9 = vsel %vm788_vm1, %v777_v51, 0.0  ;;  %s1290_s22 = sshll.u32 %s1382_s15, 4  ;;  %s1291_s22 = int_to_ptr.vmem [resolvable:$false] %s1290_s22 }
 0x130   : > { %v871_v3 = vadd.f32 %v870_v2, %v869_v12  ;;  %v972_v56 = vadd.f32 %v971_v23, %v970_v52  ;;  %v981_v17 = vsel %vm788_vm1, %v921_v4, 0.0  ;;  %s1292_s23 = scalar_lea.vmem %s1291_s22, 32  ;;  %p1293_p0 = scmp.lt.s32.totalorder %s1883_s19, %s1291_s22 }
 0x131   : > { %p1294_p1 = scmp.lt.s32.totalorder %s1292_s23, %s1286_s14 }
 0x132   : > { %v873_v58 = vadd.f32 %v872_v55, %v871_v3  ;;  %v974_v26 = vadd.f32 %v973_v59, %v972_v56 }
 0x133   : > { %p1295_p2 = por %p1294_p1, %p1293_p0 }
 0x134   : > { %v875_v28 = vadd.f32 %v874_v25, %v873_v58  ;;  %v976_v8 = vadd.f32 %v975_v15, %v974_v26 }
 0x135   : > { %p1296_p3 = pnand %p1295_p2, %p1289_p13 }
 0x136   : > { %v877_v61 = vadd.f32 %v876_v27, %v875_v28  ;;  %v978_v54 = vadd.f32 %v977_v60, %v976_v8 }
 0x138   : > { %v879_v16 = vadd.f32 %v878_v9, %v877_v61  ;;  %v980_v5 = vadd.f32 %v979_v14, %v978_v54 }
 0x13a   : > { %v881_v30 = vadd.f32 %v880_v29, %v879_v16  ;;  %v982_v32 = vadd.f32 %v981_v17, %v980_v5 }
 0x13c   : > { %v883_v33 = vadd.f32 %v882_v31, %v881_v30  ;;  %v984_v6 = vadd.f32 %v983_v22, %v982_v32 }
 0x13e   : > { %v884_v34 = vrot.slane %v883_v33, 4  ;;  %v986_v35 = vadd.f32 %v985_v24, %v984_v6 }
 0x140   : > { %v885_v36 = vadd.f32 %v884_v34, %v883_v33  ;;  %v987_v18 = vrot.slane %v986_v35, 4 }
 0x142   : > { %v886_v37 = vrot.slane %v885_v36, 2  ;;  %v988_v38 = vadd.f32 %v987_v18, %v986_v35 }
 0x144   : > { %v887_v39 = vadd.f32 %v886_v37, %v885_v36  ;;  %v989_v19 = vrot.slane %v988_v38, 2 }
 0x146   : > { %v888_v7 = vrot.slane %v887_v39, 1  ;;  %v990_v40 = vadd.f32 %v989_v19, %v988_v38 }
 0x148   : > { %v889_v41 = vadd.f32 %v888_v7, %v887_v39  ;;  %v991_v42 = vrot.slane %v990_v40, 1 }
 0x14a   : > { %891 = vst.msk [vmem:[%s296_s18] sm:$0x1] %vm890_vm4, %v889_v41 }
 0x14b   : > { %1299 = shalt.err (!%p1296_p3)
}
 0x14c   : > { %s1300_s17 = scalar_lea.hbm %s1881_s29, 16  ;;  %s1304_s8 = scalar_lea.hbm %s1963_s6, 32 }
 0x14d   : > { %p1301_p4 = scmp.ne.s32.totalorder %s1881_s29, %s1300_s17  ;;  %p1305_p9 = scmp.lt.u32.totalorder %s1881_s29, %s1963_s6 }
 0x14e   : > { %p1306_p10 = scmp.lt.u32.totalorder %s1304_s8, %s1300_s17  ;;  %p1308_p12 = scmp.lt.u32.totalorder %s1300_s17, %s1881_s29 }
 0x14f   : > { %p1302_p7 = pnand %p1301_p4, %p1462_p5 }
 0x150   : > { %p1307_p11 = por %p1306_p10, %p1305_p9 }
 0x151   : > { %p1303_p8 = pneg %p1302_p7 }
 0x152   : > { %p1309_p13 = por %p1308_p12, %p1307_p11 }
 0x154   : > { %p1310_p0 = pnand %p1309_p13, %p1303_p8 }
 0x156   : > { %1313 = shalt.err (!%p1310_p0)
}
 0x157   : > { %1242 = dma.vmem_to_hbm [thread:$0]  (%p1462_p5), %s1883_s19, 16, %s1881_s29, %s1000_s13   ;;  %v992_v62 = vadd.f32 %v991_v42, %v990_v40 }
 0x158   : > { %s1004_s14 = scalar_lea.sflag [#allocation5], %s1871_s16  ;;  %s1314_s23 = scalar_lea.vmem %s1891_s21, 16 }
 0x159   : > { %993 = vst.msk [vmem:[%s302_s20] sm:$0x1] %vm890_vm4, %v992_v62  ;;  %p1315_p1 = scmp.ne.s32.totalorder %s1891_s21, %s1314_s23  ;;  %s1383_s17 = smov [#allocation4]  }
 0x15a   : > { %s1318_s18 = sshll.u32 %s1383_s17, 4  ;;  %s1319_s18 = int_to_ptr.vmem [resolvable:$false] %s1318_s18 }
 0x15b   : > { %p1316_p2 = pnand %p1315_p1, %p1462_p5  ;;  %s1320_s28 = scalar_lea.vmem %s1319_s18, 32 }
 0x15c   : > { %p1321_p4 = scmp.lt.s32.totalorder %s1891_s21, %s1319_s18  ;;  %p1322_p7 = scmp.lt.s32.totalorder %s1320_s28, %s1314_s23 }
 0x15d   : > { %p1317_p3 = pneg %p1316_p2 }
 0x15e   : > { %p1323_p8 = por %p1322_p7, %p1321_p4 }
 0x160   : > { %p1324_p9 = pnand %p1323_p8, %p1317_p3 }
 0x162   : > { %1327 = shalt.err (!%p1324_p9)
}
 0x163   : > { %s1328_s16 = scalar_lea.hbm %s1889_s9, 16  ;;  %s1332_s29 = scalar_lea.hbm %s1964_s7, 32 }
 0x164   : > { %p1329_p10 = scmp.ne.s32.totalorder %s1889_s9, %s1328_s16  ;;  %p1333_p13 = scmp.lt.u32.totalorder %s1889_s9, %s1964_s7 }
 0x165   : > { %p1334_p0 = scmp.lt.u32.totalorder %s1332_s29, %s1328_s16  ;;  %p1336_p2 = scmp.lt.u32.totalorder %s1328_s16, %s1889_s9 }
 0x166   : > { %p1330_p11 = pnand %p1329_p10, %p1462_p5 }
 0x167   : > { %p1335_p1 = por %p1334_p0, %p1333_p13 }
 0x168   : > { %p1331_p12 = pneg %p1330_p11 }
 0x169   : > { %p1337_p3 = por %p1336_p2, %p1335_p1 }
 0x16b   : > { %p1338_p4 = pnand %p1337_p3, %p1331_p12 }
 0x16d   : > { %1341 = shalt.err (!%p1338_p4)
}
 0x16e   : > { %1243 = dma.vmem_to_hbm [thread:$0]  (%p1462_p5), %s1891_s21, 16, %s1889_s9, %s1004_s14  }
 0x16f PF: > { %p1253_p7 = scmp.ge.s32.totalorder %s1380_s27, 2  ;;  %s1052_s15 = sand.u32 1, %s1368_s24  }
 0x170   : > { %s1053_s22 = scalar_lea.sflag [#allocation3], %s1052_s15 }
 0x171   : > { %p1247_p8 = pnand %p1253_p7, %p1466_p6 }
 0x173   : > { %1359 = dma.done.wait (!%p1247_p8), %s1053_s22, 16  }
 0x174   : > { %1361 = vsyncadd (!%p1247_p8), %s1053_s22, 4294967280  ;;  %s1061_s23 = scalar_lea.sflag [#allocation5], %s1052_s15 }
 0x175   : > { %1363 = dma.done.wait (!%p1247_p8), %s1061_s23, 16  }
 0x176   : > { %1365 = vsyncadd (!%p1247_p8), %s1061_s23, 4294967280  ;;  %p21_p5 = scmp.ge.s32.totalorder %s1449_s30, 4   ;;  %s1967_s24 = smov %s1372_s25 }
 0x177   : > { %s1968_s25 = smov %s1376_s26  ;;  %s1969_s26 = smov %s1460_s10 }
 0x178   : > { %s1970_s27 = smov %s1449_s30  ;;  %23 = sbr.rel (!%p21_p5) target bundleno = 5 (0x5), region = 107 }
 0x17f   :  { %1065 = vsyncpa [#allocation3], 1 }
 0x180   :  { %1067 = vsyncpa [#allocation3 + $0x1], 1 }
 0x181   :  { %1068 = vsyncpa [#allocation5], 1 }
 0x182   :  { %1070 = vsyncpa [#allocation5 + $0x1], 1 }

// kernel: zhugo_residual_conv_block.9
= control target key start
LH: loop header
LB: loop body
LE: loop exit
PB: predicated region body
PF: predicated region fallthrough
CT: control target
= control target key end

     0   :  { %s6807_s21 = smov 0   ;;  %s8679_s0 = inlined_call_operand.vmem [shape: f32[1,8], index: 0, kind: input, shape index: {}]   ;;  %s8680_s1 = inlined_call_operand.vmem [shape: f32[1,8], index: 1, kind: input, shape index: {}]   ;;  %s8681_s2 = inlined_call_operand.vmem [shape: f32[2,256,8], index: 2, kind: input, shape index: {}]   ;;  %s8682_s3 = inlined_call_operand.vmem [shape: bf16[9,8,8], index: 3, kind: input, shape index: {}]   ;;  %s8683_s4 = inlined_call_operand.vmem [shape: f32[2,256,8], index: 4, kind: output, shape index: {0}]   ;;  %s8684_s5 = inlined_call_operand.vmem [shape: f32[2,1,8], index: 5, kind: output, shape index: {1}]   ;;  %s8685_s6 = inlined_call_operand.vmem [shape: f32[2,1,8], index: 6, kind: output, shape index: {2}]  }
   0x1 LB: > { %s5861_s22 = sadd.s32 4294967295, %s6768_s21   ;;  %p5865_p0 = scmp.ge.s32.totalorder %s6768_s21, 1  ;;  %s6768_s21 = sphi %s6807_s21, %s17_s21  }
   0x2   : > { %p217_p1 = scmp.lt.s32.totalorder %s6768_s21, 3 }
   0x4   : > { %p218_p2 = pnand %p5865_p0, %p217_p1 }
   0x6   : > { %221 = sbr.rel (%p218_p2) target bundleno = 591 (0x24f), region = 36 }
   0xd   : > { %v5872_v0 = vld [vmem:[%s8682_s3 + $0x4] sm:$0xf]  ;;  %vm8743_vm0 = vcmask 1043456   ;;  %v5937_v1 = vld [vmem:[%s8682_s3 + $0x10] sm:$0xf]  ;;  %p253_p3 = scmp.lt.s32.totalorder %s5861_s22, 1  ;;  %v476_v4 = vlaneseq }
   0xe   : > { %6741 = vmatprep.subr.msk.bf16.mxu1 %vm8743_vm0, %v5872_v0  ;;  %6745 = vmatprep.subr.msk.bf16.mxu0 %vm8743_vm0, %v5937_v1  ;;  %v1556_v2 = vsel %vm8743_vm0, %v5872_v0, 0  ;;  %v6825_v3 = vsel %vm8743_vm0, %v5937_v1, 0  ;;  %v1262_v5 = vld [vmem:[%s8682_s3] sm:$0xf]  ;;  %v8689_v6 = vmov 0.0|0.0   ;;  %vm8763_vm2 = vcmask 64512  }
   0xf   : > { %8841 = vst [vmem:[#allocation2_spill] sm:$0xff] %v6825_v3  ;;  %6178 = vmatpush3.bf16.msra.mxu1 %v1556_v2  ;;  %6314 = vmatpush3.bf16.msra.mxu0 %v6825_v3  ;;  %s9367_s22 = smov (!%p253_p3, %s5861_s22), 1  ;;  %v5954_v7 = vld [vmem:[%s8682_s3 + $0x14] sm:$0xf]  ;;  %v6843_v8 = vld [vmem:[%s8679_s0] ss:$0 sm:$0xff] }
  0x10   : > { %6179 = vmatprep.mubr.bf16.mxu1 %v8689_v6  ;;  %6742 = vmatprep.subr.msk.bf16.mxu1 %vm8743_vm0, %v1262_v5  ;;  %s6022_s7 = sshll.u32 %s9367_s22, 8  ;;  %v6845_v9 = vshrl.u32 %v476_v4, 7  ;;  %v6857_v10 = vld [vmem:[%s8680_s1] ss:$0 sm:$0xff]  ;;  %v6862_v11 = vld [vmem:[%s8682_s3 + $0x18] sm:$0xf]  ;;  %s265_s10 = scalar_lea.vmem %s8684_s5, %s9367_s22 }
  0x11   : > { %6747 = vmatprep.subr.msk.bf16.mxu0 %vm8743_vm0, %v5954_v7  ;;  %s6852_s12 = scalar_lea.vmem %s8681_s2, %s6022_s7  ;;  %v1768_v15 = vsel %vm8743_vm0, %v1262_v5, 0  ;;  %v6875_v21 = vsel %vm8743_vm0, %v5954_v7, 0  ;;  %v6892_v31 = vsel %vm8743_vm0, %v6862_v11, 0  ;;  %v6929_v57 = vld [vmem:[%s8682_s3 + $0x8] sm:$0xf]  ;;  %s8530_s8 = scalar_lea.vmem %s8683_s4, %s6022_s7 }
  0x12   : > { %v270_v12 = vld [vmem:[%s6852_s12] sm:$0xff]  ;;  %v271_v13 = vld [vmem:[%s6852_s12 + $0x8] sm:$0xff]  ;;  %v301_v14 = vld [vmem:[%s6852_s12 + $0xf8] sm:$0xff]  ;;  %vm8771_vm1 = vcmp.lt.s32.totalorder %v6845_v9, 1  ;;  %v6883_v27 = vadd.s32 8, %v6845_v9  ;;  %v6888_v30 = vadd.s32 24, %v6845_v9  ;;  %s268_s13 = scalar_lea.vmem %s8685_s6, %s9367_s22 }
  0x13   : > { %v309_v16 = vmul.f32 %v6843_v8, %v270_v12  ;;  %v310_v17 = vmul.f32 %v6843_v8, %v271_v13  ;;  %v340_v18 = vmul.f32 %v6843_v8, %v301_v14  ;;  %v272_v19 = vld [vmem:[%s6852_s12 + $0x10] sm:$0xff]  ;;  %v273_v20 = vld [vmem:[%s6852_s12 + $0x18] sm:$0xff]  ;;  %v274_v22 = vld [vmem:[%s6852_s12 + $0x20] sm:$0xff]  ;;  %v6898_v35 = vadd.s32 40, %v6845_v9 }
  0x14   : > { %v311_v23 = vmul.f32 %v6843_v8, %v272_v19  ;;  %v312_v24 = vmul.f32 %v6843_v8, %v273_v20  ;;  %v275_v25 = vld [vmem:[%s6852_s12 + $0x28] sm:$0xff]  ;;  %v313_v26 = vmul.f32 %v6843_v8, %v274_v22  ;;  %v276_v40 = vld [vmem:[%s6852_s12 + $0x30] sm:$0xff]  ;;  %v6904_v41 = vadd.s32 56, %v6845_v9  ;;  %v277_v55 = vld [vmem:[%s6852_s12 + $0x38] sm:$0xff] }
  0x15   : > { %v348_v28 = vadd.f32 %v6857_v10, %v309_v16  ;;  %v349_v29 = vadd.f32 %v6857_v10, %v310_v17  ;;  %v314_v34 = vmul.f32 %v6843_v8, %v275_v25  ;;  %v379_v36 = vadd.f32 %v6857_v10, %v340_v18  ;;  %v278_v59 = vld [vmem:[%s6852_s12 + $0x40] sm:$0xff]  ;;  %v279_v60 = vld [vmem:[%s6852_s12 + $0x48] sm:$0xff]  ;;  %v280_v19 = vld [vmem:[%s6852_s12 + $0x50] sm:$0xff] }
  0x16   : > { %v350_v32 = vadd.f32 %v6857_v10, %v311_v23  ;;  %v351_v33 = vadd.f32 %v6857_v10, %v312_v24  ;;  %v352_v39 = vadd.f32 %v6857_v10, %v313_v26  ;;  %v520_v48 = vand.u32 15, %v6883_v27  ;;  %v281_v20 = vld [vmem:[%s6852_s12 + $0x58] sm:$0xff]  ;;  %v282_v26 = vld [vmem:[%s6852_s12 + $0x60] sm:$0xff] }
  0x17   : > { %vm380_vm3 = vcmp.gt.f32.partialorder %v348_v28, 0.0  ;;  %vm381_vm4 = vcmp.gt.f32.partialorder %v349_v29, 0.0  ;;  %v412_v37 = vmul.f32 0.01, %v348_v28  ;;  %v413_v38 = vmul.f32 0.01, %v349_v29 }
  0x18   : > { %vm382_vm5 = vcmp.gt.f32.partialorder %v350_v32, 0.0  ;;  %vm383_vm6 = vcmp.gt.f32.partialorder %v351_v33, 0.0  ;;  %v414_v43 = vmul.f32 0.01, %v350_v32  ;;  %v415_v44 = vmul.f32 0.01, %v351_v33 }
  0x19   : > { %v6906_v42 = vsel %vm380_vm3, %v348_v28, %v412_v37  ;;  %v6908_v45 = vsel %vm381_vm4, %v349_v29, %v413_v38  ;;  %v353_v47 = vadd.f32 %v6857_v10, %v314_v34  ;;  %v443_v49 = vmul.f32 0.01, %v379_v36  ;;  %v293_v3 = vld [vmem:[%s6852_s12 + $0xb8] sm:$0xff] }
  0x1a   : > { %v893_v46 = vrot.slane %v6906_v42, 7  ;;  %v8687_v50 = vrot.slane %v6908_v45, 7  ;;  %v1488_v51 = vpack.c.bf16 %v6908_v45, %v6906_v42  ;;  %v315_v52 = vmul.f32 %v6843_v8, %v276_v40 }
  0x1b   : > { %vm411_vm7 = vcmp.gt.f32.partialorder %v379_v36, 0.0  ;;  %v6918_v53 = vsel %vm382_vm5, %v350_v32, %v414_v43  ;;  %v6920_v54 = vsel %vm383_vm6, %v351_v33, %v415_v44  ;;  %v6924_v56 = vadd.s32 72, %v6845_v9 }
  0x1c   : > { %v6937_v58 = vsel %vm8771_vm1, %v893_v46, %v8687_v50  ;;  %6180 = vmatmul.mubr.msk.bf16.vlgmr.msra.gmra.mrb[0].mxu1 %vm8763_vm2, %v1488_v51  ;;  %6315 = vmatprep.mubr.msk.bf16.mxu0 %vm8763_vm2, %v1488_v51  ;;  %vm384_vm8 = vcmp.gt.f32.partialorder %v352_v39, 0.0  ;;  %v6944_v61 = vadd.s32 88, %v6845_v9  ;;  %v6947_v62 = vadd.s32 104, %v6845_v9  ;;  %v284_v51 = vld [vmem:[%s6852_s12 + $0x70] sm:$0xff] }
  0x1d   : > { %8842 = vst [vmem:[#allocation3_spill] sm:$0xff] %v6937_v58  ;;  %6212 = vmatpush3.bf16.msra.mxu1 %v1768_v15  ;;  %v6951_v63 = vpack.c.bf16 %v6920_v54, %v6918_v53  ;;  %vm385_vm9 = vcmp.gt.f32.partialorder %v353_v47, 0.0  ;;  %v416_v0 = vmul.f32 0.01, %v352_v39  ;;  %v534_v1 = vand.u32 15, %v6888_v30 }
  0x1e   : > { %v6955_v2 = vsel %vm411_vm7, %v379_v36, %v443_v49  ;;  %v417_v4 = vmul.f32 0.01, %v353_v47  ;;  %v316_v5 = vmul.f32 %v6843_v8, %v277_v55  ;;  %v354_v7 = vadd.f32 %v6857_v10, %v315_v52  ;;  %6743 = vmatprep.subr.msk.bf16.mxu1 %vm8743_vm0, %v6929_v57 }
  0x1f   : > { %8843 = vst [vmem:[#allocation4_spill] sm:$0xff] %v6951_v63  ;;  %8844 = vst [vmem:[#allocation5_spill] sm:$0xff] %v6955_v2  ;;  %vm8758_vm10 = vcmp.lt.s32.totalorder %v6845_v9, 7  ;;  %6316 = vmatmul.mubr.msk.bf16.vlgmr.msra.gmra.mrb[0].mxu0 %vm8763_vm2, %v6951_v63  ;;  %6183 = vmatprep.mubr.msk.bf16.mxu1 %vm8763_vm2, %v6951_v63  ;;  %v6967_v12 = vsel %vm384_vm8, %v352_v39, %v416_v0  ;;  %v317_v13 = vmul.f32 %v6843_v8, %v278_v59  ;;  %v285_v59 = vld [vmem:[%s6852_s12 + $0x78] sm:$0xff] }
  0x20   : > { %v318_v14 = vmul.f32 %v6843_v8, %v279_v60  ;;  %v548_v15 = vand.u32 15, %v6898_v35  ;;  %v8688_v16 = vrot.slane %v6906_v42, 1  ;;  %6348 = vmatpush3.bf16.msra.mxu0 %v6875_v21  ;;  %v6975_v17 = vsel %vm385_vm9, %v353_v47, %v417_v4  ;;  %v283_v21 = vld [vmem:[%s6852_s12 + $0x68] sm:$0xff] }
  0x21   : > { %v355_v18 = vadd.f32 %v6857_v10, %v316_v5  ;;  %v8686_v23 = vrot.slane %v6955_v2, 7  ;;  %v1932_v24 = vrot.slane %v6908_v45, 1  ;;  %v6985_v25 = vpack.c.bf16 %v6975_v17, %v6967_v12  ;;  %6748 = vmatprep.subr.msk.bf16.mxu0 %vm8743_vm0, %v6862_v11 }
  0x22   : > { %vm386_vm11 = vcmp.gt.f32.partialorder %v354_v7, 0.0  ;;  %v1934_v28 = vrot.slane %v6920_v54, 1  ;;  %v418_v29 = vmul.f32 0.01, %v354_v7  ;;  %v356_v33 = vadd.f32 %v6857_v10, %v317_v13 }
  0x23   : > { %8845 = vst [vmem:[#allocation6_spill] sm:$0xff] %v6985_v25  ;;  %vm387_vm12 = vcmp.gt.f32.partialorder %v355_v18, 0.0  ;;  %v419_v32 = vmul.f32 0.01, %v355_v18  ;;  %6319 = vmatprep.mubr.msk.bf16.mxu0 %vm8763_vm2, %v6985_v25  ;;  %v357_v34 = vadd.f32 %v6857_v10, %v318_v14  ;;  %v319_v36 = vmul.f32 %v6843_v8, %v280_v19 }
  0x24   : > { %v320_v37 = vmul.f32 %v6843_v8, %v281_v20  ;;  %6184 = vmatmul.mubr.msk.bf16.gmra.mrb[4].mxu1 %vm8763_vm2, %v6985_v25  ;;  %v7000_v11 = vsel %vm386_vm11, %v354_v7, %v418_v29  ;;  %v321_v39 = vmul.f32 %v6843_v8, %v282_v26  ;;  %v322_v40 = vmul.f32 %v6843_v8, %v283_v21 }
  0x25   : > { %v7002_v38 = vsel %vm387_vm12, %v355_v18, %v419_v32  ;;  %v7012_v43 = vsel %vm8771_vm1, %v8686_v23, %v893_v46  ;;  %v1933_v52 = vrot.slane %v6918_v53, 1  ;;  %vm388_vm13 = vcmp.gt.f32.partialorder %v356_v33, 0.0 }
  0x26   : > { %8846 = vst [vmem:[#allocation7_spill] sm:$0xff] %v7012_v43  ;;  %v7018_v49 = vpack.c.bf16 %v7002_v38, %v7000_v11  ;;  %vm389_vm14 = vcmp.gt.f32.partialorder %v357_v34, 0.0  ;;  %v420_v55 = vmul.f32 0.01, %v356_v33  ;;  %v421_v46 = vmul.f32 0.01, %v357_v34 }
  0x27   : > { %v358_v60 = vadd.f32 %v6857_v10, %v319_v36  ;;  %v359_v0 = vadd.f32 %v6857_v10, %v320_v37  ;;  %v360_v4 = vadd.f32 %v6857_v10, %v321_v39  ;;  %v7034_v5 = vsel %vm8758_vm10, %v1933_v52, %v1934_v28 }
  0x28   : > { %8847 = vst [vmem:[#allocation8_spill] sm:$0xff] %v7018_v49  ;;  %6320 = vmatmul.mubr.msk.bf16.gmra.mrb[4].mxu0 %vm8763_vm2, %v7018_v49  ;;  %6187 = vmatprep.mubr.msk.bf16.mxu1 %vm8763_vm2, %v7018_v49  ;;  %8848 = vst [vmem:[#allocation9_spill] sm:$0xff] %v7034_v5  ;;  %v7036_v7 = vsel %vm388_vm13, %v356_v33, %v420_v55  ;;  %v361_v13 = vadd.f32 %v6857_v10, %v322_v40  ;;  %vm7042_vm15 = vcmp.lt.s32.totalorder %v520_v48, 15  ;;  %v8849_v18 = vmov 0  ;;  %v286_v48 = vld [vmem:[%s6852_s12 + $0x80] sm:$0xff]  ;;  %v287_v33 = vld [vmem:[%s6852_s12 + $0x88] sm:$0xff] }
  0x29   : > { %v323_v14 = vmul.f32 %v6843_v8, %v284_v51  ;;  %v8850_v18 = vsel %vm7042_vm15, 4294967295, %v8849_v18  ;;  %v1935_v20 = vrot.slane %v6967_v12, 1  ;;  %v7049_v26 = vsel %vm389_vm14, %v357_v34, %v421_v46 }
  0x2a   : > { %8851 = vst [vmem:[#allocation10_spill] sm:$0xff] %v8850_v18  ;;  %v324_v21 = vmul.f32 %v6843_v8, %v285_v59  ;;  %v7055_v32 = vpack.c.bf16 %v7049_v26, %v7036_v7  ;;  %vm390_vm3 = vcmp.gt.f32.partialorder %v358_v60, 0.0  ;;  %vm391_vm4 = vcmp.gt.f32.partialorder %v359_v0, 0.0 }
  0x2b   : > { %vm7061_vm5 = vcmp.lt.s32.totalorder %v534_v1, 15  ;;  %v8853_v36 = vmov 0  ;;  %v1936_v34 = vrot.slane %v6975_v17, 1  ;;  %v422_v37 = vmul.f32 0.01, %v358_v60 }
  0x2c   : > { %8852 = vst [vmem:[#allocation11_spill] sm:$0xff] %v7055_v32  ;;  %v8854_v36 = vsel %vm7061_vm5, 4294967295, %v8853_v36  ;;  %v423_v39 = vmul.f32 0.01, %v359_v0  ;;  %vm392_vm6 = vcmp.gt.f32.partialorder %v360_v4, 0.0  ;;  %6188 = vmatmul.mubr.msk.bf16.gmra.mrb[8].mxu1 %vm8763_vm2, %v7055_v32  ;;  %6323 = vmatprep.mubr.msk.bf16.mxu0 %vm8763_vm2, %v7055_v32  ;;  %vm393_vm7 = vcmp.gt.f32.partialorder %v361_v13, 0.0 }
  0x2d   : > { %8855 = vst [vmem:[#allocation12_spill] sm:$0xff] %v8854_v36  ;;  %v424_v40 = vmul.f32 0.01, %v360_v4  ;;  %v425_v51 = vmul.f32 0.01, %v361_v13  ;;  %v362_v30 = vadd.f32 %v6857_v10, %v323_v14  ;;  %v7075_v1 = vsel %vm8758_vm10, %v1934_v28, %v1935_v20  ;;  %v292_v36 = vld [vmem:[%s6852_s12 + $0xb0] sm:$0xff] }
  0x2e   : > { %8856 = vst [vmem:[#allocation13_spill] sm:$0xff] %v7075_v1  ;;  %v7078_v55 = vsel %vm390_vm3, %v358_v60, %v422_v37  ;;  %v7081_v59 = vsel %vm391_vm4, %v359_v0, %v423_v39  ;;  %v363_v46 = vadd.f32 %v6857_v10, %v324_v21  ;;  %v325_v14 = vmul.f32 %v6843_v8, %v286_v48  ;;  %v291_v21 = vld [vmem:[%s6852_s12 + $0xa8] sm:$0xff] }
  0x2f   : > { %v7087_v19 = vpack.c.bf16 %v7081_v59, %v7078_v55  ;;  %v326_v29 = vmul.f32 %v6843_v8, %v287_v33  ;;  %v8691_v60 = vrot.slane %v7000_v11, 1  ;;  %v7094_v37 = vsel %vm392_vm6, %v360_v4, %v424_v40 }
  0x30   : > { %v7096_v0 = vsel %vm393_vm7, %v361_v13, %v425_v51  ;;  %vm394_vm8 = vcmp.gt.f32.partialorder %v362_v30, 0.0  ;;  %vm7110_vm9 = vcmp.lt.s32.totalorder %v548_v15, 15  ;;  %v8859_v4 = vmov 0 }
  0x31   : > { %8857 = vst [vmem:[#allocation14_spill] sm:$0xff] %v7087_v19  ;;  %6324 = vmatmul.mubr.msk.bf16.gmra.mrb[8].mxu0 %vm8763_vm2, %v7087_v19  ;;  %6191 = vmatprep.mubr.msk.bf16.mxu1 %vm8763_vm2, %v7087_v19  ;;  %v7106_v48 = vpack.c.bf16 %v7096_v0, %v7094_v37  ;;  %v8860_v4 = vsel %vm7110_vm9, 4294967295, %v8859_v4  ;;  %vm395_vm11 = vcmp.gt.f32.partialorder %v363_v46, 0.0  ;;  %v426_v33 = vmul.f32 0.01, %v362_v30 }
  0x32   : > { %8861 = vst [vmem:[#allocation16_spill] sm:$0xff] %v8860_v4  ;;  %v427_v40 = vmul.f32 0.01, %v363_v46  ;;  %v364_v51 = vadd.f32 %v6857_v10, %v325_v14  ;;  %v365_v39 = vadd.f32 %v6857_v10, %v326_v29  ;;  %v1993_v35 = vsel %vm8758_vm10, %v1932_v24, %v1933_v52 }
  0x33   : > { %8858 = vst [vmem:[#allocation15_spill] sm:$0xff] %v7106_v48  ;;  %6327 = vmatprep.mubr.msk.bf16.mxu0 %vm8763_vm2, %v7106_v48  ;;  %v1994_v15 = vsel %vm8758_vm10, %v8688_v16, %v1932_v24  ;;  %v7131_v23 = vsel %vm394_vm8, %v362_v30, %v426_v33  ;;  %v2255_v29 = vsel %vm7061_vm5, %v1993_v35, 0.0  ;;  %v3743_v28 = vsel %vm7042_vm15, %v1993_v35, 0.0  ;;  %v288_v30 = vld [vmem:[%s6852_s12 + $0x90] sm:$0xff]  ;;  %v290_v35 = vld [vmem:[%s6852_s12 + $0xa0] sm:$0xff] }
  0x34   : > { %v7133_v14 = vsel %vm395_vm11, %v363_v46, %v427_v40  ;;  %6192 = vmatmul.mubr.msk.bf16.gmra.mrb[12].mxu1 %vm8763_vm2, %v7106_v48  ;;  %v289_v46 = vld [vmem:[%s6852_s12 + $0x98] sm:$0xff]  ;;  %vm396_vm12 = vcmp.gt.f32.partialorder %v364_v51, 0.0  ;;  %vm397_vm13 = vcmp.gt.f32.partialorder %v365_v39, 0.0  ;;  %v428_v40 = vmul.f32 0.01, %v364_v51 }
  0x35   : > { %v7146_v24 = vpack.c.bf16 %v7133_v14, %v7131_v23  ;;  %v429_v44 = vmul.f32 0.01, %v365_v39  ;;  %v7155_v52 = vpack.c.bf16 %v2255_v29, %v1994_v15  ;;  %v3774_v47 = vpack.c.bf16 %v3743_v28, %v1994_v15 }
  0x36   : > { %v7158_v50 = vsel %vm396_vm12, %v364_v51, %v428_v40  ;;  %v327_v22 = vmul.f32 %v6843_v8, %v288_v30  ;;  %v328_v33 = vmul.f32 %v6843_v8, %v289_v46  ;;  %v329_v28 = vmul.f32 %v6843_v8, %v290_v35 }
  0x37   : > { %8862 = vst [vmem:[#allocation17_spill] sm:$0xff] %v7146_v24  ;;  %6195 = vmatprep.mubr.msk.bf16.mxu1 %vm8763_vm2, %v7146_v24  ;;  %8863 = vst [vmem:[#allocation18_spill] sm:$0xff] %v7155_v52  ;;  %v7168_v29 = vsel %vm397_vm13, %v365_v39, %v429_v44  ;;  %v3745_v30 = vsel %vm7061_vm5, %v7075_v1, 0.0  ;;  %v330_v44 = vmul.f32 %v6843_v8, %v291_v21  ;;  %v8869_v16 = vrot.slane %v7002_v38, 1 }
  0x38   : > { %v7174_v15 = vpack.c.bf16 %v7168_v29, %v7158_v50  ;;  %v366_v46 = vadd.f32 %v6857_v10, %v327_v22  ;;  %v367_v40 = vadd.f32 %v6857_v10, %v328_v33  ;;  %v368_v39 = vadd.f32 %v6857_v10, %v329_v28 }
  0x39   : > { %6328 = vmatmul.mubr.msk.bf16.gmra.mrb[12].mxu0 %vm8763_vm2, %v7146_v24  ;;  %v7190_v35 = vsel %vm8758_vm10, %v1936_v34, %v8691_v60  ;;  %v7198_v22 = vsel %vm8758_vm10, %v1935_v20, %v1936_v34  ;;  %v3775_v21 = vpack.c.bf16 %v3745_v30, %v7034_v5  ;;  %v369_v28 = vadd.f32 %v6857_v10, %v330_v44  ;;  %v7223_v34 = vld [vmem:[%s8682_s3 + $0x1c] sm:$0xf] }
  0x3a   : > { %8864 = vst [vmem:[#allocation19_spill] sm:$0xff] %v7174_v15  ;;  %6349 = vmatprep.mubr.msk.bf16.mxu0 %vm8763_vm2, %v3774_v47  ;;  %8865 = vst [vmem:[#allocation20_spill] sm:$0xff] %v7190_v35  ;;  %vm398_vm14 = vcmp.gt.f32.partialorder %v366_v46, 0.0  ;;  %v430_v13 = vmul.f32 0.01, %v366_v46  ;;  %v3747_v47 = vsel %vm7110_vm9, %v7190_v35, 0.0 }
  0x3b   : > { %8866 = vst [vmem:[#allocation21_spill] sm:$0xff] %v7198_v22  ;;  %vm399_vm3 = vcmp.gt.f32.partialorder %v367_v40, 0.0  ;;  %v431_v33 = vmul.f32 0.01, %v367_v40  ;;  %vm400_vm4 = vcmp.gt.f32.partialorder %v368_v39, 0.0  ;;  %vm401_vm6 = vcmp.gt.f32.partialorder %v369_v28, 0.0 }
  0x3c   : > { %6196 = vmatmul.mubr.msk.bf16.gmra.mrb[16].mxu1 %vm8763_vm2, %v7174_v15  ;;  %v7208_v6 = vsel %vm398_vm14, %v366_v46, %v430_v13  ;;  %v432_v20 = vmul.f32 0.01, %v368_v39  ;;  %v3776_v30 = vpack.c.bf16 %v3747_v47, %v7198_v22  ;;  %v433_v46 = vmul.f32 0.01, %v369_v28  ;;  %v294_v15 = vld [vmem:[%s6852_s12 + $0xc0] sm:$0xff] }
  0x3d   : > { %v7211_v51 = vsel %vm399_vm3, %v367_v40, %v431_v33  ;;  %v8868_v60 = vrot.slane %v7036_v7, 1  ;;  %v8875_v33 = vmov 0  ;;  %v333_v40 = vmul.f32 %v6843_v8, %v294_v15 }
  0x3e   : > { %v7218_v13 = vpack.c.bf16 %v7211_v51, %v7208_v6  ;;  %v7228_v47 = vsel %vm400_vm4, %v368_v39, %v432_v20  ;;  %v7246_v39 = vsel %vm401_vm6, %v369_v28, %v433_v46  ;;  %v8872_v20 = vrot.slane %v7000_v11, 1 }
  0x3f   : > { %v7236_v44 = vsel %vm8758_vm10, %v8869_v16, %v8868_v60  ;;  %v8874_v60 = vand.u32 15, %v6904_v41  ;;  %v7267_v46 = vpack.c.bf16 %v7246_v39, %v7228_v47  ;;  %v8880_v15 = vrot.slane %v7049_v26, 1 }
  0x40   : > { %8867 = vst [vmem:[#allocation22_spill] sm:$0xff] %v7218_v13  ;;  %8870 = vst [vmem:[#allocation23_spill] sm:$0xff] %v7236_v44  ;;  %6199 = vmatprep.mubr.msk.bf16.mxu1 %vm8763_vm2, %v7218_v13  ;;  %v576_v13 = vand.u32 15, %v6924_v56  ;;  %v8883_v56 = vrot.slane %v7036_v7, 1  ;;  %v8889_v32 = vrot.slane %v7094_v37, 1  ;;  %v8890_v49 = vrot.slane %v7081_v59, 1 }
  0x41   : > { %6350 = vmatmul.mubr.msk.bf16.vlgmr.msra.gmra.mrb[0].mxu0 %vm8763_vm2, %v3775_v21  ;;  %v8871_v21 = vmov %v8869_v16  ;;  %vm7258_vm7 = vcmp.lt.s32.totalorder %v8874_v60, 15  ;;  %8878 = vst [vmem:[#allocation26_spill] sm:$0xff] %v7267_v46  ;;  %v332_v60 = vmul.f32 %v6843_v8, %v293_v3  ;;  %v8879_v3 = vrot.slane %v7078_v55, 1 }
  0x42   : > { %6382 = vmatpush3.bf16.msra.mxu0 %v6892_v31  ;;  %v7254_v16 = vsel %vm8758_vm10, %v8872_v20, %v8871_v21  ;;  %v8876_v33 = vsel %vm7258_vm7, 4294967295, %v8875_v33  ;;  %v295_v31 = vld [vmem:[%s6852_s12 + $0xc8] sm:$0xff]  ;;  %6353 = vmatprep.mubr.msk.bf16.mxu0 %vm8763_vm2, %v3776_v30  ;;  %v3749_v21 = vsel %vm7258_vm7, %v7236_v44, 0.0  ;;  %v331_v20 = vmul.f32 %v6843_v8, %v292_v36 }
  0x43   : > { %8873 = vst [vmem:[#allocation24_spill] sm:$0xff] %v7254_v16  ;;  %8877 = vst [vmem:[#allocation25_spill] sm:$0xff] %v8876_v33  ;;  %6749 = vmatprep.subr.msk.bf16.mxu0 %vm8743_vm0, %v7223_v34  ;;  %v3777_v30 = vpack.c.bf16 %v3749_v21, %v7254_v16  ;;  %v334_v24 = vmul.f32 %v6843_v8, %v295_v31  ;;  %v371_v41 = vadd.f32 %v6857_v10, %v332_v60  ;;  %vm8982_vm5 = vcmask 64512  }
  0x44   : > { %6200 = vmatmul.mubr.msk.bf16.gmra.mrb[20].mxu1 %vm8763_vm2, %v7267_v46  ;;  %v370_v48 = vadd.f32 %v6857_v10, %v331_v20  ;;  %v372_v36 = vadd.f32 %v6857_v10, %v333_v40  ;;  %v7294_v28 = vsel %vm8758_vm10, %v8880_v15, %v8879_v3  ;;  %v8882_v31 = vmov %v8880_v15 }
  0x45   : > { %8881 = vst [vmem:[#allocation27_spill] sm:$0xff] %v7294_v28  ;;  %v373_v21 = vadd.f32 %v6857_v10, %v334_v24  ;;  %v7303_v20 = vsel %vm8758_vm10, %v8883_v56, %v8882_v31  ;;  %vm7305_vm8 = vcmp.lt.s32.totalorder %v576_v13, 15  ;;  %v8885_v40 = vmov 0 }
  0x46   : > { %8884 = vst [vmem:[#allocation28_spill] sm:$0xff] %v7303_v20  ;;  %v8886_v40 = vsel %vm7305_vm8, 4294967295, %v8885_v40  ;;  %v590_v60 = vand.u32 15, %v6944_v61  ;;  %vm402_vm11 = vcmp.gt.f32.partialorder %v370_v48, 0.0  ;;  %vm403_vm12 = vcmp.gt.f32.partialorder %v371_v41, 0.0 }
  0x47   : > { %8887 = vst [vmem:[#allocation29_spill] sm:$0xff] %v8886_v40  ;;  %v434_v3 = vmul.f32 0.01, %v370_v48  ;;  %v435_v24 = vmul.f32 0.01, %v371_v41  ;;  %vm404_vm13 = vcmp.gt.f32.partialorder %v372_v36, 0.0  ;;  %v8895_v63 = vmov %v8890_v49 }
  0x48   : > { %vm405_vm14 = vcmp.gt.f32.partialorder %v373_v21, 0.0  ;;  %v436_v15 = vmul.f32 0.01, %v372_v36  ;;  %v437_v31 = vmul.f32 0.01, %v373_v21  ;;  %v3751_v61 = vsel %vm7305_vm8, %v7294_v28, 0.0 }
  0x49   : > { %6354 = vmatmul.mubr.msk.bf16.gmra.mrb[4].mxu0 %vm8763_vm2, %v3777_v30  ;;  %v7312_v56 = vsel %vm402_vm11, %v370_v48, %v434_v3  ;;  %v7314_v46 = vsel %vm403_vm12, %v371_v41, %v435_v24  ;;  %v7330_v48 = vsel %vm8758_vm10, %v8890_v49, %v8889_v32  ;;  %vm7332_vm3 = vcmp.lt.s32.totalorder %v590_v60, 15  ;;  %v296_v3 = vld [vmem:[%s6852_s12 + $0xd0] sm:$0xff]  ;;  %v297_v24 = vld [vmem:[%s6852_s12 + $0xd8] sm:$0xff]  ;;  %v298_v32 = vld [vmem:[%s6852_s12 + $0xe0] sm:$0xff] }
  0x4a   : > { %v7322_v30 = vpack.c.bf16 %v7314_v46, %v7312_v56  ;;  %8891 = vst [vmem:[#allocation31_spill] sm:$0xff] %v7330_v48  ;;  %v8892_v41 = vmov 0  ;;  %v7338_v13 = vsel %vm404_vm13, %v372_v36, %v436_v15  ;;  %v7340_v19 = vsel %vm405_vm14, %v373_v21, %v437_v31  ;;  %v299_v60 = vld [vmem:[%s6852_s12 + $0xe8] sm:$0xff] }
  0x4b   : > { %v8893_v41 = vsel %vm7332_vm3, 4294967295, %v8892_v41  ;;  %v3778_v25 = vpack.c.bf16 %v3751_v61, %v7303_v20  ;;  %v8896_v28 = vrot.slane %v7078_v55, 1  ;;  %v7360_v21 = vpack.c.bf16 %v7340_v19, %v7338_v13 }
  0x4c   : > { %8888 = vst [vmem:[#allocation30_spill] sm:$0xff] %v7322_v30  ;;  %8894 = vst [vmem:[#allocation32_spill] sm:$0xff] %v8893_v41  ;;  %6203 = vmatprep.mubr.msk.bf16.mxu1 %vm8763_vm2, %v7322_v30  ;;  %v336_v31 = vmul.f32 %v6843_v8, %v297_v24  ;;  %v337_v16 = vmul.f32 %v6843_v8, %v298_v32  ;;  %v338_v22 = vmul.f32 %v6843_v8, %v299_v60 }
  0x4d   : > { %v7349_v49 = vsel %vm8758_vm10, %v8896_v28, %v8895_v63  ;;  %8898 = vst [vmem:[#allocation34_spill] sm:$0xff] %v7360_v21  ;;  %6357 = vmatprep.mubr.msk.bf16.mxu0 %vm8763_vm2, %v3778_v25  ;;  %v3753_v63 = vsel %vm7332_vm3, %v7330_v48, 0.0  ;;  %v335_v28 = vmul.f32 %v6843_v8, %v296_v3  ;;  %6204 = vmatmul.mubr.msk.bf16.gmra.mrb[24].mxu1 %vm8763_vm2, %v7360_v21  ;;  %v604_v15 = vand.u32 15, %v6947_v62 }
  0x4e   : > { %8897 = vst [vmem:[#allocation33_spill] sm:$0xff] %v7349_v49  ;;  %v3779_v61 = vpack.c.bf16 %v3753_v63, %v7349_v49  ;;  %v375_v36 = vadd.f32 %v6857_v10, %v336_v31  ;;  %v8899_v30 = vrot.slane %v7131_v23, 1  ;;  %v8900_v3 = vrot.slane %v7096_v0, 1 }
  0x4f   : > { %v374_v25 = vadd.f32 %v6857_v10, %v335_v28  ;;  %v8903_v32 = vrot.slane %v7094_v37, 1  ;;  %v376_v62 = vadd.f32 %v6857_v10, %v337_v16  ;;  %v377_v28 = vadd.f32 %v6857_v10, %v338_v22 }
  0x50   : > { %v7383_v24 = vsel %vm8758_vm10, %v8900_v3, %v8899_v30  ;;  %v8902_v63 = vmov %v8900_v3  ;;  %vm7396_vm4 = vcmp.lt.s32.totalorder %v604_v15, 15  ;;  %v8905_v31 = vmov 0 }
  0x51   : > { %8901 = vst [vmem:[#allocation35_spill] sm:$0xff] %v7383_v24  ;;  %v7391_v60 = vsel %vm8758_vm10, %v8903_v32, %v8902_v63  ;;  %6358 = vmatmul.mubr.msk.bf16.gmra.mrb[8].mxu0 %vm8763_vm2, %v3779_v61  ;;  %v8906_v31 = vsel %vm7396_vm4, 4294967295, %v8905_v31  ;;  %v492_v30 = vadd.s32 120, %v6845_v9  ;;  %vm406_vm6 = vcmp.gt.f32.partialorder %v374_v25, 0.0 }
  0x52   : > { %8904 = vst [vmem:[#allocation36_spill] sm:$0xff] %v7391_v60  ;;  %8907 = vst [vmem:[#allocation37_spill] sm:$0xff] %v8906_v31  ;;  %vm407_vm11 = vcmp.gt.f32.partialorder %v375_v36, 0.0  ;;  %v438_v3 = vmul.f32 0.01, %v374_v25  ;;  %vm408_vm12 = vcmp.gt.f32.partialorder %v376_v62, 0.0 }
  0x53   : > { %v439_v21 = vmul.f32 0.01, %v375_v36  ;;  %vm409_vm13 = vcmp.gt.f32.partialorder %v377_v28, 0.0  ;;  %v440_v63 = vmul.f32 0.01, %v376_v62  ;;  %v3755_v22 = vsel %vm7396_vm4, %v7383_v24, 0.0 }
  0x54   : > { %v441_v32 = vmul.f32 0.01, %v377_v28  ;;  %v7401_v49 = vsel %vm406_vm6, %v374_v25, %v438_v3  ;;  %v618_v16 = vand.u32 15, %v492_v30  ;;  %v8914_v20 = vrot.slane %v7131_v23, 1 }
  0x55   : > { %v7403_v61 = vsel %vm407_vm11, %v375_v36, %v439_v21  ;;  %v7416_v3 = vsel %vm408_vm12, %v376_v62, %v440_v63  ;;  %v3780_v21 = vpack.c.bf16 %v3755_v22, %v7391_v60  ;;  %v8911_v63 = vrot.slane %v7133_v14, 1 }
  0x56   : > { %v7413_v41 = vpack.c.bf16 %v7403_v61, %v7401_v49  ;;  %v7418_v36 = vsel %vm409_vm13, %v377_v28, %v441_v32  ;;  %v8910_v28 = vrot.slane %v7158_v50, 1  ;;  %vm7448_vm14 = vcmp.lt.s32.totalorder %v618_v16, 15 }
  0x57   : > { %v7427_v48 = vpack.c.bf16 %v7418_v36, %v7416_v3  ;;  %6361 = vmatprep.mubr.msk.bf16.mxu0 %vm8763_vm2, %v3780_v21  ;;  %v8913_v22 = vmov %v8911_v63  ;;  %v8916_v62 = vmov 0  ;;  %v8919_v15 = vrot.slane %v7208_v6, 1 }
  0x58   : > { %8908 = vst [vmem:[#allocation38_spill] sm:$0xff] %v7413_v41  ;;  %6207 = vmatprep.mubr.msk.bf16.mxu1 %vm8763_vm2, %v7413_v41  ;;  %v7438_v32 = vsel %vm8758_vm10, %v8911_v63, %v8910_v28  ;;  %v7446_v25 = vsel %vm8758_vm10, %v8914_v20, %v8913_v22  ;;  %v8917_v62 = vsel %vm7448_vm14, 4294967295, %v8916_v62  ;;  %v479_v28 = vadd.s32 16, %v6845_v9 }
  0x59   : > { %8909 = vst [vmem:[#allocation39_spill] sm:$0xff] %v7427_v48  ;;  %8912 = vst [vmem:[#allocation40_spill] sm:$0xff] %v7438_v32  ;;  %6208 = vmatmul.mubr.msk.bf16.gmra.mrb[28].mxu1 %vm8763_vm2, %v7427_v48  ;;  %v3757_v21 = vsel %vm7448_vm14, %v7438_v32, 0.0  ;;  %v494_v63 = vadd.s32 136, %v6845_v9  ;;  %v8920_v20 = vrot.slane %v7168_v29, 1  ;;  %v8922_v30 = vmov 0.0|0.0  }
  0x5a   : > { %8915 = vst [vmem:[#allocation41_spill] sm:$0xff] %v7446_v25  ;;  %8918 = vst [vmem:[#allocation42_spill] sm:$0xff] %v8917_v62  ;;  %v3781_v22 = vpack.c.bf16 %v3757_v21, %v7446_v25  ;;  %6213 = vmatprep.mubr.bf16.mxu1 %v8922_v30  ;;  %v8924_v41 = vrot.slane %v7158_v50, 1  ;;  %v2351_v32 = vsel %vm8743_vm0, %v6929_v57, 0  ;;  %v496_v62 = vadd.s32 152, %v6845_v9 }
  0x5b   : > { %v7465_v16 = vsel %vm8758_vm10, %v8920_v20, %v8919_v15  ;;  %v8923_v48 = vmov %v8920_v20  ;;  %v527_v24 = vand.u32 15, %v479_v28  ;;  %v960_v15 = vadd.s32 4294967279, %v479_v28 }
  0x5c   : > { %8921 = vst [vmem:[#allocation43_spill] sm:$0xff] %v7465_v16  ;;  %v7475_v60 = vsel %vm8758_vm10, %v8924_v41, %v8923_v48  ;;  %v632_v20 = vand.u32 15, %v494_v63  ;;  %v8926_v21 = vrot.slane %v7228_v47, 1  ;;  %v8927_v30 = vrot.slane %v7211_v51, 1  ;;  %6362 = vmatmul.mubr.msk.bf16.gmra.mrb[12].mxu0 %vm8763_vm2, %v3781_v22 }
  0x5d   : > { %8925 = vst [vmem:[#allocation44_spill] sm:$0xff] %v7475_v60  ;;  %v646_v48 = vand.u32 15, %v496_v62  ;;  %v8930_v57 = vrot.slane %v7208_v6, 1  ;;  %v481_v28 = vadd.s32 32, %v6845_v9  ;;  %v8932_v63 = vrot.slane %v6920_v54, 7 }
  0x5e   : > { %v7486_v25 = vsel %vm8758_vm10, %v8927_v30, %v8926_v21  ;;  %v8929_v41 = vmov %v8927_v30  ;;  %v8933_v40 = vrot.slane %v6918_v53, 7  ;;  %vm992_vm6 = vcmp.ge.s32.totalorder %v960_v15, 0 }
  0x5f   : > { %8928 = vst [vmem:[#allocation45_spill] sm:$0xff] %v7486_v25  ;;  %v7495_v31 = vsel %vm8758_vm10, %v8930_v57, %v8929_v41  ;;  %vm7506_vm11 = vcmp.gt.s32.totalorder %v527_v24, 0  ;;  %vm7510_vm12 = vcmp.lt.s32.totalorder %v632_v20, 15  ;;  %v8936_v22 = vmov 0 }
  0x60   : > { %8931 = vst [vmem:[#allocation46_spill] sm:$0xff] %v7495_v31  ;;  %v7504_v30 = vsel %vm8771_vm1, %v8933_v40, %v8932_v63  ;;  %v8937_v22 = vsel %vm7510_vm12, 4294967295, %v8936_v22  ;;  %v8939_v21 = vmov %v8933_v40  ;;  %v8940_v41 = vrot.slane %v6908_v45, 7  ;;  %vm1120_vm13 = vmand %vm992_vm6, %vm7506_vm11 }
  0x61   : > { %8938 = vst [vmem:[#allocation47_spill] sm:$0xff] %v8937_v22  ;;  %v3759_v40 = vsel %vm7510_vm12, %v7465_v16, 0.0  ;;  %vm7527_vm0 = vcmp.lt.s32.totalorder %v646_v48, 15  ;;  %v8941_v24 = vmov 0  ;;  %v541_v15 = vand.u32 15, %v481_v28 }
  0x62   : > { %v7520_v57 = vsel %vm8771_vm1, %v8940_v41, %v8939_v21  ;;  %v8942_v24 = vsel %vm7527_vm0, 4294967295, %v8941_v24  ;;  %v1216_v53 = vsel %vm1120_vm13, %v7012_v43, 0.0  ;;  %v3782_v20 = vpack.c.bf16 %v3759_v40, %v7475_v60 }
  0x63   : > { %8943 = vst [vmem:[#allocation48_spill] sm:$0xff] %v8942_v24  ;;  %v2772_v45 = vsel %vm7506_vm11, %v7520_v57, 0.0  ;;  %v3761_v63 = vsel %vm7527_vm0, %v7486_v25, 0.0  ;;  %v1247_v48 = vpack.c.bf16 %v6937_v58, %v1216_v53  ;;  %vm7544_vm6 = vcmp.gt.s32.totalorder %v541_v15, 0 }
  0x64   : > { %v7540_v21 = vpack.c.bf16 %v7504_v30, %v2772_v45  ;;  %v3783_v41 = vpack.c.bf16 %v3761_v63, %v7495_v31  ;;  %v483_v16 = vadd.s32 48, %v6845_v9  ;;  %6365 = vmatprep.mubr.msk.bf16.mxu0 %vm8763_vm2, %v3782_v20  ;;  %v1218_v40 = vsel %vm7544_vm6, %v7520_v57, 0.0 }
  0x65   : > { %v8947_v60 = vrot.slane %v6975_v17, 7  ;;  %v8948_v45 = vrot.slane %v6967_v12, 7  ;;  %v8951_v63 = vrot.slane %v6920_v54, 7  ;;  %v498_v20 = vadd.s32 168, %v6845_v9  ;;  %6214 = vmatmul.mubr.msk.bf16.vlgmr.msra.gmra.mrb[0].mxu1 %vm8763_vm2, %v1247_v48 }
  0x66   : > { %8944 = vst [vmem:[#allocation49_spill] sm:$0xff] %v7540_v21  ;;  %v1248_v31 = vpack.c.bf16 %v7504_v30, %v1218_v40  ;;  %v555_v25 = vand.u32 15, %v483_v16  ;;  %v8954_v12 = vrot.slane %v7246_v39, 1  ;;  %6246 = vmatpush3.bf16.msra.mxu1 %v2351_v32  ;;  %v8957_v40 = vrot.slane %v7228_v47, 1  ;;  %6366 = vmatmul.mubr.msk.bf16.gmra.mrb[16].mxu0 %vm8763_vm2, %v3783_v41  ;;  %v9112_v32 = vld [vmem:[#allocation16_spill] sm:$0xff] }
  0x67   : > { %v7559_v53 = vsel %vm8771_vm1, %v8948_v45, %v8947_v60  ;;  %v8950_v15 = vmov %v8948_v45  ;;  %v8953_v45 = vrot.slane %v7312_v56, 1  ;;  %v660_v48 = vand.u32 15, %v498_v20 }
  0x68   : > { %8949 = vst [vmem:[#allocation50_spill] sm:$0xff] %v7559_v53  ;;  %v7567_v21 = vsel %vm8771_vm1, %v8951_v63, %v8950_v15  ;;  %v7586_v15 = vld [vmem:[%s8682_s3 + $0xc] sm:$0xf]  ;;  %v8956_v62 = vmov %v8954_v12  ;;  %6217 = vmatprep.mubr.msk.bf16.mxu1 %vm8763_vm2, %v1248_v31  ;;  %v8960_v20 = vrot.slane %v7338_v13, 1  ;;  %v485_v31 = vadd.s32 64, %v6845_v9 }
  0x69   : > { %8952 = vst [vmem:[#allocation51_spill] sm:$0xff] %v7567_v21  ;;  %v4262_v60 = vsel %vm7506_vm11, %v7567_v21, 0.0  ;;  %v7581_v54 = vsel %vm8758_vm10, %v8954_v12, %v8953_v45  ;;  %8955 = vst [vmem:[#allocation52_spill] sm:$0xff] %v7586_v15  ;;  %v7597_v63 = vsel %vm8758_vm10, %v8957_v40, %v8956_v62  ;;  %v500_v45 = vadd.s32 184, %v6845_v9 }
  0x6a   : > { %v7589_v16 = vpack.c.bf16 %v7559_v53, %v4262_v60  ;;  %vm7602_vm11 = vcmp.gt.s32.totalorder %v555_v25, 0  ;;  %v8961_v60 = vrot.slane %v7314_v46, 1  ;;  %v8964_v40 = vrot.slane %v7312_v56, 1 }
  0x6b   : > { %v1220_v25 = vsel %vm7602_vm11, %v7567_v21, 0.0  ;;  %vm7626_vm13 = vcmp.lt.s32.totalorder %v660_v48, 15  ;;  %v8966_v22 = vmov 0  ;;  %v8970_v44 = vrot.slane %v7000_v11, 7 }
  0x6c   : > { %v7612_v12 = vsel %vm8758_vm10, %v8961_v60, %v8960_v20  ;;  %v8963_v62 = vmov %v8961_v60  ;;  %v8967_v22 = vsel %vm7626_vm13, 4294967295, %v8966_v22  ;;  %v674_v20 = vand.u32 15, %v500_v45 }
  0x6d   : > { %8962 = vst [vmem:[#allocation53_spill] sm:$0xff] %v7612_v12  ;;  %v7620_v41 = vsel %vm8758_vm10, %v8964_v40, %v8963_v62  ;;  %8968 = vst [vmem:[#allocation55_spill] sm:$0xff] %v8967_v22  ;;  %v8969_v60 = vrot.slane %v7002_v38, 7  ;;  %vm8971_vm10 = vcmask 1043456   ;;  %v1249_v62 = vpack.c.bf16 %v7559_v53, %v1220_v25 }
  0x6e   : > { %8965 = vst [vmem:[#allocation54_spill] sm:$0xff] %v7620_v41  ;;  %6744 = vmatprep.subr.msk.bf16.mxu1 %vm8971_vm10, %v7586_v15  ;;  %v3763_v48 = vsel %vm7626_vm13, %v7581_v54, 0.0  ;;  %v569_v40 = vand.u32 15, %v485_v31  ;;  %v8972_v45 = vmov %v8970_v44  ;;  %v8973_v33 = vrot.slane %v6975_v17, 7  ;;  %v9116_v15 = vld [vmem:[#allocation7_spill] sm:$0xff] }
  0x6f   : > { %v7636_v24 = vsel %vm8771_vm1, %v8970_v44, %v8969_v60  ;;  %v3784_v44 = vpack.c.bf16 %v3763_v48, %v7597_v63  ;;  %vm7653_vm2 = vcmp.lt.s32.totalorder %v674_v20, 15  ;;  %v487_v25 = vadd.s32 80, %v6845_v9 }
  0x70   : > { %v7650_v35 = vsel %vm8771_vm1, %v8973_v33, %v8972_v45  ;;  %v8976_v22 = vrot.slane %v7049_v26, 7  ;;  %v8977_v31 = vrot.slane %v7036_v7, 7  ;;  %v3765_v17 = vsel %vm7653_vm2, %v7612_v12, 0.0 }
  0x71   : > { %vm7669_vm10 = vcmp.gt.s32.totalorder %v569_v40, 0  ;;  %v8981_v48 = vrot.slane %v7002_v38, 7  ;;  %v502_v52 = vadd.s32 200, %v6845_v9  ;;  %6369 = vmatprep.mubr.msk.bf16.mxu0 %vm8982_vm5, %v3784_v44  ;;  %v8983_v12 = vrot.slane %v7401_v49, 1 }
  0x72   : > { %v7664_v11 = vsel %vm8771_vm1, %v8977_v31, %v8976_v22  ;;  %v8980_v20 = vmov %v8977_v31  ;;  %v3785_v22 = vpack.c.bf16 %v3765_v17, %v7620_v41  ;;  %v1222_v40 = vsel %vm7669_vm10, %v7650_v35, 0.0 }
  0x73   : > { %v7679_v45 = vsel %vm8771_vm1, %v8981_v48, %v8980_v20  ;;  %v583_v31 = vand.u32 15, %v487_v25  ;;  %v8984_v7 = vrot.slane %v7340_v19, 1  ;;  %vm8985_vm13 = vcmp.lt.s32.totalorder %v6845_v9, 7  ;;  %vm8986_vm1 = vmmov %vm8982_vm5 }
  0x74   : > { %6218 = vmatmul.mubr.msk.bf16.gmra.mrb[4].mxu1 %vm8986_vm1, %v1249_v62  ;;  %v1250_v44 = vpack.c.bf16 %v7636_v24, %v1222_v40  ;;  %v688_v20 = vand.u32 15, %v502_v52  ;;  %v8988_v48 = vrot.slane %v7338_v13, 1  ;;  %vm8989_vm5 = vmmov %vm8985_vm13  ;;  %v504_v41 = vadd.s32 216, %v6845_v9 }
  0x75   : > { %v7693_v38 = vsel %vm8985_vm13, %v8984_v7, %v8983_v12  ;;  %v8987_v17 = vmov %v8984_v7  ;;  %vm7706_vm12 = vcmp.gt.s32.totalorder %v583_v31, 0  ;;  %v8992_v12 = vrot.slane %v7416_v3, 1  ;;  %vm8994_vm1 = vmmov %vm8989_vm5 }
  0x76   : > { %v7703_v25 = vsel %vm8989_vm5, %v8988_v48, %v8987_v17  ;;  %v8993_v62 = vrot.slane %v7403_v61, 1  ;;  %v8997_v7 = vrot.slane %v7401_v49, 1  ;;  %vm8998_vm13 = vmmov %vm8994_vm1  ;;  %v489_v31 = vadd.s32 96, %v6845_v9 }
  0x77   : > { %vm9000_vm5 = vcmask 64512   ;;  %v1224_v48 = vsel %vm7706_vm12, %v7679_v45, 0.0  ;;  %v9005_v5 = vrot.slane %v7081_v59, 7  ;;  %vm9033_vm0 = vcmp.lt.s32.totalorder %v6845_v9, 7 }
  0x78   : > { %v7716_v52 = vsel %vm8994_vm1, %v8993_v62, %v8992_v12  ;;  %v8996_v40 = vmov %v8993_v62  ;;  %6370 = vmatmul.mubr.msk.bf16.gmra.mrb[20].mxu0 %vm9000_vm5, %v3785_v22  ;;  %vm9001_vm14 = vmmov %vm9000_vm5  ;;  %vm7732_vm1 = vcmp.lt.s32.totalorder %v688_v20, 15  ;;  %v9002_v12 = vmov 0  ;;  %v300_v22 = vld [vmem:[%s6852_s12 + $0xf0] sm:$0xff] }
  0x79   : > { %8995 = vst [vmem:[#allocation56_spill] sm:$0xff] %v7716_v52  ;;  %v7724_v17 = vsel %vm8998_vm13, %v8997_v7, %v8996_v40  ;;  %6221 = vmatprep.mubr.msk.bf16.mxu1 %vm9001_vm14, %v1250_v44  ;;  %v9003_v12 = vsel %vm7732_vm1, 4294967295, %v9002_v12  ;;  %v702_v62 = vand.u32 15, %v504_v41  ;;  %v9006_v40 = vrot.slane %v7078_v55, 7 }
  0x7a   : > { %8999 = vst [vmem:[#allocation57_spill] sm:$0xff] %v7724_v17  ;;  %9004 = vst [vmem:[#allocation58_spill] sm:$0xff] %v9003_v12  ;;  %vm9007_vm13 = vcmp.lt.s32.totalorder %v6845_v9, 1  ;;  %v1251_v44 = vpack.c.bf16 %v7664_v11, %v1224_v48  ;;  %v3767_v58 = vsel %vm7732_vm1, %v7693_v38, 0.0  ;;  %v597_v20 = vand.u32 15, %v489_v31 }
  0x7b   : > { %v7742_v7 = vsel %vm9007_vm13, %v9006_v40, %v9005_v5  ;;  %v9008_v43 = vmov %v9006_v40  ;;  %v9009_v41 = vrot.slane %v7049_v26, 7  ;;  %vm9010_vm14 = vmmov %vm9007_vm13  ;;  %v3786_v1 = vpack.c.bf16 %v3767_v58, %v7703_v25  ;;  %v9172_v5 = vld [vmem:[#allocation36_spill] sm:$0xff] }
  0x7c   : > { %vm7758_vm5 = vcmp.lt.s32.totalorder %v702_v62, 15  ;;  %v491_v48 = vadd.s32 112, %v6845_v9  ;;  %v9013_v40 = vrot.slane %v7096_v0, 7  ;;  %v9014_v31 = vrot.slane %v7094_v37, 7  ;;  %vm9019_vm1 = vmmov %vm9007_vm13 }
  0x7d   : > { %v7755_v4 = vsel %vm9010_vm14, %v9009_v41, %v9008_v43  ;;  %v3769_v43 = vsel %vm7758_vm5, %v7716_v52, 0.0  ;;  %vm7774_vm14 = vcmp.gt.s32.totalorder %v597_v20, 0  ;;  %v9018_v62 = vrot.slane %v7081_v59, 7 }
  0x7e   : > { %v7769_v55 = vsel %vm9007_vm13, %v9014_v31, %v9013_v40  ;;  %v9017_v26 = vmov %v9014_v31  ;;  %v339_v12 = vmul.f32 %v6843_v8, %v300_v22  ;;  %vm9020_vm13 = vcmask 64512  }
  0x7f   : > { %v7784_v41 = vsel %vm9019_vm1, %v9018_v62, %v9017_v26  ;;  %6373 = vmatprep.mubr.msk.bf16.mxu0 %vm9020_vm13, %v3786_v1  ;;  %v3787_v40 = vpack.c.bf16 %v3769_v43, %v7724_v17  ;;  %v1226_v20 = vsel %vm7774_vm14, %v7755_v4, 0.0  ;;  %v611_v31 = vand.u32 15, %v491_v48  ;;  %6222 = vmatmul.mubr.msk.bf16.gmra.mrb[8].mxu1 %vm9020_vm13, %v1251_v44  ;;  %vm9027_vm3 = vmmov %vm9020_vm13 }
  0x80   : > { %v7793_v52 = vadd.s32 232, %v6845_v9  ;;  %v1252_v59 = vpack.c.bf16 %v7742_v7, %v1226_v20  ;;  %v378_v37 = vadd.f32 %v6857_v10, %v339_v12  ;;  %v9022_v26 = vrot.slane %v7418_v36, 1  ;;  %vm9028_vm13 = vmmov %vm9027_vm3 }
  0x81   : > { %v9023_v8 = vrot.slane %v7416_v3, 1  ;;  %vm9024_vm1 = vcmp.lt.s32.totalorder %v6845_v9, 7  ;;  %v508_v22 = vadd.s32 248, %v6845_v9  ;;  %vm7807_vm4 = vcmp.gt.s32.totalorder %v611_v31, 0  ;;  %6374 = vmatmul.mubr.msk.bf16.gmra.mrb[24].mxu0 %vm9028_vm13, %v3787_v40 }
  0x82   : > { %9021 = vst [vmem:[#allocation59_spill] sm:$0xff] %v7793_v52  ;;  %v9025_v48 = vmov 0  ;;  %v716_v43 = vand.u32 15, %v7793_v52  ;;  %v1962_v10 = vrot.slane %v6955_v2, 1  ;;  %v493_v12 = vadd.s32 128, %v6845_v9  ;;  %6225 = vmatprep.mubr.msk.bf16.mxu1 %vm9027_vm3, %v1252_v59 }
  0x83   : > { %v7803_v1 = vsel %vm9024_vm1, %v9023_v8, %v9022_v26  ;;  %v9026_v48 = vsel %vm7807_vm4, 4294967295, %v9025_v48  ;;  %v1228_v62 = vsel %vm7807_vm4, %v7784_v41, 0.0  ;;  %vm410_vm1 = vcmp.gt.f32.partialorder %v378_v37, 0.0 }
  0x84   : > { %v442_v20 = vmul.f32 0.01, %v378_v37  ;;  %v730_v26 = vand.u32 15, %v508_v22  ;;  %v1253_v44 = vpack.c.bf16 %v7769_v55, %v1228_v62  ;;  %vm7820_vm8 = vcmp.lt.s32.totalorder %v716_v43, 15 }
  0x85   : > { %v9029_v31 = vmov 0  ;;  %v9032_v8 = vrot.slane %v6906_v42, 1  ;;  %v3549_v52 = vadd.s32 1, %v508_v22  ;;  %v9036_v2 = vmov 0 }
  0x86   : > { %v9030_v31 = vsel %vm7820_vm8, 4294967295, %v9029_v31  ;;  %v7830_v17 = vsel %vm410_vm1, %v378_v37, %v442_v20  ;;  %vm7832_vm3 = vcmp.lt.s32.totalorder %v730_v26, 15  ;;  %v625_v40 = vand.u32 15, %v493_v12 }
  0x87   : > { %9031 = vst [vmem:[#allocation60_spill] sm:$0xff] %v9030_v31  ;;  %v7828_v59 = vsel %vm9033_vm0, %v1962_v10, %v9032_v8  ;;  %9035 = vst [vmem:[#allocation62_spill] sm:$0xff] %v7830_v17  ;;  %v9037_v2 = vsel %vm7832_vm3, 4294967295, %v9036_v2  ;;  %v9038_v62 = vrot.slane %v7133_v14, 7  ;;  %v9039_v43 = vrot.slane %v7131_v23, 7 }
  0x88   : > { %9034 = vst [vmem:[#allocation61_spill] sm:$0xff] %v7828_v59  ;;  %vm9040_vm13 = vcmp.lt.s32.totalorder %v6845_v9, 1  ;;  %v1961_v42 = vrot.slane %v7830_v17, 1  ;;  %vm3613_vm0 = vcmp.lt.s32.totalorder %v3549_v52, 256  ;;  %v9042_v37 = vrot.slane %v7096_v0, 7 }
  0x89   : > { %v7842_v53 = vsel %vm9040_vm13, %v9039_v43, %v9038_v62  ;;  %v9041_v22 = vmov %v9039_v43  ;;  %vm9043_vm1 = vmmov %vm9040_vm13  ;;  %v495_v12 = vadd.s32 144, %v6845_v9  ;;  %vm7856_vm9 = vcmp.gt.s32.totalorder %v625_v40, 0 }
  0x8a   : > { %v7851_v20 = vsel %vm9043_vm1, %v9042_v37, %v9041_v22  ;;  %vm3677_vm7 = vmand %vm3613_vm0, %vm7832_vm3  ;;  %v9046_v8 = vrot.slane %v7168_v29, 7  ;;  %v9047_v52 = vrot.slane %v7158_v50, 7  ;;  %v513_v40 = vand.u32 15, %v6845_v9 }
  0x8b   : > { %vm9048_vm13 = vmmov %vm9043_vm1  ;;  %v9050_v22 = vrot.slane %v7418_v36, 1  ;;  %vm9051_vm0 = vcmp.lt.s32.totalorder %v6845_v9, 7  ;;  %v3773_v50 = vsel %vm3677_vm7, %v7828_v59, 0.0  ;;  %v1230_v14 = vsel %vm7856_vm9, %v7851_v20, 0.0 }
  0x8c   : > { %v7866_v23 = vsel %vm9048_vm13, %v9047_v52, %v9046_v8  ;;  %v9049_v0 = vmov %v9047_v52  ;;  %vm9052_vm3 = vmmov %vm9051_vm0  ;;  %v915_v17 = vrot.slane %v7312_v56, 7  ;;  %vm9054_vm13 = vcmask 64512  }
  0x8d   : > { %v7874_v43 = vsel %vm9043_vm1, %v9038_v62, %v9049_v0  ;;  %v7881_v37 = vsel %vm9051_vm0, %v9050_v22, %v1961_v42  ;;  %v7885_v8 = vsel %vm9052_vm3, %v1961_v42, %v1962_v10  ;;  %v1254_v62 = vpack.c.bf16 %v7842_v53, %v1230_v14  ;;  %6226 = vmatmul.mubr.msk.bf16.gmra.mrb[12].mxu1 %vm9054_vm13, %v1253_v44  ;;  %vm9057_vm3 = vmmov %vm9054_vm13 }
  0x8e   : > { %9053 = vst [vmem:[#allocation63_spill] sm:$0xff] %v7885_v8  ;;  %v3771_v52 = vsel %vm7820_vm8, %v7881_v37, 0.0  ;;  %v3789_v0 = vpack.c.bf16 %v3773_v50, %v7885_v8  ;;  %v639_v22 = vand.u32 15, %v495_v12  ;;  %vm7899_vm7 = vcmp.gt.s32.totalorder %v513_v40, 0 }
  0x8f   : > { %v3788_v10 = vpack.c.bf16 %v3771_v52, %v7803_v1  ;;  %v9055_v42 = vmov 0  ;;  %v497_v21 = vadd.s32 160, %v6845_v9  ;;  %6229 = vmatprep.mubr.msk.bf16.mxu1 %vm9057_vm3, %v1254_v62  ;;  %v9058_v31 = vmov 0 }
  0x90   : > { %v9056_v42 = vsel %vm7899_vm7, 4294967295, %v9055_v42  ;;  %vm7905_vm1 = vcmp.gt.s32.totalorder %v639_v22, 0  ;;  %v4260_v56 = vsel %vm7899_vm7, %v7520_v57, 0.0  ;;  %v9060_v44 = vrot.slane %v7211_v51, 7 }
  0x91   : > { %v9059_v31 = vsel %vm7905_vm1, 4294967295, %v9058_v31  ;;  %v9061_v12 = vrot.slane %v7208_v6, 7  ;;  %vm9062_vm0 = vcmp.lt.s32.totalorder %v6845_v9, 1  ;;  %v9064_v14 = vrot.slane %v7168_v29, 7  ;;  %6377 = vmatprep.mubr.msk.bf16.mxu0 %vm9057_vm3, %v3788_v10 }
  0x92   : > { %vm9065_vm13 = vmmov %vm9062_vm0  ;;  %v1232_v57 = vsel %vm7905_vm1, %v7874_v43, 0.0  ;;  %v4292_v62 = vpack.c.bf16 %v7504_v30, %v4260_v56  ;;  %v653_v22 = vand.u32 15, %v497_v21  ;;  %v9067_v29 = vrot.slane %v7246_v39, 7 }
  0x93   : > { %v7918_v40 = vsel %vm9062_vm0, %v9061_v12, %v9060_v44  ;;  %v9063_v50 = vmov %v9061_v12  ;;  %v499_v44 = vadd.s32 176, %v6845_v9  ;;  %vm9066_vm0 = vmmov %vm9057_vm3  ;;  %v1255_v6 = vpack.c.bf16 %v7866_v23, %v1232_v57 }
  0x94   : > { %v7926_v52 = vsel %vm9065_vm13, %v9064_v14, %v9063_v50  ;;  %6378 = vmatmul.mubr.msk.bf16.gmra.mrb[28].mxu0 %vm9066_vm0, %v3789_v0  ;;  %v9068_v12 = vrot.slane %v7228_v47, 7  ;;  %v9070_v14 = vrot.slane %v7211_v51, 7  ;;  %vm9071_vm3 = vmmov %vm9065_vm13  ;;  %v4264_v21 = vsel %vm7544_vm6, %v7650_v35, 0.0 }
  0x95   : > { %6383 = vmatprep.mubr.msk.bf16.mxu0 %vm9066_vm0, %v4292_v62  ;;  %vm7956_vm8 = vcmp.gt.s32.totalorder %v653_v22, 0  ;;  %v9072_v0 = vmov 0  ;;  %v667_v56 = vand.u32 15, %v499_v44  ;;  %v4294_v57 = vpack.c.bf16 %v7636_v24, %v4264_v21  ;;  %6230 = vmatmul.mubr.msk.bf16.gmra.mrb[16].mxu1 %vm9066_vm0, %v1255_v6  ;;  %vm9079_vm7 = vmmov %vm9066_vm0 }
  0x96   : > { %v7942_v10 = vsel %vm9065_vm13, %v9068_v12, %v9067_v29  ;;  %v9069_v50 = vmov %v9068_v12  ;;  %v9073_v0 = vsel %vm7956_vm8, 4294967295, %v9072_v0  ;;  %v4266_v51 = vsel %vm7602_vm11, %v7679_v45, 0.0 }
  0x97   : > { %v7950_v30 = vsel %vm9071_vm3, %v9070_v14, %v9069_v50  ;;  %v1234_v47 = vsel %vm7956_vm8, %v7926_v52, 0.0  ;;  %v4295_v29 = vpack.c.bf16 %v7664_v11, %v4266_v51  ;;  %v501_v12 = vadd.s32 192, %v6845_v9 }
  0x98   : > { %v916_v62 = vrot.slane %v7314_v46, 7  ;;  %v1256_v22 = vpack.c.bf16 %v7918_v40, %v1234_v47  ;;  %vm7971_vm13 = vcmp.gt.s32.totalorder %v667_v56, 0  ;;  %v9074_v44 = vmov 0 }
  0x99   : > { %v9075_v44 = vsel %vm7971_vm13, 4294967295, %v9074_v44  ;;  %v503_v50 = vadd.s32 208, %v6845_v9  ;;  %v1236_v14 = vsel %vm7971_vm13, %v7950_v30, 0.0  ;;  %v681_v21 = vand.u32 15, %v501_v12 }
  0x9a   : > { %9076 = vst [vmem:[#allocation64_spill] sm:$0xff] %v9075_v44  ;;  %v9077_v8 = vrot.slane %v7246_v39, 7  ;;  %v1257_v46 = vpack.c.bf16 %v7942_v10, %v1236_v14  ;;  %v4270_v56 = vsel %vm7706_vm12, %v7784_v41, 0.0  ;;  %vm9078_vm8 = vcmask 1043456   ;;  %6233 = vmatprep.mubr.msk.bf16.mxu1 %vm9079_vm7, %v1256_v22  ;;  %v8010_v22 = vld [vmem:[%s8682_s3 + $0x20] sm:$0xf]  ;;  %vm9085_vm7 = vmmov %vm9066_vm0 }
  0x9b   : > { %v4838_v47 = vsel %vm9078_vm8, %v7223_v34, 0  ;;  %vm7993_vm13 = vcmp.gt.s32.totalorder %v681_v21, 0  ;;  %v9080_v12 = vmov 0  ;;  %v4297_v39 = vpack.c.bf16 %v7769_v55, %v4270_v56  ;;  %9083 = vst [vmem:[#allocation66_spill] sm:$0xff] %v8010_v22  ;;  %vm9084_vm8 = vmmov %vm9066_vm0 }
  0x9c   : > { %v7983_v51 = vsel %vm9071_vm3, %v9077_v8, %v915_v17  ;;  %v9081_v12 = vsel %vm7993_vm13, 4294967295, %v9080_v12  ;;  %v505_v8 = vadd.s32 224, %v6845_v9  ;;  %v917_v6 = vrot.slane %v7338_v13, 7  ;;  %6384 = vmatmul.mubr.msk.bf16.vlgmr.msra.gmra.mrb[0].mxu0 %vm9084_vm8, %v7589_v16 }
  0x9d   : > { %9082 = vst [vmem:[#allocation65_spill] sm:$0xff] %v9081_v12  ;;  %v8002_v14 = vsel %vm9071_vm3, %v915_v17, %v916_v62  ;;  %v1238_v34 = vsel %vm7993_vm13, %v7983_v51, 0.0  ;;  %v695_v44 = vand.u32 15, %v503_v50  ;;  %v919_v21 = vrot.slane %v7401_v49, 7  ;;  %6416 = vmatpush3.bf16.msra.mxu0 %v4838_v47  ;;  %6387 = vmatprep.mubr.msk.bf16.mxu0 %vm9085_vm7, %v4294_v57  ;;  %vm9089_vm7 = vmmov %vm9071_vm3 }
  0x9e   : > { %v709_v13 = vand.u32 15, %v505_v8  ;;  %v918_v56 = vrot.slane %v7340_v19, 7  ;;  %v920_v17 = vrot.slane %v7403_v61, 7  ;;  %v4272_v50 = vsel %vm7774_vm14, %v7851_v20, 0.0 }
  0x9f   : > { %v1258_v12 = vpack.c.bf16 %v8002_v14, %v1238_v34  ;;  %v4268_v49 = vsel %vm7669_vm10, %v7755_v4, 0.0  ;;  %v4298_v16 = vpack.c.bf16 %v7842_v53, %v4272_v50  ;;  %v4274_v19 = vsel %vm7807_vm4, %v7874_v43, 0.0  ;;  %vm9094_vm4 = vmmov %vm9089_vm7 }
  0xa0   : > { %vm9086_vm0 = vcmask 1043456   ;;  %v8033_v61 = vsel %vm9071_vm3, %v916_v62, %v917_v6  ;;  %vm8035_vm8 = vcmp.gt.s32.totalorder %v695_v44, 0  ;;  %v9087_v57 = vmov 0 }
  0xa1   : > { %6750 = vmatprep.subr.msk.bf16.mxu0 %vm9086_vm0, %v8010_v22  ;;  %v9088_v57 = vsel %vm8035_vm8, 4294967295, %v9087_v57  ;;  %v8040_v47 = vadd.s32 240, %v6845_v9  ;;  %v8043_v8 = vpack.c.bf16 %v7866_v23, %v4274_v19  ;;  %v8047_v34 = vsel %vm9089_vm7, %v918_v56, %v919_v21  ;;  %vm9096_vm7 = vmmov %vm9094_vm4 }
  0xa2   : > { %vm8049_vm13 = vcmp.gt.s32.totalorder %v709_v13, 0  ;;  %v9090_v50 = vmov 0  ;;  %vm9092_vm0 = vcmask 64512   ;;  %v4296_v62 = vpack.c.bf16 %v7742_v7, %v4268_v49 }
  0xa3   : > { %v9091_v50 = vsel %vm8049_vm13, 4294967295, %v9090_v50  ;;  %6234 = vmatmul.mubr.msk.bf16.gmra.mrb[20].mxu1 %vm9092_vm0, %v1257_v46  ;;  %v1997_v44 = vadd.s32 4294967281, %v6883_v27  ;;  %v4278_v22 = vsel %vm7905_vm1, %v7950_v30, 0.0  ;;  %vm9093_vm3 = vmmov %vm9092_vm0  ;;  %v8062_v19 = vsel %vm9094_vm4, %v917_v6, %v918_v56 }
  0xa4   : > { %6237 = vmatprep.mubr.msk.bf16.mxu1 %vm9093_vm3, %v1258_v12  ;;  %v1240_v13 = vsel %vm8035_vm8, %v8033_v61, 0.0  ;;  %v8068_v46 = vpack.c.bf16 %v7942_v10, %v4278_v22  ;;  %v921_v49 = vrot.slane %v7416_v3, 7  ;;  %v8073_v27 = vsel %vm9096_vm7, %v919_v21, %v920_v17  ;;  %vm9097_vm4 = vmmov %vm9092_vm0 }
  0xa5   : > { %v1242_v12 = vsel %vm8049_vm13, %v8047_v34, 0.0  ;;  %v723_v6 = vand.u32 15, %v8040_v47  ;;  %6388 = vmatmul.mubr.msk.bf16.gmra.mrb[4].mxu0 %vm9097_vm4, %v4295_v29  ;;  %v1259_v56 = vpack.c.bf16 %v8062_v19, %v1240_v13  ;;  %vm2029_vm3 = vcmp.ge.s32.totalorder %v1997_v44, 0  ;;  %vm9102_vm13 = vmmov %vm9092_vm0 }
  0xa6   : > { %9095 = vst [vmem:[#allocation67_spill] sm:$0xff] %v8068_v46  ;;  %6391 = vmatprep.mubr.msk.bf16.mxu0 %vm9092_vm0, %v4296_v62  ;;  %v922_v22 = vrot.slane %v7418_v36, 7  ;;  %v1260_v3 = vpack.c.bf16 %v8073_v27, %v1242_v12  ;;  %v8086_v21 = vsel %vm9096_vm7, %v920_v17, %v921_v49  ;;  %vm8094_vm4 = vmand %vm2029_vm3, %vm7042_vm15  ;;  %v4276_v62 = vsel %vm7856_vm9, %v7926_v52, 0.0 }
  0xa7   : > { %vm8088_vm8 = vcmp.gt.s32.totalorder %v723_v6, 0  ;;  %vm9103_vm1 = vmmov %vm9096_vm7  ;;  %v2253_v44 = vsel %vm8094_vm4, %v7828_v59, 0.0  ;;  %v2275_v13 = vsel %vm7653_vm2, %v7581_v54, 0.0  ;;  %v2279_v12 = vsel %vm7758_vm5, %v7693_v38, 0.0 }
  0xa8   : > { %v8102_v36 = vsel %vm9103_vm1, %v921_v49, %v922_v22  ;;  %v1244_v17 = vsel %vm8088_vm8, %v8086_v21, 0.0  ;;  %v8118_v49 = vpack.c.bf16 %v2275_v13, %v7597_v63  ;;  %vm9106_vm1 = vmmov %vm9092_vm0  ;;  %vm9107_vm3 = vnez %v9037_v2 }
  0xa9   : > { %v1261_v6 = vpack.c.bf16 %v8102_v36, %v1244_v17  ;;  %v6771_v29 = vmov 0.0   ;;  %v2546_v18 = vadd.s32 4294967295, %v6845_v9  ;;  %v9108_v17 = vld [vmem:[#allocation51_spill] sm:$0xff]  ;;  %v2776_v2 = vsel %vm7602_vm11, %v7650_v35, 0.0  ;;  %v9111_v35 = vld [vmem:[#allocation13_spill] sm:$0xff] }
  0xaa   : > { %9105 = vst [vmem:[#allocation68_spill] sm:$0xff] %v8118_v49  ;;  %v2284_v13 = vpack.c.bf16 %v2253_v44, %v6771_v29  ;;  %v2778_v44 = vsel %vm7669_vm10, %v7679_v45, 0.0  ;;  %vm9113_vm11 = vnez %v9112_v32  ;;  %vm9114_vm10 = vnez %v9056_v42 }
  0xab   : > { %6238 = vmatmul.mubr.msk.bf16.gmra.mrb[24].mxu1 %vm9092_vm0, %v1259_v56  ;;  %v4300_v56 = vpack.c.bf16 %v7918_v40, %v4276_v62  ;;  %v9109_v62 = vld [vmem:[#allocation50_spill] sm:$0xff]  ;;  %vm2578_vm7 = vcmp.ge.s32.totalorder %v2546_v18, 0  ;;  %v8156_v28 = vpack.c.bf16 %v7664_v11, %v2778_v44  ;;  %v2257_v33 = vsel %vm9113_vm11, %v9111_v35, 0.0 }
  0xac   : > { %6241 = vmatprep.mubr.msk.bf16.mxu1 %vm9102_vm13, %v1260_v3  ;;  %vm9104_vm13 = vmmov %vm9092_vm0  ;;  %v8127_v3 = vpack.c.bf16 %v2279_v12, %v7703_v25  ;;  %v2780_v12 = vsel %vm7706_vm12, %v7755_v4, 0.0  ;;  %v2782_v18 = vsel %vm7774_vm14, %v7784_v41, 0.0  ;;  %vm9115_vm12 = vnez %v9026_v48  ;;  %v9117_v41 = vld [vmem:[#allocation62_spill] sm:$0xff] }
  0xad   : > { %6392 = vmatmul.mubr.msk.bf16.gmra.mrb[8].mxu0 %vm9104_vm13, %v4297_v39  ;;  %v2283_v39 = vsel %vm9107_vm3, %v7881_v37, 0.0  ;;  %vm2674_vm4 = vmand %vm2578_vm7, %vm9114_vm10  ;;  %v2784_v4 = vsel %vm9115_vm12, %v7851_v20, 0.0  ;;  %v8179_v45 = vpack.c.bf16 %v7769_v55, %v2782_v18  ;;  %v923_v48 = vrot.slane %v9117_v41, 7  ;;  %v9118_v20 = vld [vmem:[#allocation3_spill] sm:$0xff] }
  0xae   : > { %6395 = vmatprep.mubr.msk.bf16.mxu0 %vm9106_vm1, %v4298_v16  ;;  %v8134_v59 = vpack.c.bf16 %v2283_v39, %v7803_v1  ;;  %v2774_v16 = vsel %vm7544_vm6, %v9108_v17, 0.0  ;;  %v8153_v39 = vpack.c.bf16 %v7636_v24, %v2776_v2  ;;  %v8159_v17 = vpack.c.bf16 %v7742_v7, %v2780_v12  ;;  %vm9110_vm6 = vmmov %vm9092_vm0 }
  0xaf   : > { %v8141_v49 = vpack.c.bf16 %v9109_v62, %v2774_v16  ;;  %v2786_v24 = vsel %vm7856_vm9, %v7874_v43, 0.0  ;;  %v2770_v11 = vsel %vm2674_vm4, %v9116_v15, 0.0  ;;  %v8182_v7 = vpack.c.bf16 %v7842_v53, %v2784_v4  ;;  %vm9121_vm13 = vmmov %vm9092_vm0  ;;  %v9122_v43 = vld [vmem:[#allocation64_spill] sm:$0xff] }
  0xb0   : > { %v8185_v58 = vpack.c.bf16 %v7866_v23, %v2786_v24  ;;  %v8189_v42 = vpack.c.bf16 %v9118_v20, %v2770_v11  ;;  %vm9119_vm9 = vnez %v9059_v31  ;;  %vm9120_vm14 = vnez %v9073_v0  ;;  %vm9124_vm3 = vmmov %vm9092_vm0  ;;  %v9129_v16 = vld [vmem:[#allocation52_spill] sm:$0xff]  ;;  %v9136_v24 = vld [vmem:[#allocation18_spill] sm:$0xff] }
  0xb1   : > { %v2788_v26 = vsel %vm9119_vm9, %v7926_v52, 0.0  ;;  %v2790_v55 = vsel %vm9120_vm14, %v7950_v30, 0.0  ;;  %vm9123_vm1 = vnez %v9122_v43  ;;  %v9125_v52 = vld [vmem:[#allocation65_spill] sm:$0xff]  ;;  %vm9130_vm10 = vcmask 1043456   ;;  %vm9137_vm9 = vmmov %vm9124_vm3  ;;  %v9139_v20 = vld [vmem:[#allocation20_spill] sm:$0xff] }
  0xb2   : > { %v8200_v53 = vpack.c.bf16 %v7918_v40, %v2788_v26  ;;  %v8203_v23 = vpack.c.bf16 %v7942_v10, %v2790_v55  ;;  %vm9126_vm7 = vnez %v9125_v52  ;;  %v4280_v40 = vsel %vm9120_vm14, %v7983_v51, 0.0  ;;  %vm9138_vm14 = vmmov %vm9124_vm3  ;;  %v9140_v26 = vld [vmem:[#allocation25_spill] sm:$0xff]  ;;  %v9155_v43 = vld [vmem:[#allocation27_spill] sm:$0xff] }
  0xb3   : > { %6242 = vmatmul.mubr.msk.bf16.gmra.mrb[28].mxu1 %vm9110_vm6, %v1261_v6  ;;  %v2792_v6 = vsel %vm9123_vm1, %v7983_v51, 0.0  ;;  %v2794_v30 = vsel %vm9126_vm7, %v8033_v61, 0.0  ;;  %vm9128_vm6 = vnez %v9088_v57  ;;  %v2869_v62 = vsel %vm9130_vm10, %v9129_v16, 0  ;;  %v9133_v51 = vld [vmem:[#allocation5_spill] sm:$0xff]  ;;  %v9167_v57 = vld [vmem:[#allocation42_spill] sm:$0xff] }
  0xb4   : > { %6247 = vmatprep.mubr.msk.bf16.mxu1 %vm9092_vm0, %v2284_v13  ;;  %v8210_v31 = vpack.c.bf16 %v8002_v14, %v2792_v6  ;;  %v8220_v10 = vpack.c.bf16 %v8062_v19, %v2794_v30  ;;  %vm9131_vm4 = vcmp.lt.s32.totalorder %v6845_v9, 1  ;;  %vm9132_vm12 = vnez %v9091_v50  ;;  %v9144_v6 = vld [vmem:[#allocation23_spill] sm:$0xff]  ;;  %v9145_v30 = vld [vmem:[#allocation29_spill] sm:$0xff] }
  0xb5   : > { %6396 = vmatmul.mubr.msk.bf16.gmra.mrb[12].mxu0 %vm9121_vm13, %v8043_v8  ;;  %v9127_v8 = vld [vmem:[#allocation9_spill] sm:$0xff]  ;;  %v927_v2 = vsel %vm9131_vm4, %v922_v22, %v923_v48  ;;  %v2798_v0 = vsel %vm9132_vm12, %v8086_v21, 0.0  ;;  %v9134_v12 = vrot.slane %v9133_v51, 7  ;;  %vm9135_vm0 = vmmov %vm9131_vm4  ;;  %v4302_v22 = vpack.c.bf16 %v8002_v14, %v4280_v40  ;;  %v6761_v14 = vld [vmem:[%s8682_s3 + $0x10] sm:$0xf] }
  0xb6   : > { %6399 = vmatprep.mubr.msk.bf16.mxu0 %vm9124_vm3, %v4300_v56  ;;  %v2286_v13 = vpack.c.bf16 %v2257_v33, %v9127_v8  ;;  %v2796_v56 = vsel %vm9128_vm6, %v8047_v34, 0.0  ;;  %v8240_v18 = vpack.c.bf16 %v8102_v36, %v2798_v0  ;;  %v2800_v4 = vsel %vm8088_vm8, %v927_v2, 0.0  ;;  %v9148_v40 = vld [vmem:[#allocation67_spill] sm:$0xff]  ;;  %v9150_v16 = vld [vmem:[#allocation21_spill] sm:$0xff]  ;;  %v9152_v0 = vld [vmem:[#allocation24_spill] sm:$0xff] }
  0xb7   : > { %v8230_v44 = vpack.c.bf16 %v8073_v27, %v2796_v56  ;;  %v926_v33 = vsel %vm9135_vm0, %v923_v48, %v9134_v12  ;;  %vm9141_vm13 = vnez %v9140_v26  ;;  %v9142_v48 = vld [vmem:[#allocation48_spill] sm:$0xff]  ;;  %vm9146_vm10 = vnez %v9145_v30  ;;  %vm9149_vm0 = vmmov %vm9137_vm9  ;;  %v9159_v52 = vld [vmem:[#allocation37_spill] sm:$0xff] }
  0xb8   : > { %v8247_v11 = vpack.c.bf16 %v926_v33, %v2800_v4  ;;  %v2259_v9 = vsel %vm9141_vm13, %v9139_v20, 0.0  ;;  %vm9143_vm3 = vnez %v9142_v48  ;;  %v2261_v56 = vsel %vm9146_vm10, %v9144_v6, 0.0  ;;  %v9190_v48 = vld [vmem:[#allocation53_spill] sm:$0xff] }
  0xb9   : > { %v5276_v55 = vsel %vm9143_vm3, %v7581_v54, 0.0  ;;  %vm9147_vm4 = vcmask 1043456   ;;  %v4282_v54 = vsel %vm9123_vm1, %v8033_v61, 0.0  ;;  %v2288_v12 = vpack.c.bf16 %v2261_v56, %v9152_v0  ;;  %v9156_v61 = vld [vmem:[#allocation32_spill] sm:$0xff] }
  0xba   : > { %v4284_v4 = vsel %vm9126_vm7, %v8047_v34, 0.0  ;;  %vm9157_vm1 = vnez %v9156_v61  ;;  %v9158_v34 = vld [vmem:[#allocation31_spill] sm:$0xff]  ;;  %vm9160_vm7 = vnez %v9159_v52  ;;  %v4066_v56 = vadd.s32 15, %v8040_v47 }
  0xbb   : > { %6248 = vmatmul.mubr.msk.bf16.vlgmr.msra.gmra.mrb[0].mxu1 %vm9137_vm9, %v9136_v24  ;;  %vm9151_vm9 = vmmov %vm9149_vm0  ;;  %v4304_v24 = vpack.c.bf16 %v8073_v27, %v4284_v4  ;;  %v9161_v27 = vld [vmem:[#allocation28_spill] sm:$0xff]  ;;  %v5266_v32 = vsel %vm9146_vm10, %v9158_v34, 0.0  ;;  %v9271_v52 = vld [vmem:[#allocation63_spill] sm:$0xff] }
  0xbc   : > { %6280 = vmatpush3.bf16.msra.mxu1 %v2869_v62  ;;  %6251 = vmatprep.mubr.msk.bf16.mxu1 %vm9138_vm14, %v2286_v13  ;;  %v8264_v13 = vpack.c.bf16 %v5276_v55, %v7597_v63  ;;  %v2287_v62 = vpack.c.bf16 %v2259_v9, %v9150_v16  ;;  %v4303_v63 = vpack.c.bf16 %v8062_v19, %v4282_v54  ;;  %vm9153_vm14 = vmmov %vm9149_vm0  ;;  %v2263_v9 = vsel %vm9157_vm1, %v9155_v43, 0.0 }
  0xbd   : > { %6746 = vmatprep.subr.msk.bf16.mxu1 %vm9147_vm4, %v6761_v14  ;;  %6400 = vmatmul.mubr.msk.bf16.gmra.mrb[16].mxu0 %vm9149_vm0, %v9148_v40  ;;  %vm9154_vm4 = vmmov %vm9149_vm0  ;;  %v2265_v19 = vsel %vm9160_vm7, %v9158_v34, 0.0  ;;  %v2289_v60 = vpack.c.bf16 %v2263_v9, %v9161_v27  ;;  %v9163_v14 = vld [vmem:[#allocation33_spill] sm:$0xff]  ;;  %v5284_v54 = vsel %vm7758_vm5, %v7881_v37, 0.0 }
  0xbe   : > { %6403 = vmatprep.mubr.msk.bf16.mxu0 %vm9151_vm9, %v4302_v22  ;;  %v5280_v22 = vsel %vm7653_vm2, %v7693_v38, 0.0  ;;  %vm9162_vm2 = vmmov %vm9149_vm0  ;;  %v4286_v38 = vsel %vm9128_vm6, %v8086_v21, 0.0  ;;  %v2290_v40 = vpack.c.bf16 %v2265_v19, %v9163_v14  ;;  %vm4130_vm9 = vcmp.lt.s32.totalorder %v4066_v56, 256  ;;  %v9178_v9 = vld [vmem:[#allocation45_spill] sm:$0xff]  ;;  %v9179_v19 = vld [vmem:[#allocation55_spill] sm:$0xff] }
  0xbf   : > { %v8288_v55 = vpack.c.bf16 %v5280_v22, %v7703_v25  ;;  %v4288_v25 = vsel %vm9132_vm12, %v927_v2, 0.0  ;;  %vm9168_vm6 = vnez %v9167_v57  ;;  %v8315_v50 = vpack.c.bf16 %v5284_v54, %v7803_v1  ;;  %v9170_v2 = vld [vmem:[#allocation47_spill] sm:$0xff]  ;;  %vm9173_vm5 = vmmov %vm9162_vm2 }
  0xc0   : > { %v4306_v47 = vpack.c.bf16 %v926_v33, %v4288_v25  ;;  %vm9171_vm12 = vnez %v9170_v2  ;;  %v9177_v1 = vld [vmem:[#allocation43_spill] sm:$0xff]  ;;  %v9187_v25 = vld [vmem:[#allocation66_spill] sm:$0xff] }
  0xc1   : > { %v2271_v22 = vsel %vm9143_vm3, %v9177_v1, 0.0 }
  0xc3   : > { %6252 = vmatmul.mubr.msk.bf16.gmra.mrb[4].mxu1 %vm9153_vm14, %v2287_v62  ;;  %v4305_v62 = vpack.c.bf16 %v8102_v36, %v4286_v38  ;;  %vm9164_vm14 = vmmov %vm9149_vm0  ;;  %v9169_v36 = vld [vmem:[#allocation40_spill] sm:$0xff] }
  0xc4   : > { %6255 = vmatprep.mubr.msk.bf16.mxu1 %vm9154_vm4, %v2288_v12  ;;  %vm9165_vm4 = vmmov %vm9149_vm0  ;;  %v9166_v12 = vld [vmem:[#allocation35_spill] sm:$0xff]  ;;  %v2269_v33 = vsel %vm9171_vm12, %v9169_v36, 0.0  ;;  %v9183_v38 = vld [vmem:[#allocation4_spill] sm:$0xff] }
  0xc5   : > { %6404 = vmatmul.mubr.msk.bf16.gmra.mrb[20].mxu0 %vm9149_vm0, %v4303_v63  ;;  %v2267_v21 = vsel %vm9168_vm6, %v9166_v12, 0.0  ;;  %vm4194_vm0 = vmand %vm4130_vm9, %vm8088_vm8  ;;  %v9174_v63 = vld [vmem:[#allocation41_spill] sm:$0xff] }
  0xc6   : > { %6407 = vmatprep.mubr.msk.bf16.mxu0 %vm9162_vm2, %v4304_v24  ;;  %v2291_v37 = vpack.c.bf16 %v2267_v21, %v9172_v5  ;;  %v4290_v4 = vsel %vm4194_vm0, %v9116_v15, 0.0  ;;  %v2292_v24 = vpack.c.bf16 %v2269_v33, %v9174_v63  ;;  %vm9175_vm8 = vmmov %vm9162_vm2  ;;  %v9193_v21 = vld [vmem:[#allocation6_spill] sm:$0xff]  ;;  %v9195_v33 = vld [vmem:[#allocation8_spill] sm:$0xff] }
  0xc7   : > { %v4307_v46 = vpack.c.bf16 %v6771_v29, %v4290_v4  ;;  %vm9176_vm9 = vmmov %vm9162_vm2  ;;  %v9185_v29 = vld [vmem:[#allocation46_spill] sm:$0xff] }
  0xc8   : > { %vm9184_vm0 = vmmov %vm9162_vm2 }
  0xc9   : > { %vm9251_vm10 = vmmov %vm9184_vm0 }
  0xcb   : > { %6256 = vmatmul.mubr.msk.bf16.gmra.mrb[8].mxu1 %vm9164_vm14, %v2289_v60  ;;  %vm9180_vm14 = vnez %v9179_v19  ;;  %v9182_v60 = vld [vmem:[#allocation44_spill] sm:$0xff] }
  0xcc   : > { %6259 = vmatprep.mubr.msk.bf16.mxu1 %vm9165_vm4, %v2290_v40  ;;  %v2273_v56 = vsel %vm9180_vm14, %v9178_v9, 0.0  ;;  %vm9181_vm4 = vmmov %vm9162_vm2  ;;  %v2293_v15 = vpack.c.bf16 %v2271_v22, %v9182_v60  ;;  %v9201_v22 = vld [vmem:[#allocation60_spill] sm:$0xff] }
  0xcd   : > { %6408 = vmatmul.mubr.msk.bf16.gmra.mrb[24].mxu0 %vm9162_vm2, %v4305_v62  ;;  %v2294_v40 = vpack.c.bf16 %v2273_v56, %v9185_v29  ;;  %vm9186_vm2 = vmmov %vm9184_vm0 }
  0xce   : > { %6411 = vmatprep.mubr.msk.bf16.mxu0 %vm9173_vm5, %v4306_v47  ;;  %vm9188_vm5 = vcmask 1043456   ;;  %v9191_v47 = vld [vmem:[#allocation58_spill] sm:$0xff]  ;;  %vm9218_vm14 = vmmov %vm9184_vm0 }
  0xcf   : > { %v5356_v62 = vsel %vm9188_vm5, %v9187_v25, 0  ;;  %vm9192_vm3 = vnez %v9191_v47  ;;  %vm9202_vm5 = vnez %v9201_v22 }
  0xd0   : > { %v2277_v54 = vsel %vm9192_vm3, %v9190_v48, 0.0  ;;  %vm9209_vm3 = vmmov %vm9184_vm0 }
  0xd3   : > { %6260 = vmatmul.mubr.msk.bf16.gmra.mrb[12].mxu1 %vm9175_vm8, %v2291_v37  ;;  %vm9189_vm8 = vmmov %vm9184_vm0  ;;  %v9197_v37 = vld [vmem:[#allocation54_spill] sm:$0xff] }
  0xd4   : > { %6263 = vmatprep.mubr.msk.bf16.mxu1 %vm9176_vm9, %v2292_v24  ;;  %vm9194_vm9 = vmmov %vm9184_vm0  ;;  %v2296_v4 = vpack.c.bf16 %v2277_v54, %v9197_v37  ;;  %v9198_v24 = vld [vmem:[#allocation68_spill] sm:$0xff]  ;;  %v9211_v54 = vld [vmem:[#allocation17_spill] sm:$0xff] }
  0xd5   : > { %6412 = vmatmul.mubr.msk.bf16.gmra.mrb[28].mxu0 %vm9181_vm4, %v4307_v46  ;;  %vm9196_vm4 = vmmov %vm9184_vm0  ;;  %v9200_v46 = vld [vmem:[#allocation56_spill] sm:$0xff] }
  0xd6   : > { %6417 = vmatprep.mubr.msk.bf16.mxu0 %vm9184_vm0, %v9183_v38  ;;  %v2281_v56 = vsel %vm9202_vm5, %v9200_v46, 0.0  ;;  %v9205_v38 = vld [vmem:[#allocation14_spill] sm:$0xff]  ;;  %vm9213_vm5 = vmmov %vm9184_vm0 }
  0xdb   : > { %6264 = vmatmul.mubr.msk.bf16.gmra.mrb[16].mxu1 %vm9186_vm2, %v2293_v15  ;;  %vm9199_vm2 = vmmov %vm9184_vm0  ;;  %v9203_v15 = vld [vmem:[#allocation11_spill] sm:$0xff] }
  0xdc   : > { %6267 = vmatprep.mubr.msk.bf16.mxu1 %vm9189_vm8, %v2294_v40  ;;  %vm9204_vm8 = vmmov %vm9184_vm0  ;;  %v9207_v40 = vld [vmem:[#allocation57_spill] sm:$0xff] }
  0xdd   : > { %6418 = vmatmul.mubr.msk.bf16.vlgmr.msra.gmra.mrb[0].mxu0 %vm9194_vm9, %v9193_v21  ;;  %vm9206_vm9 = vmmov %vm9184_vm0  ;;  %v2298_v25 = vpack.c.bf16 %v2281_v56, %v9207_v40  ;;  %v9215_v21 = vld [vmem:[#allocation19_spill] sm:$0xff]  ;;  %v9230_v56 = vld [vmem:[#allocation38_spill] sm:$0xff] }
  0xde   : > { %6450 = vmatpush3.bf16.msra.mxu0 %v5356_v62  ;;  %6421 = vmatprep.mubr.msk.bf16.mxu0 %vm9196_vm4, %v9195_v33  ;;  %vm9208_vm4 = vmmov %vm9184_vm0  ;;  %v9210_v62 = vld [vmem:[#allocation15_spill] sm:$0xff]  ;;  %v9217_v33 = vld [vmem:[#allocation22_spill] sm:$0xff] }
  0xe3   : > { %6268 = vmatmul.mubr.msk.bf16.gmra.mrb[20].mxu1 %vm9184_vm0, %v9198_v24  ;;  %v9223_v24 = vld [vmem:[#allocation26_spill] sm:$0xff] }
  0xe4   : > { %6271 = vmatprep.mubr.msk.bf16.mxu1 %vm9199_vm2, %v2296_v4  ;;  %vm9212_vm2 = vmmov %vm9184_vm0  ;;  %v9221_v4 = vld [vmem:[#allocation2_spill] sm:$0xff] }
  0xe5   : > { %6422 = vmatmul.mubr.msk.bf16.gmra.mrb[4].mxu0 %vm9204_vm8, %v9203_v15  ;;  %vm9214_vm8 = vmmov %vm9184_vm0  ;;  %v5258_v15 = vsel %vm7042_vm15, %v9111_v35, 0.0  ;;  %v5262_v35 = vsel %vm9113_vm11, %v9144_v6, 0.0  ;;  %v5274_v6 = vsel %vm9171_vm12, %v9178_v9, 0.0 }
  0xe6   : > { %6425 = vmatprep.mubr.msk.bf16.mxu0 %vm9206_vm9, %v9205_v38  ;;  %vm9216_vm9 = vmmov %vm9184_vm0 }
  0xe7   : > { %vm9243_vm15 = vmmov %vm9184_vm0 }
  0xe8   : > { %vm9246_vm11 = vmmov %vm9184_vm0 }
  0xe9   : > { %vm9259_vm12 = vmmov %vm9184_vm0 }
  0xeb   : > { %6272 = vmatmul.mubr.msk.bf16.gmra.mrb[24].mxu1 %vm9208_vm4, %v8127_v3  ;;  %v9219_v3 = vld [vmem:[#allocation49_spill] sm:$0xff]  ;;  %vm9222_vm4 = vmmov %vm9184_vm0 }
  0xec   : > { %6275 = vmatprep.mubr.msk.bf16.mxu1 %vm9209_vm3, %v2298_v25  ;;  %vm9220_vm3 = vmmov %vm9184_vm0 }
  0xed   : > { %6426 = vmatmul.mubr.msk.bf16.gmra.mrb[8].mxu0 %vm9184_vm0, %v9210_v62 }
  0xee   : > { %6429 = vmatprep.mubr.msk.bf16.mxu0 %vm9212_vm2, %v9211_v54  ;;  %vm9226_vm2 = vmmov %vm9184_vm0 }
  0xf3   : > { %6276 = vmatmul.mubr.msk.bf16.gmra.mrb[28].mxu1 %vm9213_vm5, %v8134_v59  ;;  %v9224_v59 = vld [vmem:[#allocation30_spill] sm:$0xff]  ;;  %vm9225_vm5 = vmmov %vm9184_vm0 }
  0xf4   : > { %6281 = vmatprep.mubr.msk.bf16.mxu1 %vm9214_vm8, %v8189_v42  ;;  %vm9227_vm8 = vmmov %vm9184_vm0  ;;  %v9228_v42 = vld [vmem:[#allocation34_spill] sm:$0xff] }
  0xf5   : > { %6430 = vmatmul.mubr.msk.bf16.gmra.mrb[12].mxu0 %vm9216_vm9, %v9215_v21  ;;  %vm9231_vm9 = vmmov %vm9184_vm0 }
  0xf6   : > { %6433 = vmatprep.mubr.msk.bf16.mxu0 %vm9218_vm14, %v9217_v33  ;;  %vm9229_vm14 = vmmov %vm9184_vm0 }
  0xfb   : > { %6282 = vmatmul.mubr.msk.bf16.vlgmr.msra.gmra.mrb[0].mxu1 %vm9220_vm3, %v9219_v3  ;;  %vm9232_vm3 = vmmov %vm9184_vm0 }
  0xfc   : > { %6484 = vmatpush3.bf16.msra.mxu1 %v9221_v4  ;;  %6285 = vmatprep.mubr.msk.bf16.mxu1 %vm9222_vm4, %v8141_v49  ;;  %v8398_v49 = vpack.c.bf16 %v9133_v51, %v9117_v41  ;;  %vm9233_vm4 = vmmov %vm9184_vm0  ;;  %v9239_v41 = vmov 0.0|0.0  }
  0xfd   : > { %6434 = vmatmul.mubr.msk.bf16.gmra.mrb[16].mxu0 %vm9184_vm0, %v9223_v24 }
  0xfe   : > { %6437 = vmatprep.mubr.msk.bf16.mxu0 %vm9225_vm5, %v9224_v59  ;;  %vm9235_vm5 = vmmov %vm9184_vm0 }
 0x103   : > { %6286 = vmatmul.mubr.msk.bf16.gmra.mrb[4].mxu1 %vm9226_vm2, %v8153_v39  ;;  %v9234_v39 = vld [vmem:[#allocation39_spill] sm:$0xff]  ;;  %vm9237_vm2 = vmmov %vm9184_vm0 }
 0x104   : > { %6289 = vmatprep.mubr.msk.bf16.mxu1 %vm9227_vm8, %v8156_v28  ;;  %vm9238_vm8 = vmmov %vm9184_vm0 }
 0x105   : > { %6438 = vmatmul.mubr.msk.bf16.gmra.mrb[20].mxu0 %vm9229_vm14, %v9228_v42 }
 0x106   : > { %6441 = vmatprep.mubr.msk.bf16.mxu0 %vm9231_vm9, %v9230_v56  ;;  %vm9242_vm9 = vmmov %vm9184_vm0 }
 0x10b   : > { %6290 = vmatmul.mubr.msk.bf16.gmra.mrb[8].mxu1 %vm9232_vm3, %v8159_v17  ;;  %v5289_v17 = vpack.c.bf16 %v5258_v15, %v9127_v8  ;;  %vm9244_vm3 = vmmov %vm9184_vm0 }
 0x10c   : > { %6293 = vmatprep.mubr.msk.bf16.mxu1 %vm9233_vm4, %v8179_v45  ;;  %v9240_v45 = vld [vmem:[#allocation12_spill] sm:$0xff]  ;;  %vm9245_vm4 = vmmov %vm9184_vm0 }
 0x10d   : > { %6442 = vmatmul.mubr.msk.bf16.gmra.mrb[24].mxu0 %vm9184_vm0, %v9234_v39  ;;  %vm9241_vm14 = vnez %v9240_v45 }
 0x10e   : > { %6445 = vmatprep.mubr.msk.bf16.mxu0 %vm9235_vm5, %v8398_v49  ;;  %v5260_v51 = vsel %vm9241_vm14, %v9139_v20, 0.0  ;;  %vm9247_vm5 = vmmov %vm9184_vm0  ;;  %v5270_v20 = vsel %vm9160_vm7, %v9169_v36, 0.0 }
 0x10f   : > { %v5290_v38 = vpack.c.bf16 %v5260_v51, %v9150_v16  ;;  %vm9252_vm14 = vmmov %vm9184_vm0 }
 0x110   : > { %vm9255_vm7 = vmmov %vm9184_vm0 }
 0x113   : > { %6294 = vmatmul.mubr.msk.bf16.gmra.mrb[12].mxu1 %vm9237_vm2, %v8182_v7  ;;  %v5291_v7 = vpack.c.bf16 %v5262_v35, %v9152_v0  ;;  %vm9248_vm2 = vmmov %vm9184_vm0 }
 0x114   : > { %6297 = vmatprep.mubr.msk.bf16.mxu1 %vm9238_vm8, %v8185_v58  ;;  %v5264_v58 = vsel %vm9141_vm13, %v9155_v43, 0.0  ;;  %vm9249_vm8 = vmmov %vm9184_vm0 }
 0x115   : > { %6446 = vmatmul.mubr.bf16.gmra.mrb[28].mxu0 %v9239_v41  ;;  %v5292_v8 = vpack.c.bf16 %v5264_v58, %v9161_v27  ;;  %vm9250_vm13 = vmmov %vm9184_vm0 }
 0x116   : > { %6451 = vmatprep.mubr.msk.bf16.mxu0 %vm9242_vm9, %v5289_v17  ;;  %vm9253_vm9 = vmmov %vm9184_vm0 }
 0x11b   : > { %6298 = vmatmul.mubr.msk.bf16.gmra.mrb[16].mxu1 %vm9243_vm15, %v8200_v53  ;;  %v5293_v53 = vpack.c.bf16 %v5266_v32, %v9163_v14  ;;  %vm9256_vm15 = vmmov %vm9184_vm0 }
 0x11c   : > { %6301 = vmatprep.mubr.msk.bf16.mxu1 %vm9244_vm3, %v8203_v23  ;;  %v5268_v23 = vsel %vm9157_vm1, %v9166_v12, 0.0  ;;  %vm9254_vm1 = vmmov %vm9184_vm0 }
 0x11d   : > { %6452 = vmatmul.mubr.msk.bf16.vlgmr.msra.gmra.mrb[0].mxu0 %vm9245_vm4, %v5290_v38  ;;  %v5294_v26 = vpack.c.bf16 %v5268_v23, %v9172_v5  ;;  %vm9257_vm3 = vmmov %vm9184_vm0 }
 0x11e   : > { %6455 = vmatprep.mubr.msk.bf16.mxu0 %vm9184_vm0, %v5291_v7  ;;  %vm9260_vm4 = vmmov %vm9184_vm0 }
 0x123   : > { %6302 = vmatmul.mubr.msk.bf16.gmra.mrb[20].mxu1 %vm9246_vm11, %v8210_v31  ;;  %v5295_v31 = vpack.c.bf16 %v5270_v20, %v9174_v63  ;;  %vm9262_vm11 = vmmov %vm9184_vm0 }
 0x124   : > { %6305 = vmatprep.mubr.msk.bf16.mxu1 %vm9247_vm5, %v8220_v10  ;;  %v5272_v10 = vsel %vm9168_vm6, %v9177_v1, 0.0  ;;  %vm9258_vm6 = vnez %v9179_v19  ;;  %vm9263_vm5 = vnez %v9191_v47 }
 0x125   : > { %6456 = vmatmul.mubr.msk.bf16.gmra.mrb[4].mxu0 %vm9248_vm2, %v5292_v8  ;;  %v5296_v30 = vpack.c.bf16 %v5272_v10, %v9182_v60  ;;  %v5282_v43 = vsel %vm9263_vm5, %v9200_v46, 0.0  ;;  %vm9278_vm5 = vmmov %vm9184_vm0 }
 0x126   : > { %6459 = vmatprep.mubr.msk.bf16.mxu0 %vm9249_vm8, %v5293_v53  ;;  %vm9264_vm8 = vmmov %vm9184_vm0  ;;  %v5301_v61 = vpack.c.bf16 %v5282_v43, %v9207_v40 }
 0x12b   : > { %6306 = vmatmul.mubr.msk.bf16.gmra.mrb[24].mxu1 %vm9250_vm13, %v8230_v44  ;;  %v5297_v44 = vpack.c.bf16 %v5274_v6, %v9185_v29  ;;  %vm9265_vm13 = vmmov %vm9184_vm0 }
 0x12c   : > { %6309 = vmatprep.mubr.msk.bf16.mxu1 %vm9251_vm10, %v8240_v18  ;;  %v5278_v18 = vsel %vm9258_vm6, %v9190_v48, 0.0  ;;  %vm9266_vm10 = vnez %v9201_v22  ;;  %vm9274_vm6 = vmmov %vm9184_vm0 }
 0x12d   : > { %6460 = vmatmul.mubr.msk.bf16.gmra.mrb[8].mxu0 %vm9252_vm14, %v5294_v26  ;;  %v5299_v16 = vpack.c.bf16 %v5278_v18, %v9197_v37 }
 0x12e   : > { %6463 = vmatprep.mubr.msk.bf16.mxu0 %vm9253_vm9, %v5295_v31  ;;  %vm9267_vm9 = vmmov %vm9184_vm0 }
 0x133   : > { %6310 = vmatmul.mubr.msk.bf16.gmra.mrb[28].mxu1 %vm9254_vm1, %v8247_v11  ;;  %v9261_v11 = vld [vmem:[#allocation59_spill] sm:$0xff]  ;;  %vm9268_vm1 = vmmov %vm9184_vm0 }
 0x134   : > { %6331 = vmatprep.mubr.msk.bf16.mxu1 %vm9255_vm7, %v9215_v21  ;;  %v5062_v0 = vadd.s32 17, %v9261_v11  ;;  %vm9270_vm7 = vmmov %vm9184_vm0 }
 0x135   : > { %6464 = vmatmul.mubr.msk.bf16.gmra.mrb[12].mxu0 %vm9256_vm15, %v5296_v30  ;;  %vm9272_vm15 = vmmov %vm9184_vm0 }
 0x136   : > { %6467 = vmatprep.mubr.msk.bf16.mxu0 %vm9257_vm3, %v5297_v44  ;;  %vm5126_vm2 = vcmp.lt.s32.totalorder %v5062_v0, 256  ;;  %vm9273_vm3 = vmmov %vm9184_vm0 }
 0x137   : > { %vm5190_vm14 = vmand %vm5126_vm2, %vm9266_vm10 }
 0x138   : > { %vm9279_vm2 = vmmov %vm9184_vm0 }
 0x139   : > { %vm9282_vm10 = vmmov %vm9184_vm0 }
 0x13b   : > { %6332 = vmatmul.mubr.msk.bf16.vlgmr.msra.gmra.mrb[16].mxu1 %vm9259_vm12, %v9217_v33  ;;  %vm9275_vm12 = vmmov %vm9184_vm0 }
 0x13c   : > { %6335 = vmatprep.mubr.msk.bf16.mxu1 %vm9260_vm4, %v9223_v24  ;;  %vm9276_vm4 = vmmov %vm9184_vm0 }
 0x13d   : > { %6468 = vmatmul.mubr.msk.bf16.gmra.mrb[16].mxu0 %vm9184_vm0, %v8264_v13  ;;  %v9269_v13 = vld [vmem:[#allocation61_spill] sm:$0xff] }
 0x13e   : > { %6471 = vmatprep.mubr.msk.bf16.mxu0 %vm9262_vm11, %v5299_v16  ;;  %v5286_v34 = vsel %vm5190_vm14, %v9269_v13, 0.0  ;;  %vm9277_vm11 = vmmov %vm9184_vm0 }
 0x13f   : > { %v5303_v27 = vpack.c.bf16 %v5286_v34, %v9271_v52  ;;  %vm9283_vm14 = vmmov %vm9184_vm0 }
 0x143   : > { %6336 = vmatmul.mubr.msk.bf16.gmra.mrb[20].mxu1 %vm9264_vm8, %v9224_v59  ;;  %vm9280_vm8 = vmmov %vm9184_vm0 }
 0x144   : > { %6339 = vmatprep.mubr.msk.bf16.mxu1 %vm9265_vm13, %v9228_v42  ;;  %vm9281_vm13 = vmmov %vm9184_vm0 }
 0x145   : > { %6472 = vmatmul.mubr.msk.bf16.gmra.mrb[20].mxu0 %vm9267_vm9, %v8288_v55  ;;  %vm9284_vm9 = vmmov %vm9184_vm0 }
 0x146   : > { %6475 = vmatprep.mubr.msk.bf16.mxu0 %vm9268_vm1, %v5301_v61  ;;  %vm9285_vm1 = vmmov %vm9184_vm0 }
 0x14b   : > { %6340 = vmatmul.mubr.msk.bf16.gmra.mrb[24].mxu1 %vm9270_vm7, %v9230_v56  ;;  %vm9286_vm7 = vmmov %vm9184_vm0 }
 0x14c   : > { %6343 = vmatprep.mubr.msk.bf16.mxu1 %vm9272_vm15, %v9234_v39  ;;  %vm9287_vm15 = vmmov %vm9184_vm0 }
 0x14d   : > { %6476 = vmatmul.mubr.msk.bf16.gmra.mrb[24].mxu0 %vm9273_vm3, %v8315_v50  ;;  %vm9288_vm3 = vmmov %vm9184_vm0 }
 0x14e   : > { %6479 = vmatprep.mubr.msk.bf16.mxu0 %vm9274_vm6, %v5303_v27  ;;  %vm9289_vm6 = vmmov %vm9184_vm0 }
 0x153   : > { %6344 = vmatmul.mubr.msk.bf16.gmra.mrb[28].mxu1 %vm9275_vm12, %v8398_v49  ;;  %vm9290_vm12 = vmmov %vm9184_vm0 }
 0x155   : > { %6480 = vmatmul.mubr.bf16.gmra.mrb[28].mxu0 %v9239_v41 }
 0x1ce   : > { %v6283_v55 = vpop.f32.mrb[0].mxu1 }
 0x1cf   : > { %v2905_v14 = vpop.f32.mrb[1].mxu1 }
 0x1d0   : > { %v6284_v12 = vpop.f32.mrb[2].mxu1 }
 0x1d1   : > { %v2908_v57 = vpop.f32.mrb[3].mxu1 }
 0x1d6   : > { %v6287_v36 = vpop.f32.mrb[4].mxu1 }
 0x1d7   : > { %v2921_v2 = vpop.f32.mrb[5].mxu1 }
 0x1d8   : > { %v6288_v5 = vpop.f32.mrb[6].mxu1 }
 0x1d9   : > { %v2924_v63 = vpop.f32.mrb[7].mxu1 }
 0x1de   : > { %v8509_v1 = vpop.f32.mrb[8].mxu1 }
 0x1df   : > { %v8511_v9 = vpop.f32.mrb[9].mxu1 }
 0x1e0   : > { %v8513_v50 = vpop.f32.mrb[10].mxu1 }
 0x1e1   : > { %v8515_v19 = vpop.f32.mrb[11].mxu1 }
 0x1e6   : > { %v8517_v60 = vpop.f32.mrb[12].mxu1 }
 0x1e7   : > { %v8519_v29 = vpop.f32.mrb[13].mxu1 }
 0x1e8   : > { %v8521_v48 = vpop.f32.mrb[14].mxu1 }
 0x1e9   : > { %v8523_v47 = vpop.f32.mrb[15].mxu1 }
 0x1f0   : > { %v6453_v37 = vpop.f32.mrb[0].mxu0 }
 0x1f1   : > { %v6485_v46 = vadd.f32 %v6453_v37, %v6283_v55  ;;  %v5392_v22 = vpop.f32.mrb[1].mxu0 }
 0x1f2   : > { %v6486_v40 = vadd.f32 %v5392_v22, %v2905_v14  ;;  %v6454_v25 = vpop.f32.mrb[2].mxu0 }
 0x1f3   : > { %5553 = vst.msk [vmem:[%s8530_s8 + $0x10] sm:$0xff] %vm9276_vm4, %v6485_v46  ;;  %v6487_v62 = vadd.f32 %v6454_v25, %v6284_v12  ;;  %v5395_v54 = vpop.f32.mrb[3].mxu0  ;;  %v5656_v3 = vmul.f32 %v6485_v46, %v6485_v46  ;;  %v5586_v49 = vsel %vm9281_vm13, %v6485_v46, 0.0  ;;  %vm9291_vm4 = vmmov %vm9184_vm0 }
 0x1f4   : > { %5551 = vst.msk [vmem:[%s8530_s8] sm:$0xff] %vm9184_vm0, %v6486_v40  ;;  %v5654_v21 = vmul.f32 %v6486_v40, %v6486_v40  ;;  %v6488_v33 = vadd.f32 %v5395_v54, %v2908_v57  ;;  %v5583_v4 = vsel %vm9278_vm5, %v6486_v40, 0.0  ;;  %vm9293_vm5 = vmmov %vm9184_vm0 }
 0x1f5   : > { %5554 = vst.msk [vmem:[%s8530_s8 + $0x18] sm:$0xff] %vm9277_vm11, %v6487_v62  ;;  %v5657_v42 = vmul.f32 %v6487_v62, %v6487_v62  ;;  %v5689_v35 = vsel %vm9284_vm9, %v5656_v3, 0.0  ;;  %v5588_v38 = vsel %vm9285_vm1, %v6487_v62, 0.0  ;;  %vm9292_vm11 = vmmov %vm9184_vm0 }
 0x1f6   : > { %5552 = vst.msk [vmem:[%s8530_s8 + $0x8] sm:$0xff] %vm9279_vm2, %v6488_v33  ;;  %v5584_v24 = vsel %vm9280_vm8, %v6488_v33, 0.0  ;;  %v5655_v59 = vmul.f32 %v6488_v33, %v6488_v33  ;;  %v5686_v39 = vsel %vm9282_vm10, %v5654_v21, 0.0  ;;  %vm9294_vm2 = vmmov %vm9184_vm0 }
 0x1f7   : > { %v5585_v56 = vadd.f32 %v5584_v24, %v5583_v4  ;;  %v5691_v32 = vsel %vm9286_vm7, %v5657_v42, 0.0  ;;  %vm9295_vm8 = vmmov %vm9184_vm0 }
 0x1f8   : > { %v5687_v28 = vsel %vm9283_vm14, %v5655_v59, 0.0  ;;  %v6457_v15 = vpop.f32.mrb[4].mxu0  ;;  %vm9296_vm13 = vmmov %vm9184_vm0 }
 0x1f9   : > { %v5587_v17 = vadd.f32 %v5586_v49, %v5585_v56  ;;  %v5688_v41 = vadd.f32 %v5687_v28, %v5686_v39  ;;  %v6489_v45 = vadd.f32 %v6457_v15, %v6287_v36  ;;  %v5408_v51 = vpop.f32.mrb[5].mxu0  ;;  %vm9297_vm10 = vmmov %vm9184_vm0 }
 0x1fa   : > { %v6490_v7 = vadd.f32 %v5408_v51, %v2921_v2  ;;  %v6458_v58 = vpop.f32.mrb[6].mxu0  ;;  %vm9298_vm14 = vmmov %vm9184_vm0 }
 0x1fb   : > { %v5690_v8 = vadd.f32 %v5689_v35, %v5688_v41  ;;  %5557 = vst.msk [vmem:[%s8530_s8 + $0x30] sm:$0xff] %vm9287_vm15, %v6489_v45  ;;  %v5589_v53 = vadd.f32 %v5588_v38, %v5587_v17  ;;  %v5411_v23 = vpop.f32.mrb[7].mxu0  ;;  %v6491_v31 = vadd.f32 %v6458_v58, %v6288_v5  ;;  %v5660_v16 = vmul.f32 %v6489_v45, %v6489_v45  ;;  %vm9299_vm9 = vmmov %vm9184_vm0 }
 0x1fc   : > { %5555 = vst.msk [vmem:[%s8530_s8 + $0x20] sm:$0xff] %vm9288_vm3, %v6490_v7  ;;  %v5590_v20 = vsel %vm9289_vm6, %v6490_v7, 0.0  ;;  %v5658_v26 = vmul.f32 %v6490_v7, %v6490_v7  ;;  %v6492_v10 = vadd.f32 %v5411_v23, %v2924_v63  ;;  %v5594_v61 = vsel %vm9293_vm5, %v6489_v45, 0.0  ;;  %vm9300_vm1 = vmmov %vm9184_vm0 }
 0x1fd   : > { %v5591_v6 = vadd.f32 %v5590_v20, %v5589_v53  ;;  %v5692_v30 = vadd.f32 %v5691_v32, %v5690_v8  ;;  %5558 = vst.msk [vmem:[%s8530_s8 + $0x38] sm:$0xff] %vm9291_vm4, %v6491_v31  ;;  %v5661_v34 = vmul.f32 %v6491_v31, %v6491_v31  ;;  %v5596_v12 = vsel %vm9295_vm8, %v6491_v31, 0.0  ;;  %vm9301_vm7 = vmmov %vm9184_vm0 }
 0x1fe   : > { %v5693_v44 = vsel %vm9290_vm12, %v5658_v26, 0.0  ;;  %5556 = vst.msk [vmem:[%s8530_s8 + $0x28] sm:$0xff] %vm9184_vm0, %v6492_v10  ;;  %v5592_v18 = vsel %vm9292_vm11, %v6492_v10, 0.0  ;;  %v5659_v43 = vmul.f32 %v6492_v10, %v6492_v10  ;;  %v5697_v5 = vsel %vm9296_vm13, %v5660_v16, 0.0  ;;  %vm9302_vm15 = vmmov %vm9184_vm0 }
 0x1ff   : > { %v5694_v11 = vadd.f32 %v5693_v44, %v5692_v30  ;;  %v5593_v0 = vadd.f32 %v5592_v18, %v5591_v6  ;;  %vm9303_vm3 = vmmov %vm9184_vm0 }
 0x200   : > { %v6461_v13 = vpop.f32.mrb[8].mxu0  ;;  %v5695_v27 = vsel %vm9294_vm2, %v5659_v43, 0.0  ;;  %vm9304_vm6 = vmmov %vm9184_vm0 }
 0x201   : > { %v5595_v52 = vadd.f32 %v5594_v61, %v5593_v0  ;;  %v6493_v55 = vadd.f32 %v6461_v13, %v8509_v1  ;;  %v5424_v14 = vpop.f32.mrb[9].mxu0  ;;  %v5696_v57 = vadd.f32 %v5695_v27, %v5694_v11  ;;  %vm9305_vm12 = vmmov %vm9184_vm0 }
 0x202   : > { %v6494_v36 = vadd.f32 %v5424_v14, %v8511_v9  ;;  %v6462_v2 = vpop.f32.mrb[10].mxu0  ;;  %v5699_v9 = vsel %vm9300_vm1, %v5661_v34, 0.0  ;;  %vm9306_vm4 = vmmov %vm9184_vm0 }
 0x203   : > { %5561 = vst.msk [vmem:[%s8530_s8 + $0x50] sm:$0xff] %vm9297_vm10, %v6493_v55  ;;  %v5597_v63 = vadd.f32 %v5596_v12, %v5595_v52  ;;  %v6495_v37 = vadd.f32 %v6462_v2, %v8513_v50  ;;  %v5427_v46 = vpop.f32.mrb[11].mxu0  ;;  %v5698_v22 = vadd.f32 %v5697_v5, %v5696_v57  ;;  %v5664_v3 = vmul.f32 %v6493_v55, %v6493_v55  ;;  %vm9307_vm11 = vmmov %vm9184_vm0 }
 0x204   : > { %5559 = vst.msk [vmem:[%s8530_s8 + $0x40] sm:$0xff] %vm9298_vm14, %v6494_v36  ;;  %v5598_v1 = vsel %vm9299_vm9, %v6494_v36, 0.0  ;;  %v5662_v40 = vmul.f32 %v6494_v36, %v6494_v36  ;;  %v6496_v25 = vadd.f32 %v5427_v46, %v8515_v19  ;;  %v5602_v24 = vsel %vm9305_vm12, %v6493_v55, 0.0  ;;  %vm9308_vm5 = vmmov %vm9184_vm0 }
 0x205   : > { %v5599_v62 = vadd.f32 %v5598_v1, %v5597_v63  ;;  %5562 = vst.msk [vmem:[%s8530_s8 + $0x58] sm:$0xff] %vm9301_vm7, %v6495_v37  ;;  %v5700_v54 = vadd.f32 %v5699_v9, %v5698_v22  ;;  %v5665_v56 = vmul.f32 %v6495_v37, %v6495_v37  ;;  %v5604_v15 = vsel %vm9184_vm0, %v6495_v37, 0.0  ;;  %vm9309_vm2 = vmmov %vm9184_vm0 }
 0x206   : > { %v5701_v21 = vsel %vm9302_vm15, %v5662_v40, 0.0  ;;  %5560 = vst.msk [vmem:[%s8530_s8 + $0x48] sm:$0xff] %vm9303_vm3, %v6496_v25  ;;  %v5600_v50 = vsel %vm9304_vm6, %v6496_v25, 0.0  ;;  %v5663_v33 = vmul.f32 %v6496_v25, %v6496_v25  ;;  %v5705_v51 = vsel %vm9307_vm11, %v5664_v3, 0.0  ;;  %vm9310_vm8 = vmmov %vm9184_vm0 }
 0x207   : > { %v5601_v4 = vadd.f32 %v5600_v50, %v5599_v62  ;;  %v5702_v59 = vadd.f32 %v5701_v21, %v5700_v54  ;;  %vm9311_vm13 = vmmov %vm9184_vm0 }
 0x208   : > { %v5703_v19 = vsel %vm9306_vm4, %v5663_v33, 0.0  ;;  %v6465_v42 = vpop.f32.mrb[12].mxu0  ;;  %vm9312_vm10 = vmmov %vm9184_vm0 }
 0x209   : > { %v5603_v49 = vadd.f32 %v5602_v24, %v5601_v4  ;;  %v6497_v39 = vadd.f32 %v6465_v42, %v8517_v60  ;;  %v5440_v28 = vpop.f32.mrb[13].mxu0  ;;  %v5704_v17 = vadd.f32 %v5703_v19, %v5702_v59  ;;  %vm9313_vm14 = vmmov %vm9184_vm0 }
 0x20a   : > { %v6498_v41 = vadd.f32 %v5440_v28, %v8519_v29  ;;  %v6466_v45 = vpop.f32.mrb[14].mxu0  ;;  %v5707_v29 = vsel %vm9311_vm13, %v5665_v56, 0.0  ;;  %vm9314_vm9 = vmmov %vm9184_vm0 }
 0x20b   : > { %5565 = vst.msk [vmem:[%s8530_s8 + $0x70] sm:$0xff] %vm9308_vm5, %v6497_v39  ;;  %v5605_v35 = vadd.f32 %v5604_v15, %v5603_v49  ;;  %v6499_v38 = vadd.f32 %v6466_v45, %v8521_v48  ;;  %v5443_v7 = vpop.f32.mrb[15].mxu0  ;;  %v5706_v58 = vadd.f32 %v5705_v51, %v5704_v17  ;;  %vm9315_vm1 = vmmov %vm9184_vm0  ;;  %v5668_v6 = vmul.f32 %v6497_v39, %v6497_v39 }
 0x20c   : > { %5563 = vst.msk [vmem:[%s8530_s8 + $0x60] sm:$0xff] %vm9309_vm2, %v6498_v41  ;;  %v5606_v60 = vsel %vm9310_vm8, %v6498_v41, 0.0  ;;  %v5666_v32 = vmul.f32 %v6498_v41, %v6498_v41  ;;  %v6500_v8 = vadd.f32 %v5443_v7, %v8523_v47  ;;  %vm9316_vm7 = vmmov %vm9184_vm0 }
 0x20d   : > { %v5607_v53 = vadd.f32 %v5606_v60, %v5605_v35  ;;  %5566 = vst.msk [vmem:[%s8530_s8 + $0x78] sm:$0xff] %vm9312_vm10, %v6499_v38  ;;  %v5708_v20 = vadd.f32 %v5707_v29, %v5706_v58  ;;  %v5610_v47 = vsel %vm9316_vm7, %v6497_v39, 0.0  ;;  %vm9317_vm15 = vmmov %vm9184_vm0  ;;  %v5669_v43 = vmul.f32 %v6499_v38, %v6499_v38 }
 0x20e   : > { %v6333_v23 = vpop.f32.mrb[16].mxu1  ;;  %v5709_v26 = vsel %vm9313_vm14, %v5666_v32, 0.0  ;;  %5564 = vst.msk [vmem:[%s8530_s8 + $0x68] sm:$0xff] %vm9314_vm9, %v6500_v8  ;;  %v5608_v48 = vsel %vm9315_vm1, %v6500_v8, 0.0  ;;  %v5667_v31 = vmul.f32 %v6500_v8, %v6500_v8  ;;  %vm9318_vm3 = vmmov %vm9184_vm0 }
 0x20f   : > { %v3423_v10 = vpop.f32.mrb[17].mxu1  ;;  %v5609_v30 = vadd.f32 %v5608_v48, %v5607_v53  ;;  %v5710_v18 = vadd.f32 %v5709_v26, %v5708_v20  ;;  %v5612_v52 = vsel %vm9318_vm3, %v6499_v38, 0.0  ;;  %vm9319_vm6 = vmmov %vm9184_vm0 }
 0x210   : > { %v6334_v44 = vpop.f32.mrb[18].mxu1  ;;  %v5711_v16 = vsel %vm9317_vm15, %v5667_v31, 0.0  ;;  %v6469_v11 = vpop.f32.mrb[16].mxu0  ;;  %v5713_v12 = vsel %vm9319_vm6, %v5668_v6, 0.0  ;;  %vm9320_vm12 = vmmov %vm9184_vm0 }
 0x211   : > { %v3426_v0 = vpop.f32.mrb[19].mxu1  ;;  %v5611_v61 = vadd.f32 %v5610_v47, %v5609_v30  ;;  %v6501_v13 = vadd.f32 %v6469_v11, %v6333_v23  ;;  %v5456_v34 = vpop.f32.mrb[17].mxu0  ;;  %v5712_v27 = vadd.f32 %v5711_v16, %v5710_v18  ;;  %vm9321_vm4 = vmmov %vm9184_vm0 }
 0x212   : > { %v6502_v55 = vadd.f32 %v5456_v34, %v3423_v10  ;;  %v6470_v14 = vpop.f32.mrb[18].mxu0  ;;  %vm9322_vm11 = vmmov %vm9184_vm0 }
 0x213   : > { %5569 = vst.msk [vmem:[%s8530_s8 + $0x90] sm:$0xff] %vm9320_vm12, %v6501_v13  ;;  %v5613_v57 = vadd.f32 %v5612_v52, %v5611_v61  ;;  %v6503_v36 = vadd.f32 %v6470_v14, %v6334_v44  ;;  %v5459_v2 = vpop.f32.mrb[19].mxu0  ;;  %v5714_v5 = vadd.f32 %v5713_v12, %v5712_v27  ;;  %v5715_v22 = vsel %vm9322_vm11, %v5669_v43, 0.0  ;;  %vm9323_vm5 = vmmov %vm9184_vm0 }
 0x214   : > { %5567 = vst.msk [vmem:[%s8530_s8 + $0x80] sm:$0xff] %vm9321_vm4, %v6502_v55  ;;  %v5614_v63 = vsel %vm9184_vm0, %v6502_v55, 0.0  ;;  %v5670_v37 = vmul.f32 %v6502_v55, %v6502_v55  ;;  %v6504_v46 = vadd.f32 %v5459_v2, %v3426_v0  ;;  %vm9324_vm2 = vmmov %vm9184_vm0  ;;  %v5672_v50 = vmul.f32 %v6501_v13, %v6501_v13 }
 0x215   : > { %v5615_v1 = vadd.f32 %v5614_v63, %v5613_v57  ;;  %5570 = vst.msk [vmem:[%s8530_s8 + $0x98] sm:$0xff] %vm9323_vm5, %v6503_v36  ;;  %v5716_v25 = vadd.f32 %v5715_v22, %v5714_v5  ;;  %vm9325_vm8 = vmmov %vm9184_vm0  ;;  %v5673_v56 = vmul.f32 %v6503_v36, %v6503_v36 }
 0x216   : > { %v6337_v40 = vpop.f32.mrb[20].mxu1  ;;  %v5717_v9 = vsel %vm9324_vm2, %v5670_v37, 0.0  ;;  %5568 = vst.msk [vmem:[%s8530_s8 + $0x88] sm:$0xff] %vm9325_vm8, %v6504_v46  ;;  %vm9326_vm13 = vmmov %vm9184_vm0  ;;  %v5671_v54 = vmul.f32 %v6504_v46, %v6504_v46 }
 0x217   : > { %v5616_v62 = vsel %vm9326_vm13, %v6504_v46, 0.0  ;;  %v3439_v21 = vpop.f32.mrb[21].mxu1  ;;  %vm9327_vm10 = vmmov %vm9184_vm0  ;;  %v5718_v24 = vadd.f32 %v5717_v9, %v5716_v25 }
 0x218   : > { %v5617_v33 = vadd.f32 %v5616_v62, %v5615_v1  ;;  %v6338_v3 = vpop.f32.mrb[22].mxu1  ;;  %v5618_v4 = vsel %vm9327_vm10, %v6501_v13, 0.0  ;;  %vm9328_vm14 = vmmov %vm9184_vm0  ;;  %v6473_v19 = vpop.f32.mrb[20].mxu0 }
 0x219   : > { %v5719_v59 = vsel %vm9328_vm14, %v5671_v54, 0.0  ;;  %v3442_v42 = vpop.f32.mrb[23].mxu1  ;;  %v6505_v39 = vadd.f32 %v6473_v19, %v6337_v40  ;;  %v5472_v28 = vpop.f32.mrb[21].mxu0  ;;  %vm9329_vm9 = vmmov %vm9184_vm0 }
 0x21a   : > { %v5619_v49 = vadd.f32 %v5618_v4, %v5617_v33  ;;  %v5620_v15 = vsel %vm9329_vm9, %v6503_v36, 0.0  ;;  %v5720_v17 = vadd.f32 %v5719_v59, %v5718_v24  ;;  %v6506_v41 = vadd.f32 %v5472_v28, %v3439_v21  ;;  %v6474_v45 = vpop.f32.mrb[22].mxu0  ;;  %vm9330_vm1 = vmmov %vm9184_vm0 }
 0x21b   : > { %v5721_v51 = vsel %vm9330_vm1, %v5672_v50, 0.0  ;;  %vm9331_vm7 = vmmov %vm9184_vm0  ;;  %v6507_v38 = vadd.f32 %v6474_v45, %v6338_v3  ;;  %v5475_v7 = vpop.f32.mrb[23].mxu0  ;;  %v5676_v6 = vmul.f32 %v6505_v39, %v6505_v39 }
 0x21c   : > { %5573 = vst.msk [vmem:[%s8530_s8 + $0xb0] sm:$0xff] %vm9331_vm7, %v6505_v39  ;;  %v5621_v35 = vadd.f32 %v5620_v15, %v5619_v49  ;;  %v5722_v58 = vadd.f32 %v5721_v51, %v5720_v17  ;;  %vm9332_vm15 = vmmov %vm9184_vm0  ;;  %v5674_v32 = vmul.f32 %v6506_v41, %v6506_v41  ;;  %v6508_v8 = vadd.f32 %v5475_v7, %v3442_v42 }
 0x21d   : > { %5571 = vst.msk [vmem:[%s8530_s8 + $0xa0] sm:$0xff] %vm9332_vm15, %v6506_v41  ;;  %vm9333_vm3 = vmmov %vm9184_vm0  ;;  %v5677_v43 = vmul.f32 %v6507_v38, %v6507_v38 }
 0x21e   : > { %v5622_v60 = vsel %vm9333_vm3, %v6506_v41, 0.0  ;;  %vm9334_vm6 = vmmov %vm9184_vm0  ;;  %v6341_v23 = vpop.f32.mrb[24].mxu1  ;;  %5572 = vst.msk [vmem:[%s8530_s8 + $0xa8] sm:$0xff] %vm9184_vm0, %v6508_v8  ;;  %v5675_v31 = vmul.f32 %v6508_v8, %v6508_v8 }
 0x21f   : > { %v5723_v29 = vsel %vm9334_vm6, %v5673_v56, 0.0  ;;  %v5623_v53 = vadd.f32 %v5622_v60, %v5621_v35  ;;  %vm9335_vm12 = vmmov %vm9184_vm0  ;;  %v3455_v10 = vpop.f32.mrb[25].mxu1 }
 0x220   : > { %5574 = vst.msk [vmem:[%s8530_s8 + $0xb8] sm:$0xff] %vm9335_vm12, %v6507_v38  ;;  %v5724_v20 = vadd.f32 %v5723_v29, %v5722_v58  ;;  %vm9336_vm4 = vmmov %vm9184_vm0  ;;  %v6342_v44 = vpop.f32.mrb[26].mxu1  ;;  %v6477_v11 = vpop.f32.mrb[24].mxu0 }
 0x221   : > { %v5725_v26 = vsel %vm9336_vm4, %v5674_v32, 0.0  ;;  %vm9337_vm11 = vmmov %vm9184_vm0  ;;  %v3458_v0 = vpop.f32.mrb[27].mxu1  ;;  %v6509_v13 = vadd.f32 %v6477_v11, %v6341_v23  ;;  %v5488_v34 = vpop.f32.mrb[25].mxu0 }
 0x222   : > { %v5624_v48 = vsel %vm9337_vm11, %v6508_v8, 0.0  ;;  %vm9338_vm5 = vmmov %vm9184_vm0  ;;  %v5726_v18 = vadd.f32 %v5725_v26, %v5724_v20  ;;  %v6510_v55 = vadd.f32 %v5488_v34, %v3455_v10  ;;  %v6478_v14 = vpop.f32.mrb[26].mxu0 }
 0x223   : > { %v5625_v30 = vadd.f32 %v5624_v48, %v5623_v53  ;;  %v5626_v47 = vsel %vm9338_vm5, %v6505_v39, 0.0  ;;  %vm9339_vm2 = vmmov %vm9184_vm0  ;;  %v6511_v36 = vadd.f32 %v6478_v14, %v6342_v44  ;;  %v5491_v2 = vpop.f32.mrb[27].mxu0  ;;  %v5680_v50 = vmul.f32 %v6509_v13, %v6509_v13 }
 0x224   : > { %v5727_v16 = vsel %vm9339_vm2, %v5675_v31, 0.0  ;;  %vm9340_vm8 = vmmov %vm9184_vm0  ;;  %v5678_v37 = vmul.f32 %v6510_v55, %v6510_v55  ;;  %v6512_v46 = vadd.f32 %v5491_v2, %v3458_v0 }
 0x225   : > { %v5627_v61 = vadd.f32 %v5626_v47, %v5625_v30  ;;  %v5628_v52 = vsel %vm9340_vm8, %v6507_v38, 0.0  ;;  %v5728_v27 = vadd.f32 %v5727_v16, %v5726_v18  ;;  %vm9341_vm13 = vmmov %vm9184_vm0  ;;  %v5681_v56 = vmul.f32 %v6511_v36, %v6511_v36 }
 0x226   : > { %v5729_v12 = vsel %vm9341_vm13, %v5676_v6, 0.0  ;;  %vm9342_vm10 = vmmov %vm9184_vm0  ;;  %v6345_v40 = vpop.f32.mrb[28].mxu1  ;;  %v5679_v54 = vmul.f32 %v6512_v46, %v6512_v46  ;;  %v5636_v15 = vsel %vm9184_vm0, %v6511_v36, 0.0 }
 0x227   : > { %5577 = vst.msk [vmem:[%s8530_s8 + $0xd0] sm:$0xff] %vm9342_vm10, %v6509_v13  ;;  %v5629_v57 = vadd.f32 %v5628_v52, %v5627_v61  ;;  %v5730_v5 = vadd.f32 %v5729_v12, %v5728_v27  ;;  %vm9343_vm14 = vmmov %vm9184_vm0  ;;  %v3471_v21 = vpop.f32.mrb[29].mxu1 }
 0x228   : > { %5575 = vst.msk [vmem:[%s8530_s8 + $0xc0] sm:$0xff] %vm9343_vm14, %v6510_v55  ;;  %vm9344_vm9 = vmmov %vm9184_vm0  ;;  %v6346_v3 = vpop.f32.mrb[30].mxu1  ;;  %v6481_v19 = vpop.f32.mrb[28].mxu0 }
 0x229   : > { %v5630_v63 = vsel %vm9344_vm9, %v6510_v55, 0.0  ;;  %vm9345_vm1 = vmmov %vm9184_vm0  ;;  %v3474_v42 = vpop.f32.mrb[31].mxu1  ;;  %v6513_v39 = vadd.f32 %v6481_v19, %v6345_v40  ;;  %v5504_v28 = vpop.f32.mrb[29].mxu0 }
 0x22a   : > { %v5731_v22 = vsel %vm9345_vm1, %v5677_v43, 0.0  ;;  %v5631_v1 = vadd.f32 %v5630_v63, %v5629_v57  ;;  %vm9346_vm7 = vmmov %vm9184_vm0  ;;  %v6514_v41 = vadd.f32 %v5504_v28, %v3471_v21  ;;  %v6482_v45 = vpop.f32.mrb[30].mxu0 }
 0x22b   : > { %5578 = vst.msk [vmem:[%s8530_s8 + $0xd8] sm:$0xff] %vm9346_vm7, %v6511_v36  ;;  %v5732_v25 = vadd.f32 %v5731_v22, %v5730_v5  ;;  %vm9347_vm15 = vmmov %vm9184_vm0  ;;  %v6515_v38 = vadd.f32 %v6482_v45, %v6346_v3  ;;  %v5507_v7 = vpop.f32.mrb[31].mxu0  ;;  %v5684_v31 = vmul.f32 %v6513_v39, %v6513_v39 }
 0x22c   : > { %v5733_v9 = vsel %vm9347_vm15, %v5678_v37, 0.0  ;;  %vm9348_vm3 = vmmov %vm9184_vm0  ;;  %v5682_v32 = vmul.f32 %v6514_v41, %v6514_v41  ;;  %v6516_v8 = vadd.f32 %v5507_v7, %v3474_v42 }
 0x22d   : > { %5576 = vst.msk [vmem:[%s8530_s8 + $0xc8] sm:$0xff] %vm9348_vm3, %v6512_v46  ;;  %vm9349_vm6 = vmmov %vm9184_vm0  ;;  %v5734_v24 = vadd.f32 %v5733_v9, %v5732_v25  ;;  %v5685_v47 = vmul.f32 %v6515_v38, %v6515_v38 }
 0x22e   : > { %v5632_v62 = vsel %vm9349_vm6, %v6512_v46, 0.0  ;;  %vm9350_vm12 = vmmov %vm9184_vm0  ;;  %v5683_v48 = vmul.f32 %v6516_v8, %v6516_v8 }
 0x22f   : > { %v5633_v33 = vadd.f32 %v5632_v62, %v5631_v1  ;;  %v5634_v4 = vsel %vm9350_vm12, %v6509_v13, 0.0  ;;  %vm9351_vm4 = vmmov %vm9184_vm0 }
 0x230   : > { %v5735_v59 = vsel %vm9351_vm4, %v5679_v54, 0.0  ;;  %vm9352_vm11 = vmmov %vm9184_vm0  ;;  %vm5652_vm4 = vcmask 57344  }
 0x231   : > { %v5635_v49 = vadd.f32 %v5634_v4, %v5633_v33  ;;  %v5736_v17 = vadd.f32 %v5735_v59, %v5734_v24  ;;  %v5737_v51 = vsel %vm9352_vm11, %v5680_v50, 0.0  ;;  %vm9353_vm5 = vmmov %vm9184_vm0 }
 0x232   : > { %5581 = vst.msk [vmem:[%s8530_s8 + $0xf0] sm:$0xff] %vm9353_vm5, %v6513_v39  ;;  %vm9354_vm2 = vmmov %vm9184_vm0 }
 0x233   : > { %v5637_v35 = vadd.f32 %v5636_v15, %v5635_v49  ;;  %v5738_v58 = vadd.f32 %v5737_v51, %v5736_v17  ;;  %5579 = vst.msk [vmem:[%s8530_s8 + $0xe0] sm:$0xff] %vm9354_vm2, %v6514_v41  ;;  %vm9355_vm8 = vmmov %vm9184_vm0 }
 0x234   : > { %v5638_v60 = vsel %vm9355_vm8, %v6514_v41, 0.0  ;;  %vm9356_vm13 = vmmov %vm9184_vm0 }
 0x235   : > { %v5739_v29 = vsel %vm9356_vm13, %v5681_v56, 0.0  ;;  %v5639_v53 = vadd.f32 %v5638_v60, %v5637_v35  ;;  %vm9357_vm10 = vmmov %vm9184_vm0 }
 0x236   : > { %5582 = vst.msk [vmem:[%s8530_s8 + $0xf8] sm:$0xff] %vm9357_vm10, %v6515_v38  ;;  %v5740_v23 = vadd.f32 %v5739_v29, %v5738_v58  ;;  %vm9358_vm14 = vmmov %vm9184_vm0 }
 0x237   : > { %v5741_v20 = vsel %vm9358_vm14, %v5682_v32, 0.0  ;;  %vm9359_vm9 = vmmov %vm9184_vm0 }
 0x238   : > { %5580 = vst.msk [vmem:[%s8530_s8 + $0xe8] sm:$0xff] %vm9359_vm9, %v6516_v8  ;;  %vm9360_vm1 = vmmov %vm9184_vm0  ;;  %v5742_v30 = vadd.f32 %v5741_v20, %v5740_v23 }
 0x239   : > { %v5640_v26 = vsel %vm9360_vm1, %v6516_v8, 0.0  ;;  %vm9361_vm7 = vmmov %vm9184_vm0 }
 0x23a   : > { %v5641_v10 = vadd.f32 %v5640_v26, %v5639_v53  ;;  %v5642_v6 = vsel %vm9361_vm7, %v6513_v39, 0.0  ;;  %vm9362_vm15 = vmmov %vm9184_vm0 }
 0x23b   : > { %v5743_v44 = vsel %vm9362_vm15, %v5683_v48, 0.0  ;;  %vm9363_vm3 = vmmov %vm9184_vm0 }
 0x23c   : > { %v5643_v18 = vadd.f32 %v5642_v6, %v5641_v10  ;;  %v5644_v16 = vsel %vm9363_vm3, %v6515_v38, 0.0  ;;  %v5744_v11 = vadd.f32 %v5743_v44, %v5742_v30  ;;  %vm9364_vm6 = vmmov %vm9184_vm0 }
 0x23d   : > { %v5745_v0 = vsel %vm9364_vm6, %v5684_v31, 0.0  ;;  %vm9365_vm12 = vmmov %vm9184_vm0 }
 0x23e   : > { %v5645_v43 = vadd.f32 %v5644_v16, %v5643_v18  ;;  %v5746_v61 = vadd.f32 %v5745_v0, %v5744_v11  ;;  %v5747_v13 = vsel %vm9365_vm12, %v5685_v47, 0.0 }
 0x240   : > { %v5646_v34 = vrot.slane %v5645_v43, 4  ;;  %v5748_v52 = vadd.f32 %v5747_v13, %v5746_v61 }
 0x242   : > { %v5647_v27 = vadd.f32 %v5646_v34, %v5645_v43  ;;  %v5749_v55 = vrot.slane %v5748_v52, 4 }
 0x244   : > { %v5648_v14 = vrot.slane %v5647_v27, 2  ;;  %v5750_v12 = vadd.f32 %v5749_v55, %v5748_v52 }
 0x246   : > { %v5649_v57 = vadd.f32 %v5648_v14, %v5647_v27  ;;  %v5751_v36 = vrot.slane %v5750_v12, 2 }
 0x248   : > { %v5650_v2 = vrot.slane %v5649_v57, 1  ;;  %v5752_v5 = vadd.f32 %v5751_v36, %v5750_v12 }
 0x24a   : > { %v5651_v63 = vadd.f32 %v5650_v2, %v5649_v57  ;;  %v5753_v37 = vrot.slane %v5752_v5, 1 }
 0x24c   : > { %5653 = vst.msk [vmem:[%s265_s10] sm:$0x1] %vm5652_vm4, %v5651_v63  ;;  %v5754_v46 = vadd.f32 %v5753_v37, %v5752_v5 }
 0x24e   : > { %5755 = vst.msk [vmem:[%s268_s13] sm:$0x1] %vm5652_vm4, %v5754_v46 }
 0x24f PF: > { %s17_s21 = sadd.s32 1, %s6768_s21  }
 0x250   : > { %p14_p4 = scmp.ge.s32.totalorder %s17_s21, 4  }
 0x252   :  { %16 = sbr.rel (!%p14_p4) target bundleno = 1 (0x1), region = 98 }

// kernel: zhugo_residual_conv_block.10
= control target key start
LH: loop header
LB: loop body
LE: loop exit
PB: predicated region body
PF: predicated region fallthrough
CT: control target
= control target key end

     0   :  { %s6938_s24 = smov 0   ;;  %s8941_s0 = inlined_call_operand.vmem [shape: f32[1,8], index: 0, kind: input, shape index: {}]   ;;  %s8942_s1 = inlined_call_operand.vmem [shape: f32[1,8], index: 1, kind: input, shape index: {}]   ;;  %s8943_s2 = inlined_call_operand.vmem [shape: f32[2,256,8], index: 2, kind: input, shape index: {}]   ;;  %s8944_s3 = inlined_call_operand.vmem [shape: bf16[9,8,8], index: 3, kind: input, shape index: {}]   ;;  %s8945_s4 = inlined_call_operand.vmem [shape: f32[2,256,8], index: 4, kind: input, shape index: {}, may-alias: {4,5}]   ;;  %s8946_s5 = inlined_call_operand.vmem [shape: f32[2,256,8], index: 5, kind: output, shape index: {0}, may-alias: {4,5}]   ;;  %s8947_s6 = inlined_call_operand.vmem [shape: f32[2,1,8], index: 6, kind: output, shape index: {1}]   ;;  %s8948_s7 = inlined_call_operand.vmem [shape: f32[2,1,8], index: 7, kind: output, shape index: {2}]  }
   0x1 LB: > { %s5984_s25 = sadd.s32 4294967295, %s6894_s24   ;;  %p5988_p0 = scmp.ge.s32.totalorder %s6894_s24, 1  ;;  %s6894_s24 = sphi %s6938_s24, %s18_s24  }
   0x2   : > { %p252_p1 = scmp.lt.s32.totalorder %s6894_s24, 3 }
   0x4   : > { %p253_p2 = pnand %p5988_p0, %p252_p1 }
   0x6   : > { %256 = sbr.rel (%p253_p2) target bundleno = 593 (0x251), region = 40 }
   0xd   : > { %v5997_v0 = vld [vmem:[%s8944_s3 + $0x4] sm:$0xf]  ;;  %vm9006_vm0 = vcmask 1043456   ;;  %v6062_v1 = vld [vmem:[%s8944_s3 + $0x10] sm:$0xf]  ;;  %p295_p3 = scmp.lt.s32.totalorder %s5984_s25, 1  ;;  %v523_v4 = vlaneseq }
   0xe   : > { %6867 = vmatprep.subr.msk.bf16.mxu1 %vm9006_vm0, %v5997_v0  ;;  %6871 = vmatprep.subr.msk.bf16.mxu0 %vm9006_vm0, %v6062_v1  ;;  %v1603_v2 = vsel %vm9006_vm0, %v5997_v0, 0  ;;  %v6956_v3 = vsel %vm9006_vm0, %v6062_v1, 0  ;;  %v1309_v5 = vld [vmem:[%s8944_s3] sm:$0xf]  ;;  %v8952_v6 = vmov 0.0|0.0   ;;  %vm9026_vm2 = vcmask 64512  }
   0xf   : > { %9104 = vst [vmem:[#allocation2_spill] sm:$0xff] %v6956_v3  ;;  %6304 = vmatpush3.bf16.msra.mxu1 %v1603_v2  ;;  %6440 = vmatpush3.bf16.msra.mxu0 %v6956_v3  ;;  %s9630_s25 = smov (!%p295_p3, %s5984_s25), 1  ;;  %v6079_v7 = vld [vmem:[%s8944_s3 + $0x14] sm:$0xf]  ;;  %v6976_v8 = vld [vmem:[%s8941_s0] ss:$0 sm:$0xff] }
  0x10   : > { %6305 = vmatprep.mubr.bf16.mxu1 %v8952_v6  ;;  %6868 = vmatprep.subr.msk.bf16.mxu1 %vm9006_vm0, %v1309_v5  ;;  %s6971_s11 = sshll.u32 %s9630_s25, 8  ;;  %v6978_v9 = vshrl.u32 %v523_v4, 7  ;;  %v6989_v10 = vld [vmem:[%s8942_s1] ss:$0 sm:$0xff]  ;;  %v6994_v11 = vld [vmem:[%s8944_s3 + $0x18] sm:$0xf]  ;;  %s312_s18 = scalar_lea.vmem %s8947_s6, %s9630_s25 }
  0x11   : > { %6873 = vmatprep.subr.msk.bf16.mxu0 %vm9006_vm0, %v6079_v7  ;;  %s6984_s16 = scalar_lea.vmem %s8943_s2, %s6971_s11  ;;  %v1815_v15 = vsel %vm9006_vm0, %v1309_v5, 0  ;;  %v7007_v21 = vsel %vm9006_vm0, %v6079_v7, 0  ;;  %v7024_v31 = vsel %vm9006_vm0, %v6994_v11, 0  ;;  %v7061_v57 = vld [vmem:[%s8944_s3 + $0x8] sm:$0xf]  ;;  %s8669_s13 = scalar_lea.vmem %s8945_s4, %s6971_s11 }
  0x12   : > { %v317_v12 = vld [vmem:[%s6984_s16] sm:$0xff]  ;;  %v318_v13 = vld [vmem:[%s6984_s16 + $0x8] sm:$0xff]  ;;  %v348_v14 = vld [vmem:[%s6984_s16 + $0xf8] sm:$0xff]  ;;  %vm9034_vm1 = vcmp.lt.s32.totalorder %v6978_v9, 1  ;;  %v7015_v27 = vadd.s32 8, %v6978_v9  ;;  %v7020_v30 = vadd.s32 24, %v6978_v9  ;;  %s315_s21 = scalar_lea.vmem %s8948_s7, %s9630_s25 }
  0x13   : > { %v356_v16 = vmul.f32 %v6976_v8, %v317_v12  ;;  %v357_v17 = vmul.f32 %v6976_v8, %v318_v13  ;;  %v387_v18 = vmul.f32 %v6976_v8, %v348_v14  ;;  %v319_v19 = vld [vmem:[%s6984_s16 + $0x10] sm:$0xff]  ;;  %v320_v20 = vld [vmem:[%s6984_s16 + $0x18] sm:$0xff]  ;;  %v321_v22 = vld [vmem:[%s6984_s16 + $0x20] sm:$0xff]  ;;  %v7030_v35 = vadd.s32 40, %v6978_v9 }
  0x14   : > { %v358_v23 = vmul.f32 %v6976_v8, %v319_v19  ;;  %v359_v24 = vmul.f32 %v6976_v8, %v320_v20  ;;  %v322_v25 = vld [vmem:[%s6984_s16 + $0x28] sm:$0xff]  ;;  %v360_v26 = vmul.f32 %v6976_v8, %v321_v22  ;;  %v323_v40 = vld [vmem:[%s6984_s16 + $0x30] sm:$0xff]  ;;  %v7036_v41 = vadd.s32 56, %v6978_v9  ;;  %v324_v55 = vld [vmem:[%s6984_s16 + $0x38] sm:$0xff] }
  0x15   : > { %v395_v28 = vadd.f32 %v6989_v10, %v356_v16  ;;  %v396_v29 = vadd.f32 %v6989_v10, %v357_v17  ;;  %v361_v34 = vmul.f32 %v6976_v8, %v322_v25  ;;  %v426_v36 = vadd.f32 %v6989_v10, %v387_v18  ;;  %v325_v59 = vld [vmem:[%s6984_s16 + $0x40] sm:$0xff]  ;;  %v326_v60 = vld [vmem:[%s6984_s16 + $0x48] sm:$0xff]  ;;  %v327_v19 = vld [vmem:[%s6984_s16 + $0x50] sm:$0xff] }
  0x16   : > { %v397_v32 = vadd.f32 %v6989_v10, %v358_v23  ;;  %v398_v33 = vadd.f32 %v6989_v10, %v359_v24  ;;  %v399_v39 = vadd.f32 %v6989_v10, %v360_v26  ;;  %v567_v48 = vand.u32 15, %v7015_v27  ;;  %v328_v20 = vld [vmem:[%s6984_s16 + $0x58] sm:$0xff]  ;;  %v329_v26 = vld [vmem:[%s6984_s16 + $0x60] sm:$0xff] }
  0x17   : > { %vm427_vm3 = vcmp.gt.f32.partialorder %v395_v28, 0.0  ;;  %vm428_vm4 = vcmp.gt.f32.partialorder %v396_v29, 0.0  ;;  %v459_v37 = vmul.f32 0.01, %v395_v28  ;;  %v460_v38 = vmul.f32 0.01, %v396_v29 }
  0x18   : > { %vm429_vm5 = vcmp.gt.f32.partialorder %v397_v32, 0.0  ;;  %vm430_vm6 = vcmp.gt.f32.partialorder %v398_v33, 0.0  ;;  %v461_v43 = vmul.f32 0.01, %v397_v32  ;;  %v462_v44 = vmul.f32 0.01, %v398_v33 }
  0x19   : > { %v7038_v42 = vsel %vm427_vm3, %v395_v28, %v459_v37  ;;  %v7040_v45 = vsel %vm428_vm4, %v396_v29, %v460_v38  ;;  %v400_v47 = vadd.f32 %v6989_v10, %v361_v34  ;;  %v490_v49 = vmul.f32 0.01, %v426_v36  ;;  %v340_v3 = vld [vmem:[%s6984_s16 + $0xb8] sm:$0xff] }
  0x1a   : > { %v940_v46 = vrot.slane %v7038_v42, 7  ;;  %v8950_v50 = vrot.slane %v7040_v45, 7  ;;  %v1535_v51 = vpack.c.bf16 %v7040_v45, %v7038_v42  ;;  %v362_v52 = vmul.f32 %v6976_v8, %v323_v40 }
  0x1b   : > { %vm458_vm7 = vcmp.gt.f32.partialorder %v426_v36, 0.0  ;;  %v7050_v53 = vsel %vm429_vm5, %v397_v32, %v461_v43  ;;  %v7052_v54 = vsel %vm430_vm6, %v398_v33, %v462_v44  ;;  %v7056_v56 = vadd.s32 72, %v6978_v9 }
  0x1c   : > { %v7069_v58 = vsel %vm9034_vm1, %v940_v46, %v8950_v50  ;;  %6306 = vmatmul.mubr.msk.bf16.vlgmr.msra.gmra.mrb[0].mxu1 %vm9026_vm2, %v1535_v51  ;;  %6441 = vmatprep.mubr.msk.bf16.mxu0 %vm9026_vm2, %v1535_v51  ;;  %vm431_vm8 = vcmp.gt.f32.partialorder %v399_v39, 0.0  ;;  %v7076_v61 = vadd.s32 88, %v6978_v9  ;;  %v7079_v62 = vadd.s32 104, %v6978_v9  ;;  %v331_v51 = vld [vmem:[%s6984_s16 + $0x70] sm:$0xff] }
  0x1d   : > { %9105 = vst [vmem:[#allocation3_spill] sm:$0xff] %v7069_v58  ;;  %6338 = vmatpush3.bf16.msra.mxu1 %v1815_v15  ;;  %v7083_v63 = vpack.c.bf16 %v7052_v54, %v7050_v53  ;;  %vm432_vm9 = vcmp.gt.f32.partialorder %v400_v47, 0.0  ;;  %v463_v0 = vmul.f32 0.01, %v399_v39  ;;  %v581_v1 = vand.u32 15, %v7020_v30 }
  0x1e   : > { %v7087_v2 = vsel %vm458_vm7, %v426_v36, %v490_v49  ;;  %v464_v4 = vmul.f32 0.01, %v400_v47  ;;  %v363_v5 = vmul.f32 %v6976_v8, %v324_v55  ;;  %v401_v7 = vadd.f32 %v6989_v10, %v362_v52  ;;  %6869 = vmatprep.subr.msk.bf16.mxu1 %vm9006_vm0, %v7061_v57 }
  0x1f   : > { %9106 = vst [vmem:[#allocation4_spill] sm:$0xff] %v7083_v63  ;;  %9107 = vst [vmem:[#allocation5_spill] sm:$0xff] %v7087_v2  ;;  %vm9021_vm10 = vcmp.lt.s32.totalorder %v6978_v9, 7  ;;  %6442 = vmatmul.mubr.msk.bf16.vlgmr.msra.gmra.mrb[0].mxu0 %vm9026_vm2, %v7083_v63  ;;  %6309 = vmatprep.mubr.msk.bf16.mxu1 %vm9026_vm2, %v7083_v63  ;;  %v7099_v12 = vsel %vm431_vm8, %v399_v39, %v463_v0  ;;  %v364_v13 = vmul.f32 %v6976_v8, %v325_v59  ;;  %v332_v59 = vld [vmem:[%s6984_s16 + $0x78] sm:$0xff] }
  0x20   : > { %v365_v14 = vmul.f32 %v6976_v8, %v326_v60  ;;  %v595_v15 = vand.u32 15, %v7030_v35  ;;  %v8951_v16 = vrot.slane %v7038_v42, 1  ;;  %6474 = vmatpush3.bf16.msra.mxu0 %v7007_v21  ;;  %v7107_v17 = vsel %vm432_vm9, %v400_v47, %v464_v4  ;;  %v330_v21 = vld [vmem:[%s6984_s16 + $0x68] sm:$0xff] }
  0x21   : > { %v402_v18 = vadd.f32 %v6989_v10, %v363_v5  ;;  %v8949_v23 = vrot.slane %v7087_v2, 7  ;;  %v1979_v24 = vrot.slane %v7040_v45, 1  ;;  %v7117_v25 = vpack.c.bf16 %v7107_v17, %v7099_v12  ;;  %6874 = vmatprep.subr.msk.bf16.mxu0 %vm9006_vm0, %v6994_v11 }
  0x22   : > { %vm433_vm11 = vcmp.gt.f32.partialorder %v401_v7, 0.0  ;;  %v1981_v28 = vrot.slane %v7052_v54, 1  ;;  %v465_v29 = vmul.f32 0.01, %v401_v7  ;;  %v403_v33 = vadd.f32 %v6989_v10, %v364_v13 }
  0x23   : > { %9108 = vst [vmem:[#allocation6_spill] sm:$0xff] %v7117_v25  ;;  %vm434_vm12 = vcmp.gt.f32.partialorder %v402_v18, 0.0  ;;  %v466_v32 = vmul.f32 0.01, %v402_v18  ;;  %6445 = vmatprep.mubr.msk.bf16.mxu0 %vm9026_vm2, %v7117_v25  ;;  %v404_v34 = vadd.f32 %v6989_v10, %v365_v14  ;;  %v366_v36 = vmul.f32 %v6976_v8, %v327_v19 }
  0x24   : > { %v367_v37 = vmul.f32 %v6976_v8, %v328_v20  ;;  %6310 = vmatmul.mubr.msk.bf16.gmra.mrb[4].mxu1 %vm9026_vm2, %v7117_v25  ;;  %v7132_v11 = vsel %vm433_vm11, %v401_v7, %v465_v29  ;;  %v368_v39 = vmul.f32 %v6976_v8, %v329_v26  ;;  %v369_v40 = vmul.f32 %v6976_v8, %v330_v21 }
  0x25   : > { %v7134_v38 = vsel %vm434_vm12, %v402_v18, %v466_v32  ;;  %v7144_v43 = vsel %vm9034_vm1, %v8949_v23, %v940_v46  ;;  %v1980_v52 = vrot.slane %v7050_v53, 1  ;;  %vm435_vm13 = vcmp.gt.f32.partialorder %v403_v33, 0.0 }
  0x26   : > { %9109 = vst [vmem:[#allocation7_spill] sm:$0xff] %v7144_v43  ;;  %v7150_v49 = vpack.c.bf16 %v7134_v38, %v7132_v11  ;;  %vm436_vm14 = vcmp.gt.f32.partialorder %v404_v34, 0.0  ;;  %v467_v55 = vmul.f32 0.01, %v403_v33  ;;  %v468_v46 = vmul.f32 0.01, %v404_v34 }
  0x27   : > { %v405_v60 = vadd.f32 %v6989_v10, %v366_v36  ;;  %v406_v0 = vadd.f32 %v6989_v10, %v367_v37  ;;  %v407_v4 = vadd.f32 %v6989_v10, %v368_v39  ;;  %v7166_v5 = vsel %vm9021_vm10, %v1980_v52, %v1981_v28 }
  0x28   : > { %9110 = vst [vmem:[#allocation8_spill] sm:$0xff] %v7150_v49  ;;  %6446 = vmatmul.mubr.msk.bf16.gmra.mrb[4].mxu0 %vm9026_vm2, %v7150_v49  ;;  %6313 = vmatprep.mubr.msk.bf16.mxu1 %vm9026_vm2, %v7150_v49  ;;  %9111 = vst [vmem:[#allocation9_spill] sm:$0xff] %v7166_v5  ;;  %v7168_v7 = vsel %vm435_vm13, %v403_v33, %v467_v55  ;;  %v408_v13 = vadd.f32 %v6989_v10, %v369_v40  ;;  %vm7174_vm15 = vcmp.lt.s32.totalorder %v567_v48, 15  ;;  %v9112_v18 = vmov 0  ;;  %v333_v48 = vld [vmem:[%s6984_s16 + $0x80] sm:$0xff]  ;;  %v334_v33 = vld [vmem:[%s6984_s16 + $0x88] sm:$0xff] }
  0x29   : > { %v370_v14 = vmul.f32 %v6976_v8, %v331_v51  ;;  %v9113_v18 = vsel %vm7174_vm15, 4294967295, %v9112_v18  ;;  %v1982_v20 = vrot.slane %v7099_v12, 1  ;;  %v7181_v26 = vsel %vm436_vm14, %v404_v34, %v468_v46 }
  0x2a   : > { %9114 = vst [vmem:[#allocation10_spill] sm:$0xff] %v9113_v18  ;;  %v371_v21 = vmul.f32 %v6976_v8, %v332_v59  ;;  %v7187_v32 = vpack.c.bf16 %v7181_v26, %v7168_v7  ;;  %vm437_vm3 = vcmp.gt.f32.partialorder %v405_v60, 0.0  ;;  %vm438_vm4 = vcmp.gt.f32.partialorder %v406_v0, 0.0 }
  0x2b   : > { %vm7193_vm5 = vcmp.lt.s32.totalorder %v581_v1, 15  ;;  %v9116_v36 = vmov 0  ;;  %v1983_v34 = vrot.slane %v7107_v17, 1  ;;  %v469_v37 = vmul.f32 0.01, %v405_v60 }
  0x2c   : > { %9115 = vst [vmem:[#allocation11_spill] sm:$0xff] %v7187_v32  ;;  %v9117_v36 = vsel %vm7193_vm5, 4294967295, %v9116_v36  ;;  %v470_v39 = vmul.f32 0.01, %v406_v0  ;;  %vm439_vm6 = vcmp.gt.f32.partialorder %v407_v4, 0.0  ;;  %6314 = vmatmul.mubr.msk.bf16.gmra.mrb[8].mxu1 %vm9026_vm2, %v7187_v32  ;;  %6449 = vmatprep.mubr.msk.bf16.mxu0 %vm9026_vm2, %v7187_v32  ;;  %vm440_vm7 = vcmp.gt.f32.partialorder %v408_v13, 0.0 }
  0x2d   : > { %9118 = vst [vmem:[#allocation12_spill] sm:$0xff] %v9117_v36  ;;  %v471_v40 = vmul.f32 0.01, %v407_v4  ;;  %v472_v51 = vmul.f32 0.01, %v408_v13  ;;  %v409_v30 = vadd.f32 %v6989_v10, %v370_v14  ;;  %v7207_v1 = vsel %vm9021_vm10, %v1981_v28, %v1982_v20  ;;  %v339_v36 = vld [vmem:[%s6984_s16 + $0xb0] sm:$0xff] }
  0x2e   : > { %9119 = vst [vmem:[#allocation13_spill] sm:$0xff] %v7207_v1  ;;  %v7210_v55 = vsel %vm437_vm3, %v405_v60, %v469_v37  ;;  %v7213_v59 = vsel %vm438_vm4, %v406_v0, %v470_v39  ;;  %v410_v46 = vadd.f32 %v6989_v10, %v371_v21  ;;  %v372_v14 = vmul.f32 %v6976_v8, %v333_v48  ;;  %v338_v21 = vld [vmem:[%s6984_s16 + $0xa8] sm:$0xff] }
  0x2f   : > { %v7219_v19 = vpack.c.bf16 %v7213_v59, %v7210_v55  ;;  %v373_v29 = vmul.f32 %v6976_v8, %v334_v33  ;;  %v8954_v60 = vrot.slane %v7132_v11, 1  ;;  %v7226_v37 = vsel %vm439_vm6, %v407_v4, %v471_v40 }
  0x30   : > { %v7228_v0 = vsel %vm440_vm7, %v408_v13, %v472_v51  ;;  %vm441_vm8 = vcmp.gt.f32.partialorder %v409_v30, 0.0  ;;  %vm7242_vm9 = vcmp.lt.s32.totalorder %v595_v15, 15  ;;  %v9122_v4 = vmov 0 }
  0x31   : > { %9120 = vst [vmem:[#allocation14_spill] sm:$0xff] %v7219_v19  ;;  %6450 = vmatmul.mubr.msk.bf16.gmra.mrb[8].mxu0 %vm9026_vm2, %v7219_v19  ;;  %6317 = vmatprep.mubr.msk.bf16.mxu1 %vm9026_vm2, %v7219_v19  ;;  %v7238_v48 = vpack.c.bf16 %v7228_v0, %v7226_v37  ;;  %v9123_v4 = vsel %vm7242_vm9, 4294967295, %v9122_v4  ;;  %vm442_vm11 = vcmp.gt.f32.partialorder %v410_v46, 0.0  ;;  %v473_v33 = vmul.f32 0.01, %v409_v30 }
  0x32   : > { %9124 = vst [vmem:[#allocation16_spill] sm:$0xff] %v9123_v4  ;;  %v474_v40 = vmul.f32 0.01, %v410_v46  ;;  %v411_v51 = vadd.f32 %v6989_v10, %v372_v14  ;;  %v412_v39 = vadd.f32 %v6989_v10, %v373_v29  ;;  %v2040_v35 = vsel %vm9021_vm10, %v1979_v24, %v1980_v52 }
  0x33   : > { %9121 = vst [vmem:[#allocation15_spill] sm:$0xff] %v7238_v48  ;;  %6453 = vmatprep.mubr.msk.bf16.mxu0 %vm9026_vm2, %v7238_v48  ;;  %v2041_v15 = vsel %vm9021_vm10, %v8951_v16, %v1979_v24  ;;  %v7263_v23 = vsel %vm441_vm8, %v409_v30, %v473_v33  ;;  %v2302_v29 = vsel %vm7193_vm5, %v2040_v35, 0.0  ;;  %v3790_v28 = vsel %vm7174_vm15, %v2040_v35, 0.0  ;;  %v335_v30 = vld [vmem:[%s6984_s16 + $0x90] sm:$0xff]  ;;  %v337_v35 = vld [vmem:[%s6984_s16 + $0xa0] sm:$0xff] }
  0x34   : > { %v7265_v14 = vsel %vm442_vm11, %v410_v46, %v474_v40  ;;  %6318 = vmatmul.mubr.msk.bf16.gmra.mrb[12].mxu1 %vm9026_vm2, %v7238_v48  ;;  %v336_v46 = vld [vmem:[%s6984_s16 + $0x98] sm:$0xff]  ;;  %vm443_vm12 = vcmp.gt.f32.partialorder %v411_v51, 0.0  ;;  %vm444_vm13 = vcmp.gt.f32.partialorder %v412_v39, 0.0  ;;  %v475_v40 = vmul.f32 0.01, %v411_v51 }
  0x35   : > { %v7278_v24 = vpack.c.bf16 %v7265_v14, %v7263_v23  ;;  %v476_v44 = vmul.f32 0.01, %v412_v39  ;;  %v7287_v52 = vpack.c.bf16 %v2302_v29, %v2041_v15  ;;  %v3821_v47 = vpack.c.bf16 %v3790_v28, %v2041_v15 }
  0x36   : > { %v7290_v50 = vsel %vm443_vm12, %v411_v51, %v475_v40  ;;  %v374_v22 = vmul.f32 %v6976_v8, %v335_v30  ;;  %v375_v33 = vmul.f32 %v6976_v8, %v336_v46  ;;  %v376_v28 = vmul.f32 %v6976_v8, %v337_v35 }
  0x37   : > { %9125 = vst [vmem:[#allocation17_spill] sm:$0xff] %v7278_v24  ;;  %6321 = vmatprep.mubr.msk.bf16.mxu1 %vm9026_vm2, %v7278_v24  ;;  %9126 = vst [vmem:[#allocation18_spill] sm:$0xff] %v7287_v52  ;;  %v7300_v29 = vsel %vm444_vm13, %v412_v39, %v476_v44  ;;  %v3792_v30 = vsel %vm7193_vm5, %v7207_v1, 0.0  ;;  %v377_v44 = vmul.f32 %v6976_v8, %v338_v21  ;;  %v9132_v16 = vrot.slane %v7134_v38, 1 }
  0x38   : > { %v7306_v15 = vpack.c.bf16 %v7300_v29, %v7290_v50  ;;  %v413_v46 = vadd.f32 %v6989_v10, %v374_v22  ;;  %v414_v40 = vadd.f32 %v6989_v10, %v375_v33  ;;  %v415_v39 = vadd.f32 %v6989_v10, %v376_v28 }
  0x39   : > { %6454 = vmatmul.mubr.msk.bf16.gmra.mrb[12].mxu0 %vm9026_vm2, %v7278_v24  ;;  %v7322_v35 = vsel %vm9021_vm10, %v1983_v34, %v8954_v60  ;;  %v7330_v22 = vsel %vm9021_vm10, %v1982_v20, %v1983_v34  ;;  %v3822_v21 = vpack.c.bf16 %v3792_v30, %v7166_v5  ;;  %v416_v28 = vadd.f32 %v6989_v10, %v377_v44  ;;  %v7355_v34 = vld [vmem:[%s8944_s3 + $0x1c] sm:$0xf] }
  0x3a   : > { %9127 = vst [vmem:[#allocation19_spill] sm:$0xff] %v7306_v15  ;;  %6475 = vmatprep.mubr.msk.bf16.mxu0 %vm9026_vm2, %v3821_v47  ;;  %9128 = vst [vmem:[#allocation20_spill] sm:$0xff] %v7322_v35  ;;  %vm445_vm14 = vcmp.gt.f32.partialorder %v413_v46, 0.0  ;;  %v477_v13 = vmul.f32 0.01, %v413_v46  ;;  %v3794_v47 = vsel %vm7242_vm9, %v7322_v35, 0.0 }
  0x3b   : > { %9129 = vst [vmem:[#allocation21_spill] sm:$0xff] %v7330_v22  ;;  %vm446_vm3 = vcmp.gt.f32.partialorder %v414_v40, 0.0  ;;  %v478_v33 = vmul.f32 0.01, %v414_v40  ;;  %vm447_vm4 = vcmp.gt.f32.partialorder %v415_v39, 0.0  ;;  %vm448_vm6 = vcmp.gt.f32.partialorder %v416_v28, 0.0 }
  0x3c   : > { %6322 = vmatmul.mubr.msk.bf16.gmra.mrb[16].mxu1 %vm9026_vm2, %v7306_v15  ;;  %v7340_v6 = vsel %vm445_vm14, %v413_v46, %v477_v13  ;;  %v479_v20 = vmul.f32 0.01, %v415_v39  ;;  %v3823_v30 = vpack.c.bf16 %v3794_v47, %v7330_v22  ;;  %v480_v46 = vmul.f32 0.01, %v416_v28  ;;  %v341_v15 = vld [vmem:[%s6984_s16 + $0xc0] sm:$0xff] }
  0x3d   : > { %v7343_v51 = vsel %vm446_vm3, %v414_v40, %v478_v33  ;;  %v9131_v60 = vrot.slane %v7168_v7, 1  ;;  %v9138_v33 = vmov 0  ;;  %v380_v40 = vmul.f32 %v6976_v8, %v341_v15 }
  0x3e   : > { %v7350_v13 = vpack.c.bf16 %v7343_v51, %v7340_v6  ;;  %v7360_v47 = vsel %vm447_vm4, %v415_v39, %v479_v20  ;;  %v7378_v39 = vsel %vm448_vm6, %v416_v28, %v480_v46  ;;  %v9135_v20 = vrot.slane %v7132_v11, 1 }
  0x3f   : > { %v7368_v44 = vsel %vm9021_vm10, %v9132_v16, %v9131_v60  ;;  %v9137_v60 = vand.u32 15, %v7036_v41  ;;  %v7399_v46 = vpack.c.bf16 %v7378_v39, %v7360_v47  ;;  %v9143_v15 = vrot.slane %v7181_v26, 1 }
  0x40   : > { %9130 = vst [vmem:[#allocation22_spill] sm:$0xff] %v7350_v13  ;;  %9133 = vst [vmem:[#allocation23_spill] sm:$0xff] %v7368_v44  ;;  %6325 = vmatprep.mubr.msk.bf16.mxu1 %vm9026_vm2, %v7350_v13  ;;  %v623_v13 = vand.u32 15, %v7056_v56  ;;  %v9146_v56 = vrot.slane %v7168_v7, 1  ;;  %v9152_v32 = vrot.slane %v7226_v37, 1  ;;  %v9153_v49 = vrot.slane %v7213_v59, 1 }
  0x41   : > { %6476 = vmatmul.mubr.msk.bf16.vlgmr.msra.gmra.mrb[0].mxu0 %vm9026_vm2, %v3822_v21  ;;  %v9134_v21 = vmov %v9132_v16  ;;  %vm7390_vm7 = vcmp.lt.s32.totalorder %v9137_v60, 15  ;;  %9141 = vst [vmem:[#allocation26_spill] sm:$0xff] %v7399_v46  ;;  %v379_v60 = vmul.f32 %v6976_v8, %v340_v3  ;;  %v9142_v3 = vrot.slane %v7210_v55, 1 }
  0x42   : > { %6508 = vmatpush3.bf16.msra.mxu0 %v7024_v31  ;;  %v7386_v16 = vsel %vm9021_vm10, %v9135_v20, %v9134_v21  ;;  %v9139_v33 = vsel %vm7390_vm7, 4294967295, %v9138_v33  ;;  %v342_v31 = vld [vmem:[%s6984_s16 + $0xc8] sm:$0xff]  ;;  %6479 = vmatprep.mubr.msk.bf16.mxu0 %vm9026_vm2, %v3823_v30  ;;  %v3796_v21 = vsel %vm7390_vm7, %v7368_v44, 0.0  ;;  %v378_v20 = vmul.f32 %v6976_v8, %v339_v36 }
  0x43   : > { %9136 = vst [vmem:[#allocation24_spill] sm:$0xff] %v7386_v16  ;;  %9140 = vst [vmem:[#allocation25_spill] sm:$0xff] %v9139_v33  ;;  %6875 = vmatprep.subr.msk.bf16.mxu0 %vm9006_vm0, %v7355_v34  ;;  %v3824_v30 = vpack.c.bf16 %v3796_v21, %v7386_v16  ;;  %v381_v24 = vmul.f32 %v6976_v8, %v342_v31  ;;  %v418_v41 = vadd.f32 %v6989_v10, %v379_v60  ;;  %vm9245_vm5 = vcmask 64512  }
  0x44   : > { %6326 = vmatmul.mubr.msk.bf16.gmra.mrb[20].mxu1 %vm9026_vm2, %v7399_v46  ;;  %v417_v48 = vadd.f32 %v6989_v10, %v378_v20  ;;  %v419_v36 = vadd.f32 %v6989_v10, %v380_v40  ;;  %v7426_v28 = vsel %vm9021_vm10, %v9143_v15, %v9142_v3  ;;  %v9145_v31 = vmov %v9143_v15 }
  0x45   : > { %9144 = vst [vmem:[#allocation27_spill] sm:$0xff] %v7426_v28  ;;  %v420_v21 = vadd.f32 %v6989_v10, %v381_v24  ;;  %v7435_v20 = vsel %vm9021_vm10, %v9146_v56, %v9145_v31  ;;  %vm7437_vm8 = vcmp.lt.s32.totalorder %v623_v13, 15  ;;  %v9148_v40 = vmov 0 }
  0x46   : > { %9147 = vst [vmem:[#allocation28_spill] sm:$0xff] %v7435_v20  ;;  %v9149_v40 = vsel %vm7437_vm8, 4294967295, %v9148_v40  ;;  %v637_v60 = vand.u32 15, %v7076_v61  ;;  %vm449_vm11 = vcmp.gt.f32.partialorder %v417_v48, 0.0  ;;  %vm450_vm12 = vcmp.gt.f32.partialorder %v418_v41, 0.0 }
  0x47   : > { %9150 = vst [vmem:[#allocation29_spill] sm:$0xff] %v9149_v40  ;;  %v481_v3 = vmul.f32 0.01, %v417_v48  ;;  %v482_v24 = vmul.f32 0.01, %v418_v41  ;;  %vm451_vm13 = vcmp.gt.f32.partialorder %v419_v36, 0.0  ;;  %v9158_v63 = vmov %v9153_v49 }
  0x48   : > { %vm452_vm14 = vcmp.gt.f32.partialorder %v420_v21, 0.0  ;;  %v483_v15 = vmul.f32 0.01, %v419_v36  ;;  %v484_v31 = vmul.f32 0.01, %v420_v21  ;;  %v3798_v61 = vsel %vm7437_vm8, %v7426_v28, 0.0 }
  0x49   : > { %6480 = vmatmul.mubr.msk.bf16.gmra.mrb[4].mxu0 %vm9026_vm2, %v3824_v30  ;;  %v7444_v56 = vsel %vm449_vm11, %v417_v48, %v481_v3  ;;  %v7446_v46 = vsel %vm450_vm12, %v418_v41, %v482_v24  ;;  %v7462_v48 = vsel %vm9021_vm10, %v9153_v49, %v9152_v32  ;;  %vm7464_vm3 = vcmp.lt.s32.totalorder %v637_v60, 15  ;;  %v343_v3 = vld [vmem:[%s6984_s16 + $0xd0] sm:$0xff]  ;;  %v344_v24 = vld [vmem:[%s6984_s16 + $0xd8] sm:$0xff]  ;;  %v345_v32 = vld [vmem:[%s6984_s16 + $0xe0] sm:$0xff] }
  0x4a   : > { %v7454_v30 = vpack.c.bf16 %v7446_v46, %v7444_v56  ;;  %9154 = vst [vmem:[#allocation31_spill] sm:$0xff] %v7462_v48  ;;  %v9155_v41 = vmov 0  ;;  %v7470_v13 = vsel %vm451_vm13, %v419_v36, %v483_v15  ;;  %v7472_v19 = vsel %vm452_vm14, %v420_v21, %v484_v31  ;;  %v346_v60 = vld [vmem:[%s6984_s16 + $0xe8] sm:$0xff] }
  0x4b   : > { %v9156_v41 = vsel %vm7464_vm3, 4294967295, %v9155_v41  ;;  %v3825_v25 = vpack.c.bf16 %v3798_v61, %v7435_v20  ;;  %v9159_v28 = vrot.slane %v7210_v55, 1  ;;  %v7492_v21 = vpack.c.bf16 %v7472_v19, %v7470_v13 }
  0x4c   : > { %9151 = vst [vmem:[#allocation30_spill] sm:$0xff] %v7454_v30  ;;  %9157 = vst [vmem:[#allocation32_spill] sm:$0xff] %v9156_v41  ;;  %6329 = vmatprep.mubr.msk.bf16.mxu1 %vm9026_vm2, %v7454_v30  ;;  %v383_v31 = vmul.f32 %v6976_v8, %v344_v24  ;;  %v384_v16 = vmul.f32 %v6976_v8, %v345_v32  ;;  %v385_v22 = vmul.f32 %v6976_v8, %v346_v60 }
  0x4d   : > { %v7481_v49 = vsel %vm9021_vm10, %v9159_v28, %v9158_v63  ;;  %9161 = vst [vmem:[#allocation34_spill] sm:$0xff] %v7492_v21  ;;  %6483 = vmatprep.mubr.msk.bf16.mxu0 %vm9026_vm2, %v3825_v25  ;;  %v3800_v63 = vsel %vm7464_vm3, %v7462_v48, 0.0  ;;  %v382_v28 = vmul.f32 %v6976_v8, %v343_v3  ;;  %6330 = vmatmul.mubr.msk.bf16.gmra.mrb[24].mxu1 %vm9026_vm2, %v7492_v21  ;;  %v651_v15 = vand.u32 15, %v7079_v62 }
  0x4e   : > { %9160 = vst [vmem:[#allocation33_spill] sm:$0xff] %v7481_v49  ;;  %v3826_v61 = vpack.c.bf16 %v3800_v63, %v7481_v49  ;;  %v422_v36 = vadd.f32 %v6989_v10, %v383_v31  ;;  %v9162_v30 = vrot.slane %v7263_v23, 1  ;;  %v9163_v3 = vrot.slane %v7228_v0, 1 }
  0x4f   : > { %v421_v25 = vadd.f32 %v6989_v10, %v382_v28  ;;  %v9166_v32 = vrot.slane %v7226_v37, 1  ;;  %v423_v62 = vadd.f32 %v6989_v10, %v384_v16  ;;  %v424_v28 = vadd.f32 %v6989_v10, %v385_v22 }
  0x50   : > { %v7515_v24 = vsel %vm9021_vm10, %v9163_v3, %v9162_v30  ;;  %v9165_v63 = vmov %v9163_v3  ;;  %vm7528_vm4 = vcmp.lt.s32.totalorder %v651_v15, 15  ;;  %v9168_v31 = vmov 0 }
  0x51   : > { %9164 = vst [vmem:[#allocation35_spill] sm:$0xff] %v7515_v24  ;;  %v7523_v60 = vsel %vm9021_vm10, %v9166_v32, %v9165_v63  ;;  %6484 = vmatmul.mubr.msk.bf16.gmra.mrb[8].mxu0 %vm9026_vm2, %v3826_v61  ;;  %v9169_v31 = vsel %vm7528_vm4, 4294967295, %v9168_v31  ;;  %v539_v30 = vadd.s32 120, %v6978_v9  ;;  %vm453_vm6 = vcmp.gt.f32.partialorder %v421_v25, 0.0 }
  0x52   : > { %9167 = vst [vmem:[#allocation36_spill] sm:$0xff] %v7523_v60  ;;  %9170 = vst [vmem:[#allocation37_spill] sm:$0xff] %v9169_v31  ;;  %vm454_vm11 = vcmp.gt.f32.partialorder %v422_v36, 0.0  ;;  %v485_v3 = vmul.f32 0.01, %v421_v25  ;;  %vm455_vm12 = vcmp.gt.f32.partialorder %v423_v62, 0.0 }
  0x53   : > { %v486_v21 = vmul.f32 0.01, %v422_v36  ;;  %vm456_vm13 = vcmp.gt.f32.partialorder %v424_v28, 0.0  ;;  %v487_v63 = vmul.f32 0.01, %v423_v62  ;;  %v3802_v22 = vsel %vm7528_vm4, %v7515_v24, 0.0 }
  0x54   : > { %v488_v32 = vmul.f32 0.01, %v424_v28  ;;  %v7533_v49 = vsel %vm453_vm6, %v421_v25, %v485_v3  ;;  %v665_v16 = vand.u32 15, %v539_v30  ;;  %v9177_v20 = vrot.slane %v7263_v23, 1 }
  0x55   : > { %v7535_v61 = vsel %vm454_vm11, %v422_v36, %v486_v21  ;;  %v7548_v3 = vsel %vm455_vm12, %v423_v62, %v487_v63  ;;  %v3827_v21 = vpack.c.bf16 %v3802_v22, %v7523_v60  ;;  %v9174_v63 = vrot.slane %v7265_v14, 1 }
  0x56   : > { %v7545_v41 = vpack.c.bf16 %v7535_v61, %v7533_v49  ;;  %v7550_v36 = vsel %vm456_vm13, %v424_v28, %v488_v32  ;;  %v9173_v28 = vrot.slane %v7290_v50, 1  ;;  %vm7580_vm14 = vcmp.lt.s32.totalorder %v665_v16, 15 }
  0x57   : > { %v7559_v48 = vpack.c.bf16 %v7550_v36, %v7548_v3  ;;  %6487 = vmatprep.mubr.msk.bf16.mxu0 %vm9026_vm2, %v3827_v21  ;;  %v9176_v22 = vmov %v9174_v63  ;;  %v9179_v62 = vmov 0  ;;  %v9182_v15 = vrot.slane %v7340_v6, 1 }
  0x58   : > { %9171 = vst [vmem:[#allocation38_spill] sm:$0xff] %v7545_v41  ;;  %6333 = vmatprep.mubr.msk.bf16.mxu1 %vm9026_vm2, %v7545_v41  ;;  %v7570_v32 = vsel %vm9021_vm10, %v9174_v63, %v9173_v28  ;;  %v7578_v25 = vsel %vm9021_vm10, %v9177_v20, %v9176_v22  ;;  %v9180_v62 = vsel %vm7580_vm14, 4294967295, %v9179_v62  ;;  %v526_v28 = vadd.s32 16, %v6978_v9 }
  0x59   : > { %9172 = vst [vmem:[#allocation39_spill] sm:$0xff] %v7559_v48  ;;  %9175 = vst [vmem:[#allocation40_spill] sm:$0xff] %v7570_v32  ;;  %6334 = vmatmul.mubr.msk.bf16.gmra.mrb[28].mxu1 %vm9026_vm2, %v7559_v48  ;;  %v3804_v21 = vsel %vm7580_vm14, %v7570_v32, 0.0  ;;  %v541_v63 = vadd.s32 136, %v6978_v9  ;;  %v9183_v20 = vrot.slane %v7300_v29, 1  ;;  %v9185_v30 = vmov 0.0|0.0  }
  0x5a   : > { %9178 = vst [vmem:[#allocation41_spill] sm:$0xff] %v7578_v25  ;;  %9181 = vst [vmem:[#allocation42_spill] sm:$0xff] %v9180_v62  ;;  %v3828_v22 = vpack.c.bf16 %v3804_v21, %v7578_v25  ;;  %6339 = vmatprep.mubr.bf16.mxu1 %v9185_v30  ;;  %v9187_v41 = vrot.slane %v7290_v50, 1  ;;  %v2398_v32 = vsel %vm9006_vm0, %v7061_v57, 0  ;;  %v543_v62 = vadd.s32 152, %v6978_v9 }
  0x5b   : > { %v7597_v16 = vsel %vm9021_vm10, %v9183_v20, %v9182_v15  ;;  %v9186_v48 = vmov %v9183_v20  ;;  %v574_v24 = vand.u32 15, %v526_v28  ;;  %v1007_v15 = vadd.s32 4294967279, %v526_v28 }
  0x5c   : > { %9184 = vst [vmem:[#allocation43_spill] sm:$0xff] %v7597_v16  ;;  %v7607_v60 = vsel %vm9021_vm10, %v9187_v41, %v9186_v48  ;;  %v679_v20 = vand.u32 15, %v541_v63  ;;  %v9189_v21 = vrot.slane %v7360_v47, 1  ;;  %v9190_v30 = vrot.slane %v7343_v51, 1  ;;  %6488 = vmatmul.mubr.msk.bf16.gmra.mrb[12].mxu0 %vm9026_vm2, %v3828_v22 }
  0x5d   : > { %9188 = vst [vmem:[#allocation44_spill] sm:$0xff] %v7607_v60  ;;  %v693_v48 = vand.u32 15, %v543_v62  ;;  %v9193_v57 = vrot.slane %v7340_v6, 1  ;;  %v528_v28 = vadd.s32 32, %v6978_v9  ;;  %v9195_v63 = vrot.slane %v7052_v54, 7 }
  0x5e   : > { %v7618_v25 = vsel %vm9021_vm10, %v9190_v30, %v9189_v21  ;;  %v9192_v41 = vmov %v9190_v30  ;;  %v9196_v40 = vrot.slane %v7050_v53, 7  ;;  %vm1039_vm6 = vcmp.ge.s32.totalorder %v1007_v15, 0 }
  0x5f   : > { %9191 = vst [vmem:[#allocation45_spill] sm:$0xff] %v7618_v25  ;;  %v7627_v31 = vsel %vm9021_vm10, %v9193_v57, %v9192_v41  ;;  %vm7638_vm11 = vcmp.gt.s32.totalorder %v574_v24, 0  ;;  %vm7642_vm12 = vcmp.lt.s32.totalorder %v679_v20, 15  ;;  %v9199_v22 = vmov 0 }
  0x60   : > { %9194 = vst [vmem:[#allocation46_spill] sm:$0xff] %v7627_v31  ;;  %v7636_v30 = vsel %vm9034_vm1, %v9196_v40, %v9195_v63  ;;  %v9200_v22 = vsel %vm7642_vm12, 4294967295, %v9199_v22  ;;  %v9202_v21 = vmov %v9196_v40  ;;  %v9203_v41 = vrot.slane %v7040_v45, 7  ;;  %vm1167_vm13 = vmand %vm1039_vm6, %vm7638_vm11 }
  0x61   : > { %9201 = vst [vmem:[#allocation47_spill] sm:$0xff] %v9200_v22  ;;  %v3806_v40 = vsel %vm7642_vm12, %v7597_v16, 0.0  ;;  %vm7659_vm0 = vcmp.lt.s32.totalorder %v693_v48, 15  ;;  %v9204_v24 = vmov 0  ;;  %v588_v15 = vand.u32 15, %v528_v28 }
  0x62   : > { %v7652_v57 = vsel %vm9034_vm1, %v9203_v41, %v9202_v21  ;;  %v9205_v24 = vsel %vm7659_vm0, 4294967295, %v9204_v24  ;;  %v1263_v53 = vsel %vm1167_vm13, %v7144_v43, 0.0  ;;  %v3829_v20 = vpack.c.bf16 %v3806_v40, %v7607_v60 }
  0x63   : > { %9206 = vst [vmem:[#allocation48_spill] sm:$0xff] %v9205_v24  ;;  %v2819_v45 = vsel %vm7638_vm11, %v7652_v57, 0.0  ;;  %v3808_v63 = vsel %vm7659_vm0, %v7618_v25, 0.0  ;;  %v1294_v48 = vpack.c.bf16 %v7069_v58, %v1263_v53  ;;  %vm7676_vm6 = vcmp.gt.s32.totalorder %v588_v15, 0 }
  0x64   : > { %v7672_v21 = vpack.c.bf16 %v7636_v30, %v2819_v45  ;;  %v3830_v41 = vpack.c.bf16 %v3808_v63, %v7627_v31  ;;  %v530_v16 = vadd.s32 48, %v6978_v9  ;;  %6491 = vmatprep.mubr.msk.bf16.mxu0 %vm9026_vm2, %v3829_v20  ;;  %v1265_v40 = vsel %vm7676_vm6, %v7652_v57, 0.0 }
  0x65   : > { %v9210_v60 = vrot.slane %v7107_v17, 7  ;;  %v9211_v45 = vrot.slane %v7099_v12, 7  ;;  %v9214_v63 = vrot.slane %v7052_v54, 7  ;;  %v545_v20 = vadd.s32 168, %v6978_v9  ;;  %6340 = vmatmul.mubr.msk.bf16.vlgmr.msra.gmra.mrb[0].mxu1 %vm9026_vm2, %v1294_v48 }
  0x66   : > { %9207 = vst [vmem:[#allocation49_spill] sm:$0xff] %v7672_v21  ;;  %v1295_v31 = vpack.c.bf16 %v7636_v30, %v1265_v40  ;;  %v602_v25 = vand.u32 15, %v530_v16  ;;  %v9217_v12 = vrot.slane %v7378_v39, 1  ;;  %6372 = vmatpush3.bf16.msra.mxu1 %v2398_v32  ;;  %v9220_v40 = vrot.slane %v7360_v47, 1  ;;  %6492 = vmatmul.mubr.msk.bf16.gmra.mrb[16].mxu0 %vm9026_vm2, %v3830_v41  ;;  %v9375_v32 = vld [vmem:[#allocation16_spill] sm:$0xff] }
  0x67   : > { %v7691_v53 = vsel %vm9034_vm1, %v9211_v45, %v9210_v60  ;;  %v9213_v15 = vmov %v9211_v45  ;;  %v9216_v45 = vrot.slane %v7444_v56, 1  ;;  %v707_v48 = vand.u32 15, %v545_v20 }
  0x68   : > { %9212 = vst [vmem:[#allocation50_spill] sm:$0xff] %v7691_v53  ;;  %v7699_v21 = vsel %vm9034_vm1, %v9214_v63, %v9213_v15  ;;  %v7718_v15 = vld [vmem:[%s8944_s3 + $0xc] sm:$0xf]  ;;  %v9219_v62 = vmov %v9217_v12  ;;  %6343 = vmatprep.mubr.msk.bf16.mxu1 %vm9026_vm2, %v1295_v31  ;;  %v9223_v20 = vrot.slane %v7470_v13, 1  ;;  %v532_v31 = vadd.s32 64, %v6978_v9 }
  0x69   : > { %9215 = vst [vmem:[#allocation51_spill] sm:$0xff] %v7699_v21  ;;  %v4309_v60 = vsel %vm7638_vm11, %v7699_v21, 0.0  ;;  %v7713_v54 = vsel %vm9021_vm10, %v9217_v12, %v9216_v45  ;;  %9218 = vst [vmem:[#allocation52_spill] sm:$0xff] %v7718_v15  ;;  %v7729_v63 = vsel %vm9021_vm10, %v9220_v40, %v9219_v62  ;;  %v547_v45 = vadd.s32 184, %v6978_v9 }
  0x6a   : > { %v7721_v16 = vpack.c.bf16 %v7691_v53, %v4309_v60  ;;  %vm7734_vm11 = vcmp.gt.s32.totalorder %v602_v25, 0  ;;  %v9224_v60 = vrot.slane %v7446_v46, 1  ;;  %v9227_v40 = vrot.slane %v7444_v56, 1 }
  0x6b   : > { %v1267_v25 = vsel %vm7734_vm11, %v7699_v21, 0.0  ;;  %vm7758_vm13 = vcmp.lt.s32.totalorder %v707_v48, 15  ;;  %v9229_v22 = vmov 0  ;;  %v9233_v44 = vrot.slane %v7132_v11, 7 }
  0x6c   : > { %v7744_v12 = vsel %vm9021_vm10, %v9224_v60, %v9223_v20  ;;  %v9226_v62 = vmov %v9224_v60  ;;  %v9230_v22 = vsel %vm7758_vm13, 4294967295, %v9229_v22  ;;  %v721_v20 = vand.u32 15, %v547_v45 }
  0x6d   : > { %9225 = vst [vmem:[#allocation53_spill] sm:$0xff] %v7744_v12  ;;  %v7752_v41 = vsel %vm9021_vm10, %v9227_v40, %v9226_v62  ;;  %9231 = vst [vmem:[#allocation55_spill] sm:$0xff] %v9230_v22  ;;  %v9232_v60 = vrot.slane %v7134_v38, 7  ;;  %vm9234_vm10 = vcmask 1043456   ;;  %v1296_v62 = vpack.c.bf16 %v7691_v53, %v1267_v25 }
  0x6e   : > { %9228 = vst [vmem:[#allocation54_spill] sm:$0xff] %v7752_v41  ;;  %6870 = vmatprep.subr.msk.bf16.mxu1 %vm9234_vm10, %v7718_v15  ;;  %v3810_v48 = vsel %vm7758_vm13, %v7713_v54, 0.0  ;;  %v616_v40 = vand.u32 15, %v532_v31  ;;  %v9235_v45 = vmov %v9233_v44  ;;  %v9236_v33 = vrot.slane %v7107_v17, 7  ;;  %v9379_v15 = vld [vmem:[#allocation7_spill] sm:$0xff] }
  0x6f   : > { %v7768_v24 = vsel %vm9034_vm1, %v9233_v44, %v9232_v60  ;;  %v3831_v44 = vpack.c.bf16 %v3810_v48, %v7729_v63  ;;  %vm7785_vm2 = vcmp.lt.s32.totalorder %v721_v20, 15  ;;  %v534_v25 = vadd.s32 80, %v6978_v9 }
  0x70   : > { %v7782_v35 = vsel %vm9034_vm1, %v9236_v33, %v9235_v45  ;;  %v9239_v22 = vrot.slane %v7181_v26, 7  ;;  %v9240_v31 = vrot.slane %v7168_v7, 7  ;;  %v3812_v17 = vsel %vm7785_vm2, %v7744_v12, 0.0 }
  0x71   : > { %vm7801_vm10 = vcmp.gt.s32.totalorder %v616_v40, 0  ;;  %v9244_v48 = vrot.slane %v7134_v38, 7  ;;  %v549_v52 = vadd.s32 200, %v6978_v9  ;;  %6495 = vmatprep.mubr.msk.bf16.mxu0 %vm9245_vm5, %v3831_v44  ;;  %v9246_v12 = vrot.slane %v7533_v49, 1 }
  0x72   : > { %v7796_v11 = vsel %vm9034_vm1, %v9240_v31, %v9239_v22  ;;  %v9243_v20 = vmov %v9240_v31  ;;  %v3832_v22 = vpack.c.bf16 %v3812_v17, %v7752_v41  ;;  %v1269_v40 = vsel %vm7801_vm10, %v7782_v35, 0.0 }
  0x73   : > { %v7811_v45 = vsel %vm9034_vm1, %v9244_v48, %v9243_v20  ;;  %v630_v31 = vand.u32 15, %v534_v25  ;;  %v9247_v7 = vrot.slane %v7472_v19, 1  ;;  %vm9248_vm13 = vcmp.lt.s32.totalorder %v6978_v9, 7  ;;  %vm9249_vm1 = vmmov %vm9245_vm5 }
  0x74   : > { %6344 = vmatmul.mubr.msk.bf16.gmra.mrb[4].mxu1 %vm9249_vm1, %v1296_v62  ;;  %v1297_v44 = vpack.c.bf16 %v7768_v24, %v1269_v40  ;;  %v735_v20 = vand.u32 15, %v549_v52  ;;  %v9251_v48 = vrot.slane %v7470_v13, 1  ;;  %vm9252_vm5 = vmmov %vm9248_vm13  ;;  %v551_v41 = vadd.s32 216, %v6978_v9 }
  0x75   : > { %v7825_v38 = vsel %vm9248_vm13, %v9247_v7, %v9246_v12  ;;  %v9250_v17 = vmov %v9247_v7  ;;  %vm7838_vm12 = vcmp.gt.s32.totalorder %v630_v31, 0  ;;  %v9255_v12 = vrot.slane %v7548_v3, 1  ;;  %vm9257_vm1 = vmmov %vm9252_vm5 }
  0x76   : > { %v7835_v25 = vsel %vm9252_vm5, %v9251_v48, %v9250_v17  ;;  %v9256_v62 = vrot.slane %v7535_v61, 1  ;;  %v9260_v7 = vrot.slane %v7533_v49, 1  ;;  %vm9261_vm13 = vmmov %vm9257_vm1  ;;  %v536_v31 = vadd.s32 96, %v6978_v9 }
  0x77   : > { %vm9263_vm5 = vcmask 64512   ;;  %v1271_v48 = vsel %vm7838_vm12, %v7811_v45, 0.0  ;;  %v9268_v5 = vrot.slane %v7213_v59, 7  ;;  %vm9296_vm0 = vcmp.lt.s32.totalorder %v6978_v9, 7 }
  0x78   : > { %v7848_v52 = vsel %vm9257_vm1, %v9256_v62, %v9255_v12  ;;  %v9259_v40 = vmov %v9256_v62  ;;  %6496 = vmatmul.mubr.msk.bf16.gmra.mrb[20].mxu0 %vm9263_vm5, %v3832_v22  ;;  %vm9264_vm14 = vmmov %vm9263_vm5  ;;  %vm7864_vm1 = vcmp.lt.s32.totalorder %v735_v20, 15  ;;  %v9265_v12 = vmov 0  ;;  %v347_v22 = vld [vmem:[%s6984_s16 + $0xf0] sm:$0xff]  ;;  %s8752_s16 = scalar_lea.vmem %s8946_s5, %s6971_s11 }
  0x79   : > { %9258 = vst [vmem:[#allocation56_spill] sm:$0xff] %v7848_v52  ;;  %v7856_v17 = vsel %vm9261_vm13, %v9260_v7, %v9259_v40  ;;  %6347 = vmatprep.mubr.msk.bf16.mxu1 %vm9264_vm14, %v1297_v44  ;;  %v9266_v12 = vsel %vm7864_vm1, 4294967295, %v9265_v12  ;;  %v749_v62 = vand.u32 15, %v551_v41  ;;  %v9269_v40 = vrot.slane %v7210_v55, 7 }
  0x7a   : > { %9262 = vst [vmem:[#allocation57_spill] sm:$0xff] %v7856_v17  ;;  %9267 = vst [vmem:[#allocation58_spill] sm:$0xff] %v9266_v12  ;;  %vm9270_vm13 = vcmp.lt.s32.totalorder %v6978_v9, 1  ;;  %v1298_v44 = vpack.c.bf16 %v7796_v11, %v1271_v48  ;;  %v3814_v58 = vsel %vm7864_vm1, %v7825_v38, 0.0  ;;  %v644_v20 = vand.u32 15, %v536_v31 }
  0x7b   : > { %v7874_v7 = vsel %vm9270_vm13, %v9269_v40, %v9268_v5  ;;  %v9271_v43 = vmov %v9269_v40  ;;  %v9272_v41 = vrot.slane %v7181_v26, 7  ;;  %vm9273_vm14 = vmmov %vm9270_vm13  ;;  %v3833_v1 = vpack.c.bf16 %v3814_v58, %v7835_v25  ;;  %v9435_v5 = vld [vmem:[#allocation36_spill] sm:$0xff] }
  0x7c   : > { %vm7890_vm5 = vcmp.lt.s32.totalorder %v749_v62, 15  ;;  %v538_v48 = vadd.s32 112, %v6978_v9  ;;  %v9276_v40 = vrot.slane %v7228_v0, 7  ;;  %v9277_v31 = vrot.slane %v7226_v37, 7  ;;  %vm9282_vm1 = vmmov %vm9270_vm13 }
  0x7d   : > { %v7887_v4 = vsel %vm9273_vm14, %v9272_v41, %v9271_v43  ;;  %v3816_v43 = vsel %vm7890_vm5, %v7848_v52, 0.0  ;;  %vm7906_vm14 = vcmp.gt.s32.totalorder %v644_v20, 0  ;;  %v9281_v62 = vrot.slane %v7213_v59, 7 }
  0x7e   : > { %v7901_v55 = vsel %vm9270_vm13, %v9277_v31, %v9276_v40  ;;  %v9280_v26 = vmov %v9277_v31  ;;  %v386_v12 = vmul.f32 %v6976_v8, %v347_v22  ;;  %vm9283_vm13 = vcmask 64512  }
  0x7f   : > { %v7916_v41 = vsel %vm9282_vm1, %v9281_v62, %v9280_v26  ;;  %6499 = vmatprep.mubr.msk.bf16.mxu0 %vm9283_vm13, %v3833_v1  ;;  %v3834_v40 = vpack.c.bf16 %v3816_v43, %v7856_v17  ;;  %v1273_v20 = vsel %vm7906_vm14, %v7887_v4, 0.0  ;;  %v658_v31 = vand.u32 15, %v538_v48  ;;  %6348 = vmatmul.mubr.msk.bf16.gmra.mrb[8].mxu1 %vm9283_vm13, %v1298_v44  ;;  %vm9290_vm3 = vmmov %vm9283_vm13 }
  0x80   : > { %v7925_v52 = vadd.s32 232, %v6978_v9  ;;  %v1299_v59 = vpack.c.bf16 %v7874_v7, %v1273_v20  ;;  %v425_v37 = vadd.f32 %v6989_v10, %v386_v12  ;;  %v9285_v26 = vrot.slane %v7550_v36, 1  ;;  %vm9291_vm13 = vmmov %vm9290_vm3 }
  0x81   : > { %v9286_v8 = vrot.slane %v7548_v3, 1  ;;  %vm9287_vm1 = vcmp.lt.s32.totalorder %v6978_v9, 7  ;;  %v555_v22 = vadd.s32 248, %v6978_v9  ;;  %vm7939_vm4 = vcmp.gt.s32.totalorder %v658_v31, 0  ;;  %6500 = vmatmul.mubr.msk.bf16.gmra.mrb[24].mxu0 %vm9291_vm13, %v3834_v40 }
  0x82   : > { %9284 = vst [vmem:[#allocation59_spill] sm:$0xff] %v7925_v52  ;;  %v9288_v48 = vmov 0  ;;  %v763_v43 = vand.u32 15, %v7925_v52  ;;  %v2009_v10 = vrot.slane %v7087_v2, 1  ;;  %v540_v12 = vadd.s32 128, %v6978_v9  ;;  %6351 = vmatprep.mubr.msk.bf16.mxu1 %vm9290_vm3, %v1299_v59 }
  0x83   : > { %v7935_v1 = vsel %vm9287_vm1, %v9286_v8, %v9285_v26  ;;  %v9289_v48 = vsel %vm7939_vm4, 4294967295, %v9288_v48  ;;  %v1275_v62 = vsel %vm7939_vm4, %v7916_v41, 0.0  ;;  %vm457_vm1 = vcmp.gt.f32.partialorder %v425_v37, 0.0 }
  0x84   : > { %v489_v20 = vmul.f32 0.01, %v425_v37  ;;  %v777_v26 = vand.u32 15, %v555_v22  ;;  %v1300_v44 = vpack.c.bf16 %v7901_v55, %v1275_v62  ;;  %vm7952_vm8 = vcmp.lt.s32.totalorder %v763_v43, 15 }
  0x85   : > { %v9292_v31 = vmov 0  ;;  %v9295_v8 = vrot.slane %v7038_v42, 1  ;;  %v3596_v52 = vadd.s32 1, %v555_v22  ;;  %v9299_v2 = vmov 0 }
  0x86   : > { %v9293_v31 = vsel %vm7952_vm8, 4294967295, %v9292_v31  ;;  %v7962_v17 = vsel %vm457_vm1, %v425_v37, %v489_v20  ;;  %vm7964_vm3 = vcmp.lt.s32.totalorder %v777_v26, 15  ;;  %v672_v40 = vand.u32 15, %v540_v12 }
  0x87   : > { %9294 = vst [vmem:[#allocation60_spill] sm:$0xff] %v9293_v31  ;;  %v7960_v59 = vsel %vm9296_vm0, %v2009_v10, %v9295_v8  ;;  %9298 = vst [vmem:[#allocation62_spill] sm:$0xff] %v7962_v17  ;;  %v9300_v2 = vsel %vm7964_vm3, 4294967295, %v9299_v2  ;;  %v9301_v62 = vrot.slane %v7265_v14, 7  ;;  %v9302_v43 = vrot.slane %v7263_v23, 7 }
  0x88   : > { %9297 = vst [vmem:[#allocation61_spill] sm:$0xff] %v7960_v59  ;;  %vm9303_vm13 = vcmp.lt.s32.totalorder %v6978_v9, 1  ;;  %v2008_v42 = vrot.slane %v7962_v17, 1  ;;  %vm3660_vm0 = vcmp.lt.s32.totalorder %v3596_v52, 256  ;;  %v9305_v37 = vrot.slane %v7228_v0, 7 }
  0x89   : > { %v7974_v53 = vsel %vm9303_vm13, %v9302_v43, %v9301_v62  ;;  %v9304_v22 = vmov %v9302_v43  ;;  %vm9306_vm1 = vmmov %vm9303_vm13  ;;  %v542_v12 = vadd.s32 144, %v6978_v9  ;;  %vm7988_vm9 = vcmp.gt.s32.totalorder %v672_v40, 0 }
  0x8a   : > { %v7983_v20 = vsel %vm9306_vm1, %v9305_v37, %v9304_v22  ;;  %vm3724_vm7 = vmand %vm3660_vm0, %vm7964_vm3  ;;  %v9309_v8 = vrot.slane %v7300_v29, 7  ;;  %v9310_v52 = vrot.slane %v7290_v50, 7  ;;  %v560_v40 = vand.u32 15, %v6978_v9 }
  0x8b   : > { %vm9311_vm13 = vmmov %vm9306_vm1  ;;  %v9313_v22 = vrot.slane %v7550_v36, 1  ;;  %vm9314_vm0 = vcmp.lt.s32.totalorder %v6978_v9, 7  ;;  %v3820_v50 = vsel %vm3724_vm7, %v7960_v59, 0.0  ;;  %v1277_v14 = vsel %vm7988_vm9, %v7983_v20, 0.0 }
  0x8c   : > { %v7998_v23 = vsel %vm9311_vm13, %v9310_v52, %v9309_v8  ;;  %v9312_v0 = vmov %v9310_v52  ;;  %vm9315_vm3 = vmmov %vm9314_vm0  ;;  %v962_v17 = vrot.slane %v7444_v56, 7  ;;  %vm9317_vm13 = vcmask 64512  }
  0x8d   : > { %v8006_v43 = vsel %vm9306_vm1, %v9301_v62, %v9312_v0  ;;  %v8013_v37 = vsel %vm9314_vm0, %v9313_v22, %v2008_v42  ;;  %v8017_v8 = vsel %vm9315_vm3, %v2008_v42, %v2009_v10  ;;  %v1301_v62 = vpack.c.bf16 %v7974_v53, %v1277_v14  ;;  %6352 = vmatmul.mubr.msk.bf16.gmra.mrb[12].mxu1 %vm9317_vm13, %v1300_v44  ;;  %vm9320_vm3 = vmmov %vm9317_vm13 }
  0x8e   : > { %9316 = vst [vmem:[#allocation63_spill] sm:$0xff] %v8017_v8  ;;  %v3818_v52 = vsel %vm7952_vm8, %v8013_v37, 0.0  ;;  %v3836_v0 = vpack.c.bf16 %v3820_v50, %v8017_v8  ;;  %v686_v22 = vand.u32 15, %v542_v12  ;;  %vm8031_vm7 = vcmp.gt.s32.totalorder %v560_v40, 0 }
  0x8f   : > { %v3835_v10 = vpack.c.bf16 %v3818_v52, %v7935_v1  ;;  %v9318_v42 = vmov 0  ;;  %v544_v21 = vadd.s32 160, %v6978_v9  ;;  %6355 = vmatprep.mubr.msk.bf16.mxu1 %vm9320_vm3, %v1301_v62  ;;  %v9321_v31 = vmov 0 }
  0x90   : > { %v9319_v42 = vsel %vm8031_vm7, 4294967295, %v9318_v42  ;;  %vm8037_vm1 = vcmp.gt.s32.totalorder %v686_v22, 0  ;;  %v4307_v56 = vsel %vm8031_vm7, %v7652_v57, 0.0  ;;  %v9323_v44 = vrot.slane %v7343_v51, 7 }
  0x91   : > { %v9322_v31 = vsel %vm8037_vm1, 4294967295, %v9321_v31  ;;  %v9324_v12 = vrot.slane %v7340_v6, 7  ;;  %vm9325_vm0 = vcmp.lt.s32.totalorder %v6978_v9, 1  ;;  %v9327_v14 = vrot.slane %v7300_v29, 7  ;;  %6503 = vmatprep.mubr.msk.bf16.mxu0 %vm9320_vm3, %v3835_v10 }
  0x92   : > { %vm9328_vm13 = vmmov %vm9325_vm0  ;;  %v1279_v57 = vsel %vm8037_vm1, %v8006_v43, 0.0  ;;  %v4339_v62 = vpack.c.bf16 %v7636_v30, %v4307_v56  ;;  %v700_v22 = vand.u32 15, %v544_v21  ;;  %v9330_v29 = vrot.slane %v7378_v39, 7 }
  0x93   : > { %v8050_v40 = vsel %vm9325_vm0, %v9324_v12, %v9323_v44  ;;  %v9326_v50 = vmov %v9324_v12  ;;  %v546_v44 = vadd.s32 176, %v6978_v9  ;;  %vm9329_vm0 = vmmov %vm9320_vm3  ;;  %v1302_v6 = vpack.c.bf16 %v7998_v23, %v1279_v57 }
  0x94   : > { %v8058_v52 = vsel %vm9328_vm13, %v9327_v14, %v9326_v50  ;;  %6504 = vmatmul.mubr.msk.bf16.gmra.mrb[28].mxu0 %vm9329_vm0, %v3836_v0  ;;  %v9331_v12 = vrot.slane %v7360_v47, 7  ;;  %v9333_v14 = vrot.slane %v7343_v51, 7  ;;  %vm9334_vm3 = vmmov %vm9328_vm13  ;;  %v4311_v21 = vsel %vm7676_vm6, %v7782_v35, 0.0 }
  0x95   : > { %6509 = vmatprep.mubr.msk.bf16.mxu0 %vm9329_vm0, %v4339_v62  ;;  %vm8088_vm8 = vcmp.gt.s32.totalorder %v700_v22, 0  ;;  %v9335_v0 = vmov 0  ;;  %v714_v56 = vand.u32 15, %v546_v44  ;;  %v4341_v57 = vpack.c.bf16 %v7768_v24, %v4311_v21  ;;  %6356 = vmatmul.mubr.msk.bf16.gmra.mrb[16].mxu1 %vm9329_vm0, %v1302_v6  ;;  %vm9342_vm7 = vmmov %vm9329_vm0 }
  0x96   : > { %v8074_v10 = vsel %vm9328_vm13, %v9331_v12, %v9330_v29  ;;  %v9332_v50 = vmov %v9331_v12  ;;  %v9336_v0 = vsel %vm8088_vm8, 4294967295, %v9335_v0  ;;  %v4313_v51 = vsel %vm7734_vm11, %v7811_v45, 0.0 }
  0x97   : > { %v8082_v30 = vsel %vm9334_vm3, %v9333_v14, %v9332_v50  ;;  %v1281_v47 = vsel %vm8088_vm8, %v8058_v52, 0.0  ;;  %v4342_v29 = vpack.c.bf16 %v7796_v11, %v4313_v51  ;;  %v548_v12 = vadd.s32 192, %v6978_v9 }
  0x98   : > { %v963_v62 = vrot.slane %v7446_v46, 7  ;;  %v1303_v22 = vpack.c.bf16 %v8050_v40, %v1281_v47  ;;  %vm8103_vm13 = vcmp.gt.s32.totalorder %v714_v56, 0  ;;  %v9337_v44 = vmov 0 }
  0x99   : > { %v9338_v44 = vsel %vm8103_vm13, 4294967295, %v9337_v44  ;;  %v550_v50 = vadd.s32 208, %v6978_v9  ;;  %v1283_v14 = vsel %vm8103_vm13, %v8082_v30, 0.0  ;;  %v728_v21 = vand.u32 15, %v548_v12 }
  0x9a   : > { %9339 = vst [vmem:[#allocation64_spill] sm:$0xff] %v9338_v44  ;;  %v9340_v8 = vrot.slane %v7378_v39, 7  ;;  %v1304_v46 = vpack.c.bf16 %v8074_v10, %v1283_v14  ;;  %v4317_v56 = vsel %vm7838_vm12, %v7916_v41, 0.0  ;;  %vm9341_vm8 = vcmask 1043456   ;;  %6359 = vmatprep.mubr.msk.bf16.mxu1 %vm9342_vm7, %v1303_v22  ;;  %v8142_v22 = vld [vmem:[%s8944_s3 + $0x20] sm:$0xf]  ;;  %vm9348_vm7 = vmmov %vm9329_vm0 }
  0x9b   : > { %v4885_v47 = vsel %vm9341_vm8, %v7355_v34, 0  ;;  %vm8125_vm13 = vcmp.gt.s32.totalorder %v728_v21, 0  ;;  %v9343_v12 = vmov 0  ;;  %v4344_v39 = vpack.c.bf16 %v7901_v55, %v4317_v56  ;;  %9346 = vst [vmem:[#allocation66_spill] sm:$0xff] %v8142_v22  ;;  %vm9347_vm8 = vmmov %vm9329_vm0 }
  0x9c   : > { %v8115_v51 = vsel %vm9334_vm3, %v9340_v8, %v962_v17  ;;  %v9344_v12 = vsel %vm8125_vm13, 4294967295, %v9343_v12  ;;  %v552_v8 = vadd.s32 224, %v6978_v9  ;;  %v964_v6 = vrot.slane %v7470_v13, 7  ;;  %6510 = vmatmul.mubr.msk.bf16.vlgmr.msra.gmra.mrb[0].mxu0 %vm9347_vm8, %v7721_v16 }
  0x9d   : > { %9345 = vst [vmem:[#allocation65_spill] sm:$0xff] %v9344_v12  ;;  %v8134_v14 = vsel %vm9334_vm3, %v962_v17, %v963_v62  ;;  %v1285_v34 = vsel %vm8125_vm13, %v8115_v51, 0.0  ;;  %v742_v44 = vand.u32 15, %v550_v50  ;;  %v966_v21 = vrot.slane %v7533_v49, 7  ;;  %6542 = vmatpush3.bf16.msra.mxu0 %v4885_v47  ;;  %6513 = vmatprep.mubr.msk.bf16.mxu0 %vm9348_vm7, %v4341_v57  ;;  %vm9352_vm7 = vmmov %vm9334_vm3 }
  0x9e   : > { %v756_v13 = vand.u32 15, %v552_v8  ;;  %v965_v56 = vrot.slane %v7472_v19, 7  ;;  %v967_v17 = vrot.slane %v7535_v61, 7  ;;  %v4319_v50 = vsel %vm7906_vm14, %v7983_v20, 0.0 }
  0x9f   : > { %v1305_v12 = vpack.c.bf16 %v8134_v14, %v1285_v34  ;;  %v4315_v49 = vsel %vm7801_vm10, %v7887_v4, 0.0  ;;  %v4345_v16 = vpack.c.bf16 %v7974_v53, %v4319_v50  ;;  %v4321_v19 = vsel %vm7939_vm4, %v8006_v43, 0.0  ;;  %vm9357_vm4 = vmmov %vm9352_vm7 }
  0xa0   : > { %vm9349_vm0 = vcmask 1043456   ;;  %v8165_v61 = vsel %vm9334_vm3, %v963_v62, %v964_v6  ;;  %vm8167_vm8 = vcmp.gt.s32.totalorder %v742_v44, 0  ;;  %v9350_v57 = vmov 0 }
  0xa1   : > { %6876 = vmatprep.subr.msk.bf16.mxu0 %vm9349_vm0, %v8142_v22  ;;  %v9351_v57 = vsel %vm8167_vm8, 4294967295, %v9350_v57  ;;  %v8172_v47 = vadd.s32 240, %v6978_v9  ;;  %v8175_v8 = vpack.c.bf16 %v7998_v23, %v4321_v19  ;;  %v8179_v34 = vsel %vm9352_vm7, %v965_v56, %v966_v21  ;;  %vm9359_vm7 = vmmov %vm9357_vm4 }
  0xa2   : > { %vm8181_vm13 = vcmp.gt.s32.totalorder %v756_v13, 0  ;;  %v9353_v50 = vmov 0  ;;  %vm9355_vm0 = vcmask 64512   ;;  %v4343_v62 = vpack.c.bf16 %v7874_v7, %v4315_v49 }
  0xa3   : > { %v9354_v50 = vsel %vm8181_vm13, 4294967295, %v9353_v50  ;;  %6360 = vmatmul.mubr.msk.bf16.gmra.mrb[20].mxu1 %vm9355_vm0, %v1304_v46  ;;  %v2044_v44 = vadd.s32 4294967281, %v7015_v27  ;;  %v4325_v22 = vsel %vm8037_vm1, %v8082_v30, 0.0  ;;  %vm9356_vm3 = vmmov %vm9355_vm0  ;;  %v8194_v19 = vsel %vm9357_vm4, %v964_v6, %v965_v56 }
  0xa4   : > { %6363 = vmatprep.mubr.msk.bf16.mxu1 %vm9356_vm3, %v1305_v12  ;;  %v1287_v13 = vsel %vm8167_vm8, %v8165_v61, 0.0  ;;  %v8200_v46 = vpack.c.bf16 %v8074_v10, %v4325_v22  ;;  %v968_v49 = vrot.slane %v7548_v3, 7  ;;  %v8205_v27 = vsel %vm9359_vm7, %v966_v21, %v967_v17  ;;  %vm9360_vm4 = vmmov %vm9355_vm0 }
  0xa5   : > { %v1289_v12 = vsel %vm8181_vm13, %v8179_v34, 0.0  ;;  %v770_v6 = vand.u32 15, %v8172_v47  ;;  %6514 = vmatmul.mubr.msk.bf16.gmra.mrb[4].mxu0 %vm9360_vm4, %v4342_v29  ;;  %v1306_v56 = vpack.c.bf16 %v8194_v19, %v1287_v13  ;;  %vm2076_vm3 = vcmp.ge.s32.totalorder %v2044_v44, 0  ;;  %vm9365_vm13 = vmmov %vm9355_vm0 }
  0xa6   : > { %9358 = vst [vmem:[#allocation67_spill] sm:$0xff] %v8200_v46  ;;  %6517 = vmatprep.mubr.msk.bf16.mxu0 %vm9355_vm0, %v4343_v62  ;;  %v969_v22 = vrot.slane %v7550_v36, 7  ;;  %v1307_v3 = vpack.c.bf16 %v8205_v27, %v1289_v12  ;;  %v8218_v21 = vsel %vm9359_vm7, %v967_v17, %v968_v49  ;;  %vm8226_vm4 = vmand %vm2076_vm3, %vm7174_vm15  ;;  %v4323_v62 = vsel %vm7988_vm9, %v8058_v52, 0.0 }
  0xa7   : > { %vm8220_vm8 = vcmp.gt.s32.totalorder %v770_v6, 0  ;;  %vm9366_vm1 = vmmov %vm9359_vm7  ;;  %v2300_v44 = vsel %vm8226_vm4, %v7960_v59, 0.0  ;;  %v2322_v13 = vsel %vm7785_vm2, %v7713_v54, 0.0  ;;  %v2326_v12 = vsel %vm7890_vm5, %v7825_v38, 0.0 }
  0xa8   : > { %v8234_v36 = vsel %vm9366_vm1, %v968_v49, %v969_v22  ;;  %v1291_v17 = vsel %vm8220_vm8, %v8218_v21, 0.0  ;;  %v8250_v49 = vpack.c.bf16 %v2322_v13, %v7729_v63  ;;  %vm9369_vm1 = vmmov %vm9355_vm0  ;;  %vm9370_vm3 = vnez %v9300_v2 }
  0xa9   : > { %v1308_v6 = vpack.c.bf16 %v8234_v36, %v1291_v17  ;;  %v6897_v29 = vmov 0.0   ;;  %v2593_v18 = vadd.s32 4294967295, %v6978_v9  ;;  %v9371_v17 = vld [vmem:[#allocation51_spill] sm:$0xff]  ;;  %v2823_v2 = vsel %vm7734_vm11, %v7782_v35, 0.0  ;;  %v9374_v35 = vld [vmem:[#allocation13_spill] sm:$0xff] }
  0xaa   : > { %9368 = vst [vmem:[#allocation68_spill] sm:$0xff] %v8250_v49  ;;  %v2331_v13 = vpack.c.bf16 %v2300_v44, %v6897_v29  ;;  %v2825_v44 = vsel %vm7801_vm10, %v7811_v45, 0.0  ;;  %vm9376_vm11 = vnez %v9375_v32  ;;  %vm9377_vm10 = vnez %v9319_v42 }
  0xab   : > { %6364 = vmatmul.mubr.msk.bf16.gmra.mrb[24].mxu1 %vm9355_vm0, %v1306_v56  ;;  %v4347_v56 = vpack.c.bf16 %v8050_v40, %v4323_v62  ;;  %v9372_v62 = vld [vmem:[#allocation50_spill] sm:$0xff]  ;;  %vm2625_vm7 = vcmp.ge.s32.totalorder %v2593_v18, 0  ;;  %v8288_v28 = vpack.c.bf16 %v7796_v11, %v2825_v44  ;;  %v2304_v33 = vsel %vm9376_vm11, %v9374_v35, 0.0 }
  0xac   : > { %6367 = vmatprep.mubr.msk.bf16.mxu1 %vm9365_vm13, %v1307_v3  ;;  %vm9367_vm13 = vmmov %vm9355_vm0  ;;  %v8259_v3 = vpack.c.bf16 %v2326_v12, %v7835_v25  ;;  %v2827_v12 = vsel %vm7838_vm12, %v7887_v4, 0.0  ;;  %v2829_v18 = vsel %vm7906_vm14, %v7916_v41, 0.0  ;;  %vm9378_vm12 = vnez %v9289_v48  ;;  %v9380_v41 = vld [vmem:[#allocation62_spill] sm:$0xff] }
  0xad   : > { %6518 = vmatmul.mubr.msk.bf16.gmra.mrb[8].mxu0 %vm9367_vm13, %v4344_v39  ;;  %v2330_v39 = vsel %vm9370_vm3, %v8013_v37, 0.0  ;;  %vm2721_vm4 = vmand %vm2625_vm7, %vm9377_vm10  ;;  %v2831_v4 = vsel %vm9378_vm12, %v7983_v20, 0.0  ;;  %v8311_v45 = vpack.c.bf16 %v7901_v55, %v2829_v18  ;;  %v970_v48 = vrot.slane %v9380_v41, 7  ;;  %v9381_v20 = vld [vmem:[#allocation3_spill] sm:$0xff] }
  0xae   : > { %6521 = vmatprep.mubr.msk.bf16.mxu0 %vm9369_vm1, %v4345_v16  ;;  %v8266_v59 = vpack.c.bf16 %v2330_v39, %v7935_v1  ;;  %v2821_v16 = vsel %vm7676_vm6, %v9371_v17, 0.0  ;;  %v8285_v39 = vpack.c.bf16 %v7768_v24, %v2823_v2  ;;  %v8291_v17 = vpack.c.bf16 %v7874_v7, %v2827_v12  ;;  %vm9373_vm6 = vmmov %vm9355_vm0 }
  0xaf   : > { %v8273_v49 = vpack.c.bf16 %v9372_v62, %v2821_v16  ;;  %v2833_v24 = vsel %vm7988_vm9, %v8006_v43, 0.0  ;;  %v2817_v11 = vsel %vm2721_vm4, %v9379_v15, 0.0  ;;  %v8314_v7 = vpack.c.bf16 %v7974_v53, %v2831_v4  ;;  %vm9384_vm13 = vmmov %vm9355_vm0  ;;  %v9385_v43 = vld [vmem:[#allocation64_spill] sm:$0xff] }
  0xb0   : > { %v8317_v58 = vpack.c.bf16 %v7998_v23, %v2833_v24  ;;  %v8321_v42 = vpack.c.bf16 %v9381_v20, %v2817_v11  ;;  %vm9382_vm9 = vnez %v9322_v31  ;;  %vm9383_vm14 = vnez %v9336_v0  ;;  %vm9387_vm3 = vmmov %vm9355_vm0  ;;  %v9392_v16 = vld [vmem:[#allocation52_spill] sm:$0xff]  ;;  %v9399_v24 = vld [vmem:[#allocation18_spill] sm:$0xff] }
  0xb1   : > { %v2835_v26 = vsel %vm9382_vm9, %v8058_v52, 0.0  ;;  %v2837_v55 = vsel %vm9383_vm14, %v8082_v30, 0.0  ;;  %vm9386_vm1 = vnez %v9385_v43  ;;  %v9388_v52 = vld [vmem:[#allocation65_spill] sm:$0xff]  ;;  %vm9393_vm10 = vcmask 1043456   ;;  %vm9400_vm9 = vmmov %vm9387_vm3  ;;  %v9402_v20 = vld [vmem:[#allocation20_spill] sm:$0xff] }
  0xb2   : > { %v8332_v53 = vpack.c.bf16 %v8050_v40, %v2835_v26  ;;  %v8335_v23 = vpack.c.bf16 %v8074_v10, %v2837_v55  ;;  %vm9389_vm7 = vnez %v9388_v52  ;;  %v4327_v40 = vsel %vm9383_vm14, %v8115_v51, 0.0  ;;  %vm9401_vm14 = vmmov %vm9387_vm3  ;;  %v9403_v26 = vld [vmem:[#allocation25_spill] sm:$0xff]  ;;  %v9418_v43 = vld [vmem:[#allocation27_spill] sm:$0xff] }
  0xb3   : > { %6368 = vmatmul.mubr.msk.bf16.gmra.mrb[28].mxu1 %vm9373_vm6, %v1308_v6  ;;  %v2839_v6 = vsel %vm9386_vm1, %v8115_v51, 0.0  ;;  %v2841_v30 = vsel %vm9389_vm7, %v8165_v61, 0.0  ;;  %vm9391_vm6 = vnez %v9351_v57  ;;  %v2916_v62 = vsel %vm9393_vm10, %v9392_v16, 0  ;;  %v9396_v51 = vld [vmem:[#allocation5_spill] sm:$0xff]  ;;  %v9430_v57 = vld [vmem:[#allocation42_spill] sm:$0xff] }
  0xb4   : > { %6373 = vmatprep.mubr.msk.bf16.mxu1 %vm9355_vm0, %v2331_v13  ;;  %v8342_v31 = vpack.c.bf16 %v8134_v14, %v2839_v6  ;;  %v8352_v10 = vpack.c.bf16 %v8194_v19, %v2841_v30  ;;  %vm9394_vm4 = vcmp.lt.s32.totalorder %v6978_v9, 1  ;;  %vm9395_vm12 = vnez %v9354_v50  ;;  %v9407_v6 = vld [vmem:[#allocation23_spill] sm:$0xff]  ;;  %v9408_v30 = vld [vmem:[#allocation29_spill] sm:$0xff] }
  0xb5   : > { %6522 = vmatmul.mubr.msk.bf16.gmra.mrb[12].mxu0 %vm9384_vm13, %v8175_v8  ;;  %v9390_v8 = vld [vmem:[#allocation9_spill] sm:$0xff]  ;;  %v974_v2 = vsel %vm9394_vm4, %v969_v22, %v970_v48  ;;  %v2845_v0 = vsel %vm9395_vm12, %v8218_v21, 0.0  ;;  %v9397_v12 = vrot.slane %v9396_v51, 7  ;;  %vm9398_vm0 = vmmov %vm9394_vm4  ;;  %v4349_v22 = vpack.c.bf16 %v8134_v14, %v4327_v40  ;;  %v6887_v14 = vld [vmem:[%s8944_s3 + $0x10] sm:$0xf] }
  0xb6   : > { %6525 = vmatprep.mubr.msk.bf16.mxu0 %vm9387_vm3, %v4347_v56  ;;  %v2333_v13 = vpack.c.bf16 %v2304_v33, %v9390_v8  ;;  %v2843_v56 = vsel %vm9391_vm6, %v8179_v34, 0.0  ;;  %v8372_v18 = vpack.c.bf16 %v8234_v36, %v2845_v0  ;;  %v2847_v4 = vsel %vm8220_vm8, %v974_v2, 0.0  ;;  %v9411_v40 = vld [vmem:[#allocation67_spill] sm:$0xff]  ;;  %v9413_v16 = vld [vmem:[#allocation21_spill] sm:$0xff]  ;;  %v9415_v0 = vld [vmem:[#allocation24_spill] sm:$0xff] }
  0xb7   : > { %v8362_v44 = vpack.c.bf16 %v8205_v27, %v2843_v56  ;;  %v973_v33 = vsel %vm9398_vm0, %v970_v48, %v9397_v12  ;;  %vm9404_vm13 = vnez %v9403_v26  ;;  %v9405_v48 = vld [vmem:[#allocation48_spill] sm:$0xff]  ;;  %vm9409_vm10 = vnez %v9408_v30  ;;  %vm9412_vm0 = vmmov %vm9400_vm9  ;;  %v9422_v52 = vld [vmem:[#allocation37_spill] sm:$0xff] }
  0xb8   : > { %v8379_v11 = vpack.c.bf16 %v973_v33, %v2847_v4  ;;  %v2306_v9 = vsel %vm9404_vm13, %v9402_v20, 0.0  ;;  %vm9406_vm3 = vnez %v9405_v48  ;;  %v2308_v56 = vsel %vm9409_vm10, %v9407_v6, 0.0  ;;  %v9453_v48 = vld [vmem:[#allocation53_spill] sm:$0xff] }
  0xb9   : > { %v5323_v55 = vsel %vm9406_vm3, %v7713_v54, 0.0  ;;  %vm9410_vm4 = vcmask 1043456   ;;  %v4329_v54 = vsel %vm9386_vm1, %v8165_v61, 0.0  ;;  %v2335_v12 = vpack.c.bf16 %v2308_v56, %v9415_v0  ;;  %v9419_v61 = vld [vmem:[#allocation32_spill] sm:$0xff] }
  0xba   : > { %v4331_v4 = vsel %vm9389_vm7, %v8179_v34, 0.0  ;;  %vm9420_vm1 = vnez %v9419_v61  ;;  %v9421_v34 = vld [vmem:[#allocation31_spill] sm:$0xff]  ;;  %vm9423_vm7 = vnez %v9422_v52  ;;  %v4113_v56 = vadd.s32 15, %v8172_v47 }
  0xbb   : > { %6374 = vmatmul.mubr.msk.bf16.vlgmr.msra.gmra.mrb[0].mxu1 %vm9400_vm9, %v9399_v24  ;;  %vm9414_vm9 = vmmov %vm9412_vm0  ;;  %v4351_v24 = vpack.c.bf16 %v8205_v27, %v4331_v4  ;;  %v9424_v27 = vld [vmem:[#allocation28_spill] sm:$0xff]  ;;  %v5313_v32 = vsel %vm9409_vm10, %v9421_v34, 0.0  ;;  %v9534_v52 = vld [vmem:[#allocation63_spill] sm:$0xff] }
  0xbc   : > { %6406 = vmatpush3.bf16.msra.mxu1 %v2916_v62  ;;  %6377 = vmatprep.mubr.msk.bf16.mxu1 %vm9401_vm14, %v2333_v13  ;;  %v8396_v13 = vpack.c.bf16 %v5323_v55, %v7729_v63  ;;  %v2334_v62 = vpack.c.bf16 %v2306_v9, %v9413_v16  ;;  %v4350_v63 = vpack.c.bf16 %v8194_v19, %v4329_v54  ;;  %vm9416_vm14 = vmmov %vm9412_vm0  ;;  %v2310_v9 = vsel %vm9420_vm1, %v9418_v43, 0.0 }
  0xbd   : > { %6872 = vmatprep.subr.msk.bf16.mxu1 %vm9410_vm4, %v6887_v14  ;;  %6526 = vmatmul.mubr.msk.bf16.gmra.mrb[16].mxu0 %vm9412_vm0, %v9411_v40  ;;  %vm9417_vm4 = vmmov %vm9412_vm0  ;;  %v2312_v19 = vsel %vm9423_vm7, %v9421_v34, 0.0  ;;  %v2336_v60 = vpack.c.bf16 %v2310_v9, %v9424_v27  ;;  %v9426_v14 = vld [vmem:[#allocation33_spill] sm:$0xff]  ;;  %v5331_v54 = vsel %vm7890_vm5, %v8013_v37, 0.0 }
  0xbe   : > { %6529 = vmatprep.mubr.msk.bf16.mxu0 %vm9414_vm9, %v4349_v22  ;;  %v5327_v22 = vsel %vm7785_vm2, %v7825_v38, 0.0  ;;  %vm9425_vm2 = vmmov %vm9412_vm0  ;;  %v4333_v38 = vsel %vm9391_vm6, %v8218_v21, 0.0  ;;  %v2337_v40 = vpack.c.bf16 %v2312_v19, %v9426_v14  ;;  %vm4177_vm9 = vcmp.lt.s32.totalorder %v4113_v56, 256  ;;  %v9441_v9 = vld [vmem:[#allocation45_spill] sm:$0xff]  ;;  %v9442_v19 = vld [vmem:[#allocation55_spill] sm:$0xff] }
  0xbf   : > { %v8420_v55 = vpack.c.bf16 %v5327_v22, %v7835_v25  ;;  %v4335_v25 = vsel %vm9395_vm12, %v974_v2, 0.0  ;;  %vm9431_vm6 = vnez %v9430_v57  ;;  %v8447_v50 = vpack.c.bf16 %v5331_v54, %v7935_v1  ;;  %v9433_v2 = vld [vmem:[#allocation47_spill] sm:$0xff]  ;;  %vm9436_vm5 = vmmov %vm9425_vm2 }
  0xc0   : > { %v4353_v47 = vpack.c.bf16 %v973_v33, %v4335_v25  ;;  %vm9434_vm12 = vnez %v9433_v2  ;;  %v9440_v1 = vld [vmem:[#allocation43_spill] sm:$0xff]  ;;  %v9450_v25 = vld [vmem:[#allocation66_spill] sm:$0xff] }
  0xc1   : > { %v2318_v22 = vsel %vm9406_vm3, %v9440_v1, 0.0 }
  0xc3   : > { %6378 = vmatmul.mubr.msk.bf16.gmra.mrb[4].mxu1 %vm9416_vm14, %v2334_v62  ;;  %v4352_v62 = vpack.c.bf16 %v8234_v36, %v4333_v38  ;;  %vm9427_vm14 = vmmov %vm9412_vm0  ;;  %v9432_v36 = vld [vmem:[#allocation40_spill] sm:$0xff] }
  0xc4   : > { %6381 = vmatprep.mubr.msk.bf16.mxu1 %vm9417_vm4, %v2335_v12  ;;  %vm9428_vm4 = vmmov %vm9412_vm0  ;;  %v9429_v12 = vld [vmem:[#allocation35_spill] sm:$0xff]  ;;  %v2316_v33 = vsel %vm9434_vm12, %v9432_v36, 0.0  ;;  %v9446_v38 = vld [vmem:[#allocation4_spill] sm:$0xff] }
  0xc5   : > { %6530 = vmatmul.mubr.msk.bf16.gmra.mrb[20].mxu0 %vm9412_vm0, %v4350_v63  ;;  %v2314_v21 = vsel %vm9431_vm6, %v9429_v12, 0.0  ;;  %vm4241_vm0 = vmand %vm4177_vm9, %vm8220_vm8  ;;  %v9437_v63 = vld [vmem:[#allocation41_spill] sm:$0xff] }
  0xc6   : > { %6533 = vmatprep.mubr.msk.bf16.mxu0 %vm9425_vm2, %v4351_v24  ;;  %v2338_v37 = vpack.c.bf16 %v2314_v21, %v9435_v5  ;;  %v4337_v4 = vsel %vm4241_vm0, %v9379_v15, 0.0  ;;  %v2339_v24 = vpack.c.bf16 %v2316_v33, %v9437_v63  ;;  %vm9438_vm8 = vmmov %vm9425_vm2  ;;  %v9456_v21 = vld [vmem:[#allocation6_spill] sm:$0xff]  ;;  %v9458_v33 = vld [vmem:[#allocation8_spill] sm:$0xff] }
  0xc7   : > { %v4354_v46 = vpack.c.bf16 %v6897_v29, %v4337_v4  ;;  %vm9439_vm9 = vmmov %vm9425_vm2  ;;  %v9448_v29 = vld [vmem:[#allocation46_spill] sm:$0xff] }
  0xc8   : > { %vm9447_vm0 = vmmov %vm9425_vm2 }
  0xc9   : > { %vm9514_vm10 = vmmov %vm9447_vm0 }
  0xcb   : > { %6382 = vmatmul.mubr.msk.bf16.gmra.mrb[8].mxu1 %vm9427_vm14, %v2336_v60  ;;  %vm9443_vm14 = vnez %v9442_v19  ;;  %v9445_v60 = vld [vmem:[#allocation44_spill] sm:$0xff] }
  0xcc   : > { %6385 = vmatprep.mubr.msk.bf16.mxu1 %vm9428_vm4, %v2337_v40  ;;  %v2320_v56 = vsel %vm9443_vm14, %v9441_v9, 0.0  ;;  %vm9444_vm4 = vmmov %vm9425_vm2  ;;  %v2340_v15 = vpack.c.bf16 %v2318_v22, %v9445_v60  ;;  %v9464_v22 = vld [vmem:[#allocation60_spill] sm:$0xff] }
  0xcd   : > { %6534 = vmatmul.mubr.msk.bf16.gmra.mrb[24].mxu0 %vm9425_vm2, %v4352_v62  ;;  %v2341_v40 = vpack.c.bf16 %v2320_v56, %v9448_v29  ;;  %vm9449_vm2 = vmmov %vm9447_vm0 }
  0xce   : > { %6537 = vmatprep.mubr.msk.bf16.mxu0 %vm9436_vm5, %v4353_v47  ;;  %vm9451_vm5 = vcmask 1043456   ;;  %v9454_v47 = vld [vmem:[#allocation58_spill] sm:$0xff]  ;;  %vm9481_vm14 = vmmov %vm9447_vm0 }
  0xcf   : > { %v5403_v62 = vsel %vm9451_vm5, %v9450_v25, 0  ;;  %vm9455_vm3 = vnez %v9454_v47  ;;  %vm9465_vm5 = vnez %v9464_v22 }
  0xd0   : > { %v2324_v54 = vsel %vm9455_vm3, %v9453_v48, 0.0  ;;  %vm9472_vm3 = vmmov %vm9447_vm0 }
  0xd3   : > { %6386 = vmatmul.mubr.msk.bf16.gmra.mrb[12].mxu1 %vm9438_vm8, %v2338_v37  ;;  %vm9452_vm8 = vmmov %vm9447_vm0  ;;  %v9460_v37 = vld [vmem:[#allocation54_spill] sm:$0xff] }
  0xd4   : > { %6389 = vmatprep.mubr.msk.bf16.mxu1 %vm9439_vm9, %v2339_v24  ;;  %vm9457_vm9 = vmmov %vm9447_vm0  ;;  %v2343_v4 = vpack.c.bf16 %v2324_v54, %v9460_v37  ;;  %v9461_v24 = vld [vmem:[#allocation68_spill] sm:$0xff]  ;;  %v9474_v54 = vld [vmem:[#allocation17_spill] sm:$0xff] }
  0xd5   : > { %6538 = vmatmul.mubr.msk.bf16.gmra.mrb[28].mxu0 %vm9444_vm4, %v4354_v46  ;;  %vm9459_vm4 = vmmov %vm9447_vm0  ;;  %v9463_v46 = vld [vmem:[#allocation56_spill] sm:$0xff] }
  0xd6   : > { %6543 = vmatprep.mubr.msk.bf16.mxu0 %vm9447_vm0, %v9446_v38  ;;  %v2328_v56 = vsel %vm9465_vm5, %v9463_v46, 0.0  ;;  %v9468_v38 = vld [vmem:[#allocation14_spill] sm:$0xff]  ;;  %vm9476_vm5 = vmmov %vm9447_vm0 }
  0xdb   : > { %6390 = vmatmul.mubr.msk.bf16.gmra.mrb[16].mxu1 %vm9449_vm2, %v2340_v15  ;;  %vm9462_vm2 = vmmov %vm9447_vm0  ;;  %v9466_v15 = vld [vmem:[#allocation11_spill] sm:$0xff] }
  0xdc   : > { %6393 = vmatprep.mubr.msk.bf16.mxu1 %vm9452_vm8, %v2341_v40  ;;  %vm9467_vm8 = vmmov %vm9447_vm0  ;;  %v9470_v40 = vld [vmem:[#allocation57_spill] sm:$0xff] }
  0xdd   : > { %6544 = vmatmul.mubr.msk.bf16.vlgmr.msra.gmra.mrb[0].mxu0 %vm9457_vm9, %v9456_v21  ;;  %vm9469_vm9 = vmmov %vm9447_vm0  ;;  %v2345_v25 = vpack.c.bf16 %v2328_v56, %v9470_v40  ;;  %v9478_v21 = vld [vmem:[#allocation19_spill] sm:$0xff]  ;;  %v9493_v56 = vld [vmem:[#allocation38_spill] sm:$0xff] }
  0xde   : > { %6576 = vmatpush3.bf16.msra.mxu0 %v5403_v62  ;;  %6547 = vmatprep.mubr.msk.bf16.mxu0 %vm9459_vm4, %v9458_v33  ;;  %vm9471_vm4 = vmmov %vm9447_vm0  ;;  %v9473_v62 = vld [vmem:[#allocation15_spill] sm:$0xff]  ;;  %v9480_v33 = vld [vmem:[#allocation22_spill] sm:$0xff] }
  0xe3   : > { %6394 = vmatmul.mubr.msk.bf16.gmra.mrb[20].mxu1 %vm9447_vm0, %v9461_v24  ;;  %v9486_v24 = vld [vmem:[#allocation26_spill] sm:$0xff] }
  0xe4   : > { %6397 = vmatprep.mubr.msk.bf16.mxu1 %vm9462_vm2, %v2343_v4  ;;  %vm9475_vm2 = vmmov %vm9447_vm0  ;;  %v9484_v4 = vld [vmem:[#allocation2_spill] sm:$0xff] }
  0xe5   : > { %6548 = vmatmul.mubr.msk.bf16.gmra.mrb[4].mxu0 %vm9467_vm8, %v9466_v15  ;;  %vm9477_vm8 = vmmov %vm9447_vm0  ;;  %v5305_v15 = vsel %vm7174_vm15, %v9374_v35, 0.0  ;;  %v5309_v35 = vsel %vm9376_vm11, %v9407_v6, 0.0  ;;  %v5321_v6 = vsel %vm9434_vm12, %v9441_v9, 0.0 }
  0xe6   : > { %6551 = vmatprep.mubr.msk.bf16.mxu0 %vm9469_vm9, %v9468_v38  ;;  %vm9479_vm9 = vmmov %vm9447_vm0 }
  0xe7   : > { %vm9506_vm15 = vmmov %vm9447_vm0 }
  0xe8   : > { %vm9509_vm11 = vmmov %vm9447_vm0 }
  0xe9   : > { %vm9522_vm12 = vmmov %vm9447_vm0 }
  0xeb   : > { %6398 = vmatmul.mubr.msk.bf16.gmra.mrb[24].mxu1 %vm9471_vm4, %v8259_v3  ;;  %v9482_v3 = vld [vmem:[#allocation49_spill] sm:$0xff]  ;;  %vm9485_vm4 = vmmov %vm9447_vm0 }
  0xec   : > { %6401 = vmatprep.mubr.msk.bf16.mxu1 %vm9472_vm3, %v2345_v25  ;;  %vm9483_vm3 = vmmov %vm9447_vm0  ;;  %v5599_v25 = vld [vmem:[%s8669_s13 + $0x8] sm:$0xff] }
  0xed   : > { %6552 = vmatmul.mubr.msk.bf16.gmra.mrb[8].mxu0 %vm9447_vm0, %v9473_v62  ;;  %v5604_v62 = vld [vmem:[%s8669_s13 + $0x30] sm:$0xff] }
  0xee   : > { %6555 = vmatprep.mubr.msk.bf16.mxu0 %vm9475_vm2, %v9474_v54  ;;  %vm9489_vm2 = vmmov %vm9447_vm0  ;;  %v8677_v54 = vld [vmem:[%s8669_s13 + $0x20] sm:$0xff] }
  0xf3   : > { %6402 = vmatmul.mubr.msk.bf16.gmra.mrb[28].mxu1 %vm9476_vm5, %v8266_v59  ;;  %v9487_v59 = vld [vmem:[#allocation30_spill] sm:$0xff]  ;;  %vm9488_vm5 = vmmov %vm9447_vm0 }
  0xf4   : > { %6407 = vmatprep.mubr.msk.bf16.mxu1 %vm9477_vm8, %v8321_v42  ;;  %vm9490_vm8 = vmmov %vm9447_vm0  ;;  %v9491_v42 = vld [vmem:[#allocation34_spill] sm:$0xff] }
  0xf5   : > { %6556 = vmatmul.mubr.msk.bf16.gmra.mrb[12].mxu0 %vm9479_vm9, %v9478_v21  ;;  %vm9494_vm9 = vmmov %vm9447_vm0 }
  0xf6   : > { %6559 = vmatprep.mubr.msk.bf16.mxu0 %vm9481_vm14, %v9480_v33  ;;  %vm9492_vm14 = vmmov %vm9447_vm0 }
  0xfb   : > { %6408 = vmatmul.mubr.msk.bf16.vlgmr.msra.gmra.mrb[0].mxu1 %vm9483_vm3, %v9482_v3  ;;  %vm9495_vm3 = vmmov %vm9447_vm0  ;;  %v8686_v3 = vld [vmem:[%s8669_s13 + $0x50] sm:$0xff] }
  0xfc   : > { %6610 = vmatpush3.bf16.msra.mxu1 %v9484_v4  ;;  %6411 = vmatprep.mubr.msk.bf16.mxu1 %vm9485_vm4, %v8273_v49  ;;  %v8530_v49 = vpack.c.bf16 %v9396_v51, %v9380_v41  ;;  %vm9496_vm4 = vmmov %vm9447_vm0  ;;  %v9502_v41 = vmov 0.0|0.0   ;;  %v8689_v4 = vld [vmem:[%s8669_s13 + $0x40] sm:$0xff] }
  0xfd   : > { %6560 = vmatmul.mubr.msk.bf16.gmra.mrb[16].mxu0 %vm9447_vm0, %v9486_v24 }
  0xfe   : > { %6563 = vmatprep.mubr.msk.bf16.mxu0 %vm9488_vm5, %v9487_v59  ;;  %vm9498_vm5 = vmmov %vm9447_vm0 }
 0x103   : > { %6412 = vmatmul.mubr.msk.bf16.gmra.mrb[4].mxu1 %vm9489_vm2, %v8285_v39  ;;  %v9497_v39 = vld [vmem:[#allocation39_spill] sm:$0xff]  ;;  %vm9500_vm2 = vmmov %vm9447_vm0 }
 0x104   : > { %6415 = vmatprep.mubr.msk.bf16.mxu1 %vm9490_vm8, %v8288_v28  ;;  %vm9501_vm8 = vmmov %vm9447_vm0  ;;  %v8710_v28 = vld [vmem:[%s8669_s13 + $0x90] sm:$0xff] }
 0x105   : > { %6564 = vmatmul.mubr.msk.bf16.gmra.mrb[20].mxu0 %vm9492_vm14, %v9491_v42 }
 0x106   : > { %6567 = vmatprep.mubr.msk.bf16.mxu0 %vm9494_vm9, %v9493_v56  ;;  %vm9505_vm9 = vmmov %vm9447_vm0 }
 0x10b   : > { %6416 = vmatmul.mubr.msk.bf16.gmra.mrb[8].mxu1 %vm9495_vm3, %v8291_v17  ;;  %v5336_v17 = vpack.c.bf16 %v5305_v15, %v9390_v8  ;;  %vm9507_vm3 = vmmov %vm9447_vm0  ;;  %v8713_v15 = vld [vmem:[%s8669_s13 + $0x80] sm:$0xff] }
 0x10c   : > { %6419 = vmatprep.mubr.msk.bf16.mxu1 %vm9496_vm4, %v8311_v45  ;;  %v9503_v45 = vld [vmem:[#allocation12_spill] sm:$0xff]  ;;  %vm9508_vm4 = vmmov %vm9447_vm0 }
 0x10d   : > { %6568 = vmatmul.mubr.msk.bf16.gmra.mrb[24].mxu0 %vm9447_vm0, %v9497_v39  ;;  %vm9504_vm14 = vnez %v9503_v45  ;;  %v8722_v45 = vld [vmem:[%s8669_s13 + $0xb0] sm:$0xff] }
 0x10e   : > { %6571 = vmatprep.mubr.msk.bf16.mxu0 %vm9498_vm5, %v8530_v49  ;;  %v5307_v51 = vsel %vm9504_vm14, %v9402_v20, 0.0  ;;  %vm9510_vm5 = vmmov %vm9447_vm0  ;;  %v5317_v20 = vsel %vm9423_vm7, %v9432_v36, 0.0 }
 0x10f   : > { %v5337_v38 = vpack.c.bf16 %v5307_v51, %v9413_v16  ;;  %vm9515_vm14 = vmmov %vm9447_vm0  ;;  %v8725_v51 = vld [vmem:[%s8669_s13 + $0xa0] sm:$0xff] }
 0x110   : > { %vm9518_vm7 = vmmov %vm9447_vm0 }
 0x113   : > { %6420 = vmatmul.mubr.msk.bf16.gmra.mrb[12].mxu1 %vm9500_vm2, %v8314_v7  ;;  %v5338_v7 = vpack.c.bf16 %v5309_v35, %v9415_v0  ;;  %vm9511_vm2 = vmmov %vm9447_vm0  ;;  %v8728_v35 = vld [vmem:[%s8669_s13 + $0xb8] sm:$0xff] }
 0x114   : > { %6423 = vmatprep.mubr.msk.bf16.mxu1 %vm9501_vm8, %v8317_v58  ;;  %v5311_v58 = vsel %vm9404_vm13, %v9418_v43, 0.0  ;;  %vm9512_vm8 = vmmov %vm9447_vm0 }
 0x115   : > { %6572 = vmatmul.mubr.bf16.gmra.mrb[28].mxu0 %v9502_v41  ;;  %v5339_v8 = vpack.c.bf16 %v5311_v58, %v9424_v27  ;;  %vm9513_vm13 = vmmov %vm9447_vm0  ;;  %v8737_v58 = vld [vmem:[%s8669_s13 + $0xc0] sm:$0xff] }
 0x116   : > { %6577 = vmatprep.mubr.msk.bf16.mxu0 %vm9505_vm9, %v5336_v17  ;;  %vm9516_vm9 = vmmov %vm9447_vm0  ;;  %v8716_v17 = vld [vmem:[%s8669_s13 + $0x98] sm:$0xff] }
 0x11b   : > { %6424 = vmatmul.mubr.msk.bf16.gmra.mrb[16].mxu1 %vm9506_vm15, %v8332_v53  ;;  %v5340_v53 = vpack.c.bf16 %v5313_v32, %v9426_v14  ;;  %vm9519_vm15 = vmmov %vm9447_vm0 }
 0x11c   : > { %6427 = vmatprep.mubr.msk.bf16.mxu1 %vm9507_vm3, %v8335_v23  ;;  %v5315_v23 = vsel %vm9420_vm1, %v9429_v12, 0.0  ;;  %vm9517_vm1 = vmmov %vm9447_vm0 }
 0x11d   : > { %6578 = vmatmul.mubr.msk.bf16.vlgmr.msra.gmra.mrb[0].mxu0 %vm9508_vm4, %v5337_v38  ;;  %v5341_v26 = vpack.c.bf16 %v5315_v23, %v9435_v5  ;;  %vm9520_vm3 = vmmov %vm9447_vm0  ;;  %v8731_v38 = vld [vmem:[%s8669_s13 + $0xa8] sm:$0xff] }
 0x11e   : > { %6581 = vmatprep.mubr.msk.bf16.mxu0 %vm9447_vm0, %v5338_v7  ;;  %vm9523_vm4 = vmmov %vm9447_vm0  ;;  %v8734_v7 = vld [vmem:[%s8669_s13 + $0xd0] sm:$0xff]  ;;  %v8743_v23 = vld [vmem:[%s8669_s13 + $0xc8] sm:$0xff] }
 0x123   : > { %6428 = vmatmul.mubr.msk.bf16.gmra.mrb[20].mxu1 %vm9509_vm11, %v8342_v31  ;;  %v5342_v31 = vpack.c.bf16 %v5317_v20, %v9437_v63  ;;  %vm9525_vm11 = vmmov %vm9447_vm0  ;;  %v8746_v20 = vld [vmem:[%s8669_s13 + $0xf0] sm:$0xff] }
 0x124   : > { %6431 = vmatprep.mubr.msk.bf16.mxu1 %vm9510_vm5, %v8352_v10  ;;  %v5319_v10 = vsel %vm9431_vm6, %v9440_v1, 0.0  ;;  %vm9521_vm6 = vnez %v9442_v19  ;;  %vm9526_vm5 = vnez %v9454_v47 }
 0x125   : > { %6582 = vmatmul.mubr.msk.bf16.gmra.mrb[4].mxu0 %vm9511_vm2, %v5339_v8  ;;  %v5343_v30 = vpack.c.bf16 %v5319_v10, %v9445_v60  ;;  %v5329_v43 = vsel %vm9526_vm5, %v9463_v46, 0.0  ;;  %v5598_v46 = vld [vmem:[%s8669_s13] sm:$0xff]  ;;  %vm9541_vm5 = vmmov %vm9447_vm0 }
 0x126   : > { %6585 = vmatprep.mubr.msk.bf16.mxu0 %vm9512_vm8, %v5340_v53  ;;  %vm9527_vm8 = vmmov %vm9447_vm0  ;;  %v5348_v61 = vpack.c.bf16 %v5329_v43, %v9470_v40  ;;  %v5601_v40 = vld [vmem:[%s8669_s13 + $0x18] sm:$0xff]  ;;  %v8755_v10 = vld [vmem:[%s8669_s13 + $0xe0] sm:$0xff] }
 0x127   : > { %v8740_v53 = vld [vmem:[%s8669_s13 + $0xd8] sm:$0xff] }
 0x12b   : > { %6432 = vmatmul.mubr.msk.bf16.gmra.mrb[24].mxu1 %vm9513_vm13, %v8362_v44  ;;  %v5344_v44 = vpack.c.bf16 %v5321_v6, %v9448_v29  ;;  %vm9528_vm13 = vmmov %vm9447_vm0  ;;  %v8758_v6 = vld [vmem:[%s8669_s13 + $0xf8] sm:$0xff] }
 0x12c   : > { %6435 = vmatprep.mubr.msk.bf16.mxu1 %vm9514_vm10, %v8372_v18  ;;  %v5325_v18 = vsel %vm9521_vm6, %v9453_v48, 0.0  ;;  %vm9529_vm10 = vnez %v9464_v22  ;;  %vm9537_vm6 = vmmov %vm9447_vm0 }
 0x12d   : > { %6586 = vmatmul.mubr.msk.bf16.gmra.mrb[8].mxu0 %vm9515_vm14, %v5341_v26  ;;  %v5346_v16 = vpack.c.bf16 %v5325_v18, %v9460_v37  ;;  %v5600_v37 = vld [vmem:[%s8669_s13 + $0x10] sm:$0xff] }
 0x12e   : > { %6589 = vmatprep.mubr.msk.bf16.mxu0 %vm9516_vm9, %v5342_v31  ;;  %vm9530_vm9 = vmmov %vm9447_vm0 }
 0x133   : > { %6436 = vmatmul.mubr.msk.bf16.gmra.mrb[28].mxu1 %vm9517_vm1, %v8379_v11  ;;  %v9524_v11 = vld [vmem:[#allocation59_spill] sm:$0xff]  ;;  %vm9531_vm1 = vmmov %vm9447_vm0 }
 0x134   : > { %6457 = vmatprep.mubr.msk.bf16.mxu1 %vm9518_vm7, %v9478_v21  ;;  %v5109_v0 = vadd.s32 17, %v9524_v11  ;;  %vm9533_vm7 = vmmov %vm9447_vm0  ;;  %v8680_v21 = vld [vmem:[%s8669_s13 + $0x38] sm:$0xff] }
 0x135   : > { %6590 = vmatmul.mubr.msk.bf16.gmra.mrb[12].mxu0 %vm9519_vm15, %v5343_v30  ;;  %vm9535_vm15 = vmmov %vm9447_vm0  ;;  %v8761_v30 = vld [vmem:[%s8669_s13 + $0xe8] sm:$0xff] }
 0x136   : > { %6593 = vmatprep.mubr.msk.bf16.mxu0 %vm9520_vm3, %v5344_v44  ;;  %vm5173_vm2 = vcmp.lt.s32.totalorder %v5109_v0, 256  ;;  %vm9536_vm3 = vmmov %vm9447_vm0 }
 0x137   : > { %vm5237_vm14 = vmand %vm5173_vm2, %vm9529_vm10 }
 0x138   : > { %vm9542_vm2 = vmmov %vm9447_vm0 }
 0x139   : > { %vm9545_vm10 = vmmov %vm9447_vm0 }
 0x13b   : > { %6458 = vmatmul.mubr.msk.bf16.vlgmr.msra.gmra.mrb[16].mxu1 %vm9522_vm12, %v9480_v33  ;;  %vm9538_vm12 = vmmov %vm9447_vm0  ;;  %v8683_v33 = vld [vmem:[%s8669_s13 + $0x28] sm:$0xff] }
 0x13c   : > { %6461 = vmatprep.mubr.msk.bf16.mxu1 %vm9523_vm4, %v9486_v24  ;;  %v8692_v24 = vld [vmem:[%s8669_s13 + $0x58] sm:$0xff]  ;;  %vm9539_vm4 = vmmov %vm9447_vm0 }
 0x13d   : > { %6594 = vmatmul.mubr.msk.bf16.gmra.mrb[16].mxu0 %vm9447_vm0, %v8396_v13  ;;  %v9532_v13 = vld [vmem:[#allocation61_spill] sm:$0xff] }
 0x13e   : > { %6597 = vmatprep.mubr.msk.bf16.mxu0 %vm9525_vm11, %v5346_v16  ;;  %v5333_v34 = vsel %vm5237_vm14, %v9532_v13, 0.0  ;;  %vm9540_vm11 = vmmov %vm9447_vm0 }
 0x13f   : > { %v5350_v27 = vpack.c.bf16 %v5333_v34, %v9534_v52  ;;  %vm9546_vm14 = vmmov %vm9447_vm0 }
 0x143   : > { %6462 = vmatmul.mubr.msk.bf16.gmra.mrb[20].mxu1 %vm9527_vm8, %v9487_v59  ;;  %v8695_v59 = vld [vmem:[%s8669_s13 + $0x48] sm:$0xff]  ;;  %vm9543_vm8 = vmmov %vm9447_vm0 }
 0x144   : > { %6465 = vmatprep.mubr.msk.bf16.mxu1 %vm9528_vm13, %v9491_v42  ;;  %v8698_v42 = vld [vmem:[%s8669_s13 + $0x70] sm:$0xff]  ;;  %vm9544_vm13 = vmmov %vm9447_vm0 }
 0x145   : > { %6598 = vmatmul.mubr.msk.bf16.gmra.mrb[20].mxu0 %vm9530_vm9, %v8420_v55  ;;  %vm9547_vm9 = vmmov %vm9447_vm0 }
 0x146   : > { %6601 = vmatprep.mubr.msk.bf16.mxu0 %vm9531_vm1, %v5348_v61  ;;  %vm9548_vm1 = vmmov %vm9447_vm0 }
 0x14b   : > { %6466 = vmatmul.mubr.msk.bf16.gmra.mrb[24].mxu1 %vm9533_vm7, %v9493_v56  ;;  %v8701_v56 = vld [vmem:[%s8669_s13 + $0x60] sm:$0xff]  ;;  %vm9549_vm7 = vmmov %vm9447_vm0 }
 0x14c   : > { %6469 = vmatprep.mubr.msk.bf16.mxu1 %vm9535_vm15, %v9497_v39  ;;  %v8707_v39 = vld [vmem:[%s8669_s13 + $0x68] sm:$0xff]  ;;  %vm9550_vm15 = vmmov %vm9447_vm0 }
 0x14d   : > { %6602 = vmatmul.mubr.msk.bf16.gmra.mrb[24].mxu0 %vm9536_vm3, %v8447_v50  ;;  %vm9551_vm3 = vmmov %vm9447_vm0 }
 0x14e   : > { %6605 = vmatprep.mubr.msk.bf16.mxu0 %vm9537_vm6, %v5350_v27  ;;  %vm9552_vm6 = vmmov %vm9447_vm0 }
 0x153   : > { %6470 = vmatmul.mubr.msk.bf16.gmra.mrb[28].mxu1 %vm9538_vm12, %v8530_v49  ;;  %v8704_v49 = vld [vmem:[%s8669_s13 + $0x78] sm:$0xff]  ;;  %vm9553_vm12 = vmmov %vm9447_vm0 }
 0x155   : > { %6606 = vmatmul.mubr.bf16.gmra.mrb[28].mxu0 %v9502_v41  ;;  %v8719_v41 = vld [vmem:[%s8669_s13 + $0x88] sm:$0xff] }
 0x1ce   : > { %v6409_v55 = vpop.f32.mrb[0].mxu1 }
 0x1cf   : > { %v2952_v14 = vpop.f32.mrb[1].mxu1 }
 0x1d0   : > { %v6410_v12 = vpop.f32.mrb[2].mxu1 }
 0x1d1   : > { %v2955_v57 = vpop.f32.mrb[3].mxu1 }
 0x1d6   : > { %v8641_v36 = vpop.f32.mrb[4].mxu1 }
 0x1d7   : > { %v8643_v2 = vpop.f32.mrb[5].mxu1 }
 0x1d8   : > { %v8645_v5 = vpop.f32.mrb[6].mxu1 }
 0x1d9   : > { %v8647_v63 = vpop.f32.mrb[7].mxu1 }
 0x1de   : > { %v8649_v50 = vpop.f32.mrb[8].mxu1 }
 0x1df   : > { %v8651_v1 = vpop.f32.mrb[9].mxu1 }
 0x1e0   : > { %v8653_v9 = vpop.f32.mrb[10].mxu1 }
 0x1e1   : > { %v8655_v19 = vpop.f32.mrb[11].mxu1 }
 0x1e6   : > { %v8657_v60 = vpop.f32.mrb[12].mxu1 }
 0x1e7   : > { %v8659_v29 = vpop.f32.mrb[13].mxu1 }
 0x1e8   : > { %v8661_v48 = vpop.f32.mrb[14].mxu1 }
 0x1e9   : > { %v8663_v47 = vpop.f32.mrb[15].mxu1 }
 0x1f0   : > { %v6579_v22 = vpop.f32.mrb[0].mxu0 }
 0x1f1   : > { %v6611_v32 = vadd.f32 %v6579_v22, %v6409_v55  ;;  %v5439_v8 = vpop.f32.mrb[1].mxu0 }
 0x1f2   : > { %v6612_v26 = vadd.f32 %v5439_v8, %v2952_v14  ;;  %v6580_v31 = vpop.f32.mrb[2].mxu0 }
 0x1f3   : > { %v5632_v44 = vadd.f32 %v6611_v32, %v5600_v37  ;;  %v6613_v18 = vadd.f32 %v6580_v31, %v6410_v12  ;;  %v5442_v16 = vpop.f32.mrb[3].mxu0 }
 0x1f4   : > { %v5630_v11 = vadd.f32 %v6612_v26, %v5598_v46  ;;  %v6614_v0 = vadd.f32 %v5442_v16, %v2955_v57 }
 0x1f5   : > { %v5633_v43 = vadd.f32 %v6613_v18, %v5601_v40  ;;  %5664 = vst.msk [vmem:[%s8752_s16 + $0x10] sm:$0xff] %vm9539_vm4, %v5632_v44  ;;  %v5767_v34 = vmul.f32 %v5632_v44, %v5632_v44  ;;  %v5697_v22 = vsel %vm9544_vm13, %v5632_v44, 0.0  ;;  %vm9554_vm4 = vmmov %vm9447_vm0 }
 0x1f6   : > { %v5765_v61 = vmul.f32 %v5630_v11, %v5630_v11  ;;  %v5631_v13 = vadd.f32 %v6614_v0, %v5599_v25  ;;  %5662 = vst.msk [vmem:[%s8752_s16] sm:$0xff] %vm9447_vm0, %v5630_v11  ;;  %v5694_v52 = vsel %vm9541_vm5, %v5630_v11, 0.0  ;;  %vm9556_vm5 = vmmov %vm9447_vm0 }
 0x1f7   : > { %5665 = vst.msk [vmem:[%s8752_s16 + $0x18] sm:$0xff] %vm9540_vm11, %v5633_v43  ;;  %v5768_v12 = vmul.f32 %v5633_v43, %v5633_v43  ;;  %v5699_v0 = vsel %vm9548_vm1, %v5633_v43, 0.0  ;;  %vm9555_vm11 = vmmov %vm9447_vm0 }
 0x1f8   : > { %v5695_v27 = vsel %vm9542_vm2, %v5631_v13, 0.0  ;;  %v5766_v55 = vmul.f32 %v5631_v13, %v5631_v13  ;;  %v6583_v14 = vpop.f32.mrb[4].mxu0  ;;  %5663 = vst.msk [vmem:[%s8752_s16 + $0x8] sm:$0xff] %vm9543_vm8, %v5631_v13  ;;  %v5797_v40 = vsel %vm9545_vm10, %v5765_v61, 0.0  ;;  %vm9557_vm2 = vmmov %vm9447_vm0 }
 0x1f9   : > { %v5696_v57 = vadd.f32 %v5695_v27, %v5694_v52  ;;  %v6615_v37 = vadd.f32 %v6583_v14, %v8641_v36  ;;  %v5455_v46 = vpop.f32.mrb[5].mxu0  ;;  %v5800_v36 = vsel %vm9547_vm9, %v5767_v34, 0.0  ;;  %v5802_v13 = vsel %vm9549_vm7, %v5768_v12, 0.0  ;;  %vm9558_vm8 = vmmov %vm9447_vm0 }
 0x1fa   : > { %v5798_v25 = vsel %vm9546_vm14, %v5766_v55, 0.0  ;;  %v6616_v32 = vadd.f32 %v5455_v46, %v8643_v2  ;;  %v6584_v8 = vpop.f32.mrb[6].mxu0  ;;  %vm9559_vm13 = vmmov %vm9447_vm0 }
 0x1fb   : > { %v5698_v26 = vadd.f32 %v5697_v22, %v5696_v57  ;;  %v5799_v31 = vadd.f32 %v5798_v25, %v5797_v40  ;;  %v5636_v18 = vadd.f32 %v6615_v37, %v5604_v62  ;;  %v6617_v16 = vadd.f32 %v6584_v8, %v8645_v5  ;;  %v5458_v11 = vpop.f32.mrb[7].mxu0  ;;  %vm9560_vm10 = vmmov %vm9447_vm0 }
 0x1fc   : > { %v5634_v44 = vadd.f32 %v6616_v32, %v8677_v54  ;;  %v6618_v61 = vadd.f32 %v5458_v11, %v8647_v63  ;;  %vm9561_vm14 = vmmov %vm9447_vm0 }
 0x1fd   : > { %v5801_v2 = vadd.f32 %v5800_v36, %v5799_v31  ;;  %v5700_v52 = vadd.f32 %v5699_v0, %v5698_v26  ;;  %5668 = vst.msk [vmem:[%s8752_s16 + $0x30] sm:$0xff] %vm9550_vm15, %v5636_v18  ;;  %v5637_v27 = vadd.f32 %v6617_v16, %v8680_v21  ;;  %v5771_v63 = vmul.f32 %v5636_v18, %v5636_v18  ;;  %vm9562_vm9 = vmmov %vm9447_vm0 }
 0x1fe   : > { %v5701_v62 = vsel %vm9551_vm3, %v5634_v44, 0.0  ;;  %v5769_v5 = vmul.f32 %v5634_v44, %v5634_v44  ;;  %v5635_v34 = vadd.f32 %v6618_v61, %v8683_v33  ;;  %5666 = vst.msk [vmem:[%s8752_s16 + $0x20] sm:$0xff] %vm9552_vm6, %v5634_v44  ;;  %v5705_v22 = vsel %vm9556_vm5, %v5636_v18, 0.0  ;;  %vm9563_vm1 = vmmov %vm9447_vm0 }
 0x1ff   : > { %v5702_v54 = vadd.f32 %v5701_v62, %v5700_v52  ;;  %v5803_v43 = vadd.f32 %v5802_v13, %v5801_v2  ;;  %5669 = vst.msk [vmem:[%s8752_s16 + $0x38] sm:$0xff] %vm9555_vm11, %v5637_v27  ;;  %v5772_v40 = vmul.f32 %v5637_v27, %v5637_v27  ;;  %vm9564_vm7 = vmmov %vm9447_vm0 }
 0x200   : > { %v5804_v55 = vsel %vm9553_vm12, %v5769_v5, 0.0  ;;  %v5703_v14 = vsel %vm9554_vm4, %v5635_v34, 0.0  ;;  %v6587_v12 = vpop.f32.mrb[8].mxu0  ;;  %5667 = vst.msk [vmem:[%s8752_s16 + $0x28] sm:$0xff] %vm9447_vm0, %v5635_v34  ;;  %v5770_v46 = vmul.f32 %v5635_v34, %v5635_v34  ;;  %vm9565_vm15 = vmmov %vm9447_vm0 }
 0x201   : > { %v5805_v57 = vadd.f32 %v5804_v55, %v5803_v43  ;;  %v5704_v37 = vadd.f32 %v5703_v14, %v5702_v54  ;;  %v6619_v21 = vadd.f32 %v6587_v12, %v8649_v50  ;;  %v5471_v33 = vpop.f32.mrb[9].mxu0  ;;  %v5707_v50 = vsel %vm9558_vm8, %v5637_v27, 0.0  ;;  %vm9566_vm3 = vmmov %vm9447_vm0 }
 0x202   : > { %v6620_v25 = vadd.f32 %v5471_v33, %v8651_v1  ;;  %v6588_v32 = vpop.f32.mrb[10].mxu0  ;;  %v5806_v26 = vsel %vm9557_vm2, %v5770_v46, 0.0  ;;  %v5808_v1 = vsel %vm9559_vm13, %v5771_v63, 0.0  ;;  %vm9567_vm6 = vmmov %vm9447_vm0 }
 0x203   : > { %v5706_v8 = vadd.f32 %v5705_v22, %v5704_v37  ;;  %v5640_v31 = vadd.f32 %v6619_v21, %v8686_v3  ;;  %v6621_v16 = vadd.f32 %v6588_v32, %v8653_v9  ;;  %v5474_v11 = vpop.f32.mrb[11].mxu0  ;;  %v5807_v36 = vadd.f32 %v5806_v26, %v5805_v57  ;;  %vm9568_vm12 = vmmov %vm9447_vm0 }
 0x204   : > { %v5638_v18 = vadd.f32 %v6620_v25, %v8689_v4  ;;  %v6622_v0 = vadd.f32 %v5474_v11, %v8655_v19  ;;  %v5810_v4 = vsel %vm9563_vm1, %v5772_v40, 0.0  ;;  %vm9569_vm4 = vmmov %vm9447_vm0 }
 0x205   : > { %v5708_v44 = vadd.f32 %v5707_v50, %v5706_v8  ;;  %v5641_v61 = vadd.f32 %v6621_v16, %v8692_v24  ;;  %5672 = vst.msk [vmem:[%s8752_s16 + $0x50] sm:$0xff] %vm9560_vm10, %v5640_v31  ;;  %v5809_v3 = vadd.f32 %v5808_v1, %v5807_v36  ;;  %v5775_v34 = vmul.f32 %v5640_v31, %v5640_v31  ;;  %vm9570_vm11 = vmmov %vm9447_vm0 }
 0x206   : > { %v5709_v9 = vsel %vm9561_vm14, %v5638_v18, 0.0  ;;  %v5773_v13 = vmul.f32 %v5638_v18, %v5638_v18  ;;  %v5639_v2 = vadd.f32 %v6622_v0, %v8695_v59  ;;  %5670 = vst.msk [vmem:[%s8752_s16 + $0x40] sm:$0xff] %vm9562_vm9, %v5638_v18  ;;  %v5713_v63 = vsel %vm9568_vm12, %v5640_v31, 0.0  ;;  %vm9571_vm5 = vmmov %vm9447_vm0 }
 0x207   : > { %v5710_v52 = vadd.f32 %v5709_v9, %v5708_v44  ;;  %5673 = vst.msk [vmem:[%s8752_s16 + $0x58] sm:$0xff] %vm9564_vm7, %v5641_v61  ;;  %v5811_v19 = vadd.f32 %v5810_v4, %v5809_v3  ;;  %v5776_v37 = vmul.f32 %v5641_v61, %v5641_v61  ;;  %v5816_v8 = vsel %vm9570_vm11, %v5775_v34, 0.0  ;;  %vm9572_vm2 = vmmov %vm9447_vm0 }
 0x208   : > { %v5812_v62 = vsel %vm9565_vm15, %v5773_v13, 0.0  ;;  %v5711_v24 = vsel %vm9566_vm3, %v5639_v2, 0.0  ;;  %v5774_v5 = vmul.f32 %v5639_v2, %v5639_v2  ;;  %v6591_v27 = vpop.f32.mrb[12].mxu0  ;;  %5671 = vst.msk [vmem:[%s8752_s16 + $0x48] sm:$0xff] %vm9567_vm6, %v5639_v2  ;;  %vm9573_vm8 = vmmov %vm9447_vm0 }
 0x209   : > { %v5712_v54 = vadd.f32 %v5711_v24, %v5710_v52  ;;  %v6623_v59 = vadd.f32 %v6591_v27, %v8657_v60  ;;  %v5487_v43 = vpop.f32.mrb[13].mxu0  ;;  %v5813_v55 = vadd.f32 %v5812_v62, %v5811_v19  ;;  %v5715_v60 = vsel %vm9447_vm0, %v5641_v61, 0.0  ;;  %vm9574_vm13 = vmmov %vm9447_vm0 }
 0x20a   : > { %v5814_v14 = vsel %vm9569_vm4, %v5774_v5, 0.0  ;;  %v6624_v12 = vadd.f32 %v5487_v43, %v8659_v29  ;;  %v6592_v57 = vpop.f32.mrb[14].mxu0  ;;  %vm9575_vm10 = vmmov %vm9447_vm0 }
 0x20b   : > { %v5714_v46 = vadd.f32 %v5713_v63, %v5712_v54  ;;  %v5644_v21 = vadd.f32 %v6623_v59, %v8698_v42  ;;  %v6625_v33 = vadd.f32 %v6592_v57, %v8661_v48  ;;  %v5490_v22 = vpop.f32.mrb[15].mxu0  ;;  %v5815_v40 = vadd.f32 %v5814_v14, %v5813_v55  ;;  %vm9576_vm14 = vmmov %vm9447_vm0 }
 0x20c   : > { %v5642_v25 = vadd.f32 %v6624_v12, %v8701_v56  ;;  %v6626_v32 = vadd.f32 %v5490_v22, %v8663_v47  ;;  %v5818_v47 = vsel %vm9574_vm13, %v5776_v37, 0.0  ;;  %vm9577_vm9 = vmmov %vm9447_vm0 }
 0x20d   : > { %v5716_v29 = vadd.f32 %v5715_v60, %v5714_v46  ;;  %v5645_v26 = vadd.f32 %v6625_v33, %v8704_v49  ;;  %5676 = vst.msk [vmem:[%s8752_s16 + $0x70] sm:$0xff] %vm9571_vm5, %v5644_v21  ;;  %v5817_v42 = vadd.f32 %v5816_v8, %v5815_v40  ;;  %vm9578_vm1 = vmmov %vm9447_vm0 }
 0x20e   : > { %v6459_v31 = vpop.f32.mrb[16].mxu1  ;;  %v5717_v48 = vsel %vm9572_vm2, %v5642_v25, 0.0  ;;  %v5777_v16 = vmul.f32 %v5642_v25, %v5642_v25  ;;  %v5643_v11 = vadd.f32 %v6626_v32, %v8707_v39  ;;  %5674 = vst.msk [vmem:[%s8752_s16 + $0x60] sm:$0xff] %vm9573_vm8, %v5642_v25  ;;  %v5779_v39 = vmul.f32 %v5644_v21, %v5644_v21  ;;  %vm9579_vm7 = vmmov %vm9447_vm0 }
 0x20f   : > { %v3470_v50 = vpop.f32.mrb[17].mxu1  ;;  %v5718_v56 = vadd.f32 %v5717_v48, %v5716_v29  ;;  %5677 = vst.msk [vmem:[%s8752_s16 + $0x78] sm:$0xff] %vm9575_vm10, %v5645_v26  ;;  %v5819_v49 = vadd.f32 %v5818_v47, %v5817_v42  ;;  %v5721_v2 = vsel %vm9579_vm7, %v5644_v21, 0.0  ;;  %vm9580_vm15 = vmmov %vm9447_vm0  ;;  %v5780_v24 = vmul.f32 %v5645_v26, %v5645_v26 }
 0x210   : > { %v6460_v36 = vpop.f32.mrb[18].mxu1  ;;  %v5820_v18 = vsel %vm9576_vm14, %v5777_v16, 0.0  ;;  %v5719_v0 = vsel %vm9577_vm9, %v5643_v11, 0.0  ;;  %v5778_v1 = vmul.f32 %v5643_v11, %v5643_v11  ;;  %v6595_v44 = vpop.f32.mrb[16].mxu0  ;;  %5675 = vst.msk [vmem:[%s8752_s16 + $0x68] sm:$0xff] %vm9578_vm1, %v5643_v11  ;;  %vm9581_vm3 = vmmov %vm9447_vm0 }
 0x211   : > { %v3473_v61 = vpop.f32.mrb[19].mxu1  ;;  %v5720_v3 = vadd.f32 %v5719_v0, %v5718_v56  ;;  %v6627_v9 = vadd.f32 %v6595_v44, %v6459_v31  ;;  %v5503_v13 = vpop.f32.mrb[17].mxu0  ;;  %v5821_v4 = vadd.f32 %v5820_v18, %v5819_v49  ;;  %v5723_v59 = vsel %vm9581_vm3, %v5645_v26, 0.0  ;;  %vm9582_vm6 = vmmov %vm9447_vm0 }
 0x212   : > { %v5822_v52 = vsel %vm9580_vm15, %v5778_v1, 0.0  ;;  %v6628_v19 = vadd.f32 %v5503_v13, %v3470_v50  ;;  %v6596_v62 = vpop.f32.mrb[18].mxu0  ;;  %v5824_v14 = vsel %vm9582_vm6, %v5779_v39, 0.0  ;;  %vm9583_vm12 = vmmov %vm9447_vm0 }
 0x213   : > { %v5722_v5 = vadd.f32 %v5721_v2, %v5720_v3  ;;  %v5648_v27 = vadd.f32 %v6627_v9, %v8710_v28  ;;  %v6629_v34 = vadd.f32 %v6596_v62, %v6460_v36  ;;  %v5506_v54 = vpop.f32.mrb[19].mxu0  ;;  %v5823_v43 = vadd.f32 %v5822_v52, %v5821_v4  ;;  %vm9584_vm4 = vmmov %vm9447_vm0 }
 0x214   : > { %v5646_v63 = vadd.f32 %v6628_v19, %v8713_v15  ;;  %v6630_v55 = vadd.f32 %v5506_v54, %v3473_v61  ;;  %vm9585_vm11 = vmmov %vm9447_vm0 }
 0x215   : > { %v5724_v12 = vadd.f32 %v5723_v59, %v5722_v5  ;;  %v5649_v57 = vadd.f32 %v6629_v34, %v8716_v17  ;;  %5680 = vst.msk [vmem:[%s8752_s16 + $0x90] sm:$0xff] %vm9583_vm12, %v5648_v27  ;;  %v5825_v46 = vadd.f32 %v5824_v14, %v5823_v43  ;;  %v5826_v15 = vsel %vm9585_vm11, %v5780_v24, 0.0  ;;  %vm9586_vm5 = vmmov %vm9447_vm0 }
 0x216   : > { %v6463_v37 = vpop.f32.mrb[20].mxu1  ;;  %v5725_v28 = vsel %vm9584_vm4, %v5646_v63, 0.0  ;;  %v5781_v21 = vmul.f32 %v5646_v63, %v5646_v63  ;;  %v5647_v33 = vadd.f32 %v6630_v55, %v8719_v41  ;;  %5678 = vst.msk [vmem:[%s8752_s16 + $0x80] sm:$0xff] %vm9447_vm0, %v5646_v63  ;;  %vm9587_vm2 = vmmov %vm9447_vm0  ;;  %v5783_v41 = vmul.f32 %v5648_v27, %v5648_v27 }
 0x217   : > { %v3486_v22 = vpop.f32.mrb[21].mxu1  ;;  %v5726_v60 = vadd.f32 %v5725_v28, %v5724_v12  ;;  %5681 = vst.msk [vmem:[%s8752_s16 + $0x98] sm:$0xff] %vm9586_vm5, %v5649_v57  ;;  %v5827_v17 = vadd.f32 %v5826_v15, %v5825_v46  ;;  %vm9588_vm8 = vmmov %vm9447_vm0  ;;  %v5784_v36 = vmul.f32 %v5649_v57, %v5649_v57 }
 0x218   : > { %v6464_v40 = vpop.f32.mrb[22].mxu1  ;;  %v5828_v25 = vsel %vm9587_vm2, %v5781_v21, 0.0  ;;  %v5727_v32 = vsel %vm9588_vm8, %v5647_v33, 0.0  ;;  %v5782_v8 = vmul.f32 %v5647_v33, %v5647_v33  ;;  %v6599_v29 = vpop.f32.mrb[20].mxu0  ;;  %vm9589_vm13 = vmmov %vm9447_vm0 }
 0x219   : > { %v3489_v26 = vpop.f32.mrb[23].mxu1  ;;  %5679 = vst.msk [vmem:[%s8752_s16 + $0x88] sm:$0xff] %vm9589_vm13, %v5647_v33  ;;  %v5728_v31 = vadd.f32 %v5727_v32, %v5726_v60  ;;  %v6631_v42 = vadd.f32 %v6599_v29, %v6463_v37  ;;  %v5519_v48 = vpop.f32.mrb[21].mxu0  ;;  %vm9590_vm10 = vmmov %vm9447_vm0  ;;  %v5829_v11 = vadd.f32 %v5828_v25, %v5827_v17 }
 0x21a   : > { %v5729_v16 = vsel %vm9590_vm10, %v5648_v27, 0.0  ;;  %vm9591_vm14 = vmmov %vm9447_vm0  ;;  %v6632_v47 = vadd.f32 %v5519_v48, %v3486_v22  ;;  %v6600_v56 = vpop.f32.mrb[22].mxu0 }
 0x21b   : > { %v5830_v50 = vsel %vm9591_vm14, %v5782_v8, 0.0  ;;  %v5730_v49 = vadd.f32 %v5729_v16, %v5728_v31  ;;  %v5652_v18 = vadd.f32 %v6631_v42, %v8722_v45  ;;  %v6633_v0 = vadd.f32 %v6600_v56, %v6464_v40  ;;  %v5522_v1 = vpop.f32.mrb[23].mxu0  ;;  %vm9592_vm9 = vmmov %vm9447_vm0 }
 0x21c   : > { %v5731_v44 = vsel %vm9592_vm9, %v5649_v57, 0.0  ;;  %v5831_v61 = vadd.f32 %v5830_v50, %v5829_v11  ;;  %v5650_v39 = vadd.f32 %v6632_v47, %v8725_v51  ;;  %v6634_v3 = vadd.f32 %v5522_v1, %v3489_v26  ;;  %vm9593_vm1 = vmmov %vm9447_vm0 }
 0x21d   : > { %v5832_v9 = vsel %vm9593_vm1, %v5783_v41, 0.0  ;;  %v5732_v13 = vadd.f32 %v5731_v44, %v5730_v49  ;;  %v5653_v2 = vadd.f32 %v6633_v0, %v8728_v35  ;;  %vm9594_vm7 = vmmov %vm9447_vm0 }
 0x21e   : > { %v6467_v4 = vpop.f32.mrb[24].mxu1  ;;  %5684 = vst.msk [vmem:[%s8752_s16 + $0xb0] sm:$0xff] %vm9594_vm7, %v5652_v18  ;;  %v5833_v52 = vadd.f32 %v5832_v9, %v5831_v61  ;;  %vm9595_vm15 = vmmov %vm9447_vm0  ;;  %v5785_v19 = vmul.f32 %v5650_v39, %v5650_v39  ;;  %v5651_v62 = vadd.f32 %v6634_v3, %v8731_v38  ;;  %v5787_v38 = vmul.f32 %v5652_v18, %v5652_v18 }
 0x21f   : > { %v5733_v45 = vsel %vm9595_vm15, %v5650_v39, 0.0  ;;  %v3502_v24 = vpop.f32.mrb[25].mxu1  ;;  %vm9596_vm3 = vmmov %vm9447_vm0  ;;  %v5788_v33 = vmul.f32 %v5653_v2, %v5653_v2 }
 0x220   : > { %5682 = vst.msk [vmem:[%s8752_s16 + $0xa0] sm:$0xff] %vm9596_vm3, %v5650_v39  ;;  %vm9597_vm6 = vmmov %vm9447_vm0  ;;  %v5734_v5 = vadd.f32 %v5733_v45, %v5732_v13  ;;  %v6468_v27 = vpop.f32.mrb[26].mxu1  ;;  %v5735_v54 = vsel %vm9447_vm0, %v5651_v62, 0.0  ;;  %v5786_v59 = vmul.f32 %v5651_v62, %v5651_v62  ;;  %v6603_v43 = vpop.f32.mrb[24].mxu0 }
 0x221   : > { %v5834_v51 = vsel %vm9597_vm6, %v5784_v36, 0.0  ;;  %vm9598_vm12 = vmmov %vm9447_vm0  ;;  %v3505_v63 = vpop.f32.mrb[27].mxu1  ;;  %v6635_v14 = vadd.f32 %v6603_v43, %v6467_v4  ;;  %v5535_v12 = vpop.f32.mrb[25].mxu0 }
 0x222   : > { %5685 = vst.msk [vmem:[%s8752_s16 + $0xb8] sm:$0xff] %vm9598_vm12, %v5653_v2  ;;  %v5835_v35 = vadd.f32 %v5834_v51, %v5833_v52  ;;  %vm9599_vm4 = vmmov %vm9447_vm0  ;;  %v5736_v55 = vadd.f32 %v5735_v54, %v5734_v5  ;;  %v6636_v28 = vadd.f32 %v5535_v12, %v3502_v24  ;;  %v6604_v21 = vpop.f32.mrb[26].mxu0 }
 0x223   : > { %v5836_v34 = vsel %vm9599_vm4, %v5785_v19, 0.0  ;;  %vm9600_vm11 = vmmov %vm9447_vm0  ;;  %v5656_v15 = vadd.f32 %v6635_v14, %v8734_v7  ;;  %v6637_v60 = vadd.f32 %v6604_v21, %v6468_v27  ;;  %v5538_v40 = vpop.f32.mrb[27].mxu0 }
 0x224   : > { %5683 = vst.msk [vmem:[%s8752_s16 + $0xa8] sm:$0xff] %vm9600_vm11, %v5651_v62  ;;  %vm9601_vm5 = vmmov %vm9447_vm0  ;;  %v5837_v37 = vadd.f32 %v5836_v34, %v5835_v35  ;;  %v5654_v32 = vadd.f32 %v6636_v28, %v8737_v58  ;;  %v6638_v8 = vadd.f32 %v5538_v40, %v3505_v63 }
 0x225   : > { %v5737_v57 = vsel %vm9601_vm5, %v5652_v18, 0.0  ;;  %vm9602_vm2 = vmmov %vm9447_vm0  ;;  %v5657_v41 = vadd.f32 %v6637_v60, %v8740_v53 }
 0x226   : > { %v5838_v46 = vsel %vm9602_vm2, %v5786_v59, 0.0  ;;  %v5738_v22 = vadd.f32 %v5737_v57, %v5736_v55  ;;  %vm9603_vm8 = vmmov %vm9447_vm0  ;;  %v6471_v31 = vpop.f32.mrb[28].mxu1  ;;  %v5789_v48 = vmul.f32 %v5654_v32, %v5654_v32  ;;  %v5655_v16 = vadd.f32 %v6638_v8, %v8743_v23 }
 0x227   : > { %v5739_v17 = vsel %vm9603_vm8, %v5653_v2, 0.0  ;;  %v5839_v25 = vadd.f32 %v5838_v46, %v5837_v37  ;;  %vm9604_vm13 = vmmov %vm9447_vm0  ;;  %v3518_v11 = vpop.f32.mrb[29].mxu1  ;;  %v5791_v23 = vmul.f32 %v5656_v15, %v5656_v15  ;;  %v5792_v4 = vmul.f32 %v5657_v41, %v5657_v41 }
 0x228   : > { %v5840_v29 = vsel %vm9604_vm13, %v5787_v38, 0.0  ;;  %v5740_v26 = vadd.f32 %v5739_v17, %v5738_v22  ;;  %vm9605_vm10 = vmmov %vm9447_vm0  ;;  %v6472_v47 = vpop.f32.mrb[30].mxu1  ;;  %v5790_v49 = vmul.f32 %v5655_v16, %v5655_v16  ;;  %v6607_v18 = vpop.f32.mrb[28].mxu0  ;;  %v5747_v24 = vsel %vm9447_vm0, %v5657_v41, 0.0 }
 0x229   : > { %5688 = vst.msk [vmem:[%s8752_s16 + $0xd0] sm:$0xff] %vm9605_vm10, %v5656_v15  ;;  %v5841_v42 = vadd.f32 %v5840_v29, %v5839_v25  ;;  %vm9606_vm14 = vmmov %vm9447_vm0  ;;  %v3521_v0 = vpop.f32.mrb[31].mxu1  ;;  %v6639_v44 = vadd.f32 %v6607_v18, %v6471_v31  ;;  %v5551_v61 = vpop.f32.mrb[29].mxu0 }
 0x22a   : > { %v5741_v7 = vsel %vm9606_vm14, %v5654_v32, 0.0  ;;  %vm9607_vm9 = vmmov %vm9447_vm0  ;;  %v6640_v13 = vadd.f32 %v5551_v61, %v3518_v11  ;;  %v6608_v2 = vpop.f32.mrb[30].mxu0 }
 0x22b   : > { %5686 = vst.msk [vmem:[%s8752_s16 + $0xc0] sm:$0xff] %vm9607_vm9, %v5654_v32  ;;  %vm9608_vm1 = vmmov %vm9447_vm0  ;;  %v5742_v50 = vadd.f32 %v5741_v7, %v5740_v26  ;;  %v5660_v45 = vadd.f32 %v6639_v44, %v8746_v20  ;;  %v6641_v19 = vadd.f32 %v6608_v2, %v6472_v47  ;;  %v5554_v62 = vpop.f32.mrb[31].mxu0 }
 0x22c   : > { %v5842_v58 = vsel %vm9608_vm1, %v5788_v33, 0.0  ;;  %vm9609_vm7 = vmmov %vm9447_vm0  ;;  %v5658_v5 = vadd.f32 %v6640_v13, %v8755_v10  ;;  %v6642_v27 = vadd.f32 %v5554_v62, %v3521_v0 }
 0x22d   : > { %5689 = vst.msk [vmem:[%s8752_s16 + $0xd8] sm:$0xff] %vm9609_vm7, %v5657_v41  ;;  %v5843_v53 = vadd.f32 %v5842_v58, %v5841_v42  ;;  %vm9610_vm15 = vmmov %vm9447_vm0  ;;  %v5661_v54 = vadd.f32 %v6641_v19, %v8758_v6  ;;  %v5795_v57 = vmul.f32 %v5660_v45, %v5660_v45 }
 0x22e   : > { %v5844_v56 = vsel %vm9610_vm15, %v5789_v48, 0.0  ;;  %vm9611_vm3 = vmmov %vm9447_vm0  ;;  %v5793_v43 = vmul.f32 %v5658_v5, %v5658_v5  ;;  %v5659_v63 = vadd.f32 %v6642_v27, %v8761_v30 }
 0x22f   : > { %v5743_v36 = vsel %vm9611_vm3, %v5655_v16, 0.0  ;;  %vm9612_vm6 = vmmov %vm9447_vm0  ;;  %v5845_v3 = vadd.f32 %v5844_v56, %v5843_v53  ;;  %v5796_v21 = vmul.f32 %v5661_v54, %v5661_v54 }
 0x230   : > { %5687 = vst.msk [vmem:[%s8752_s16 + $0xc8] sm:$0xff] %vm9612_vm6, %v5655_v16  ;;  %v5744_v1 = vadd.f32 %v5743_v36, %v5742_v50  ;;  %vm9613_vm12 = vmmov %vm9447_vm0  ;;  %v5794_v12 = vmul.f32 %v5659_v63, %v5659_v63 }
 0x231   : > { %v5745_v39 = vsel %vm9613_vm12, %v5656_v15, 0.0  ;;  %vm9614_vm4 = vmmov %vm9447_vm0 }
 0x232   : > { %v5846_v9 = vsel %vm9614_vm4, %v5790_v49, 0.0  ;;  %v5746_v52 = vadd.f32 %v5745_v39, %v5744_v1  ;;  %vm9615_vm11 = vmmov %vm9447_vm0  ;;  %vm5763_vm4 = vcmask 57344  }
 0x233   : > { %v5847_v51 = vadd.f32 %v5846_v9, %v5845_v3  ;;  %v5848_v35 = vsel %vm9615_vm11, %v5791_v23, 0.0  ;;  %vm9616_vm5 = vmmov %vm9447_vm0 }
 0x234   : > { %v5748_v34 = vadd.f32 %v5747_v24, %v5746_v52  ;;  %5692 = vst.msk [vmem:[%s8752_s16 + $0xf0] sm:$0xff] %vm9616_vm5, %v5660_v45  ;;  %vm9617_vm2 = vmmov %vm9447_vm0 }
 0x235   : > { %v5849_v59 = vadd.f32 %v5848_v35, %v5847_v51  ;;  %v5749_v20 = vsel %vm9617_vm2, %v5658_v5, 0.0  ;;  %vm9618_vm8 = vmmov %vm9447_vm0 }
 0x236   : > { %5690 = vst.msk [vmem:[%s8752_s16 + $0xe0] sm:$0xff] %vm9618_vm8, %v5658_v5  ;;  %vm9619_vm13 = vmmov %vm9447_vm0  ;;  %v5750_v10 = vadd.f32 %v5749_v20, %v5748_v34 }
 0x237   : > { %v5850_v38 = vsel %vm9619_vm13, %v5792_v4, 0.0  ;;  %vm9620_vm10 = vmmov %vm9447_vm0 }
 0x238   : > { %5693 = vst.msk [vmem:[%s8752_s16 + $0xf8] sm:$0xff] %vm9620_vm10, %v5661_v54  ;;  %v5851_v55 = vadd.f32 %v5850_v38, %v5849_v59  ;;  %vm9621_vm14 = vmmov %vm9447_vm0 }
 0x239   : > { %v5852_v14 = vsel %vm9621_vm14, %v5793_v43, 0.0  ;;  %vm9622_vm9 = vmmov %vm9447_vm0 }
 0x23a   : > { %5691 = vst.msk [vmem:[%s8752_s16 + $0xe8] sm:$0xff] %vm9622_vm9, %v5659_v63  ;;  %vm9623_vm1 = vmmov %vm9447_vm0  ;;  %v5853_v30 = vadd.f32 %v5852_v14, %v5851_v55 }
 0x23b   : > { %v5751_v6 = vsel %vm9623_vm1, %v5659_v63, 0.0  ;;  %vm9624_vm7 = vmmov %vm9447_vm0 }
 0x23c   : > { %v5752_v37 = vadd.f32 %v5751_v6, %v5750_v10  ;;  %v5753_v46 = vsel %vm9624_vm7, %v5660_v45, 0.0  ;;  %vm9625_vm15 = vmmov %vm9447_vm0 }
 0x23d   : > { %v5854_v28 = vsel %vm9625_vm15, %v5794_v12, 0.0  ;;  %vm9626_vm3 = vmmov %vm9447_vm0 }
 0x23e   : > { %v5754_v33 = vadd.f32 %v5753_v46, %v5752_v37  ;;  %v5755_v22 = vsel %vm9626_vm3, %v5661_v54, 0.0  ;;  %v5855_v15 = vadd.f32 %v5854_v28, %v5853_v30  ;;  %vm9627_vm6 = vmmov %vm9447_vm0 }
 0x23f   : > { %v5856_v60 = vsel %vm9627_vm6, %v5795_v57, 0.0  ;;  %vm9628_vm12 = vmmov %vm9447_vm0 }
 0x240   : > { %v5756_v40 = vadd.f32 %v5755_v22, %v5754_v33  ;;  %v5857_v17 = vadd.f32 %v5856_v60, %v5855_v15  ;;  %v5858_v25 = vsel %vm9628_vm12, %v5796_v21, 0.0 }
 0x242   : > { %v5757_v32 = vrot.slane %v5756_v40, 4  ;;  %v5859_v8 = vadd.f32 %v5858_v25, %v5857_v17 }
 0x244   : > { %v5758_v29 = vadd.f32 %v5757_v32, %v5756_v40  ;;  %v5860_v26 = vrot.slane %v5859_v8, 4 }
 0x246   : > { %v5759_v41 = vrot.slane %v5758_v29, 2  ;;  %v5861_v31 = vadd.f32 %v5860_v26, %v5859_v8 }
 0x248   : > { %v5760_v42 = vadd.f32 %v5759_v41, %v5758_v29  ;;  %v5862_v7 = vrot.slane %v5861_v31, 2 }
 0x24a   : > { %v5761_v48 = vrot.slane %v5760_v42, 1  ;;  %v5863_v16 = vadd.f32 %v5862_v7, %v5861_v31 }
 0x24c   : > { %v5762_v11 = vadd.f32 %v5761_v48, %v5760_v42  ;;  %v5864_v58 = vrot.slane %v5863_v16, 1 }
 0x24e   : > { %5764 = vst.msk [vmem:[%s312_s18] sm:$0x1] %vm5763_vm4, %v5762_v11  ;;  %v5865_v50 = vadd.f32 %v5864_v58, %v5863_v16 }
 0x250   : > { %5866 = vst.msk [vmem:[%s315_s21] sm:$0x1] %vm5763_vm4, %v5865_v50 }
 0x251 PF: > { %s18_s24 = sadd.s32 1, %s6894_s24  }
 0x252   : > { %p15_p4 = scmp.ge.s32.totalorder %s18_s24, 4  }
 0x254   :  { %17 = sbr.rel (!%p15_p4) target bundleno = 1 (0x1), region = 105 }

</bundles_post_ra>
